<compile_context>
chip_gen: v7x
topology: tpu7x:2x2x1
jax: 0.10.0
libtpu: 0.0.40
codegen_flags: <defaults>
</compile_context>

<pallas_src>
import numpy as np
import jax
import jax.numpy as jnp
from jax.experimental import pallas as pl
from jax.experimental.pallas import tpu as pltpu

H = W = 8
P = H * W            # 64 board squares
C_IN = 12            # input planes
C_TRUNK = 64
C_HEAD = 32
V_HID = 256
BN_EPS = 1e-5


# ----------------------------------------------------------------------------
# Pallas kernel: the whole forward pass (all matmuls / conv / reductions here).
# ----------------------------------------------------------------------------
def qnet_kernel(x_ref, mask_ref,
                w1_ref, b1_ref,
                wres_ref, bres_ref,
                whead_ref, bhead_ref,
                wpf_ref, bpf_ref, wvf1_ref, bvf1_ref, wvf2_ref, bvf2_ref,
                policy_ref, value_ref,
                pact_ref, flat_ref):
    BP = x_ref.shape[1]
    B = policy_ref.shape[0]
    masks = mask_ref[...]                         # (9, BP) bf16 edge masks

    def im2col(x_f32):
        # x_f32: (Cin, BP) f32  ->  (9*Cin, BP) bf16 column block.
        xb = x_f32.astype(jnp.bfloat16)
        cols = []
        for t in range(9):                        # 3x3 taps, fully unrolled
            dh, dw = t // 3 - 1, t % 3 - 1
            d = dh * 8 + dw                       # lane shift for this tap
            if d == 0:
                cols.append(xb)
            else:
                s = d % BP                        # rot[:, q] == x[:, (q + d) mod BP]
                rot = jnp.concatenate([xb[:, s:], xb[:, :s]], axis=1)
                cols.append(rot * masks[t:t + 1, :])   # zero out-of-board taps
        return jnp.concatenate(cols, axis=0)

    def conv3x3_bn(x, w_bf16, bias):
        # w_bf16: (Cout, 9*Cin) bf16 with BN scale pre-folded; bias: (Cout, 1) f32
        return jnp.dot(w_bf16, im2col(x), preferred_element_type=jnp.float32) + bias

    # trunk: conv1 + bn1 + relu
    h = jnp.maximum(conv3x3_bn(x_ref[...], w1_ref[...], b1_ref[...]), 0.0)

    # three residual blocks (64 -> 64, identity shortcut)
    for r in range(3):
        y = jnp.maximum(conv3x3_bn(h, wres_ref[r, 0], bres_ref[r, 0]), 0.0)
        y = conv3x3_bn(y, wres_ref[r, 1], bres_ref[r, 1])
        h = jnp.maximum(y + h, 0.0)

    # heads: merged policy/value 1x1 conv + bn + relu (ONE matmul, channels interleaved)
    hb = h.astype(jnp.bfloat16)
    pact_ref[...] = jnp.maximum(
        jnp.dot(whead_ref[...], hb, preferred_element_type=jnp.float32)
        + bhead_ref[...], 0.0)                    # (2*C_HEAD, BP): row 2c=policy, 2c+1=value

    # NCHW flatten (feature = c*64 + p, batch separate): 64 small (2,64) VMEM copies
    # flat row 2b = policy flat of batch b, row 2b+1 = value flat of batch b.
    for b in range(B):
        for c in range(C_HEAD):
            flat_ref[2 * b:2 * b + 2, c * P:(c + 1) * P] = \
                pact_ref[2 * c:2 * c + 2, b * P:(b + 1) * P]

    # Both head Linears share the same (2B, 2048) LHS (extra rows are free on the MXU).
    flat_b = flat_ref[...].astype(jnp.bfloat16)
    pol_all = jnp.dot(flat_b, wpf_ref[...],
                      preferred_element_type=jnp.float32) + bpf_ref[...]      # (2B, A)
    v1_all = jnp.maximum(
        jnp.dot(flat_b, wvf1_ref[...],
                preferred_element_type=jnp.float32) + bvf1_ref[...], 0.0)     # (2B, 256)
    v2_all = jnp.tanh(jnp.sum(v1_all * wvf2_ref[...], axis=1, keepdims=True)
                      + bvf2_ref[...])                                        # (2B, 1)

    for b in range(B):
        policy_ref[b:b + 1, :] = pol_all[2 * b:2 * b + 1, :]
        value_ref[b:b + 1, :] = v2_all[2 * b + 1:2 * b + 2, :]


# ----------------------------------------------------------------------------
# Glue: deterministic parameter init + repacking into the kernel layout.
# ----------------------------------------------------------------------------
def _edge_masks(B):
    bp = B * P
    m = np.zeros((9, bp), np.float32)
    for t in range(9):
        dh, dw = t // 3 - 1, t % 3 - 1
        for b in range(B):
            for pos in range(P):
                hh, ww = pos // 8, pos % 8
                if 0 <= hh + dh < H and 0 <= ww + dw < W:
                    m[t, b * P + pos] = 1.0
    return jnp.asarray(m, jnp.bfloat16)


def _bn_scale_bias(conv_bias, bn):
    scale = bn['gamma'] / jnp.sqrt(bn['var'] + BN_EPS)
    bias = (conv_bias - bn['mean']) * scale + bn['beta']
    return scale, bias


def _pack_conv3x3_folded(w, conv_bias, bn):
    # (Cout, Cin, 3, 3) -> (Cout, 9*Cin), col = t*Cin + cin, with BN scale folded in.
    cout, cin = w.shape[0], w.shape[1]
    scale, bias = _bn_scale_bias(conv_bias, bn)
    wp = jnp.transpose(w, (0, 2, 3, 1)).reshape(cout, 9 * cin)
    wp = (wp * scale[:, None]).astype(jnp.bfloat16)
    return wp, bias[:, None].astype(jnp.float32)


def init_params(key, action_size):
    ks = jax.random.split(key, 12)

    def kaiming_conv(k, cout, cin, ksz):
        std = (2.0 / (cout * ksz * ksz)) ** 0.5        # kaiming_normal, fan_out
        return jax.random.normal(k, (cout, cin, ksz, ksz), jnp.float32) * std

    def linear(k, dout, din):
        return jax.random.normal(k, (dout, din), jnp.float32) * 0.01

    def bn(c):
        return dict(gamma=jnp.ones((c,), jnp.float32),
                    beta=jnp.zeros((c,), jnp.float32),
                    mean=jnp.zeros((c,), jnp.float32),
                    var=jnp.ones((c,), jnp.float32))

    p = {}
    p['conv1_w'] = kaiming_conv(ks[0], C_TRUNK, C_IN, 3)
    p['conv1_b'] = jnp.zeros((C_TRUNK,), jnp.float32)
    p['bn1'] = bn(C_TRUNK)
    for r in range(3):
        p[f'res{r}_w1'] = kaiming_conv(ks[1 + 2 * r], C_TRUNK, C_TRUNK, 3)
        p[f'res{r}_b1'] = jnp.zeros((C_TRUNK,), jnp.float32)
        p[f'res{r}_bn1'] = bn(C_TRUNK)
        p[f'res{r}_w2'] = kaiming_conv(ks[2 + 2 * r], C_TRUNK, C_TRUNK, 3)
        p[f'res{r}_b2'] = jnp.zeros((C_TRUNK,), jnp.float32)
        p[f'res{r}_bn2'] = bn(C_TRUNK)
    p['pconv_w'] = kaiming_conv(ks[7], C_HEAD, C_TRUNK, 1)
    p['pconv_b'] = jnp.zeros((C_HEAD,), jnp.float32)
    p['pbn'] = bn(C_HEAD)
    p['pfc_w'] = linear(ks[8], action_size, C_HEAD * P)
    p['pfc_b'] = jnp.zeros((action_size,), jnp.float32)
    p['vconv_w'] = kaiming_conv(ks[9], C_HEAD, C_TRUNK, 1)
    p['vconv_b'] = jnp.zeros((C_HEAD,), jnp.float32)
    p['vbn'] = bn(C_HEAD)
    p['vfc1_w'] = linear(ks[10], V_HID, C_HEAD * P)
    p['vfc1_b'] = jnp.zeros((V_HID,), jnp.float32)
    p['vfc2_w'] = linear(ks[11], 1, V_HID)
    p['vfc2_b'] = jnp.zeros((1,), jnp.float32)
    return p


def pack_params(p, B):
    masks = _edge_masks(B)
    w1, b1 = _pack_conv3x3_folded(p['conv1_w'], p['conv1_b'], p['bn1'])
    wres, bres = [], []
    for r in range(3):
        wa, ba = _pack_conv3x3_folded(p[f'res{r}_w1'], p[f'res{r}_b1'], p[f'res{r}_bn1'])
        wb, bb = _pack_conv3x3_folded(p[f'res{r}_w2'], p[f'res{r}_b2'], p[f'res{r}_bn2'])
        wres.append(jnp.stack([wa, wb], 0))
        bres.append(jnp.stack([ba, bb], 0))
    wres = jnp.stack(wres, 0)                                # (3, 2, 64, 576) bf16
    bres = jnp.stack(bres, 0)                                # (3, 2, 64, 1) f32

    # merged + interleaved 1x1 head conv: row 2c = policy channel c, row 2c+1 = value ch c
    sp, bp_ = _bn_scale_bias(p['pconv_b'], p['pbn'])
    sv, bv_ = _bn_scale_bias(p['vconv_b'], p['vbn'])
    wpc = p['pconv_w'][:, :, 0, 0] * sp[:, None]             # (32, 64) f32, BN folded
    wvc = p['vconv_w'][:, :, 0, 0] * sv[:, None]
    whead = jnp.stack([wpc, wvc], axis=1).reshape(2 * C_HEAD, C_TRUNK).astype(jnp.bfloat16)
    bhead = jnp.stack([bp_, bv_], axis=1).reshape(2 * C_HEAD, 1).astype(jnp.float32)

    wpf = p['pfc_w'].T.astype(jnp.bfloat16)                  # (2048, A), row = c*64+p
    bpf = p['pfc_b'][None, :].astype(jnp.float32)            # (1, A)
    wvf1 = p['vfc1_w'].T.astype(jnp.bfloat16)                # (2048, 256)
    bvf1 = p['vfc1_b'][None, :].astype(jnp.float32)          # (1, 256)
    wvf2 = p['vfc2_w'].astype(jnp.float32)                   # (1, 256)
    bvf2 = p['vfc2_b'][None, :].astype(jnp.float32)          # (1, 1)
    return [masks, w1, b1, wres, bres, whead, bhead,
            wpf, bpf, wvf1, bvf1, wvf2, bvf2]


def qnetwork_forward(state, packed, action_size):
    B = state.shape[0]
    BP = B * P
    # PyTorch view(-1, 12, 8, 8), then repack to kernel layout (C, B*P)
    x0 = state.reshape(B, C_IN, P).transpose(1, 0, 2).reshape(C_IN, BP)
    args = [x0] + list(packed)
    vmem = pl.BlockSpec(memory_space=pltpu.MemorySpace.VMEM)

    flops = (2 * C_TRUNK * 9 * C_IN * BP
             + 6 * 2 * C_TRUNK * 9 * C_TRUNK * BP
             + 2 * (2 * C_HEAD) * C_TRUNK * BP
             + 2 * (2 * B) * (C_HEAD * P) * (action_size + V_HID)
             + 2 * (2 * B) * V_HID)
    bytes_accessed = int(sum(int(np.prod(a.shape)) * a.dtype.itemsize for a in args)
                         + B * action_size * 4 + B * 4)

    policy, value = pl.pallas_call(
        qnet_kernel,
        out_shape=(jax.ShapeDtypeStruct((B, action_size), jnp.float32),
                   jax.ShapeDtypeStruct((B, 1), jnp.float32)),
        in_specs=[vmem] * len(args),
        out_specs=(vmem, vmem),
        scratch_shapes=[pltpu.VMEM((2 * C_HEAD, BP), jnp.float32),
                        pltpu.VMEM((2 * B, C_HEAD * P), jnp.float32)],
        compiler_params=pltpu.CompilerParams(
            vmem_limit_bytes=32 * 1024 * 1024),
        cost_estimate=pl.CostEstimate(flops=int(flops), transcendentals=int(2 * B),
                                      bytes_accessed=bytes_accessed),
    )(*args)
    return policy, value


# ----------------------------------------------------------------------------
# Pure-JAX reference (NCHW, same math) for a correctness check.
# ----------------------------------------------------------------------------
def ref_forward(state, p):
    B = state.shape[0]

    def conv(x, w, b, pad):
        y = jax.lax.conv_general_dilated(
            x, w, window_strides=(1, 1), padding=[(pad, pad), (pad, pad)],
            dimension_numbers=('NCHW', 'OIHW', 'NCHW'))
        return y + b[None, :, None, None]

    def bn(x, d):
        return ((x - d['mean'][None, :, None, None])
                / jnp.sqrt(d['var'][None, :, None, None] + BN_EPS)
                * d['gamma'][None, :, None, None] + d['beta'][None, :, None, None])

    relu = lambda t: jnp.maximum(t, 0.0)
    x = state.reshape(B, C_IN, H, W)
    x = relu(bn(conv(x, p['conv1_w'], p['conv1_b'], 1), p['bn1']))
    for r in range(3):
        y = relu(bn(conv(x, p[f'res{r}_w1'], p[f'res{r}_b1'], 1), p[f'res{r}_bn1']))
        y = bn(conv(y, p[f'res{r}_w2'], p[f'res{r}_b2'], 1), p[f'res{r}_bn2'])
        x = relu(y + x)
    pol = relu(bn(conv(x, p['pconv_w'], p['pconv_b'], 0), p['pbn']))
    pol = pol.reshape(B, C_HEAD * P) @ p['pfc_w'].T + p['pfc_b']
    val = relu(bn(conv(x, p['vconv_w'], p['vconv_b'], 0), p['vbn']))
    val = relu(val.reshape(B, C_HEAD * P) @ p['vfc1_w'].T + p['vfc1_b'])
    val = jnp.tanh(val @ p['vfc2_w'].T + p['vfc2_b'])
    return pol, val


if __name__ == "__main__":
    B = 2
    ACTION_SIZE = 128                 # constructor arg (chess would be 64*64)
    STATE_SIZE = C_IN * H * W         # 768, fixed by the module's reshape

    key = jax.random.PRNGKey(0)
    pkey, xkey = jax.random.split(key)
    params = init_params(pkey, ACTION_SIZE)
    state = jax.random.normal(xkey, (B, STATE_SIZE), jnp.float32)

    packed = pack_params(params, B)
    policy, value = qnetwork_forward(state, packed, ACTION_SIZE)
    jax.block_until_ready((policy, value))

    pol_ref, val_ref = ref_forward(state, params)
    np.testing.assert_allclose(np.asarray(policy), np.asarray(pol_ref),
                               rtol=5e-2, atol=5e-2)
    np.testing.assert_allclose(np.asarray(value), np.asarray(val_ref),
                               rtol=5e-2, atol=5e-2)
    print("KERNEL_OK")
</pallas_src>

<mosaic_0001>
module attributes {stable_mosaic.version = 11 : i64} {
  func.func @qnet_kernel(%arg0: memref<12x128xf32, #tpu.memory_space<vmem>>, %arg1: memref<9x128xbf16, #tpu.memory_space<vmem>>, %arg2: memref<64x108xbf16, #tpu.memory_space<vmem>>, %arg3: memref<64x1xf32, #tpu.memory_space<vmem>>, %arg4: memref<3x2x64x576xbf16, #tpu.memory_space<vmem>>, %arg5: memref<3x2x64x1xf32, #tpu.memory_space<vmem>>, %arg6: memref<64x64xbf16, #tpu.memory_space<vmem>>, %arg7: memref<64x1xf32, #tpu.memory_space<vmem>>, %arg8: memref<2048x128xbf16, #tpu.memory_space<vmem>>, %arg9: memref<1x128xf32, #tpu.memory_space<vmem>>, %arg10: memref<2048x256xbf16, #tpu.memory_space<vmem>>, %arg11: memref<1x256xf32, #tpu.memory_space<vmem>>, %arg12: memref<1x256xf32, #tpu.memory_space<vmem>>, %arg13: memref<1x1xf32, #tpu.memory_space<vmem>>, %arg14: memref<2x128xf32, #tpu.memory_space<vmem>>, %arg15: memref<2x1xf32, #tpu.memory_space<vmem>>, %arg16: memref<64x128xf32, #tpu.memory_space<vmem>>, %arg17: memref<4x2048xf32, #tpu.memory_space<vmem>>) attributes {dimension_semantics = [], scalar_prefetch = 0 : i64, scratch_operands = 2 : i64, tpu.core_type = #tpu.core_type<tc>} {
    %c0 = arith.constant 0 : index
    %c0_0 = arith.constant 0 : index
    %0 = vector.load %arg1[%c0, %c0_0] : memref<9x128xbf16, #tpu.memory_space<vmem>>, vector<9x128xbf16>
    %c0_1 = arith.constant 0 : index
    %c0_2 = arith.constant 0 : index
    %1 = vector.load %arg0[%c0_1, %c0_2] : memref<12x128xf32, #tpu.memory_space<vmem>>, vector<12x128xf32>
    %c0_3 = arith.constant 0 : index
    %c0_4 = arith.constant 0 : index
    %2 = vector.load %arg2[%c0_3, %c0_4] : memref<64x108xbf16, #tpu.memory_space<vmem>>, vector<64x108xbf16>
    %c0_5 = arith.constant 0 : index
    %c0_6 = arith.constant 0 : index
    %3 = vector.load %arg3[%c0_5, %c0_6] : memref<64x1xf32, #tpu.memory_space<vmem>>, vector<64x1xf32>
    %4 = arith.truncf %1 : vector<12x128xf32> to vector<12x128xbf16>
    %5 = vector.extract_strided_slice %4 {offsets = [0, 119], sizes = [12, 9], strides = [1, 1]} : vector<12x128xbf16> to vector<12x9xbf16>
    %6 = vector.extract_strided_slice %4 {offsets = [0, 0], sizes = [12, 119], strides = [1, 1]} : vector<12x128xbf16> to vector<12x119xbf16>
    %7 = tpu.concatenate %5, %6 in 1 : vector<12x9xbf16>, vector<12x119xbf16> -> vector<12x128xbf16>
    %8 = vector.extract_strided_slice %0 {offsets = [0, 0], sizes = [1, 128], strides = [1, 1]} : vector<9x128xbf16> to vector<1x128xbf16>
    %9 = vector.broadcast %8 : vector<1x128xbf16> to vector<12x128xbf16>
    %10 = arith.mulf %7, %9 : vector<12x128xbf16>
    %11 = vector.extract_strided_slice %4 {offsets = [0, 120], sizes = [12, 8], strides = [1, 1]} : vector<12x128xbf16> to vector<12x8xbf16>
    %12 = vector.extract_strided_slice %4 {offsets = [0, 0], sizes = [12, 120], strides = [1, 1]} : vector<12x128xbf16> to vector<12x120xbf16>
    %13 = tpu.concatenate %11, %12 in 1 : vector<12x8xbf16>, vector<12x120xbf16> -> vector<12x128xbf16>
    %14 = vector.extract_strided_slice %0 {offsets = [1, 0], sizes = [1, 128], strides = [1, 1]} : vector<9x128xbf16> to vector<1x128xbf16>
    %15 = vector.broadcast %14 : vector<1x128xbf16> to vector<12x128xbf16>
    %16 = arith.mulf %13, %15 : vector<12x128xbf16>
    %17 = vector.extract_strided_slice %4 {offsets = [0, 121], sizes = [12, 7], strides = [1, 1]} : vector<12x128xbf16> to vector<12x7xbf16>
    %18 = vector.extract_strided_slice %4 {offsets = [0, 0], sizes = [12, 121], strides = [1, 1]} : vector<12x128xbf16> to vector<12x121xbf16>
    %19 = tpu.concatenate %17, %18 in 1 : vector<12x7xbf16>, vector<12x121xbf16> -> vector<12x128xbf16>
    %20 = vector.extract_strided_slice %0 {offsets = [2, 0], sizes = [1, 128], strides = [1, 1]} : vector<9x128xbf16> to vector<1x128xbf16>
    %21 = vector.broadcast %20 : vector<1x128xbf16> to vector<12x128xbf16>
    %22 = arith.mulf %19, %21 : vector<12x128xbf16>
    %23 = vector.extract_strided_slice %4 {offsets = [0, 127], sizes = [12, 1], strides = [1, 1]} : vector<12x128xbf16> to vector<12x1xbf16>
    %24 = vector.extract_strided_slice %4 {offsets = [0, 0], sizes = [12, 127], strides = [1, 1]} : vector<12x128xbf16> to vector<12x127xbf16>
    %25 = tpu.concatenate %23, %24 in 1 : vector<12x1xbf16>, vector<12x127xbf16> -> vector<12x128xbf16>
    %26 = vector.extract_strided_slice %0 {offsets = [3, 0], sizes = [1, 128], strides = [1, 1]} : vector<9x128xbf16> to vector<1x128xbf16>
    %27 = vector.broadcast %26 : vector<1x128xbf16> to vector<12x128xbf16>
    %28 = arith.mulf %25, %27 : vector<12x128xbf16>
    %29 = vector.extract_strided_slice %4 {offsets = [0, 1], sizes = [12, 127], strides = [1, 1]} : vector<12x128xbf16> to vector<12x127xbf16>
    %30 = vector.extract_strided_slice %4 {offsets = [0, 0], sizes = [12, 1], strides = [1, 1]} : vector<12x128xbf16> to vector<12x1xbf16>
    %31 = tpu.concatenate %29, %30 in 1 : vector<12x127xbf16>, vector<12x1xbf16> -> vector<12x128xbf16>
    %32 = vector.extract_strided_slice %0 {offsets = [5, 0], sizes = [1, 128], strides = [1, 1]} : vector<9x128xbf16> to vector<1x128xbf16>
    %33 = vector.broadcast %32 : vector<1x128xbf16> to vector<12x128xbf16>
    %34 = arith.mulf %31, %33 : vector<12x128xbf16>
    %35 = vector.extract_strided_slice %4 {offsets = [0, 7], sizes = [12, 121], strides = [1, 1]} : vector<12x128xbf16> to vector<12x121xbf16>
    %36 = vector.extract_strided_slice %4 {offsets = [0, 0], sizes = [12, 7], strides = [1, 1]} : vector<12x128xbf16> to vector<12x7xbf16>
    %37 = tpu.concatenate %35, %36 in 1 : vector<12x121xbf16>, vector<12x7xbf16> -> vector<12x128xbf16>
    %38 = vector.extract_strided_slice %0 {offsets = [6, 0], sizes = [1, 128], strides = [1, 1]} : vector<9x128xbf16> to vector<1x128xbf16>
    %39 = vector.broadcast %38 : vector<1x128xbf16> to vector<12x128xbf16>
    %40 = arith.mulf %37, %39 : vector<12x128xbf16>
    %41 = vector.extract_strided_slice %4 {offsets = [0, 8], sizes = [12, 120], strides = [1, 1]} : vector<12x128xbf16> to vector<12x120xbf16>
    %42 = vector.extract_strided_slice %4 {offsets = [0, 0], sizes = [12, 8], strides = [1, 1]} : vector<12x128xbf16> to vector<12x8xbf16>
    %43 = tpu.concatenate %41, %42 in 1 : vector<12x120xbf16>, vector<12x8xbf16> -> vector<12x128xbf16>
    %44 = vector.extract_strided_slice %0 {offsets = [7, 0], sizes = [1, 128], strides = [1, 1]} : vector<9x128xbf16> to vector<1x128xbf16>
    %45 = vector.broadcast %44 : vector<1x128xbf16> to vector<12x128xbf16>
    %46 = arith.mulf %43, %45 : vector<12x128xbf16>
    %47 = vector.extract_strided_slice %4 {offsets = [0, 9], sizes = [12, 119], strides = [1, 1]} : vector<12x128xbf16> to vector<12x119xbf16>
    %48 = vector.extract_strided_slice %4 {offsets = [0, 0], sizes = [12, 9], strides = [1, 1]} : vector<12x128xbf16> to vector<12x9xbf16>
    %49 = tpu.concatenate %47, %48 in 1 : vector<12x119xbf16>, vector<12x9xbf16> -> vector<12x128xbf16>
    %50 = vector.extract_strided_slice %0 {offsets = [8, 0], sizes = [1, 128], strides = [1, 1]} : vector<9x128xbf16> to vector<1x128xbf16>
    %51 = vector.broadcast %50 : vector<1x128xbf16> to vector<12x128xbf16>
    %52 = arith.mulf %49, %51 : vector<12x128xbf16>
    %53 = tpu.concatenate %10, %16, %22, %28, %4, %34, %40, %46, %52 in 0 : vector<12x128xbf16>, vector<12x128xbf16>, vector<12x128xbf16>, vector<12x128xbf16>, vector<12x128xbf16>, vector<12x128xbf16>, vector<12x128xbf16>, vector<12x128xbf16>, vector<12x128xbf16> -> vector<108x128xbf16>
    %cst = arith.constant dense<0.000000e+00> : vector<64x128xf32>
    %54 = tpu.matmul %2, %53, %cst {dimension_numbers = #tpu.dot_dimension_numbers<[1], [0], [0], [1], [0, 0, 1, 1], [], []>} : vector<64x108xbf16>, vector<108x128xbf16>, vector<64x128xf32> -> vector<64x128xf32>
    %55 = vector.broadcast %3 : vector<64x1xf32> to vector<64x128xf32>
    %56 = arith.addf %54, %55 : vector<64x128xf32>
    %cst_7 = arith.constant 0.000000e+00 : f32
    %57 = vector.broadcast %cst_7 : f32 to vector<64x128xf32>
    %58 = arith.maximumf %56, %57 : vector<64x128xf32>
    %c0_8 = arith.constant 0 : index
    %c0_9 = arith.constant 0 : index
    %c0_10 = arith.constant 0 : index
    %c0_11 = arith.constant 0 : index
    %59 = vector.load %arg4[%c0_8, %c0_9, %c0_10, %c0_11] : memref<3x2x64x576xbf16, #tpu.memory_space<vmem>>, vector<1x1x64x576xbf16>
    %60 = vector.shape_cast %59 : vector<1x1x64x576xbf16> to vector<64x576xbf16>
    %c0_12 = arith.constant 0 : index
    %c0_13 = arith.constant 0 : index
    %c0_14 = arith.constant 0 : index
    %c0_15 = arith.constant 0 : index
    %61 = vector.load %arg5[%c0_12, %c0_13, %c0_14, %c0_15] : memref<3x2x64x1xf32, #tpu.memory_space<vmem>>, vector<1x1x64x1xf32>
    %62 = vector.shape_cast %61 : vector<1x1x64x1xf32> to vector<64x1xf32>
    %63 = arith.truncf %58 : vector<64x128xf32> to vector<64x128xbf16>
    %64 = vector.extract_strided_slice %63 {offsets = [0, 119], sizes = [64, 9], strides = [1, 1]} : vector<64x128xbf16> to vector<64x9xbf16>
    %65 = vector.extract_strided_slice %63 {offsets = [0, 0], sizes = [64, 119], strides = [1, 1]} : vector<64x128xbf16> to vector<64x119xbf16>
    %66 = tpu.concatenate %64, %65 in 1 : vector<64x9xbf16>, vector<64x119xbf16> -> vector<64x128xbf16>
    %67 = vector.extract_strided_slice %0 {offsets = [0, 0], sizes = [1, 128], strides = [1, 1]} : vector<9x128xbf16> to vector<1x128xbf16>
    %68 = vector.broadcast %67 : vector<1x128xbf16> to vector<64x128xbf16>
    %69 = arith.mulf %66, %68 : vector<64x128xbf16>
    %70 = vector.extract_strided_slice %63 {offsets = [0, 120], sizes = [64, 8], strides = [1, 1]} : vector<64x128xbf16> to vector<64x8xbf16>
    %71 = vector.extract_strided_slice %63 {offsets = [0, 0], sizes = [64, 120], strides = [1, 1]} : vector<64x128xbf16> to vector<64x120xbf16>
    %72 = tpu.concatenate %70, %71 in 1 : vector<64x8xbf16>, vector<64x120xbf16> -> vector<64x128xbf16>
    %73 = vector.extract_strided_slice %0 {offsets = [1, 0], sizes = [1, 128], strides = [1, 1]} : vector<9x128xbf16> to vector<1x128xbf16>
    %74 = vector.broadcast %73 : vector<1x128xbf16> to vector<64x128xbf16>
    %75 = arith.mulf %72, %74 : vector<64x128xbf16>
    %76 = vector.extract_strided_slice %63 {offsets = [0, 121], sizes = [64, 7], strides = [1, 1]} : vector<64x128xbf16> to vector<64x7xbf16>
    %77 = vector.extract_strided_slice %63 {offsets = [0, 0], sizes = [64, 121], strides = [1, 1]} : vector<64x128xbf16> to vector<64x121xbf16>
    %78 = tpu.concatenate %76, %77 in 1 : vector<64x7xbf16>, vector<64x121xbf16> -> vector<64x128xbf16>
    %79 = vector.extract_strided_slice %0 {offsets = [2, 0], sizes = [1, 128], strides = [1, 1]} : vector<9x128xbf16> to vector<1x128xbf16>
    %80 = vector.broadcast %79 : vector<1x128xbf16> to vector<64x128xbf16>
    %81 = arith.mulf %78, %80 : vector<64x128xbf16>
    %82 = vector.extract_strided_slice %63 {offsets = [0, 127], sizes = [64, 1], strides = [1, 1]} : vector<64x128xbf16> to vector<64x1xbf16>
    %83 = vector.extract_strided_slice %63 {offsets = [0, 0], sizes = [64, 127], strides = [1, 1]} : vector<64x128xbf16> to vector<64x127xbf16>
    %84 = tpu.concatenate %82, %83 in 1 : vector<64x1xbf16>, vector<64x127xbf16> -> vector<64x128xbf16>
    %85 = vector.extract_strided_slice %0 {offsets = [3, 0], sizes = [1, 128], strides = [1, 1]} : vector<9x128xbf16> to vector<1x128xbf16>
    %86 = vector.broadcast %85 : vector<1x128xbf16> to vector<64x128xbf16>
    %87 = arith.mulf %84, %86 : vector<64x128xbf16>
    %88 = vector.extract_strided_slice %63 {offsets = [0, 1], sizes = [64, 127], strides = [1, 1]} : vector<64x128xbf16> to vector<64x127xbf16>
    %89 = vector.extract_strided_slice %63 {offsets = [0, 0], sizes = [64, 1], strides = [1, 1]} : vector<64x128xbf16> to vector<64x1xbf16>
    %90 = tpu.concatenate %88, %89 in 1 : vector<64x127xbf16>, vector<64x1xbf16> -> vector<64x128xbf16>
    %91 = vector.extract_strided_slice %0 {offsets = [5, 0], sizes = [1, 128], strides = [1, 1]} : vector<9x128xbf16> to vector<1x128xbf16>
    %92 = vector.broadcast %91 : vector<1x128xbf16> to vector<64x128xbf16>
    %93 = arith.mulf %90, %92 : vector<64x128xbf16>
    %94 = vector.extract_strided_slice %63 {offsets = [0, 7], sizes = [64, 121], strides = [1, 1]} : vector<64x128xbf16> to vector<64x121xbf16>
    %95 = vector.extract_strided_slice %63 {offsets = [0, 0], sizes = [64, 7], strides = [1, 1]} : vector<64x128xbf16> to vector<64x7xbf16>
    %96 = tpu.concatenate %94, %95 in 1 : vector<64x121xbf16>, vector<64x7xbf16> -> vector<64x128xbf16>
    %97 = vector.extract_strided_slice %0 {offsets = [6, 0], sizes = [1, 128], strides = [1, 1]} : vector<9x128xbf16> to vector<1x128xbf16>
    %98 = vector.broadcast %97 : vector<1x128xbf16> to vector<64x128xbf16>
    %99 = arith.mulf %96, %98 : vector<64x128xbf16>
    %100 = vector.extract_strided_slice %63 {offsets = [0, 8], sizes = [64, 120], strides = [1, 1]} : vector<64x128xbf16> to vector<64x120xbf16>
    %101 = vector.extract_strided_slice %63 {offsets = [0, 0], sizes = [64, 8], strides = [1, 1]} : vector<64x128xbf16> to vector<64x8xbf16>
    %102 = tpu.concatenate %100, %101 in 1 : vector<64x120xbf16>, vector<64x8xbf16> -> vector<64x128xbf16>
    %103 = vector.extract_strided_slice %0 {offsets = [7, 0], sizes = [1, 128], strides = [1, 1]} : vector<9x128xbf16> to vector<1x128xbf16>
    %104 = vector.broadcast %103 : vector<1x128xbf16> to vector<64x128xbf16>
    %105 = arith.mulf %102, %104 : vector<64x128xbf16>
    %106 = vector.extract_strided_slice %63 {offsets = [0, 9], sizes = [64, 119], strides = [1, 1]} : vector<64x128xbf16> to vector<64x119xbf16>
    %107 = vector.extract_strided_slice %63 {offsets = [0, 0], sizes = [64, 9], strides = [1, 1]} : vector<64x128xbf16> to vector<64x9xbf16>
    %108 = tpu.concatenate %106, %107 in 1 : vector<64x119xbf16>, vector<64x9xbf16> -> vector<64x128xbf16>
    %109 = vector.extract_strided_slice %0 {offsets = [8, 0], sizes = [1, 128], strides = [1, 1]} : vector<9x128xbf16> to vector<1x128xbf16>
    %110 = vector.broadcast %109 : vector<1x128xbf16> to vector<64x128xbf16>
    %111 = arith.mulf %108, %110 : vector<64x128xbf16>
    %112 = tpu.concatenate %69, %75, %81, %87, %63, %93, %99, %105, %111 in 0 : vector<64x128xbf16>, vector<64x128xbf16>, vector<64x128xbf16>, vector<64x128xbf16>, vector<64x128xbf16>, vector<64x128xbf16>, vector<64x128xbf16>, vector<64x128xbf16>, vector<64x128xbf16> -> vector<576x128xbf16>
    %cst_16 = arith.constant dense<0.000000e+00> : vector<64x128xf32>
    %113 = tpu.matmul %60, %112, %cst_16 {dimension_numbers = #tpu.dot_dimension_numbers<[1], [0], [0], [1], [0, 0, 1, 1], [], []>} : vector<64x576xbf16>, vector<576x128xbf16>, vector<64x128xf32> -> vector<64x128xf32>
    %114 = vector.broadcast %62 : vector<64x1xf32> to vector<64x128xf32>
    %115 = arith.addf %113, %114 : vector<64x128xf32>
    %cst_17 = arith.constant 0.000000e+00 : f32
    %116 = vector.broadcast %cst_17 : f32 to vector<64x128xf32>
    %117 = arith.maximumf %115, %116 : vector<64x128xf32>
    %c0_18 = arith.constant 0 : index
    %c1 = arith.constant 1 : index
    %c0_19 = arith.constant 0 : index
    %c0_20 = arith.constant 0 : index
    %118 = vector.load %arg4[%c0_18, %c1, %c0_19, %c0_20] : memref<3x2x64x576xbf16, #tpu.memory_space<vmem>>, vector<1x1x64x576xbf16>
    %119 = vector.shape_cast %118 : vector<1x1x64x576xbf16> to vector<64x576xbf16>
    %c0_21 = arith.constant 0 : index
    %c1_22 = arith.constant 1 : index
    %c0_23 = arith.constant 0 : index
    %c0_24 = arith.constant 0 : index
    %120 = vector.load %arg5[%c0_21, %c1_22, %c0_23, %c0_24] : memref<3x2x64x1xf32, #tpu.memory_space<vmem>>, vector<1x1x64x1xf32>
    %121 = vector.shape_cast %120 : vector<1x1x64x1xf32> to vector<64x1xf32>
    %122 = arith.truncf %117 : vector<64x128xf32> to vector<64x128xbf16>
    %123 = vector.extract_strided_slice %122 {offsets = [0, 119], sizes = [64, 9], strides = [1, 1]} : vector<64x128xbf16> to vector<64x9xbf16>
    %124 = vector.extract_strided_slice %122 {offsets = [0, 0], sizes = [64, 119], strides = [1, 1]} : vector<64x128xbf16> to vector<64x119xbf16>
    %125 = tpu.concatenate %123, %124 in 1 : vector<64x9xbf16>, vector<64x119xbf16> -> vector<64x128xbf16>
    %126 = vector.extract_strided_slice %0 {offsets = [0, 0], sizes = [1, 128], strides = [1, 1]} : vector<9x128xbf16> to vector<1x128xbf16>
    %127 = vector.broadcast %126 : vector<1x128xbf16> to vector<64x128xbf16>
    %128 = arith.mulf %125, %127 : vector<64x128xbf16>
    %129 = vector.extract_strided_slice %122 {offsets = [0, 120], sizes = [64, 8], strides = [1, 1]} : vector<64x128xbf16> to vector<64x8xbf16>
    %130 = vector.extract_strided_slice %122 {offsets = [0, 0], sizes = [64, 120], strides = [1, 1]} : vector<64x128xbf16> to vector<64x120xbf16>
    %131 = tpu.concatenate %129, %130 in 1 : vector<64x8xbf16>, vector<64x120xbf16> -> vector<64x128xbf16>
    %132 = vector.extract_strided_slice %0 {offsets = [1, 0], sizes = [1, 128], strides = [1, 1]} : vector<9x128xbf16> to vector<1x128xbf16>
    %133 = vector.broadcast %132 : vector<1x128xbf16> to vector<64x128xbf16>
    %134 = arith.mulf %131, %133 : vector<64x128xbf16>
    %135 = vector.extract_strided_slice %122 {offsets = [0, 121], sizes = [64, 7], strides = [1, 1]} : vector<64x128xbf16> to vector<64x7xbf16>
    %136 = vector.extract_strided_slice %122 {offsets = [0, 0], sizes = [64, 121], strides = [1, 1]} : vector<64x128xbf16> to vector<64x121xbf16>
    %137 = tpu.concatenate %135, %136 in 1 : vector<64x7xbf16>, vector<64x121xbf16> -> vector<64x128xbf16>
    %138 = vector.extract_strided_slice %0 {offsets = [2, 0], sizes = [1, 128], strides = [1, 1]} : vector<9x128xbf16> to vector<1x128xbf16>
    %139 = vector.broadcast %138 : vector<1x128xbf16> to vector<64x128xbf16>
    %140 = arith.mulf %137, %139 : vector<64x128xbf16>
    %141 = vector.extract_strided_slice %122 {offsets = [0, 127], sizes = [64, 1], strides = [1, 1]} : vector<64x128xbf16> to vector<64x1xbf16>
    %142 = vector.extract_strided_slice %122 {offsets = [0, 0], sizes = [64, 127], strides = [1, 1]} : vector<64x128xbf16> to vector<64x127xbf16>
    %143 = tpu.concatenate %141, %142 in 1 : vector<64x1xbf16>, vector<64x127xbf16> -> vector<64x128xbf16>
    %144 = vector.extract_strided_slice %0 {offsets = [3, 0], sizes = [1, 128], strides = [1, 1]} : vector<9x128xbf16> to vector<1x128xbf16>
    %145 = vector.broadcast %144 : vector<1x128xbf16> to vector<64x128xbf16>
    %146 = arith.mulf %143, %145 : vector<64x128xbf16>
    %147 = vector.extract_strided_slice %122 {offsets = [0, 1], sizes = [64, 127], strides = [1, 1]} : vector<64x128xbf16> to vector<64x127xbf16>
    %148 = vector.extract_strided_slice %122 {offsets = [0, 0], sizes = [64, 1], strides = [1, 1]} : vector<64x128xbf16> to vector<64x1xbf16>
    %149 = tpu.concatenate %147, %148 in 1 : vector<64x127xbf16>, vector<64x1xbf16> -> vector<64x128xbf16>
    %150 = vector.extract_strided_slice %0 {offsets = [5, 0], sizes = [1, 128], strides = [1, 1]} : vector<9x128xbf16> to vector<1x128xbf16>
    %151 = vector.broadcast %150 : vector<1x128xbf16> to vector<64x128xbf16>
    %152 = arith.mulf %149, %151 : vector<64x128xbf16>
    %153 = vector.extract_strided_slice %122 {offsets = [0, 7], sizes = [64, 121], strides = [1, 1]} : vector<64x128xbf16> to vector<64x121xbf16>
    %154 = vector.extract_strided_slice %122 {offsets = [0, 0], sizes = [64, 7], strides = [1, 1]} : vector<64x128xbf16> to vector<64x7xbf16>
    %155 = tpu.concatenate %153, %154 in 1 : vector<64x121xbf16>, vector<64x7xbf16> -> vector<64x128xbf16>
    %156 = vector.extract_strided_slice %0 {offsets = [6, 0], sizes = [1, 128], strides = [1, 1]} : vector<9x128xbf16> to vector<1x128xbf16>
    %157 = vector.broadcast %156 : vector<1x128xbf16> to vector<64x128xbf16>
    %158 = arith.mulf %155, %157 : vector<64x128xbf16>
    %159 = vector.extract_strided_slice %122 {offsets = [0, 8], sizes = [64, 120], strides = [1, 1]} : vector<64x128xbf16> to vector<64x120xbf16>
    %160 = vector.extract_strided_slice %122 {offsets = [0, 0], sizes = [64, 8], strides = [1, 1]} : vector<64x128xbf16> to vector<64x8xbf16>
    %161 = tpu.concatenate %159, %160 in 1 : vector<64x120xbf16>, vector<64x8xbf16> -> vector<64x128xbf16>
    %162 = vector.extract_strided_slice %0 {offsets = [7, 0], sizes = [1, 128], strides = [1, 1]} : vector<9x128xbf16> to vector<1x128xbf16>
    %163 = vector.broadcast %162 : vector<1x128xbf16> to vector<64x128xbf16>
    %164 = arith.mulf %161, %163 : vector<64x128xbf16>
    %165 = vector.extract_strided_slice %122 {offsets = [0, 9], sizes = [64, 119], strides = [1, 1]} : vector<64x128xbf16> to vector<64x119xbf16>
    %166 = vector.extract_strided_slice %122 {offsets = [0, 0], sizes = [64, 9], strides = [1, 1]} : vector<64x128xbf16> to vector<64x9xbf16>
    %167 = tpu.concatenate %165, %166 in 1 : vector<64x119xbf16>, vector<64x9xbf16> -> vector<64x128xbf16>
    %168 = vector.extract_strided_slice %0 {offsets = [8, 0], sizes = [1, 128], strides = [1, 1]} : vector<9x128xbf16> to vector<1x128xbf16>
    %169 = vector.broadcast %168 : vector<1x128xbf16> to vector<64x128xbf16>
    %170 = arith.mulf %167, %169 : vector<64x128xbf16>
    %171 = tpu.concatenate %128, %134, %140, %146, %122, %152, %158, %164, %170 in 0 : vector<64x128xbf16>, vector<64x128xbf16>, vector<64x128xbf16>, vector<64x128xbf16>, vector<64x128xbf16>, vector<64x128xbf16>, vector<64x128xbf16>, vector<64x128xbf16>, vector<64x128xbf16> -> vector<576x128xbf16>
    %cst_25 = arith.constant dense<0.000000e+00> : vector<64x128xf32>
    %172 = tpu.matmul %119, %171, %cst_25 {dimension_numbers = #tpu.dot_dimension_numbers<[1], [0], [0], [1], [0, 0, 1, 1], [], []>} : vector<64x576xbf16>, vector<576x128xbf16>, vector<64x128xf32> -> vector<64x128xf32>
    %173 = vector.broadcast %121 : vector<64x1xf32> to vector<64x128xf32>
    %174 = arith.addf %172, %173 : vector<64x128xf32>
    %175 = arith.addf %174, %58 : vector<64x128xf32>
    %cst_26 = arith.constant 0.000000e+00 : f32
    %176 = vector.broadcast %cst_26 : f32 to vector<64x128xf32>
    %177 = arith.maximumf %175, %176 : vector<64x128xf32>
    %c1_27 = arith.constant 1 : index
    %c0_28 = arith.constant 0 : index
    %c0_29 = arith.constant 0 : index
    %c0_30 = arith.constant 0 : index
    %178 = vector.load %arg4[%c1_27, %c0_28, %c0_29, %c0_30] : memref<3x2x64x576xbf16, #tpu.memory_space<vmem>>, vector<1x1x64x576xbf16>
    %179 = vector.shape_cast %178 : vector<1x1x64x576xbf16> to vector<64x576xbf16>
    %c1_31 = arith.constant 1 : index
    %c0_32 = arith.constant 0 : index
    %c0_33 = arith.constant 0 : index
    %c0_34 = arith.constant 0 : index
    %180 = vector.load %arg5[%c1_31, %c0_32, %c0_33, %c0_34] : memref<3x2x64x1xf32, #tpu.memory_space<vmem>>, vector<1x1x64x1xf32>
    %181 = vector.shape_cast %180 : vector<1x1x64x1xf32> to vector<64x1xf32>
    %182 = arith.truncf %177 : vector<64x128xf32> to vector<64x128xbf16>
    %183 = vector.extract_strided_slice %182 {offsets = [0, 119], sizes = [64, 9], strides = [1, 1]} : vector<64x128xbf16> to vector<64x9xbf16>
    %184 = vector.extract_strided_slice %182 {offsets = [0, 0], sizes = [64, 119], strides = [1, 1]} : vector<64x128xbf16> to vector<64x119xbf16>
    %185 = tpu.concatenate %183, %184 in 1 : vector<64x9xbf16>, vector<64x119xbf16> -> vector<64x128xbf16>
    %186 = vector.extract_strided_slice %0 {offsets = [0, 0], sizes = [1, 128], strides = [1, 1]} : vector<9x128xbf16> to vector<1x128xbf16>
    %187 = vector.broadcast %186 : vector<1x128xbf16> to vector<64x128xbf16>
    %188 = arith.mulf %185, %187 : vector<64x128xbf16>
    %189 = vector.extract_strided_slice %182 {offsets = [0, 120], sizes = [64, 8], strides = [1, 1]} : vector<64x128xbf16> to vector<64x8xbf16>
    %190 = vector.extract_strided_slice %182 {offsets = [0, 0], sizes = [64, 120], strides = [1, 1]} : vector<64x128xbf16> to vector<64x120xbf16>
    %191 = tpu.concatenate %189, %190 in 1 : vector<64x8xbf16>, vector<64x120xbf16> -> vector<64x128xbf16>
    %192 = vector.extract_strided_slice %0 {offsets = [1, 0], sizes = [1, 128], strides = [1, 1]} : vector<9x128xbf16> to vector<1x128xbf16>
    %193 = vector.broadcast %192 : vector<1x128xbf16> to vector<64x128xbf16>
    %194 = arith.mulf %191, %193 : vector<64x128xbf16>
    %195 = vector.extract_strided_slice %182 {offsets = [0, 121], sizes = [64, 7], strides = [1, 1]} : vector<64x128xbf16> to vector<64x7xbf16>
    %196 = vector.extract_strided_slice %182 {offsets = [0, 0], sizes = [64, 121], strides = [1, 1]} : vector<64x128xbf16> to vector<64x121xbf16>
    %197 = tpu.concatenate %195, %196 in 1 : vector<64x7xbf16>, vector<64x121xbf16> -> vector<64x128xbf16>
    %198 = vector.extract_strided_slice %0 {offsets = [2, 0], sizes = [1, 128], strides = [1, 1]} : vector<9x128xbf16> to vector<1x128xbf16>
    %199 = vector.broadcast %198 : vector<1x128xbf16> to vector<64x128xbf16>
    %200 = arith.mulf %197, %199 : vector<64x128xbf16>
    %201 = vector.extract_strided_slice %182 {offsets = [0, 127], sizes = [64, 1], strides = [1, 1]} : vector<64x128xbf16> to vector<64x1xbf16>
    %202 = vector.extract_strided_slice %182 {offsets = [0, 0], sizes = [64, 127], strides = [1, 1]} : vector<64x128xbf16> to vector<64x127xbf16>
    %203 = tpu.concatenate %201, %202 in 1 : vector<64x1xbf16>, vector<64x127xbf16> -> vector<64x128xbf16>
    %204 = vector.extract_strided_slice %0 {offsets = [3, 0], sizes = [1, 128], strides = [1, 1]} : vector<9x128xbf16> to vector<1x128xbf16>
    %205 = vector.broadcast %204 : vector<1x128xbf16> to vector<64x128xbf16>
    %206 = arith.mulf %203, %205 : vector<64x128xbf16>
    %207 = vector.extract_strided_slice %182 {offsets = [0, 1], sizes = [64, 127], strides = [1, 1]} : vector<64x128xbf16> to vector<64x127xbf16>
    %208 = vector.extract_strided_slice %182 {offsets = [0, 0], sizes = [64, 1], strides = [1, 1]} : vector<64x128xbf16> to vector<64x1xbf16>
    %209 = tpu.concatenate %207, %208 in 1 : vector<64x127xbf16>, vector<64x1xbf16> -> vector<64x128xbf16>
    %210 = vector.extract_strided_slice %0 {offsets = [5, 0], sizes = [1, 128], strides = [1, 1]} : vector<9x128xbf16> to vector<1x128xbf16>
    %211 = vector.broadcast %210 : vector<1x128xbf16> to vector<64x128xbf16>
    %212 = arith.mulf %209, %211 : vector<64x128xbf16>
    %213 = vector.extract_strided_slice %182 {offsets = [0, 7], sizes = [64, 121], strides = [1, 1]} : vector<64x128xbf16> to vector<64x121xbf16>
    %214 = vector.extract_strided_slice %182 {offsets = [0, 0], sizes = [64, 7], strides = [1, 1]} : vector<64x128xbf16> to vector<64x7xbf16>
    %215 = tpu.concatenate %213, %214 in 1 : vector<64x121xbf16>, vector<64x7xbf16> -> vector<64x128xbf16>
    %216 = vector.extract_strided_slice %0 {offsets = [6, 0], sizes = [1, 128], strides = [1, 1]} : vector<9x128xbf16> to vector<1x128xbf16>
    %217 = vector.broadcast %216 : vector<1x128xbf16> to vector<64x128xbf16>
    %218 = arith.mulf %215, %217 : vector<64x128xbf16>
    %219 = vector.extract_strided_slice %182 {offsets = [0, 8], sizes = [64, 120], strides = [1, 1]} : vector<64x128xbf16> to vector<64x120xbf16>
    %220 = vector.extract_strided_slice %182 {offsets = [0, 0], sizes = [64, 8], strides = [1, 1]} : vector<64x128xbf16> to vector<64x8xbf16>
    %221 = tpu.concatenate %219, %220 in 1 : vector<64x120xbf16>, vector<64x8xbf16> -> vector<64x128xbf16>
    %222 = vector.extract_strided_slice %0 {offsets = [7, 0], sizes = [1, 128], strides = [1, 1]} : vector<9x128xbf16> to vector<1x128xbf16>
    %223 = vector.broadcast %222 : vector<1x128xbf16> to vector<64x128xbf16>
    %224 = arith.mulf %221, %223 : vector<64x128xbf16>
    %225 = vector.extract_strided_slice %182 {offsets = [0, 9], sizes = [64, 119], strides = [1, 1]} : vector<64x128xbf16> to vector<64x119xbf16>
    %226 = vector.extract_strided_slice %182 {offsets = [0, 0], sizes = [64, 9], strides = [1, 1]} : vector<64x128xbf16> to vector<64x9xbf16>
    %227 = tpu.concatenate %225, %226 in 1 : vector<64x119xbf16>, vector<64x9xbf16> -> vector<64x128xbf16>
    %228 = vector.extract_strided_slice %0 {offsets = [8, 0], sizes = [1, 128], strides = [1, 1]} : vector<9x128xbf16> to vector<1x128xbf16>
    %229 = vector.broadcast %228 : vector<1x128xbf16> to vector<64x128xbf16>
    %230 = arith.mulf %227, %229 : vector<64x128xbf16>
    %231 = tpu.concatenate %188, %194, %200, %206, %182, %212, %218, %224, %230 in 0 : vector<64x128xbf16>, vector<64x128xbf16>, vector<64x128xbf16>, vector<64x128xbf16>, vector<64x128xbf16>, vector<64x128xbf16>, vector<64x128xbf16>, vector<64x128xbf16>, vector<64x128xbf16> -> vector<576x128xbf16>
    %cst_35 = arith.constant dense<0.000000e+00> : vector<64x128xf32>
    %232 = tpu.matmul %179, %231, %cst_35 {dimension_numbers = #tpu.dot_dimension_numbers<[1], [0], [0], [1], [0, 0, 1, 1], [], []>} : vector<64x576xbf16>, vector<576x128xbf16>, vector<64x128xf32> -> vector<64x128xf32>
    %233 = vector.broadcast %181 : vector<64x1xf32> to vector<64x128xf32>
    %234 = arith.addf %232, %233 : vector<64x128xf32>
    %cst_36 = arith.constant 0.000000e+00 : f32
    %235 = vector.broadcast %cst_36 : f32 to vector<64x128xf32>
    %236 = arith.maximumf %234, %235 : vector<64x128xf32>
    %c1_37 = arith.constant 1 : index
    %c1_38 = arith.constant 1 : index
    %c0_39 = arith.constant 0 : index
    %c0_40 = arith.constant 0 : index
    %237 = vector.load %arg4[%c1_37, %c1_38, %c0_39, %c0_40] : memref<3x2x64x576xbf16, #tpu.memory_space<vmem>>, vector<1x1x64x576xbf16>
    %238 = vector.shape_cast %237 : vector<1x1x64x576xbf16> to vector<64x576xbf16>
    %c1_41 = arith.constant 1 : index
    %c1_42 = arith.constant 1 : index
    %c0_43 = arith.constant 0 : index
    %c0_44 = arith.constant 0 : index
    %239 = vector.load %arg5[%c1_41, %c1_42, %c0_43, %c0_44] : memref<3x2x64x1xf32, #tpu.memory_space<vmem>>, vector<1x1x64x1xf32>
    %240 = vector.shape_cast %239 : vector<1x1x64x1xf32> to vector<64x1xf32>
    %241 = arith.truncf %236 : vector<64x128xf32> to vector<64x128xbf16>
    %242 = vector.extract_strided_slice %241 {offsets = [0, 119], sizes = [64, 9], strides = [1, 1]} : vector<64x128xbf16> to vector<64x9xbf16>
    %243 = vector.extract_strided_slice %241 {offsets = [0, 0], sizes = [64, 119], strides = [1, 1]} : vector<64x128xbf16> to vector<64x119xbf16>
    %244 = tpu.concatenate %242, %243 in 1 : vector<64x9xbf16>, vector<64x119xbf16> -> vector<64x128xbf16>
    %245 = vector.extract_strided_slice %0 {offsets = [0, 0], sizes = [1, 128], strides = [1, 1]} : vector<9x128xbf16> to vector<1x128xbf16>
    %246 = vector.broadcast %245 : vector<1x128xbf16> to vector<64x128xbf16>
    %247 = arith.mulf %244, %246 : vector<64x128xbf16>
    %248 = vector.extract_strided_slice %241 {offsets = [0, 120], sizes = [64, 8], strides = [1, 1]} : vector<64x128xbf16> to vector<64x8xbf16>
    %249 = vector.extract_strided_slice %241 {offsets = [0, 0], sizes = [64, 120], strides = [1, 1]} : vector<64x128xbf16> to vector<64x120xbf16>
    %250 = tpu.concatenate %248, %249 in 1 : vector<64x8xbf16>, vector<64x120xbf16> -> vector<64x128xbf16>
    %251 = vector.extract_strided_slice %0 {offsets = [1, 0], sizes = [1, 128], strides = [1, 1]} : vector<9x128xbf16> to vector<1x128xbf16>
    %252 = vector.broadcast %251 : vector<1x128xbf16> to vector<64x128xbf16>
    %253 = arith.mulf %250, %252 : vector<64x128xbf16>
    %254 = vector.extract_strided_slice %241 {offsets = [0, 121], sizes = [64, 7], strides = [1, 1]} : vector<64x128xbf16> to vector<64x7xbf16>
    %255 = vector.extract_strided_slice %241 {offsets = [0, 0], sizes = [64, 121], strides = [1, 1]} : vector<64x128xbf16> to vector<64x121xbf16>
    %256 = tpu.concatenate %254, %255 in 1 : vector<64x7xbf16>, vector<64x121xbf16> -> vector<64x128xbf16>
    %257 = vector.extract_strided_slice %0 {offsets = [2, 0], sizes = [1, 128], strides = [1, 1]} : vector<9x128xbf16> to vector<1x128xbf16>
    %258 = vector.broadcast %257 : vector<1x128xbf16> to vector<64x128xbf16>
    %259 = arith.mulf %256, %258 : vector<64x128xbf16>
    %260 = vector.extract_strided_slice %241 {offsets = [0, 127], sizes = [64, 1], strides = [1, 1]} : vector<64x128xbf16> to vector<64x1xbf16>
    %261 = vector.extract_strided_slice %241 {offsets = [0, 0], sizes = [64, 127], strides = [1, 1]} : vector<64x128xbf16> to vector<64x127xbf16>
    %262 = tpu.concatenate %260, %261 in 1 : vector<64x1xbf16>, vector<64x127xbf16> -> vector<64x128xbf16>
    %263 = vector.extract_strided_slice %0 {offsets = [3, 0], sizes = [1, 128], strides = [1, 1]} : vector<9x128xbf16> to vector<1x128xbf16>
    %264 = vector.broadcast %263 : vector<1x128xbf16> to vector<64x128xbf16>
    %265 = arith.mulf %262, %264 : vector<64x128xbf16>
    %266 = vector.extract_strided_slice %241 {offsets = [0, 1], sizes = [64, 127], strides = [1, 1]} : vector<64x128xbf16> to vector<64x127xbf16>
    %267 = vector.extract_strided_slice %241 {offsets = [0, 0], sizes = [64, 1], strides = [1, 1]} : vector<64x128xbf16> to vector<64x1xbf16>
    %268 = tpu.concatenate %266, %267 in 1 : vector<64x127xbf16>, vector<64x1xbf16> -> vector<64x128xbf16>
    %269 = vector.extract_strided_slice %0 {offsets = [5, 0], sizes = [1, 128], strides = [1, 1]} : vector<9x128xbf16> to vector<1x128xbf16>
    %270 = vector.broadcast %269 : vector<1x128xbf16> to vector<64x128xbf16>
    %271 = arith.mulf %268, %270 : vector<64x128xbf16>
    %272 = vector.extract_strided_slice %241 {offsets = [0, 7], sizes = [64, 121], strides = [1, 1]} : vector<64x128xbf16> to vector<64x121xbf16>
    %273 = vector.extract_strided_slice %241 {offsets = [0, 0], sizes = [64, 7], strides = [1, 1]} : vector<64x128xbf16> to vector<64x7xbf16>
    %274 = tpu.concatenate %272, %273 in 1 : vector<64x121xbf16>, vector<64x7xbf16> -> vector<64x128xbf16>
    %275 = vector.extract_strided_slice %0 {offsets = [6, 0], sizes = [1, 128], strides = [1, 1]} : vector<9x128xbf16> to vector<1x128xbf16>
    %276 = vector.broadcast %275 : vector<1x128xbf16> to vector<64x128xbf16>
    %277 = arith.mulf %274, %276 : vector<64x128xbf16>
    %278 = vector.extract_strided_slice %241 {offsets = [0, 8], sizes = [64, 120], strides = [1, 1]} : vector<64x128xbf16> to vector<64x120xbf16>
    %279 = vector.extract_strided_slice %241 {offsets = [0, 0], sizes = [64, 8], strides = [1, 1]} : vector<64x128xbf16> to vector<64x8xbf16>
    %280 = tpu.concatenate %278, %279 in 1 : vector<64x120xbf16>, vector<64x8xbf16> -> vector<64x128xbf16>
    %281 = vector.extract_strided_slice %0 {offsets = [7, 0], sizes = [1, 128], strides = [1, 1]} : vector<9x128xbf16> to vector<1x128xbf16>
    %282 = vector.broadcast %281 : vector<1x128xbf16> to vector<64x128xbf16>
    %283 = arith.mulf %280, %282 : vector<64x128xbf16>
    %284 = vector.extract_strided_slice %241 {offsets = [0, 9], sizes = [64, 119], strides = [1, 1]} : vector<64x128xbf16> to vector<64x119xbf16>
    %285 = vector.extract_strided_slice %241 {offsets = [0, 0], sizes = [64, 9], strides = [1, 1]} : vector<64x128xbf16> to vector<64x9xbf16>
    %286 = tpu.concatenate %284, %285 in 1 : vector<64x119xbf16>, vector<64x9xbf16> -> vector<64x128xbf16>
    %287 = vector.extract_strided_slice %0 {offsets = [8, 0], sizes = [1, 128], strides = [1, 1]} : vector<9x128xbf16> to vector<1x128xbf16>
    %288 = vector.broadcast %287 : vector<1x128xbf16> to vector<64x128xbf16>
    %289 = arith.mulf %286, %288 : vector<64x128xbf16>
    %290 = tpu.concatenate %247, %253, %259, %265, %241, %271, %277, %283, %289 in 0 : vector<64x128xbf16>, vector<64x128xbf16>, vector<64x128xbf16>, vector<64x128xbf16>, vector<64x128xbf16>, vector<64x128xbf16>, vector<64x128xbf16>, vector<64x128xbf16>, vector<64x128xbf16> -> vector<576x128xbf16>
    %cst_45 = arith.constant dense<0.000000e+00> : vector<64x128xf32>
    %291 = tpu.matmul %238, %290, %cst_45 {dimension_numbers = #tpu.dot_dimension_numbers<[1], [0], [0], [1], [0, 0, 1, 1], [], []>} : vector<64x576xbf16>, vector<576x128xbf16>, vector<64x128xf32> -> vector<64x128xf32>
    %292 = vector.broadcast %240 : vector<64x1xf32> to vector<64x128xf32>
    %293 = arith.addf %291, %292 : vector<64x128xf32>
    %294 = arith.addf %293, %177 : vector<64x128xf32>
    %cst_46 = arith.constant 0.000000e+00 : f32
    %295 = vector.broadcast %cst_46 : f32 to vector<64x128xf32>
    %296 = arith.maximumf %294, %295 : vector<64x128xf32>
    %c2 = arith.constant 2 : index
    %c0_47 = arith.constant 0 : index
    %c0_48 = arith.constant 0 : index
    %c0_49 = arith.constant 0 : index
    %297 = vector.load %arg4[%c2, %c0_47, %c0_48, %c0_49] : memref<3x2x64x576xbf16, #tpu.memory_space<vmem>>, vector<1x1x64x576xbf16>
    %298 = vector.shape_cast %297 : vector<1x1x64x576xbf16> to vector<64x576xbf16>
    %c2_50 = arith.constant 2 : index
    %c0_51 = arith.constant 0 : index
    %c0_52 = arith.constant 0 : index
    %c0_53 = arith.constant 0 : index
    %299 = vector.load %arg5[%c2_50, %c0_51, %c0_52, %c0_53] : memref<3x2x64x1xf32, #tpu.memory_space<vmem>>, vector<1x1x64x1xf32>
    %300 = vector.shape_cast %299 : vector<1x1x64x1xf32> to vector<64x1xf32>
    %301 = arith.truncf %296 : vector<64x128xf32> to vector<64x128xbf16>
    %302 = vector.extract_strided_slice %301 {offsets = [0, 119], sizes = [64, 9], strides = [1, 1]} : vector<64x128xbf16> to vector<64x9xbf16>
    %303 = vector.extract_strided_slice %301 {offsets = [0, 0], sizes = [64, 119], strides = [1, 1]} : vector<64x128xbf16> to vector<64x119xbf16>
    %304 = tpu.concatenate %302, %303 in 1 : vector<64x9xbf16>, vector<64x119xbf16> -> vector<64x128xbf16>
    %305 = vector.extract_strided_slice %0 {offsets = [0, 0], sizes = [1, 128], strides = [1, 1]} : vector<9x128xbf16> to vector<1x128xbf16>
    %306 = vector.broadcast %305 : vector<1x128xbf16> to vector<64x128xbf16>
    %307 = arith.mulf %304, %306 : vector<64x128xbf16>
    %308 = vector.extract_strided_slice %301 {offsets = [0, 120], sizes = [64, 8], strides = [1, 1]} : vector<64x128xbf16> to vector<64x8xbf16>
    %309 = vector.extract_strided_slice %301 {offsets = [0, 0], sizes = [64, 120], strides = [1, 1]} : vector<64x128xbf16> to vector<64x120xbf16>
    %310 = tpu.concatenate %308, %309 in 1 : vector<64x8xbf16>, vector<64x120xbf16> -> vector<64x128xbf16>
    %311 = vector.extract_strided_slice %0 {offsets = [1, 0], sizes = [1, 128], strides = [1, 1]} : vector<9x128xbf16> to vector<1x128xbf16>
    %312 = vector.broadcast %311 : vector<1x128xbf16> to vector<64x128xbf16>
    %313 = arith.mulf %310, %312 : vector<64x128xbf16>
    %314 = vector.extract_strided_slice %301 {offsets = [0, 121], sizes = [64, 7], strides = [1, 1]} : vector<64x128xbf16> to vector<64x7xbf16>
    %315 = vector.extract_strided_slice %301 {offsets = [0, 0], sizes = [64, 121], strides = [1, 1]} : vector<64x128xbf16> to vector<64x121xbf16>
    %316 = tpu.concatenate %314, %315 in 1 : vector<64x7xbf16>, vector<64x121xbf16> -> vector<64x128xbf16>
    %317 = vector.extract_strided_slice %0 {offsets = [2, 0], sizes = [1, 128], strides = [1, 1]} : vector<9x128xbf16> to vector<1x128xbf16>
    %318 = vector.broadcast %317 : vector<1x128xbf16> to vector<64x128xbf16>
    %319 = arith.mulf %316, %318 : vector<64x128xbf16>
    %320 = vector.extract_strided_slice %301 {offsets = [0, 127], sizes = [64, 1], strides = [1, 1]} : vector<64x128xbf16> to vector<64x1xbf16>
    %321 = vector.extract_strided_slice %301 {offsets = [0, 0], sizes = [64, 127], strides = [1, 1]} : vector<64x128xbf16> to vector<64x127xbf16>
    %322 = tpu.concatenate %320, %321 in 1 : vector<64x1xbf16>, vector<64x127xbf16> -> vector<64x128xbf16>
    %323 = vector.extract_strided_slice %0 {offsets = [3, 0], sizes = [1, 128], strides = [1, 1]} : vector<9x128xbf16> to vector<1x128xbf16>
    %324 = vector.broadcast %323 : vector<1x128xbf16> to vector<64x128xbf16>
    %325 = arith.mulf %322, %324 : vector<64x128xbf16>
    %326 = vector.extract_strided_slice %301 {offsets = [0, 1], sizes = [64, 127], strides = [1, 1]} : vector<64x128xbf16> to vector<64x127xbf16>
    %327 = vector.extract_strided_slice %301 {offsets = [0, 0], sizes = [64, 1], strides = [1, 1]} : vector<64x128xbf16> to vector<64x1xbf16>
    %328 = tpu.concatenate %326, %327 in 1 : vector<64x127xbf16>, vector<64x1xbf16> -> vector<64x128xbf16>
    %329 = vector.extract_strided_slice %0 {offsets = [5, 0], sizes = [1, 128], strides = [1, 1]} : vector<9x128xbf16> to vector<1x128xbf16>
    %330 = vector.broadcast %329 : vector<1x128xbf16> to vector<64x128xbf16>
    %331 = arith.mulf %328, %330 : vector<64x128xbf16>
    %332 = vector.extract_strided_slice %301 {offsets = [0, 7], sizes = [64, 121], strides = [1, 1]} : vector<64x128xbf16> to vector<64x121xbf16>
    %333 = vector.extract_strided_slice %301 {offsets = [0, 0], sizes = [64, 7], strides = [1, 1]} : vector<64x128xbf16> to vector<64x7xbf16>
    %334 = tpu.concatenate %332, %333 in 1 : vector<64x121xbf16>, vector<64x7xbf16> -> vector<64x128xbf16>
    %335 = vector.extract_strided_slice %0 {offsets = [6, 0], sizes = [1, 128], strides = [1, 1]} : vector<9x128xbf16> to vector<1x128xbf16>
    %336 = vector.broadcast %335 : vector<1x128xbf16> to vector<64x128xbf16>
    %337 = arith.mulf %334, %336 : vector<64x128xbf16>
    %338 = vector.extract_strided_slice %301 {offsets = [0, 8], sizes = [64, 120], strides = [1, 1]} : vector<64x128xbf16> to vector<64x120xbf16>
    %339 = vector.extract_strided_slice %301 {offsets = [0, 0], sizes = [64, 8], strides = [1, 1]} : vector<64x128xbf16> to vector<64x8xbf16>
    %340 = tpu.concatenate %338, %339 in 1 : vector<64x120xbf16>, vector<64x8xbf16> -> vector<64x128xbf16>
    %341 = vector.extract_strided_slice %0 {offsets = [7, 0], sizes = [1, 128], strides = [1, 1]} : vector<9x128xbf16> to vector<1x128xbf16>
    %342 = vector.broadcast %341 : vector<1x128xbf16> to vector<64x128xbf16>
    %343 = arith.mulf %340, %342 : vector<64x128xbf16>
    %344 = vector.extract_strided_slice %301 {offsets = [0, 9], sizes = [64, 119], strides = [1, 1]} : vector<64x128xbf16> to vector<64x119xbf16>
    %345 = vector.extract_strided_slice %301 {offsets = [0, 0], sizes = [64, 9], strides = [1, 1]} : vector<64x128xbf16> to vector<64x9xbf16>
    %346 = tpu.concatenate %344, %345 in 1 : vector<64x119xbf16>, vector<64x9xbf16> -> vector<64x128xbf16>
    %347 = vector.extract_strided_slice %0 {offsets = [8, 0], sizes = [1, 128], strides = [1, 1]} : vector<9x128xbf16> to vector<1x128xbf16>
    %348 = vector.broadcast %347 : vector<1x128xbf16> to vector<64x128xbf16>
    %349 = arith.mulf %346, %348 : vector<64x128xbf16>
    %350 = tpu.concatenate %307, %313, %319, %325, %301, %331, %337, %343, %349 in 0 : vector<64x128xbf16>, vector<64x128xbf16>, vector<64x128xbf16>, vector<64x128xbf16>, vector<64x128xbf16>, vector<64x128xbf16>, vector<64x128xbf16>, vector<64x128xbf16>, vector<64x128xbf16> -> vector<576x128xbf16>
    %cst_54 = arith.constant dense<0.000000e+00> : vector<64x128xf32>
    %351 = tpu.matmul %298, %350, %cst_54 {dimension_numbers = #tpu.dot_dimension_numbers<[1], [0], [0], [1], [0, 0, 1, 1], [], []>} : vector<64x576xbf16>, vector<576x128xbf16>, vector<64x128xf32> -> vector<64x128xf32>
    %352 = vector.broadcast %300 : vector<64x1xf32> to vector<64x128xf32>
    %353 = arith.addf %351, %352 : vector<64x128xf32>
    %cst_55 = arith.constant 0.000000e+00 : f32
    %354 = vector.broadcast %cst_55 : f32 to vector<64x128xf32>
    %355 = arith.maximumf %353, %354 : vector<64x128xf32>
    %c2_56 = arith.constant 2 : index
    %c1_57 = arith.constant 1 : index
    %c0_58 = arith.constant 0 : index
    %c0_59 = arith.constant 0 : index
    %356 = vector.load %arg4[%c2_56, %c1_57, %c0_58, %c0_59] : memref<3x2x64x576xbf16, #tpu.memory_space<vmem>>, vector<1x1x64x576xbf16>
    %357 = vector.shape_cast %356 : vector<1x1x64x576xbf16> to vector<64x576xbf16>
    %c2_60 = arith.constant 2 : index
    %c1_61 = arith.constant 1 : index
    %c0_62 = arith.constant 0 : index
    %c0_63 = arith.constant 0 : index
    %358 = vector.load %arg5[%c2_60, %c1_61, %c0_62, %c0_63] : memref<3x2x64x1xf32, #tpu.memory_space<vmem>>, vector<1x1x64x1xf32>
    %359 = vector.shape_cast %358 : vector<1x1x64x1xf32> to vector<64x1xf32>
    %360 = arith.truncf %355 : vector<64x128xf32> to vector<64x128xbf16>
    %361 = vector.extract_strided_slice %360 {offsets = [0, 119], sizes = [64, 9], strides = [1, 1]} : vector<64x128xbf16> to vector<64x9xbf16>
    %362 = vector.extract_strided_slice %360 {offsets = [0, 0], sizes = [64, 119], strides = [1, 1]} : vector<64x128xbf16> to vector<64x119xbf16>
    %363 = tpu.concatenate %361, %362 in 1 : vector<64x9xbf16>, vector<64x119xbf16> -> vector<64x128xbf16>
    %364 = vector.extract_strided_slice %0 {offsets = [0, 0], sizes = [1, 128], strides = [1, 1]} : vector<9x128xbf16> to vector<1x128xbf16>
    %365 = vector.broadcast %364 : vector<1x128xbf16> to vector<64x128xbf16>
    %366 = arith.mulf %363, %365 : vector<64x128xbf16>
    %367 = vector.extract_strided_slice %360 {offsets = [0, 120], sizes = [64, 8], strides = [1, 1]} : vector<64x128xbf16> to vector<64x8xbf16>
    %368 = vector.extract_strided_slice %360 {offsets = [0, 0], sizes = [64, 120], strides = [1, 1]} : vector<64x128xbf16> to vector<64x120xbf16>
    %369 = tpu.concatenate %367, %368 in 1 : vector<64x8xbf16>, vector<64x120xbf16> -> vector<64x128xbf16>
    %370 = vector.extract_strided_slice %0 {offsets = [1, 0], sizes = [1, 128], strides = [1, 1]} : vector<9x128xbf16> to vector<1x128xbf16>
    %371 = vector.broadcast %370 : vector<1x128xbf16> to vector<64x128xbf16>
    %372 = arith.mulf %369, %371 : vector<64x128xbf16>
    %373 = vector.extract_strided_slice %360 {offsets = [0, 121], sizes = [64, 7], strides = [1, 1]} : vector<64x128xbf16> to vector<64x7xbf16>
    %374 = vector.extract_strided_slice %360 {offsets = [0, 0], sizes = [64, 121], strides = [1, 1]} : vector<64x128xbf16> to vector<64x121xbf16>
    %375 = tpu.concatenate %373, %374 in 1 : vector<64x7xbf16>, vector<64x121xbf16> -> vector<64x128xbf16>
    %376 = vector.extract_strided_slice %0 {offsets = [2, 0], sizes = [1, 128], strides = [1, 1]} : vector<9x128xbf16> to vector<1x128xbf16>
    %377 = vector.broadcast %376 : vector<1x128xbf16> to vector<64x128xbf16>
    %378 = arith.mulf %375, %377 : vector<64x128xbf16>
    %379 = vector.extract_strided_slice %360 {offsets = [0, 127], sizes = [64, 1], strides = [1, 1]} : vector<64x128xbf16> to vector<64x1xbf16>
    %380 = vector.extract_strided_slice %360 {offsets = [0, 0], sizes = [64, 127], strides = [1, 1]} : vector<64x128xbf16> to vector<64x127xbf16>
    %381 = tpu.concatenate %379, %380 in 1 : vector<64x1xbf16>, vector<64x127xbf16> -> vector<64x128xbf16>
    %382 = vector.extract_strided_slice %0 {offsets = [3, 0], sizes = [1, 128], strides = [1, 1]} : vector<9x128xbf16> to vector<1x128xbf16>
    %383 = vector.broadcast %382 : vector<1x128xbf16> to vector<64x128xbf16>
    %384 = arith.mulf %381, %383 : vector<64x128xbf16>
    %385 = vector.extract_strided_slice %360 {offsets = [0, 1], sizes = [64, 127], strides = [1, 1]} : vector<64x128xbf16> to vector<64x127xbf16>
    %386 = vector.extract_strided_slice %360 {offsets = [0, 0], sizes = [64, 1], strides = [1, 1]} : vector<64x128xbf16> to vector<64x1xbf16>
    %387 = tpu.concatenate %385, %386 in 1 : vector<64x127xbf16>, vector<64x1xbf16> -> vector<64x128xbf16>
    %388 = vector.extract_strided_slice %0 {offsets = [5, 0], sizes = [1, 128], strides = [1, 1]} : vector<9x128xbf16> to vector<1x128xbf16>
    %389 = vector.broadcast %388 : vector<1x128xbf16> to vector<64x128xbf16>
    %390 = arith.mulf %387, %389 : vector<64x128xbf16>
    %391 = vector.extract_strided_slice %360 {offsets = [0, 7], sizes = [64, 121], strides = [1, 1]} : vector<64x128xbf16> to vector<64x121xbf16>
    %392 = vector.extract_strided_slice %360 {offsets = [0, 0], sizes = [64, 7], strides = [1, 1]} : vector<64x128xbf16> to vector<64x7xbf16>
    %393 = tpu.concatenate %391, %392 in 1 : vector<64x121xbf16>, vector<64x7xbf16> -> vector<64x128xbf16>
    %394 = vector.extract_strided_slice %0 {offsets = [6, 0], sizes = [1, 128], strides = [1, 1]} : vector<9x128xbf16> to vector<1x128xbf16>
    %395 = vector.broadcast %394 : vector<1x128xbf16> to vector<64x128xbf16>
    %396 = arith.mulf %393, %395 : vector<64x128xbf16>
    %397 = vector.extract_strided_slice %360 {offsets = [0, 8], sizes = [64, 120], strides = [1, 1]} : vector<64x128xbf16> to vector<64x120xbf16>
    %398 = vector.extract_strided_slice %360 {offsets = [0, 0], sizes = [64, 8], strides = [1, 1]} : vector<64x128xbf16> to vector<64x8xbf16>
    %399 = tpu.concatenate %397, %398 in 1 : vector<64x120xbf16>, vector<64x8xbf16> -> vector<64x128xbf16>
    %400 = vector.extract_strided_slice %0 {offsets = [7, 0], sizes = [1, 128], strides = [1, 1]} : vector<9x128xbf16> to vector<1x128xbf16>
    %401 = vector.broadcast %400 : vector<1x128xbf16> to vector<64x128xbf16>
    %402 = arith.mulf %399, %401 : vector<64x128xbf16>
    %403 = vector.extract_strided_slice %360 {offsets = [0, 9], sizes = [64, 119], strides = [1, 1]} : vector<64x128xbf16> to vector<64x119xbf16>
    %404 = vector.extract_strided_slice %360 {offsets = [0, 0], sizes = [64, 9], strides = [1, 1]} : vector<64x128xbf16> to vector<64x9xbf16>
    %405 = tpu.concatenate %403, %404 in 1 : vector<64x119xbf16>, vector<64x9xbf16> -> vector<64x128xbf16>
    %406 = vector.extract_strided_slice %0 {offsets = [8, 0], sizes = [1, 128], strides = [1, 1]} : vector<9x128xbf16> to vector<1x128xbf16>
    %407 = vector.broadcast %406 : vector<1x128xbf16> to vector<64x128xbf16>
    %408 = arith.mulf %405, %407 : vector<64x128xbf16>
    %409 = tpu.concatenate %366, %372, %378, %384, %360, %390, %396, %402, %408 in 0 : vector<64x128xbf16>, vector<64x128xbf16>, vector<64x128xbf16>, vector<64x128xbf16>, vector<64x128xbf16>, vector<64x128xbf16>, vector<64x128xbf16>, vector<64x128xbf16>, vector<64x128xbf16> -> vector<576x128xbf16>
    %cst_64 = arith.constant dense<0.000000e+00> : vector<64x128xf32>
    %410 = tpu.matmul %357, %409, %cst_64 {dimension_numbers = #tpu.dot_dimension_numbers<[1], [0], [0], [1], [0, 0, 1, 1], [], []>} : vector<64x576xbf16>, vector<576x128xbf16>, vector<64x128xf32> -> vector<64x128xf32>
    %411 = vector.broadcast %359 : vector<64x1xf32> to vector<64x128xf32>
    %412 = arith.addf %410, %411 : vector<64x128xf32>
    %413 = arith.addf %412, %296 : vector<64x128xf32>
    %cst_65 = arith.constant 0.000000e+00 : f32
    %414 = vector.broadcast %cst_65 : f32 to vector<64x128xf32>
    %415 = arith.maximumf %413, %414 : vector<64x128xf32>
    %416 = arith.truncf %415 : vector<64x128xf32> to vector<64x128xbf16>
    %c0_66 = arith.constant 0 : index
    %c0_67 = arith.constant 0 : index
    %417 = vector.load %arg6[%c0_66, %c0_67] : memref<64x64xbf16, #tpu.memory_space<vmem>>, vector<64x64xbf16>
    %cst_68 = arith.constant dense<0.000000e+00> : vector<64x128xf32>
    %418 = tpu.matmul %417, %416, %cst_68 {dimension_numbers = #tpu.dot_dimension_numbers<[1], [0], [0], [1], [0, 0, 1, 1], [], []>} : vector<64x64xbf16>, vector<64x128xbf16>, vector<64x128xf32> -> vector<64x128xf32>
    %c0_69 = arith.constant 0 : index
    %c0_70 = arith.constant 0 : index
    %419 = vector.load %arg7[%c0_69, %c0_70] : memref<64x1xf32, #tpu.memory_space<vmem>>, vector<64x1xf32>
    %420 = vector.broadcast %419 : vector<64x1xf32> to vector<64x128xf32>
    %421 = arith.addf %418, %420 : vector<64x128xf32>
    %cst_71 = arith.constant 0.000000e+00 : f32
    %422 = vector.broadcast %cst_71 : f32 to vector<64x128xf32>
    %423 = arith.maximumf %421, %422 : vector<64x128xf32>
    %c0_72 = arith.constant 0 : index
    %c0_73 = arith.constant 0 : index
    %424 = vector.load %arg16[%c0_72, %c0_73] : memref<64x128xf32, #tpu.memory_space<vmem>>, vector<64x128xf32>
    tpu.vector_store %arg16[%c0_72, %c0_73], %423 {strides = array<i32>} : memref<64x128xf32, #tpu.memory_space<vmem>>, vector<64x128xf32>,
    %c0_74 = arith.constant 0 : index
    %c0_75 = arith.constant 0 : index
    %425 = vector.load %arg16[%c0_74, %c0_75] : memref<64x128xf32, #tpu.memory_space<vmem>>, vector<2x64xf32>
    %c0_76 = arith.constant 0 : index
    %c0_77 = arith.constant 0 : index
    %426 = vector.load %arg17[%c0_76, %c0_77] : memref<4x2048xf32, #tpu.memory_space<vmem>>, vector<2x64xf32>
    tpu.vector_store %arg17[%c0_76, %c0_77], %425 {strides = array<i32>} : memref<4x2048xf32, #tpu.memory_space<vmem>>, vector<2x64xf32>,
    %c2_78 = arith.constant 2 : index
    %c0_79 = arith.constant 0 : index
    %427 = vector.load %arg16[%c2_78, %c0_79] : memref<64x128xf32, #tpu.memory_space<vmem>>, vector<2x64xf32>
    %c0_80 = arith.constant 0 : index
    %c64 = arith.constant 64 : index
    %428 = vector.load %arg17[%c0_80, %c64] : memref<4x2048xf32, #tpu.memory_space<vmem>>, vector<2x64xf32>
    tpu.vector_store %arg17[%c0_80, %c64], %427 {strides = array<i32>} : memref<4x2048xf32, #tpu.memory_space<vmem>>, vector<2x64xf32>,
    %c4 = arith.constant 4 : index
    %c0_81 = arith.constant 0 : index
    %429 = vector.load %arg16[%c4, %c0_81] : memref<64x128xf32, #tpu.memory_space<vmem>>, vector<2x64xf32>
    %c0_82 = arith.constant 0 : index
    %c128 = arith.constant 128 : index
    %430 = vector.load %arg17[%c0_82, %c128] : memref<4x2048xf32, #tpu.memory_space<vmem>>, vector<2x64xf32>
    tpu.vector_store %arg17[%c0_82, %c128], %429 {strides = array<i32>} : memref<4x2048xf32, #tpu.memory_space<vmem>>, vector<2x64xf32>,
    %c6 = arith.constant 6 : index
    %c0_83 = arith.constant 0 : index
    %431 = vector.load %arg16[%c6, %c0_83] : memref<64x128xf32, #tpu.memory_space<vmem>>, vector<2x64xf32>
    %c0_84 = arith.constant 0 : index
    %c192 = arith.constant 192 : index
    %432 = vector.load %arg17[%c0_84, %c192] : memref<4x2048xf32, #tpu.memory_space<vmem>>, vector<2x64xf32>
    tpu.vector_store %arg17[%c0_84, %c192], %431 {strides = array<i32>} : memref<4x2048xf32, #tpu.memory_space<vmem>>, vector<2x64xf32>,
    %c8 = arith.constant 8 : index
    %c0_85 = arith.constant 0 : index
    %433 = vector.load %arg16[%c8, %c0_85] : memref<64x128xf32, #tpu.memory_space<vmem>>, vector<2x64xf32>
    %c0_86 = arith.constant 0 : index
    %c256 = arith.constant 256 : index
    %434 = vector.load %arg17[%c0_86, %c256] : memref<4x2048xf32, #tpu.memory_space<vmem>>, vector<2x64xf32>
    tpu.vector_store %arg17[%c0_86, %c256], %433 {strides = array<i32>} : memref<4x2048xf32, #tpu.memory_space<vmem>>, vector<2x64xf32>,
    %c10 = arith.constant 10 : index
    %c0_87 = arith.constant 0 : index
    %435 = vector.load %arg16[%c10, %c0_87] : memref<64x128xf32, #tpu.memory_space<vmem>>, vector<2x64xf32>
    %c0_88 = arith.constant 0 : index
    %c320 = arith.constant 320 : index
    %436 = vector.load %arg17[%c0_88, %c320] : memref<4x2048xf32, #tpu.memory_space<vmem>>, vector<2x64xf32>
    tpu.vector_store %arg17[%c0_88, %c320], %435 {strides = array<i32>} : memref<4x2048xf32, #tpu.memory_space<vmem>>, vector<2x64xf32>,
    %c12 = arith.constant 12 : index
    %c0_89 = arith.constant 0 : index
    %437 = vector.load %arg16[%c12, %c0_89] : memref<64x128xf32, #tpu.memory_space<vmem>>, vector<2x64xf32>
    %c0_90 = arith.constant 0 : index
    %c384 = arith.constant 384 : index
    %438 = vector.load %arg17[%c0_90, %c384] : memref<4x2048xf32, #tpu.memory_space<vmem>>, vector<2x64xf32>
    tpu.vector_store %arg17[%c0_90, %c384], %437 {strides = array<i32>} : memref<4x2048xf32, #tpu.memory_space<vmem>>, vector<2x64xf32>,
    %c14 = arith.constant 14 : index
    %c0_91 = arith.constant 0 : index
    %439 = vector.load %arg16[%c14, %c0_91] : memref<64x128xf32, #tpu.memory_space<vmem>>, vector<2x64xf32>
    %c0_92 = arith.constant 0 : index
    %c448 = arith.constant 448 : index
    %440 = vector.load %arg17[%c0_92, %c448] : memref<4x2048xf32, #tpu.memory_space<vmem>>, vector<2x64xf32>
    tpu.vector_store %arg17[%c0_92, %c448], %439 {strides = array<i32>} : memref<4x2048xf32, #tpu.memory_space<vmem>>, vector<2x64xf32>,
    %c16 = arith.constant 16 : index
    %c0_93 = arith.constant 0 : index
    %441 = vector.load %arg16[%c16, %c0_93] : memref<64x128xf32, #tpu.memory_space<vmem>>, vector<2x64xf32>
    %c0_94 = arith.constant 0 : index
    %c512 = arith.constant 512 : index
    %442 = vector.load %arg17[%c0_94, %c512] : memref<4x2048xf32, #tpu.memory_space<vmem>>, vector<2x64xf32>
    tpu.vector_store %arg17[%c0_94, %c512], %441 {strides = array<i32>} : memref<4x2048xf32, #tpu.memory_space<vmem>>, vector<2x64xf32>,
    %c18 = arith.constant 18 : index
    %c0_95 = arith.constant 0 : index
    %443 = vector.load %arg16[%c18, %c0_95] : memref<64x128xf32, #tpu.memory_space<vmem>>, vector<2x64xf32>
    %c0_96 = arith.constant 0 : index
    %c576 = arith.constant 576 : index
    %444 = vector.load %arg17[%c0_96, %c576] : memref<4x2048xf32, #tpu.memory_space<vmem>>, vector<2x64xf32>
    tpu.vector_store %arg17[%c0_96, %c576], %443 {strides = array<i32>} : memref<4x2048xf32, #tpu.memory_space<vmem>>, vector<2x64xf32>,
    %c20 = arith.constant 20 : index
    %c0_97 = arith.constant 0 : index
    %445 = vector.load %arg16[%c20, %c0_97] : memref<64x128xf32, #tpu.memory_space<vmem>>, vector<2x64xf32>
    %c0_98 = arith.constant 0 : index
    %c640 = arith.constant 640 : index
    %446 = vector.load %arg17[%c0_98, %c640] : memref<4x2048xf32, #tpu.memory_space<vmem>>, vector<2x64xf32>
    tpu.vector_store %arg17[%c0_98, %c640], %445 {strides = array<i32>} : memref<4x2048xf32, #tpu.memory_space<vmem>>, vector<2x64xf32>,
    %c22 = arith.constant 22 : index
    %c0_99 = arith.constant 0 : index
    %447 = vector.load %arg16[%c22, %c0_99] : memref<64x128xf32, #tpu.memory_space<vmem>>, vector<2x64xf32>
    %c0_100 = arith.constant 0 : index
    %c704 = arith.constant 704 : index
    %448 = vector.load %arg17[%c0_100, %c704] : memref<4x2048xf32, #tpu.memory_space<vmem>>, vector<2x64xf32>
    tpu.vector_store %arg17[%c0_100, %c704], %447 {strides = array<i32>} : memref<4x2048xf32, #tpu.memory_space<vmem>>, vector<2x64xf32>,
    %c24 = arith.constant 24 : index
    %c0_101 = arith.constant 0 : index
    %449 = vector.load %arg16[%c24, %c0_101] : memref<64x128xf32, #tpu.memory_space<vmem>>, vector<2x64xf32>
    %c0_102 = arith.constant 0 : index
    %c768 = arith.constant 768 : index
    %450 = vector.load %arg17[%c0_102, %c768] : memref<4x2048xf32, #tpu.memory_space<vmem>>, vector<2x64xf32>
    tpu.vector_store %arg17[%c0_102, %c768], %449 {strides = array<i32>} : memref<4x2048xf32, #tpu.memory_space<vmem>>, vector<2x64xf32>,
    %c26 = arith.constant 26 : index
    %c0_103 = arith.constant 0 : index
    %451 = vector.load %arg16[%c26, %c0_103] : memref<64x128xf32, #tpu.memory_space<vmem>>, vector<2x64xf32>
    %c0_104 = arith.constant 0 : index
    %c832 = arith.constant 832 : index
    %452 = vector.load %arg17[%c0_104, %c832] : memref<4x2048xf32, #tpu.memory_space<vmem>>, vector<2x64xf32>
    tpu.vector_store %arg17[%c0_104, %c832], %451 {strides = array<i32>} : memref<4x2048xf32, #tpu.memory_space<vmem>>, vector<2x64xf32>,
    %c28 = arith.constant 28 : index
    %c0_105 = arith.constant 0 : index
    %453 = vector.load %arg16[%c28, %c0_105] : memref<64x128xf32, #tpu.memory_space<vmem>>, vector<2x64xf32>
    %c0_106 = arith.constant 0 : index
    %c896 = arith.constant 896 : index
    %454 = vector.load %arg17[%c0_106, %c896] : memref<4x2048xf32, #tpu.memory_space<vmem>>, vector<2x64xf32>
    tpu.vector_store %arg17[%c0_106, %c896], %453 {strides = array<i32>} : memref<4x2048xf32, #tpu.memory_space<vmem>>, vector<2x64xf32>,
    %c30 = arith.constant 30 : index
    %c0_107 = arith.constant 0 : index
    %455 = vector.load %arg16[%c30, %c0_107] : memref<64x128xf32, #tpu.memory_space<vmem>>, vector<2x64xf32>
    %c0_108 = arith.constant 0 : index
    %c960 = arith.constant 960 : index
    %456 = vector.load %arg17[%c0_108, %c960] : memref<4x2048xf32, #tpu.memory_space<vmem>>, vector<2x64xf32>
    tpu.vector_store %arg17[%c0_108, %c960], %455 {strides = array<i32>} : memref<4x2048xf32, #tpu.memory_space<vmem>>, vector<2x64xf32>,
    %c32 = arith.constant 32 : index
    %c0_109 = arith.constant 0 : index
    %457 = vector.load %arg16[%c32, %c0_109] : memref<64x128xf32, #tpu.memory_space<vmem>>, vector<2x64xf32>
    %c0_110 = arith.constant 0 : index
    %c1024 = arith.constant 1024 : index
    %458 = vector.load %arg17[%c0_110, %c1024] : memref<4x2048xf32, #tpu.memory_space<vmem>>, vector<2x64xf32>
    tpu.vector_store %arg17[%c0_110, %c1024], %457 {strides = array<i32>} : memref<4x2048xf32, #tpu.memory_space<vmem>>, vector<2x64xf32>,
    %c34 = arith.constant 34 : index
    %c0_111 = arith.constant 0 : index
    %459 = vector.load %arg16[%c34, %c0_111] : memref<64x128xf32, #tpu.memory_space<vmem>>, vector<2x64xf32>
    %c0_112 = arith.constant 0 : index
    %c1088 = arith.constant 1088 : index
    %460 = vector.load %arg17[%c0_112, %c1088] : memref<4x2048xf32, #tpu.memory_space<vmem>>, vector<2x64xf32>
    tpu.vector_store %arg17[%c0_112, %c1088], %459 {strides = array<i32>} : memref<4x2048xf32, #tpu.memory_space<vmem>>, vector<2x64xf32>,
    %c36 = arith.constant 36 : index
    %c0_113 = arith.constant 0 : index
    %461 = vector.load %arg16[%c36, %c0_113] : memref<64x128xf32, #tpu.memory_space<vmem>>, vector<2x64xf32>
    %c0_114 = arith.constant 0 : index
    %c1152 = arith.constant 1152 : index
    %462 = vector.load %arg17[%c0_114, %c1152] : memref<4x2048xf32, #tpu.memory_space<vmem>>, vector<2x64xf32>
    tpu.vector_store %arg17[%c0_114, %c1152], %461 {strides = array<i32>} : memref<4x2048xf32, #tpu.memory_space<vmem>>, vector<2x64xf32>,
    %c38 = arith.constant 38 : index
    %c0_115 = arith.constant 0 : index
    %463 = vector.load %arg16[%c38, %c0_115] : memref<64x128xf32, #tpu.memory_space<vmem>>, vector<2x64xf32>
    %c0_116 = arith.constant 0 : index
    %c1216 = arith.constant 1216 : index
    %464 = vector.load %arg17[%c0_116, %c1216] : memref<4x2048xf32, #tpu.memory_space<vmem>>, vector<2x64xf32>
    tpu.vector_store %arg17[%c0_116, %c1216], %463 {strides = array<i32>} : memref<4x2048xf32, #tpu.memory_space<vmem>>, vector<2x64xf32>,
    %c40 = arith.constant 40 : index
    %c0_117 = arith.constant 0 : index
    %465 = vector.load %arg16[%c40, %c0_117] : memref<64x128xf32, #tpu.memory_space<vmem>>, vector<2x64xf32>
    %c0_118 = arith.constant 0 : index
    %c1280 = arith.constant 1280 : index
    %466 = vector.load %arg17[%c0_118, %c1280] : memref<4x2048xf32, #tpu.memory_space<vmem>>, vector<2x64xf32>
    tpu.vector_store %arg17[%c0_118, %c1280], %465 {strides = array<i32>} : memref<4x2048xf32, #tpu.memory_space<vmem>>, vector<2x64xf32>,
    %c42 = arith.constant 42 : index
    %c0_119 = arith.constant 0 : index
    %467 = vector.load %arg16[%c42, %c0_119] : memref<64x128xf32, #tpu.memory_space<vmem>>, vector<2x64xf32>
    %c0_120 = arith.constant 0 : index
    %c1344 = arith.constant 1344 : index
    %468 = vector.load %arg17[%c0_120, %c1344] : memref<4x2048xf32, #tpu.memory_space<vmem>>, vector<2x64xf32>
    tpu.vector_store %arg17[%c0_120, %c1344], %467 {strides = array<i32>} : memref<4x2048xf32, #tpu.memory_space<vmem>>, vector<2x64xf32>,
    %c44 = arith.constant 44 : index
    %c0_121 = arith.constant 0 : index
    %469 = vector.load %arg16[%c44, %c0_121] : memref<64x128xf32, #tpu.memory_space<vmem>>, vector<2x64xf32>
    %c0_122 = arith.constant 0 : index
    %c1408 = arith.constant 1408 : index
    %470 = vector.load %arg17[%c0_122, %c1408] : memref<4x2048xf32, #tpu.memory_space<vmem>>, vector<2x64xf32>
    tpu.vector_store %arg17[%c0_122, %c1408], %469 {strides = array<i32>} : memref<4x2048xf32, #tpu.memory_space<vmem>>, vector<2x64xf32>,
    %c46 = arith.constant 46 : index
    %c0_123 = arith.constant 0 : index
    %471 = vector.load %arg16[%c46, %c0_123] : memref<64x128xf32, #tpu.memory_space<vmem>>, vector<2x64xf32>
    %c0_124 = arith.constant 0 : index
    %c1472 = arith.constant 1472 : index
    %472 = vector.load %arg17[%c0_124, %c1472] : memref<4x2048xf32, #tpu.memory_space<vmem>>, vector<2x64xf32>
    tpu.vector_store %arg17[%c0_124, %c1472], %471 {strides = array<i32>} : memref<4x2048xf32, #tpu.memory_space<vmem>>, vector<2x64xf32>,
    %c48 = arith.constant 48 : index
    %c0_125 = arith.constant 0 : index
    %473 = vector.load %arg16[%c48, %c0_125] : memref<64x128xf32, #tpu.memory_space<vmem>>, vector<2x64xf32>
    %c0_126 = arith.constant 0 : index
    %c1536 = arith.constant 1536 : index
    %474 = vector.load %arg17[%c0_126, %c1536] : memref<4x2048xf32, #tpu.memory_space<vmem>>, vector<2x64xf32>
    tpu.vector_store %arg17[%c0_126, %c1536], %473 {strides = array<i32>} : memref<4x2048xf32, #tpu.memory_space<vmem>>, vector<2x64xf32>,
    %c50 = arith.constant 50 : index
    %c0_127 = arith.constant 0 : index
    %475 = vector.load %arg16[%c50, %c0_127] : memref<64x128xf32, #tpu.memory_space<vmem>>, vector<2x64xf32>
    %c0_128 = arith.constant 0 : index
    %c1600 = arith.constant 1600 : index
    %476 = vector.load %arg17[%c0_128, %c1600] : memref<4x2048xf32, #tpu.memory_space<vmem>>, vector<2x64xf32>
    tpu.vector_store %arg17[%c0_128, %c1600], %475 {strides = array<i32>} : memref<4x2048xf32, #tpu.memory_space<vmem>>, vector<2x64xf32>,
    %c52 = arith.constant 52 : index
    %c0_129 = arith.constant 0 : index
    %477 = vector.load %arg16[%c52, %c0_129] : memref<64x128xf32, #tpu.memory_space<vmem>>, vector<2x64xf32>
    %c0_130 = arith.constant 0 : index
    %c1664 = arith.constant 1664 : index
    %478 = vector.load %arg17[%c0_130, %c1664] : memref<4x2048xf32, #tpu.memory_space<vmem>>, vector<2x64xf32>
    tpu.vector_store %arg17[%c0_130, %c1664], %477 {strides = array<i32>} : memref<4x2048xf32, #tpu.memory_space<vmem>>, vector<2x64xf32>,
    %c54 = arith.constant 54 : index
    %c0_131 = arith.constant 0 : index
    %479 = vector.load %arg16[%c54, %c0_131] : memref<64x128xf32, #tpu.memory_space<vmem>>, vector<2x64xf32>
    %c0_132 = arith.constant 0 : index
    %c1728 = arith.constant 1728 : index
    %480 = vector.load %arg17[%c0_132, %c1728] : memref<4x2048xf32, #tpu.memory_space<vmem>>, vector<2x64xf32>
    tpu.vector_store %arg17[%c0_132, %c1728], %479 {strides = array<i32>} : memref<4x2048xf32, #tpu.memory_space<vmem>>, vector<2x64xf32>,
    %c56 = arith.constant 56 : index
    %c0_133 = arith.constant 0 : index
    %481 = vector.load %arg16[%c56, %c0_133] : memref<64x128xf32, #tpu.memory_space<vmem>>, vector<2x64xf32>
    %c0_134 = arith.constant 0 : index
    %c1792 = arith.constant 1792 : index
    %482 = vector.load %arg17[%c0_134, %c1792] : memref<4x2048xf32, #tpu.memory_space<vmem>>, vector<2x64xf32>
    tpu.vector_store %arg17[%c0_134, %c1792], %481 {strides = array<i32>} : memref<4x2048xf32, #tpu.memory_space<vmem>>, vector<2x64xf32>,
    %c58 = arith.constant 58 : index
    %c0_135 = arith.constant 0 : index
    %483 = vector.load %arg16[%c58, %c0_135] : memref<64x128xf32, #tpu.memory_space<vmem>>, vector<2x64xf32>
    %c0_136 = arith.constant 0 : index
    %c1856 = arith.constant 1856 : index
    %484 = vector.load %arg17[%c0_136, %c1856] : memref<4x2048xf32, #tpu.memory_space<vmem>>, vector<2x64xf32>
    tpu.vector_store %arg17[%c0_136, %c1856], %483 {strides = array<i32>} : memref<4x2048xf32, #tpu.memory_space<vmem>>, vector<2x64xf32>,
    %c60 = arith.constant 60 : index
    %c0_137 = arith.constant 0 : index
    %485 = vector.load %arg16[%c60, %c0_137] : memref<64x128xf32, #tpu.memory_space<vmem>>, vector<2x64xf32>
    %c0_138 = arith.constant 0 : index
    %c1920 = arith.constant 1920 : index
    %486 = vector.load %arg17[%c0_138, %c1920] : memref<4x2048xf32, #tpu.memory_space<vmem>>, vector<2x64xf32>
    tpu.vector_store %arg17[%c0_138, %c1920], %485 {strides = array<i32>} : memref<4x2048xf32, #tpu.memory_space<vmem>>, vector<2x64xf32>,
    %c62 = arith.constant 62 : index
    %c0_139 = arith.constant 0 : index
    %487 = vector.load %arg16[%c62, %c0_139] : memref<64x128xf32, #tpu.memory_space<vmem>>, vector<2x64xf32>
    %c0_140 = arith.constant 0 : index
    %c1984 = arith.constant 1984 : index
    %488 = vector.load %arg17[%c0_140, %c1984] : memref<4x2048xf32, #tpu.memory_space<vmem>>, vector<2x64xf32>
    tpu.vector_store %arg17[%c0_140, %c1984], %487 {strides = array<i32>} : memref<4x2048xf32, #tpu.memory_space<vmem>>, vector<2x64xf32>,
    %c0_141 = arith.constant 0 : index
    %c64_142 = arith.constant 64 : index
    %489 = vector.load %arg16[%c0_141, %c64_142] : memref<64x128xf32, #tpu.memory_space<vmem>>, vector<2x64xf32>
    %c2_143 = arith.constant 2 : index
    %c0_144 = arith.constant 0 : index
    %490 = vector.load %arg17[%c2_143, %c0_144] : memref<4x2048xf32, #tpu.memory_space<vmem>>, vector<2x64xf32>
    tpu.vector_store %arg17[%c2_143, %c0_144], %489 {strides = array<i32>} : memref<4x2048xf32, #tpu.memory_space<vmem>>, vector<2x64xf32>,
    %c2_145 = arith.constant 2 : index
    %c64_146 = arith.constant 64 : index
    %491 = vector.load %arg16[%c2_145, %c64_146] : memref<64x128xf32, #tpu.memory_space<vmem>>, vector<2x64xf32>
    %c2_147 = arith.constant 2 : index
    %c64_148 = arith.constant 64 : index
    %492 = vector.load %arg17[%c2_147, %c64_148] : memref<4x2048xf32, #tpu.memory_space<vmem>>, vector<2x64xf32>
    tpu.vector_store %arg17[%c2_147, %c64_148], %491 {strides = array<i32>} : memref<4x2048xf32, #tpu.memory_space<vmem>>, vector<2x64xf32>,
    %c4_149 = arith.constant 4 : index
    %c64_150 = arith.constant 64 : index
    %493 = vector.load %arg16[%c4_149, %c64_150] : memref<64x128xf32, #tpu.memory_space<vmem>>, vector<2x64xf32>
    %c2_151 = arith.constant 2 : index
    %c128_152 = arith.constant 128 : index
    %494 = vector.load %arg17[%c2_151, %c128_152] : memref<4x2048xf32, #tpu.memory_space<vmem>>, vector<2x64xf32>
    tpu.vector_store %arg17[%c2_151, %c128_152], %493 {strides = array<i32>} : memref<4x2048xf32, #tpu.memory_space<vmem>>, vector<2x64xf32>,
    %c6_153 = arith.constant 6 : index
    %c64_154 = arith.constant 64 : index
    %495 = vector.load %arg16[%c6_153, %c64_154] : memref<64x128xf32, #tpu.memory_space<vmem>>, vector<2x64xf32>
    %c2_155 = arith.constant 2 : index
    %c192_156 = arith.constant 192 : index
    %496 = vector.load %arg17[%c2_155, %c192_156] : memref<4x2048xf32, #tpu.memory_space<vmem>>, vector<2x64xf32>
    tpu.vector_store %arg17[%c2_155, %c192_156], %495 {strides = array<i32>} : memref<4x2048xf32, #tpu.memory_space<vmem>>, vector<2x64xf32>,
    %c8_157 = arith.constant 8 : index
    %c64_158 = arith.constant 64 : index
    %497 = vector.load %arg16[%c8_157, %c64_158] : memref<64x128xf32, #tpu.memory_space<vmem>>, vector<2x64xf32>
    %c2_159 = arith.constant 2 : index
    %c256_160 = arith.constant 256 : index
    %498 = vector.load %arg17[%c2_159, %c256_160] : memref<4x2048xf32, #tpu.memory_space<vmem>>, vector<2x64xf32>
    tpu.vector_store %arg17[%c2_159, %c256_160], %497 {strides = array<i32>} : memref<4x2048xf32, #tpu.memory_space<vmem>>, vector<2x64xf32>,
    %c10_161 = arith.constant 10 : index
    %c64_162 = arith.constant 64 : index
    %499 = vector.load %arg16[%c10_161, %c64_162] : memref<64x128xf32, #tpu.memory_space<vmem>>, vector<2x64xf32>
    %c2_163 = arith.constant 2 : index
    %c320_164 = arith.constant 320 : index
    %500 = vector.load %arg17[%c2_163, %c320_164] : memref<4x2048xf32, #tpu.memory_space<vmem>>, vector<2x64xf32>
    tpu.vector_store %arg17[%c2_163, %c320_164], %499 {strides = array<i32>} : memref<4x2048xf32, #tpu.memory_space<vmem>>, vector<2x64xf32>,
    %c12_165 = arith.constant 12 : index
    %c64_166 = arith.constant 64 : index
    %501 = vector.load %arg16[%c12_165, %c64_166] : memref<64x128xf32, #tpu.memory_space<vmem>>, vector<2x64xf32>
    %c2_167 = arith.constant 2 : index
    %c384_168 = arith.constant 384 : index
    %502 = vector.load %arg17[%c2_167, %c384_168] : memref<4x2048xf32, #tpu.memory_space<vmem>>, vector<2x64xf32>
    tpu.vector_store %arg17[%c2_167, %c384_168], %501 {strides = array<i32>} : memref<4x2048xf32, #tpu.memory_space<vmem>>, vector<2x64xf32>,
    %c14_169 = arith.constant 14 : index
    %c64_170 = arith.constant 64 : index
    %503 = vector.load %arg16[%c14_169, %c64_170] : memref<64x128xf32, #tpu.memory_space<vmem>>, vector<2x64xf32>
    %c2_171 = arith.constant 2 : index
    %c448_172 = arith.constant 448 : index
    %504 = vector.load %arg17[%c2_171, %c448_172] : memref<4x2048xf32, #tpu.memory_space<vmem>>, vector<2x64xf32>
    tpu.vector_store %arg17[%c2_171, %c448_172], %503 {strides = array<i32>} : memref<4x2048xf32, #tpu.memory_space<vmem>>, vector<2x64xf32>,
    %c16_173 = arith.constant 16 : index
    %c64_174 = arith.constant 64 : index
    %505 = vector.load %arg16[%c16_173, %c64_174] : memref<64x128xf32, #tpu.memory_space<vmem>>, vector<2x64xf32>
    %c2_175 = arith.constant 2 : index
    %c512_176 = arith.constant 512 : index
    %506 = vector.load %arg17[%c2_175, %c512_176] : memref<4x2048xf32, #tpu.memory_space<vmem>>, vector<2x64xf32>
    tpu.vector_store %arg17[%c2_175, %c512_176], %505 {strides = array<i32>} : memref<4x2048xf32, #tpu.memory_space<vmem>>, vector<2x64xf32>,
    %c18_177 = arith.constant 18 : index
    %c64_178 = arith.constant 64 : index
    %507 = vector.load %arg16[%c18_177, %c64_178] : memref<64x128xf32, #tpu.memory_space<vmem>>, vector<2x64xf32>
    %c2_179 = arith.constant 2 : index
    %c576_180 = arith.constant 576 : index
    %508 = vector.load %arg17[%c2_179, %c576_180] : memref<4x2048xf32, #tpu.memory_space<vmem>>, vector<2x64xf32>
    tpu.vector_store %arg17[%c2_179, %c576_180], %507 {strides = array<i32>} : memref<4x2048xf32, #tpu.memory_space<vmem>>, vector<2x64xf32>,
    %c20_181 = arith.constant 20 : index
    %c64_182 = arith.constant 64 : index
    %509 = vector.load %arg16[%c20_181, %c64_182] : memref<64x128xf32, #tpu.memory_space<vmem>>, vector<2x64xf32>
    %c2_183 = arith.constant 2 : index
    %c640_184 = arith.constant 640 : index
    %510 = vector.load %arg17[%c2_183, %c640_184] : memref<4x2048xf32, #tpu.memory_space<vmem>>, vector<2x64xf32>
    tpu.vector_store %arg17[%c2_183, %c640_184], %509 {strides = array<i32>} : memref<4x2048xf32, #tpu.memory_space<vmem>>, vector<2x64xf32>,
    %c22_185 = arith.constant 22 : index
    %c64_186 = arith.constant 64 : index
    %511 = vector.load %arg16[%c22_185, %c64_186] : memref<64x128xf32, #tpu.memory_space<vmem>>, vector<2x64xf32>
    %c2_187 = arith.constant 2 : index
    %c704_188 = arith.constant 704 : index
    %512 = vector.load %arg17[%c2_187, %c704_188] : memref<4x2048xf32, #tpu.memory_space<vmem>>, vector<2x64xf32>
    tpu.vector_store %arg17[%c2_187, %c704_188], %511 {strides = array<i32>} : memref<4x2048xf32, #tpu.memory_space<vmem>>, vector<2x64xf32>,
    %c24_189 = arith.constant 24 : index
    %c64_190 = arith.constant 64 : index
    %513 = vector.load %arg16[%c24_189, %c64_190] : memref<64x128xf32, #tpu.memory_space<vmem>>, vector<2x64xf32>
    %c2_191 = arith.constant 2 : index
    %c768_192 = arith.constant 768 : index
    %514 = vector.load %arg17[%c2_191, %c768_192] : memref<4x2048xf32, #tpu.memory_space<vmem>>, vector<2x64xf32>
    tpu.vector_store %arg17[%c2_191, %c768_192], %513 {strides = array<i32>} : memref<4x2048xf32, #tpu.memory_space<vmem>>, vector<2x64xf32>,
    %c26_193 = arith.constant 26 : index
    %c64_194 = arith.constant 64 : index
    %515 = vector.load %arg16[%c26_193, %c64_194] : memref<64x128xf32, #tpu.memory_space<vmem>>, vector<2x64xf32>
    %c2_195 = arith.constant 2 : index
    %c832_196 = arith.constant 832 : index
    %516 = vector.load %arg17[%c2_195, %c832_196] : memref<4x2048xf32, #tpu.memory_space<vmem>>, vector<2x64xf32>
    tpu.vector_store %arg17[%c2_195, %c832_196], %515 {strides = array<i32>} : memref<4x2048xf32, #tpu.memory_space<vmem>>, vector<2x64xf32>,
    %c28_197 = arith.constant 28 : index
    %c64_198 = arith.constant 64 : index
    %517 = vector.load %arg16[%c28_197, %c64_198] : memref<64x128xf32, #tpu.memory_space<vmem>>, vector<2x64xf32>
    %c2_199 = arith.constant 2 : index
    %c896_200 = arith.constant 896 : index
    %518 = vector.load %arg17[%c2_199, %c896_200] : memref<4x2048xf32, #tpu.memory_space<vmem>>, vector<2x64xf32>
    tpu.vector_store %arg17[%c2_199, %c896_200], %517 {strides = array<i32>} : memref<4x2048xf32, #tpu.memory_space<vmem>>, vector<2x64xf32>,
    %c30_201 = arith.constant 30 : index
    %c64_202 = arith.constant 64 : index
    %519 = vector.load %arg16[%c30_201, %c64_202] : memref<64x128xf32, #tpu.memory_space<vmem>>, vector<2x64xf32>
    %c2_203 = arith.constant 2 : index
    %c960_204 = arith.constant 960 : index
    %520 = vector.load %arg17[%c2_203, %c960_204] : memref<4x2048xf32, #tpu.memory_space<vmem>>, vector<2x64xf32>
    tpu.vector_store %arg17[%c2_203, %c960_204], %519 {strides = array<i32>} : memref<4x2048xf32, #tpu.memory_space<vmem>>, vector<2x64xf32>,
    %c32_205 = arith.constant 32 : index
    %c64_206 = arith.constant 64 : index
    %521 = vector.load %arg16[%c32_205, %c64_206] : memref<64x128xf32, #tpu.memory_space<vmem>>, vector<2x64xf32>
    %c2_207 = arith.constant 2 : index
    %c1024_208 = arith.constant 1024 : index
    %522 = vector.load %arg17[%c2_207, %c1024_208] : memref<4x2048xf32, #tpu.memory_space<vmem>>, vector<2x64xf32>
    tpu.vector_store %arg17[%c2_207, %c1024_208], %521 {strides = array<i32>} : memref<4x2048xf32, #tpu.memory_space<vmem>>, vector<2x64xf32>,
    %c34_209 = arith.constant 34 : index
    %c64_210 = arith.constant 64 : index
    %523 = vector.load %arg16[%c34_209, %c64_210] : memref<64x128xf32, #tpu.memory_space<vmem>>, vector<2x64xf32>
    %c2_211 = arith.constant 2 : index
    %c1088_212 = arith.constant 1088 : index
    %524 = vector.load %arg17[%c2_211, %c1088_212] : memref<4x2048xf32, #tpu.memory_space<vmem>>, vector<2x64xf32>
    tpu.vector_store %arg17[%c2_211, %c1088_212], %523 {strides = array<i32>} : memref<4x2048xf32, #tpu.memory_space<vmem>>, vector<2x64xf32>,
    %c36_213 = arith.constant 36 : index
    %c64_214 = arith.constant 64 : index
    %525 = vector.load %arg16[%c36_213, %c64_214] : memref<64x128xf32, #tpu.memory_space<vmem>>, vector<2x64xf32>
    %c2_215 = arith.constant 2 : index
    %c1152_216 = arith.constant 1152 : index
    %526 = vector.load %arg17[%c2_215, %c1152_216] : memref<4x2048xf32, #tpu.memory_space<vmem>>, vector<2x64xf32>
    tpu.vector_store %arg17[%c2_215, %c1152_216], %525 {strides = array<i32>} : memref<4x2048xf32, #tpu.memory_space<vmem>>, vector<2x64xf32>,
    %c38_217 = arith.constant 38 : index
    %c64_218 = arith.constant 64 : index
    %527 = vector.load %arg16[%c38_217, %c64_218] : memref<64x128xf32, #tpu.memory_space<vmem>>, vector<2x64xf32>
    %c2_219 = arith.constant 2 : index
    %c1216_220 = arith.constant 1216 : index
    %528 = vector.load %arg17[%c2_219, %c1216_220] : memref<4x2048xf32, #tpu.memory_space<vmem>>, vector<2x64xf32>
    tpu.vector_store %arg17[%c2_219, %c1216_220], %527 {strides = array<i32>} : memref<4x2048xf32, #tpu.memory_space<vmem>>, vector<2x64xf32>,
    %c40_221 = arith.constant 40 : index
    %c64_222 = arith.constant 64 : index
    %529 = vector.load %arg16[%c40_221, %c64_222] : memref<64x128xf32, #tpu.memory_space<vmem>>, vector<2x64xf32>
    %c2_223 = arith.constant 2 : index
    %c1280_224 = arith.constant 1280 : index
    %530 = vector.load %arg17[%c2_223, %c1280_224] : memref<4x2048xf32, #tpu.memory_space<vmem>>, vector<2x64xf32>
    tpu.vector_store %arg17[%c2_223, %c1280_224], %529 {strides = array<i32>} : memref<4x2048xf32, #tpu.memory_space<vmem>>, vector<2x64xf32>,
    %c42_225 = arith.constant 42 : index
    %c64_226 = arith.constant 64 : index
    %531 = vector.load %arg16[%c42_225, %c64_226] : memref<64x128xf32, #tpu.memory_space<vmem>>, vector<2x64xf32>
    %c2_227 = arith.constant 2 : index
    %c1344_228 = arith.constant 1344 : index
    %532 = vector.load %arg17[%c2_227, %c1344_228] : memref<4x2048xf32, #tpu.memory_space<vmem>>, vector<2x64xf32>
    tpu.vector_store %arg17[%c2_227, %c1344_228], %531 {strides = array<i32>} : memref<4x2048xf32, #tpu.memory_space<vmem>>, vector<2x64xf32>,
    %c44_229 = arith.constant 44 : index
    %c64_230 = arith.constant 64 : index
    %533 = vector.load %arg16[%c44_229, %c64_230] : memref<64x128xf32, #tpu.memory_space<vmem>>, vector<2x64xf32>
    %c2_231 = arith.constant 2 : index
    %c1408_232 = arith.constant 1408 : index
    %534 = vector.load %arg17[%c2_231, %c1408_232] : memref<4x2048xf32, #tpu.memory_space<vmem>>, vector<2x64xf32>
    tpu.vector_store %arg17[%c2_231, %c1408_232], %533 {strides = array<i32>} : memref<4x2048xf32, #tpu.memory_space<vmem>>, vector<2x64xf32>,
    %c46_233 = arith.constant 46 : index
    %c64_234 = arith.constant 64 : index
    %535 = vector.load %arg16[%c46_233, %c64_234] : memref<64x128xf32, #tpu.memory_space<vmem>>, vector<2x64xf32>
    %c2_235 = arith.constant 2 : index
    %c1472_236 = arith.constant 1472 : index
    %536 = vector.load %arg17[%c2_235, %c1472_236] : memref<4x2048xf32, #tpu.memory_space<vmem>>, vector<2x64xf32>
    tpu.vector_store %arg17[%c2_235, %c1472_236], %535 {strides = array<i32>} : memref<4x2048xf32, #tpu.memory_space<vmem>>, vector<2x64xf32>,
    %c48_237 = arith.constant 48 : index
    %c64_238 = arith.constant 64 : index
    %537 = vector.load %arg16[%c48_237, %c64_238] : memref<64x128xf32, #tpu.memory_space<vmem>>, vector<2x64xf32>
    %c2_239 = arith.constant 2 : index
    %c1536_240 = arith.constant 1536 : index
    %538 = vector.load %arg17[%c2_239, %c1536_240] : memref<4x2048xf32, #tpu.memory_space<vmem>>, vector<2x64xf32>
    tpu.vector_store %arg17[%c2_239, %c1536_240], %537 {strides = array<i32>} : memref<4x2048xf32, #tpu.memory_space<vmem>>, vector<2x64xf32>,
    %c50_241 = arith.constant 50 : index
    %c64_242 = arith.constant 64 : index
    %539 = vector.load %arg16[%c50_241, %c64_242] : memref<64x128xf32, #tpu.memory_space<vmem>>, vector<2x64xf32>
    %c2_243 = arith.constant 2 : index
    %c1600_244 = arith.constant 1600 : index
    %540 = vector.load %arg17[%c2_243, %c1600_244] : memref<4x2048xf32, #tpu.memory_space<vmem>>, vector<2x64xf32>
    tpu.vector_store %arg17[%c2_243, %c1600_244], %539 {strides = array<i32>} : memref<4x2048xf32, #tpu.memory_space<vmem>>, vector<2x64xf32>,
    %c52_245 = arith.constant 52 : index
    %c64_246 = arith.constant 64 : index
    %541 = vector.load %arg16[%c52_245, %c64_246] : memref<64x128xf32, #tpu.memory_space<vmem>>, vector<2x64xf32>
    %c2_247 = arith.constant 2 : index
    %c1664_248 = arith.constant 1664 : index
    %542 = vector.load %arg17[%c2_247, %c1664_248] : memref<4x2048xf32, #tpu.memory_space<vmem>>, vector<2x64xf32>
    tpu.vector_store %arg17[%c2_247, %c1664_248], %541 {strides = array<i32>} : memref<4x2048xf32, #tpu.memory_space<vmem>>, vector<2x64xf32>,
    %c54_249 = arith.constant 54 : index
    %c64_250 = arith.constant 64 : index
    %543 = vector.load %arg16[%c54_249, %c64_250] : memref<64x128xf32, #tpu.memory_space<vmem>>, vector<2x64xf32>
    %c2_251 = arith.constant 2 : index
    %c1728_252 = arith.constant 1728 : index
    %544 = vector.load %arg17[%c2_251, %c1728_252] : memref<4x2048xf32, #tpu.memory_space<vmem>>, vector<2x64xf32>
    tpu.vector_store %arg17[%c2_251, %c1728_252], %543 {strides = array<i32>} : memref<4x2048xf32, #tpu.memory_space<vmem>>, vector<2x64xf32>,
    %c56_253 = arith.constant 56 : index
    %c64_254 = arith.constant 64 : index
    %545 = vector.load %arg16[%c56_253, %c64_254] : memref<64x128xf32, #tpu.memory_space<vmem>>, vector<2x64xf32>
    %c2_255 = arith.constant 2 : index
    %c1792_256 = arith.constant 1792 : index
    %546 = vector.load %arg17[%c2_255, %c1792_256] : memref<4x2048xf32, #tpu.memory_space<vmem>>, vector<2x64xf32>
    tpu.vector_store %arg17[%c2_255, %c1792_256], %545 {strides = array<i32>} : memref<4x2048xf32, #tpu.memory_space<vmem>>, vector<2x64xf32>,
    %c58_257 = arith.constant 58 : index
    %c64_258 = arith.constant 64 : index
    %547 = vector.load %arg16[%c58_257, %c64_258] : memref<64x128xf32, #tpu.memory_space<vmem>>, vector<2x64xf32>
    %c2_259 = arith.constant 2 : index
    %c1856_260 = arith.constant 1856 : index
    %548 = vector.load %arg17[%c2_259, %c1856_260] : memref<4x2048xf32, #tpu.memory_space<vmem>>, vector<2x64xf32>
    tpu.vector_store %arg17[%c2_259, %c1856_260], %547 {strides = array<i32>} : memref<4x2048xf32, #tpu.memory_space<vmem>>, vector<2x64xf32>,
    %c60_261 = arith.constant 60 : index
    %c64_262 = arith.constant 64 : index
    %549 = vector.load %arg16[%c60_261, %c64_262] : memref<64x128xf32, #tpu.memory_space<vmem>>, vector<2x64xf32>
    %c2_263 = arith.constant 2 : index
    %c1920_264 = arith.constant 1920 : index
    %550 = vector.load %arg17[%c2_263, %c1920_264] : memref<4x2048xf32, #tpu.memory_space<vmem>>, vector<2x64xf32>
    tpu.vector_store %arg17[%c2_263, %c1920_264], %549 {strides = array<i32>} : memref<4x2048xf32, #tpu.memory_space<vmem>>, vector<2x64xf32>,
    %c62_265 = arith.constant 62 : index
    %c64_266 = arith.constant 64 : index
    %551 = vector.load %arg16[%c62_265, %c64_266] : memref<64x128xf32, #tpu.memory_space<vmem>>, vector<2x64xf32>
    %c2_267 = arith.constant 2 : index
    %c1984_268 = arith.constant 1984 : index
    %552 = vector.load %arg17[%c2_267, %c1984_268] : memref<4x2048xf32, #tpu.memory_space<vmem>>, vector<2x64xf32>
    tpu.vector_store %arg17[%c2_267, %c1984_268], %551 {strides = array<i32>} : memref<4x2048xf32, #tpu.memory_space<vmem>>, vector<2x64xf32>,
    %c0_269 = arith.constant 0 : index
    %c0_270 = arith.constant 0 : index
    %553 = vector.load %arg17[%c0_269, %c0_270] : memref<4x2048xf32, #tpu.memory_space<vmem>>, vector<4x2048xf32>
    %554 = arith.truncf %553 : vector<4x2048xf32> to vector<4x2048xbf16>
    %c0_271 = arith.constant 0 : index
    %c0_272 = arith.constant 0 : index
    %555 = vector.load %arg8[%c0_271, %c0_272] : memref<2048x128xbf16, #tpu.memory_space<vmem>>, vector<2048x128xbf16>
    %cst_273 = arith.constant dense<0.000000e+00> : vector<4x128xf32>
    %556 = tpu.matmul %554, %555, %cst_273 {dimension_numbers = #tpu.dot_dimension_numbers<[1], [0], [0], [1], [0, 0, 1, 1], [], []>} : vector<4x2048xbf16>, vector<2048x128xbf16>, vector<4x128xf32> -> vector<4x128xf32>
    %c0_274 = arith.constant 0 : index
    %c0_275 = arith.constant 0 : index
    %557 = vector.load %arg9[%c0_274, %c0_275] : memref<1x128xf32, #tpu.memory_space<vmem>>, vector<1x128xf32>
    %558 = vector.broadcast %557 : vector<1x128xf32> to vector<4x128xf32>
    %559 = arith.addf %556, %558 : vector<4x128xf32>
    %c0_276 = arith.constant 0 : index
    %c0_277 = arith.constant 0 : index
    %560 = vector.load %arg10[%c0_276, %c0_277] : memref<2048x256xbf16, #tpu.memory_space<vmem>>, vector<2048x256xbf16>
    %cst_278 = arith.constant dense<0.000000e+00> : vector<4x256xf32>
    %561 = tpu.matmul %554, %560, %cst_278 {dimension_numbers = #tpu.dot_dimension_numbers<[1], [0], [0], [1], [0, 0, 1, 1], [], []>} : vector<4x2048xbf16>, vector<2048x256xbf16>, vector<4x256xf32> -> vector<4x256xf32>
    %c0_279 = arith.constant 0 : index
    %c0_280 = arith.constant 0 : index
    %562 = vector.load %arg11[%c0_279, %c0_280] : memref<1x256xf32, #tpu.memory_space<vmem>>, vector<1x256xf32>
    %563 = vector.broadcast %562 : vector<1x256xf32> to vector<4x256xf32>
    %564 = arith.addf %561, %563 : vector<4x256xf32>
    %cst_281 = arith.constant 0.000000e+00 : f32
    %565 = vector.broadcast %cst_281 : f32 to vector<4x256xf32>
    %566 = arith.maximumf %564, %565 : vector<4x256xf32>
    %c0_282 = arith.constant 0 : index
    %c0_283 = arith.constant 0 : index
    %567 = vector.load %arg12[%c0_282, %c0_283] : memref<1x256xf32, #tpu.memory_space<vmem>>, vector<1x256xf32>
    %568 = vector.broadcast %567 : vector<1x256xf32> to vector<4x256xf32>
    %569 = arith.mulf %566, %568 : vector<4x256xf32>
    %cst_284 = arith.constant dense<0.000000e+00> : vector<4xf32>
    %570 = vector.multi_reduction <add>, %569, %cst_284 [1] : vector<4x256xf32> to vector<4xf32>
    %571 = vector.shape_cast %570 : vector<4xf32> to vector<4x1xf32>
    %c0_285 = arith.constant 0 : index
    %c0_286 = arith.constant 0 : index
    %572 = vector.load %arg13[%c0_285, %c0_286] : memref<1x1xf32, #tpu.memory_space<vmem>>, vector<1x1xf32>
    %573 = vector.broadcast %572 : vector<1x1xf32> to vector<4x1xf32>
    %574 = arith.addf %571, %573 : vector<4x1xf32>
    %575 = math.tanh %574 : vector<4x1xf32>
    %576 = vector.extract_strided_slice %559 {offsets = [0, 0], sizes = [1, 128], strides = [1, 1]} : vector<4x128xf32> to vector<1x128xf32>
    %c0_287 = arith.constant 0 : index
    %c0_288 = arith.constant 0 : index
    %577 = vector.load %arg14[%c0_287, %c0_288] : memref<2x128xf32, #tpu.memory_space<vmem>>, vector<1x128xf32>
    tpu.vector_store %arg14[%c0_287, %c0_288], %576 {strides = array<i32>} : memref<2x128xf32, #tpu.memory_space<vmem>>, vector<1x128xf32>,
    %578 = vector.extract_strided_slice %575 {offsets = [1, 0], sizes = [1, 1], strides = [1, 1]} : vector<4x1xf32> to vector<1x1xf32>
    %c0_289 = arith.constant 0 : index
    %c0_290 = arith.constant 0 : index
    %579 = vector.load %arg15[%c0_289, %c0_290] : memref<2x1xf32, #tpu.memory_space<vmem>>, vector<1x1xf32>
    tpu.vector_store %arg15[%c0_289, %c0_290], %578 {strides = array<i32>} : memref<2x1xf32, #tpu.memory_space<vmem>>, vector<1x1xf32>,
    %580 = vector.extract_strided_slice %559 {offsets = [2, 0], sizes = [1, 128], strides = [1, 1]} : vector<4x128xf32> to vector<1x128xf32>
    %c1_291 = arith.constant 1 : index
    %c0_292 = arith.constant 0 : index
    %581 = vector.load %arg14[%c1_291, %c0_292] : memref<2x128xf32, #tpu.memory_space<vmem>>, vector<1x128xf32>
    tpu.vector_store %arg14[%c1_291, %c0_292], %580 {strides = array<i32>} : memref<2x128xf32, #tpu.memory_space<vmem>>, vector<1x128xf32>,
    %582 = vector.extract_strided_slice %575 {offsets = [3, 0], sizes = [1, 1], strides = [1, 1]} : vector<4x1xf32> to vector<1x1xf32>
    %c1_293 = arith.constant 1 : index
    %c0_294 = arith.constant 0 : index
    %583 = vector.load %arg15[%c1_293, %c0_294] : memref<2x1xf32, #tpu.memory_space<vmem>>, vector<1x1xf32>
    tpu.vector_store %arg15[%c1_293, %c0_294], %582 {strides = array<i32>} : memref<2x1xf32, #tpu.memory_space<vmem>>, vector<1x1xf32>,
    return
  }
}

</mosaic_0001>

<bundles_post_ra>
// kernel: tpu_custom_call.1
= control target key start
LH: loop header
LB: loop body
LE: loop exit
PB: predicated region body
PF: predicated region fallthrough
CT: control target
= control target key end

     0   :  { %s11342_s0 = inlined_call_operand.vmem [shape: f32[12,128], index: 0, kind: input, shape index: {}]   ;;  %s11343_s1 = inlined_call_operand.vmem [shape: bf16[9,128], index: 1, kind: input, shape index: {}]   ;;  %s11344_s2 = inlined_call_operand.vmem [shape: bf16[64,108], index: 2, kind: input, shape index: {}]   ;;  %s11345_s3 = inlined_call_operand.vmem [shape: f32[64,1], index: 3, kind: input, shape index: {}]   ;;  %s11346_s4 = inlined_call_operand.hbm [shape: bf16[3,2,64,576], index: 4, kind: input, shape index: {}]   ;;  %s11347_s5 = inlined_call_operand.vmem [shape: f32[3,2,64,1], index: 5, kind: input, shape index: {}]   ;;  %s11348_s6 = inlined_call_operand.vmem [shape: bf16[64,64], index: 6, kind: input, shape index: {}]   ;;  %s11349_s7 = inlined_call_operand.vmem [shape: f32[64,1], index: 7, kind: input, shape index: {}]   ;;  %s11350_s8 = inlined_call_operand.hbm [shape: bf16[2048,128], index: 8, kind: input, shape index: {}]   ;;  %s11351_s9 = inlined_call_operand.vmem [shape: f32[1,128], index: 9, kind: input, shape index: {}]   ;;  %s11352_s10 = inlined_call_operand.hbm [shape: bf16[2048,256], index: 10, kind: input, shape index: {}]   ;;  %s11353_s11 = inlined_call_operand.vmem [shape: f32[1,256], index: 11, kind: input, shape index: {}]   ;;  %s11354_s12 = inlined_call_operand.vmem [shape: f32[1,256], index: 12, kind: input, shape index: {}]   ;;  %s11355_s13 = inlined_call_operand.<no memory space> [shape: f32[1,1], index: 13, kind: input, shape index: {}]   ;;  %s11356_s14 = inlined_call_operand.hbm [shape: f32[2,128], index: 14, kind: output, shape index: {0}]   ;;  %s11357_s15 = inlined_call_operand.vmem [shape: f32[2,1], index: 15, kind: output, shape index: {1}]  }
   0x1   :  { %v21_v0 = vstv %s11355_s13 }
   0x2   :  { %22 = vst [vmem:[#allocation4] sm:$0x1] %v21_v0 }
   0x3   :  { %23 = vsyncpa [#allocation6], 0 }
   0x4   :  { %24 = vsyncpa [#allocation9], 0 }
   0x5   :  { %25 = vsyncpa [#allocation7], 0  ;;  %s9858_s20 = smov [#allocation8]   ;;  %s9764_s24 = scalar_lea.hbm %s11350_s8, 16384 }
   0x6   :  { %s57_s21 = sshll.u32 %s9858_s20, 4  ;;  %p9765_p0 = scmp.ne.s32.totalorder %s11350_s8, %s9764_s24  ;;  %s58_s21 = int_to_ptr.vmem [resolvable:$true] %s57_s21 }
   0x7   :  { %p9768_p1 = scmp.lt.u32.totalorder %s9764_s24, %s11350_s8 }
   0x9   :  { %p9770_p2 = pnand %p9768_p1, %p9765_p0 }
   0xb   :  { %9773 = shalt.err (!%p9770_p2)
}
   0xc   :  { %s9774_s13 = scalar_lea.vmem %s58_s21, 16384  ;;  %p9779_p4 = scmp.lt.s32.totalorder %s58_s21, %s58_s21 }
   0xd   :  { %p9775_p3 = scmp.ne.s32.totalorder %s58_s21, %s9774_s13  ;;  %p9780_p5 = scmp.lt.s32.totalorder %s9774_s13, %s9774_s13 }
   0xf   :  { %p9781_p6 = por %p9780_p5, %p9779_p4 }
  0x11   :  { %p9782_p7 = pnand %p9781_p6, %p9775_p3 }
  0x13   :  { %9785 = shalt.err (!%p9782_p7)
}
  0x14   :  { %s9859_s29 = smov 64   ;;  %s9860_s30 = smov 4  }
  0x15   :  { %63 = dma.hbm_to_vmem [thread:$0]  %s11350_s8, 16384, %s58_s21, [#allocation9], %s9859_s29, %s9859_s29, %s9860_s30  }
  0x16   :  { %s9861_s18 = smov [#allocation5]   ;;  %s9786_s23 = scalar_lea.hbm %s11346_s4, 15360 }
  0x17   :  { %s39_s19 = sshll.u32 %s9861_s18, 4  ;;  %p9787_p8 = scmp.ne.s32.totalorder %s11346_s4, %s9786_s23  ;;  %s40_s19 = int_to_ptr.vmem [resolvable:$true] %s39_s19 }
  0x18   :  { %p9790_p9 = scmp.lt.u32.totalorder %s9786_s23, %s11346_s4 }
  0x1a   :  { %p9792_p10 = pnand %p9790_p9, %p9787_p8 }
  0x1c   :  { %9795 = shalt.err (!%p9792_p10)
}
  0x1d   :  { %s9796_s28 = scalar_lea.vmem %s40_s19, 15360  ;;  %p9801_p12 = scmp.lt.s32.totalorder %s40_s19, %s40_s19 }
  0x1e   :  { %p9797_p11 = scmp.ne.s32.totalorder %s40_s19, %s9796_s28  ;;  %p9802_p13 = scmp.lt.s32.totalorder %s9796_s28, %s9796_s28 }
  0x20   :  { %p9803_p0 = por %p9802_p13, %p9801_p12 }
  0x22   :  { %p9804_p1 = pnand %p9803_p0, %p9797_p11 }
  0x24   :  { %9807 = shalt.err (!%p9804_p1)
}
  0x25   :  { %s9862_s8 = smov 320   ;;  %s9863_s21 = smov 20  }
  0x26   :  { %45 = dma.hbm_to_vmem [thread:$0]  %s11346_s4, 15360, %s40_s19, [#allocation6], %s9862_s8, %s9862_s8, %s9863_s21  }
  0x27   :  { %s9864_s16 = smov [#allocation10]   ;;  %s9808_s22 = scalar_lea.hbm %s11352_s10, 32768 }
  0x28   :  { %s71_s17 = sshll.u32 %s9864_s16, 4  ;;  %p9809_p2 = scmp.ne.s32.totalorder %s11352_s10, %s9808_s22  ;;  %s72_s17 = int_to_ptr.vmem [resolvable:$true] %s71_s17 }
  0x29   :  { %p9812_p3 = scmp.lt.u32.totalorder %s9808_s22, %s11352_s10 }
  0x2b   :  { %p9814_p4 = pnand %p9812_p3, %p9809_p2 }
  0x2d   :  { %9817 = shalt.err (!%p9814_p4)
}
  0x2e   :  { %s9818_s27 = scalar_lea.vmem %s72_s17, 32768  ;;  %p9823_p6 = scmp.lt.s32.totalorder %s72_s17, %s72_s17 }
  0x2f   :  { %p9819_p5 = scmp.ne.s32.totalorder %s72_s17, %s9818_s27  ;;  %p9824_p7 = scmp.lt.s32.totalorder %s9818_s27, %s9818_s27 }
  0x31   :  { %p9825_p8 = por %p9824_p7, %p9823_p6 }
  0x33   :  { %p9826_p9 = pnand %p9825_p8, %p9819_p5 }
  0x35   :  { %9829 = shalt.err (!%p9826_p9)
}
  0x36   :  { %s9865_s4 = smov 128   ;;  %s9866_s19 = smov 8  }
  0x37   :  { %77 = dma.hbm_to_vmem [thread:$0]  %s11352_s10, 32768, %s72_s17, [#allocation9], %s9865_s4, %s9865_s4, %s9866_s19  }
  0x38   :  { %9852 = dma.done.wait [#allocation6], 15360  }
  0x39   :  { %9853 = vsyncadd [#allocation6], 4294951936 }
  0x3a   :  { %9854 = dma.done.wait [#allocation9], 49152  }
  0x3b   :  { %9855 = vsyncadd [#allocation9], 4294918144  ;;  %v96_v1 = vld [vmem:[%s11342_s0] sm:$0xff]  ;;  %v97_v2 = vld [vmem:[%s11342_s0 + $0x8] sm:$0xf]  ;;  %s9867_s18 = smov 7   ;;  %v123_v14 = vlaneseq }
  0x3c   :  { %v10004_v3 = vpack.c.bf16 %v97_v2, %v96_v1  ;;  %s9868_s10 = smov 9   ;;  %s9869_s17 = smov 1   ;;  %v9066_v4 = vld [vmem:[%s11344_s2] sm:$0xff]   ;;  %vm292_vm0 = vcmask 883712   ;;  %v107_v5 = vld [vmem:[%s11345_s3 + $0x8] sm:$0xff]  ;;  %v9874_v7 = vmov 0  }
  0x3d   :  { %s9870_s20 = smov 121   ;;  %s9871_s0 = smov 127   ;;  %8897 = vmatprep.mubr.msk.bf16.mxu0 %vm292_vm0, %v9066_v4  ;;  %v106_v6 = vld [vmem:[%s11345_s3] sm:$0xff]  ;;  %9065 = vset.pattern.permute.xlu1 %v9874_v7  ;;  %v108_v8 = vld [vmem:[%s11345_s3 + $0x10] sm:$0xff]  ;;  %v109_v9 = vld [vmem:[%s11345_s3 + $0x18] sm:$0xff]  ;;  %v124_v15 = vshrl.u32 %v123_v14, 7 }
  0x3e   :  { %140 = vrot.lane.b32.xlu1 %v10004_v3, %s9867_s18  ;;  %128 = vrot.lane.b32.xlu0 %v10004_v3, %s9866_s19  ;;  %s9872_s22 = smov 120   ;;  %s9873_s23 = smov 119   ;;  %v110_v10 = vld [vmem:[%s11345_s3 + $0x20] sm:$0xff]  ;;  %v111_v11 = vld [vmem:[%s11345_s3 + $0x28] sm:$0xff]  ;;  %vm209_vm1 = vcmask 1045504   ;;  %vm214_vm2 = vcmask 1043456  }
  0x3f   :  { %9064 = vset.pattern.permute.xlu0 %v9874_v7  ;;  %v112_v12 = vld [vmem:[%s11345_s3 + $0x30] sm:$0xff]  ;;  %v113_v13 = vld [vmem:[%s11345_s3 + $0x38] sm:$0xff]  ;;  %v94_v16 = vld [vmem:[%s11343_s1] sm:$0xf]  ;;  %v10053_v17 = vsub.s32 1, %v124_v15  ;;  %v10055_v18 = vsub.s32 0, %v124_v15 }
  0x40   :  { %v173_v19 = vsub.s32 3, %v124_v15  ;;  %v132_v20 = vshrl.u32 %v94_v16, 16  ;;  %v164_v21 = vsub.s32 2, %v124_v15  ;;  %v121_v22 = vpack.i.b16 %v94_v16, %v94_v16  ;;  %v95_v52 = vld [vmem:[%s11343_s1 + $0x4] sm:$0x1]  ;;  %v9067_v63 = vld [vmem:[%s11344_s2 + $0x8] sm:$0xff]  }
  0x41   :  { %vm218_vm3 = vcmask 1041408   ;;  %v190_v56 = vpack.i.b16 %v95_v52, %v95_v52  ;;  %v9068_v0 = vld [vmem:[%s11344_s2 + $0x10] sm:$0xff]   ;;  %v9069_v1 = vld [vmem:[%s11344_s2 + $0x18] sm:$0xff]   ;;  %vm721_vm4 = vcmask 523264   ;;  %vm3920_vm5 = vcmask 517120  }
  0x42   :  { %116 = vrot.lane.b32.xlu0 %v10004_v3, %s9868_s10  ;;  %149 = vrot.lane.b32.xlu1 %v10004_v3, %s9869_s17  ;;  %v133_v23 = vpack.i.b16 %v132_v20, %v132_v20  ;;  %v10058_v24 = vrot.slane %v121_v22, %v10053_v17  ;;  %v10066_v30 = vrot.slane %v121_v22, %v10055_v18  ;;  %v407_v52 = vld [vmem:[%s11347_s5 + $0x10] sm:$0xff]  ;;  %vm3927_vm6 = vcmask 1041920  }
  0x43   :  { %v10076_v41 = vrot.slane %v121_v22, %v173_v19  ;;  %v10092_v58 = vrot.slane %v190_v56, %v10055_v18  ;;  %v411_v56 = vld [vmem:[%s11347_s5 + $0x30] sm:$0xff]  ;;  %vm4055_vm7 = vcmask 519170   ;;  %vm4061_vm8 = vcmask 1043970  }
  0x44   :  { %v10061_v25 = vrot.slane %v133_v23, %v10055_v18  ;;  %v10069_v31 = vrot.slane %v133_v23, %v10053_v17  ;;  %v10073_v38 = vrot.slane %v133_v23, %v164_v21  ;;  %v10080_v46 = vrot.slane %v133_v23, %v173_v19 }
  0x46   :  { %167 = vrot.lane.b32.xlu1 %v10004_v3, %s9870_s20  ;;  %158 = vrot.lane.b32.xlu0 %v10004_v3, %s9871_s0 }
  0x4a   :  { %176 = vrot.lane.b32.xlu0 %v10004_v3, %s9872_s22  ;;  %185 = vrot.lane.b32.xlu1 %v10004_v3, %s9873_s23 }
  0x4e   :  { %239 = vperm.xlu1 %9065, %v107_v5   ;;  %234 = vperm.xlu0 %9064, %v106_v6  }
  0x52   :  { %244 = vperm.xlu1 %9065, %v108_v8   ;;  %249 = vperm.xlu0 %9064, %v109_v9  }
  0x56   :  { %254 = vperm.xlu1 %9065, %v110_v10   ;;  %259 = vperm.xlu0 %9064, %v111_v11  }
  0x5a   :  { %264 = vperm.xlu1 %9065, %v112_v12   ;;  %269 = vperm.xlu0 %9064, %v113_v13  }
  0xb0   :  { %v141_v26 = vpop.permute.xlu1 %140  ;;  %v129_v27 = vpop.permute.xlu0 %128 }
  0xb1   :  { %v148_v28 = vmul.bf16 %v10058_v24, %v141_v26  ;;  %v139_v29 = vmul.bf16 %v10061_v25, %v129_v27 }
  0xb3   :  { %v200_v32 = vrot.slane %v148_v28, 4  ;;  %v198_v33 = vrot.slane %v139_v29, 2 }
  0xb4   :  { %v117_v34 = vpop.permute.xlu0 %116  ;;  %v150_v35 = vpop.permute.xlu1 %149 }
  0xb5   :  { %v127_v36 = vmul.bf16 %v10066_v30, %v117_v34  ;;  %v157_v37 = vmul.bf16 %v10069_v31, %v150_v35  ;;  %v216_v44 = vsel %vm214_vm2, %v198_v33, %v200_v32 }
  0xb7   :  { %v202_v39 = vrot.slane %v157_v37, 6  ;;  %v212_v40 = vsel %vm209_vm1, %v127_v36, %v198_v33 }
  0xb8   :  { %8883 = vmatprep.subr.bf16.mxu0 %v212_v40  ;;  %v168_v42 = vpop.permute.xlu1 %167  ;;  %v159_v43 = vpop.permute.xlu0 %158 }
  0xb9   :  { %8884 = vmatpush3.bf16.msra.mxu0 %v212_v40  ;;  %v166_v45 = vmul.bf16 %v10073_v38, %v159_v43  ;;  %v175_v47 = vmul.bf16 %v10076_v41, %v168_v42  ;;  %v220_v50 = vsel %vm218_vm3, %v200_v32, %v202_v39 }
  0xba   :  { %8885 = vmatprep.subr.bf16.mxu0 %v216_v44 }
  0xbb   :  { %v204_v48 = vrot.slane %v166_v45, 2  ;;  %v206_v53 = vrot.slane %v175_v47, 4  ;;  %v9072_v47 = vld [vmem:[#allocation5 + $0x4] ss:$20 sps:$4 sm:$0xff]  }
  0xbc   :  { %v177_v49 = vpop.permute.xlu0 %176  ;;  %v186_v59 = vpop.permute.xlu1 %185  ;;  %766 = vmatprep.mubr.bf16.mxu1 %v9072_v47 }
  0xbd   :  { %8886 = vmatpush3.bf16.msra.mxu0 %v216_v44  ;;  %v184_v51 = vmul.bf16 %v10080_v46, %v177_v49  ;;  %v224_v55 = vsel %vm209_vm1, %v10004_v3, %v204_v48  ;;  %v227_v57 = vsel %vm214_vm2, %v204_v48, %v206_v53  ;;  %v196_v61 = vmul.bf16 %v10092_v58, %v186_v59  ;;  %v9080_v48 = vld [vmem:[#allocation5 + $0xc] ss:$20 sps:$4 sm:$0xff]  }
  0xbe   :  { %8887 = vmatprep.subr.bf16.mxu0 %v220_v50  ;;  %v406_v49 = vld [vmem:[%s11347_s5 + $0x8] sm:$0xff] }
  0xbf   :  { %v208_v54 = vrot.slane %v184_v51, 6  ;;  %v306_v62 = vsel %vm209_vm1, %v196_v61, 0  ;;  %v408_v51 = vld [vmem:[%s11347_s5 + $0x18] sm:$0xff] }
  0xc1   :  { %8888 = vmatpush3.bf16.msra.mxu0 %v220_v50  ;;  %v230_v60 = vsel %vm218_vm3, %v206_v53, %v208_v54  ;;  %v405_v50 = vld [vmem:[%s11347_s5] sm:$0xff]  ;;  %v410_v53 = vld [vmem:[%s11347_s5 + $0x28] sm:$0xff] }
  0xc2   :  { %8889 = vmatprep.subr.bf16.mxu0 %v224_v55  ;;  %v409_v54 = vld [vmem:[%s11347_s5 + $0x20] sm:$0xff] }
  0xc5   :  { %8890 = vmatpush3.bf16.msra.mxu0 %v224_v55  ;;  %v412_v55 = vld [vmem:[%s11347_s5 + $0x38] sm:$0xff] }
  0xc6   :  { %8891 = vmatprep.subr.bf16.mxu0 %v227_v57 }
  0xc9   :  { %8892 = vmatpush3.bf16.msra.mxu0 %v227_v57 }
  0xca   :  { %8893 = vmatprep.subr.bf16.mxu0 %v230_v60 }
  0xcd   :  { %8894 = vmatpush3.bf16.msra.mxu0 %v230_v60  ;;  %v235_v2 = vpop.permute.xlu0 %234  ;;  %v240_v3 = vpop.permute.xlu1 %239 }
  0xce   :  { %9045 = vmatprep.subr.msk.bf16.mxu0 %vm209_vm1, %v196_v61 }
  0xd1   :  { %8896 = vmatpush3.bf16.msra.mxu0 %v306_v62  ;;  %v250_v4 = vpop.permute.xlu0 %249  ;;  %v245_v5 = vpop.permute.xlu1 %244 }
  0xd4   :  { %8898 = vmatmul.mubr.msk.bf16.vlgmr.msra.gmra.mrb[0].mxu0 %vm292_vm0, %v9067_v63 }
  0xd5   :  { %8901 = vmatprep.mubr.msk.bf16.mxu0 %vm292_vm0, %v9068_v0  ;;  %v260_v12 = vpop.permute.xlu0 %259  ;;  %v255_v19 = vpop.permute.xlu1 %254 }
  0xd9   :  { %v270_v27 = vpop.permute.xlu0 %269  ;;  %v265_v34 = vpop.permute.xlu1 %264 }
  0xdc   :  { %8902 = vmatmul.mubr.msk.bf16.gmra.mrb[4].mxu0 %vm292_vm0, %v9069_v1 }
  0xdd   :  { %831 = vmatprep.mubr.bf16.mxu0 %v9080_v48 }
 0x1a7   :  { %v8899_v6 = vpop.f32.mrb[0].mxu0 }
 0x1a8   :  { %v10110_v7 = vadd.f32 %v8899_v6, %v245_v5  ;;  %v342_v8 = vpop.f32.mrb[1].mxu0 }
 0x1a9   :  { %v8900_v9 = vpop.f32.mrb[2].mxu0  ;;  %v10117_v15 = vadd.f32 %v342_v8, %v235_v2 }
 0x1aa   :  { %v10112_v10 = vadd.f32 %v8900_v9, %v250_v4  ;;  %v345_v11 = vpop.f32.mrb[3].mxu0  ;;  %v375_v14 = vmax.f32 %v10110_v7, 0.0 }
 0x1ab   :  { %v10114_v13 = vadd.f32 %v345_v11, %v240_v3  ;;  %v373_v23 = vmax.f32 %v10117_v15, 0.0 }
 0x1ac   :  { %v376_v16 = vmax.f32 %v10112_v10, 0.0 }
 0x1ad   :  { %v374_v21 = vmax.f32 %v10114_v13, 0.0 }
 0x1ae   :  { %v10124_v20 = vpack.c.bf16 %v376_v16, %v375_v14 }
 0x1af   :  { %v8903_v22 = vpop.f32.mrb[4].mxu0  ;;  %v10136_v29 = vpack.c.bf16 %v374_v21, %v373_v23 }
 0x1b0   :  { %423 = vrot.lane.b32.xlu0 %v10124_v20, %s9868_s10  ;;  %463 = vrot.lane.b32.xlu1 %v10124_v20, %s9867_s18  ;;  %v358_v26 = vpop.f32.mrb[5].mxu0  ;;  %v10140_v35 = vadd.f32 %v8903_v22, %v265_v34 }
 0x1b1   :  { %v8904_v28 = vpop.f32.mrb[6].mxu0  ;;  %v10150_v40 = vadd.f32 %v358_v26, %v255_v19 }
 0x1b2   :  { %v10138_v32 = vadd.f32 %v8904_v28, %v270_v27  ;;  %v361_v33 = vpop.f32.mrb[7].mxu0  ;;  %v379_v39 = vmax.f32 %v10140_v35, 0.0 }
 0x1b3   :  { %v10147_v37 = vadd.f32 %v361_v33, %v260_v12  ;;  %v377_v44 = vmax.f32 %v10150_v40, 0.0 }
 0x1b4   :  { %421 = vrot.lane.b32.xlu0 %v10136_v29, %s9868_s10  ;;  %461 = vrot.lane.b32.xlu1 %v10136_v29, %s9867_s18  ;;  %v380_v36 = vmax.f32 %v10138_v32, 0.0 }
 0x1b5   :  { %v378_v43 = vmax.f32 %v10147_v37, 0.0 }
 0x1b6   :  { %v10160_v42 = vpack.c.bf16 %v380_v36, %v379_v39 }
 0x1b7   :  { %v10172_v45 = vpack.c.bf16 %v378_v43, %v377_v44 }
 0x1b8   :  { %521 = vrot.lane.b32.xlu0 %v10136_v29, %s9870_s20  ;;  %481 = vrot.lane.b32.xlu1 %v10136_v29, %s9869_s17 }
 0x1bc   :  { %427 = vrot.lane.b32.xlu0 %v10160_v42, %s9868_s10  ;;  %467 = vrot.lane.b32.xlu1 %v10160_v42, %s9867_s18 }
 0x1c0   :  { %425 = vrot.lane.b32.xlu0 %v10172_v45, %s9868_s10  ;;  %465 = vrot.lane.b32.xlu1 %v10172_v45, %s9867_s18 }
 0x1c4   :  { %483 = vrot.lane.b32.xlu0 %v10124_v20, %s9869_s17  ;;  %441 = vrot.lane.b32.xlu1 %v10136_v29, %s9866_s19 }
 0x1c8   :  { %443 = vrot.lane.b32.xlu0 %v10124_v20, %s9866_s19  ;;  %523 = vrot.lane.b32.xlu1 %v10124_v20, %s9870_s20 }
 0x1cc   :  { %525 = vrot.lane.b32.xlu0 %v10172_v45, %s9870_s20  ;;  %485 = vrot.lane.b32.xlu1 %v10172_v45, %s9869_s17 }
 0x1d0   :  { %487 = vrot.lane.b32.xlu0 %v10160_v42, %s9869_s17  ;;  %445 = vrot.lane.b32.xlu1 %v10172_v45, %s9866_s19 }
 0x1d4   :  { %447 = vrot.lane.b32.xlu0 %v10160_v42, %s9866_s19  ;;  %527 = vrot.lane.b32.xlu1 %v10160_v42, %s9870_s20 }
 0x1d8   :  { %501 = vrot.lane.b32.xlu0 %v10136_v29, %s9871_s0  ;;  %541 = vrot.lane.b32.xlu1 %v10136_v29, %s9872_s22 }
 0x1dc   :  { %503 = vrot.lane.b32.xlu0 %v10124_v20, %s9871_s0  ;;  %543 = vrot.lane.b32.xlu1 %v10124_v20, %s9872_s22 }
 0x1e0   :  { %505 = vrot.lane.b32.xlu0 %v10172_v45, %s9871_s0  ;;  %545 = vrot.lane.b32.xlu1 %v10172_v45, %s9872_s22 }
 0x1e4   :  { %507 = vrot.lane.b32.xlu0 %v10160_v42, %s9871_s0  ;;  %547 = vrot.lane.b32.xlu1 %v10160_v42, %s9872_s22 }
 0x1e8   :  { %563 = vrot.lane.b32.xlu0 %v10124_v20, %s9873_s23  ;;  %561 = vrot.lane.b32.xlu1 %v10136_v29, %s9873_s23 }
 0x1ec   :  { %567 = vrot.lane.b32.xlu0 %v10160_v42, %s9873_s23  ;;  %565 = vrot.lane.b32.xlu1 %v10172_v45, %s9873_s23 }
 0x1f0   :  { %588 = vperm.xlu0 %9064, %v406_v49   ;;  %583 = vperm.xlu1 %9065, %v405_v50  }
 0x1f4   :  { %598 = vperm.xlu0 %9064, %v408_v51   ;;  %593 = vperm.xlu1 %9065, %v407_v52  }
 0x1f8   :  { %608 = vperm.xlu0 %9064, %v410_v53   ;;  %603 = vperm.xlu1 %9065, %v409_v54  }
 0x1fc   :  { %618 = vperm.xlu0 %9064, %v412_v55   ;;  %613 = vperm.xlu1 %9065, %v411_v56  }
 0x222   :  { %v424_v57 = vpop.permute.xlu0 %423  ;;  %v464_v59 = vpop.permute.xlu1 %463 }
 0x223   :  { %v478_v0 = vmul.bf16 %v464_v59, %v10058_v24  ;;  %v438_v4 = vmul.bf16 %v424_v57, %v10066_v30 }
 0x226   :  { %v422_v60 = vpop.permute.xlu0 %421  ;;  %v462_v61 = vpop.permute.xlu1 %461 }
 0x227   :  { %v477_v62 = vmul.bf16 %v462_v61, %v10058_v24  ;;  %v437_v63 = vmul.bf16 %v422_v60, %v10066_v30 }
 0x229   :  { %8171 = vmatprep.subr.bf16.mxu1 %v477_v62  ;;  %v9070_v62 = vld [vmem:[#allocation5] ss:$20 sps:$4 sm:$0xff]  }
 0x22a   :  { %v522_v1 = vpop.permute.xlu0 %521  ;;  %8172 = vmatpush3.bf16.msra.mxu1 %v437_v63  ;;  %v482_v2 = vpop.permute.xlu1 %481 }
 0x22b   :  { %v537_v3 = vmul.bf16 %v522_v1, %v10076_v41  ;;  %8173 = vmatprep.subr.bf16.mxu1 %v478_v0  ;;  %v497_v28 = vmul.bf16 %v482_v2, %v10069_v31  ;;  %v9073_v0 = vld [vmem:[#allocation5 + $0x2c] ss:$20 sps:$4 sm:$0xff]  }
 0x22d   :  { %8211 = vmatprep.subr.bf16.mxu0 %v537_v3 }
 0x22e   :  { %8212 = vmatpush3.bf16.msra.mxu0 %v10136_v29  ;;  %v428_v5 = vpop.permute.xlu0 %427  ;;  %8174 = vmatpush3.bf16.msra.mxu1 %v438_v4  ;;  %v468_v6 = vpop.permute.xlu1 %467 }
 0x22f   :  { %v480_v19 = vmul.bf16 %v468_v6, %v10058_v24  ;;  %v440_v27 = vmul.bf16 %v428_v5, %v10066_v30 }
 0x232   :  { %v426_v8 = vpop.permute.xlu0 %425  ;;  %v466_v9 = vpop.permute.xlu1 %465 }
 0x233   :  { %v439_v11 = vmul.bf16 %v426_v8, %v10066_v30  ;;  %v479_v12 = vmul.bf16 %v466_v9, %v10058_v24  ;;  %v9075_v8 = vld [vmem:[#allocation5 + $0x28] ss:$20 sps:$4 sm:$0xff]  }
 0x235   :  { %8175 = vmatprep.subr.bf16.mxu1 %v479_v12 }
 0x236   :  { %v484_v22 = vpop.permute.xlu0 %483  ;;  %8176 = vmatpush3.bf16.msra.mxu1 %v439_v11  ;;  %v442_v26 = vpop.permute.xlu1 %441  ;;  %v9076_v11 = vld [vmem:[#allocation5 + $0x54] ss:$20 sps:$4 sm:$0xff]  }
 0x237   :  { %8177 = vmatprep.subr.bf16.mxu1 %v480_v19  ;;  %v457_v47 = vmul.bf16 %v442_v26, %v10061_v25  ;;  %v498_v48 = vmul.bf16 %v484_v22, %v10069_v31 }
 0x23a   :  { %v444_v29 = vpop.permute.xlu0 %443  ;;  %8178 = vmatpush3.bf16.msra.mxu1 %v440_v27  ;;  %v524_v33 = vpop.permute.xlu1 %523 }
 0x23b   :  { %v538_v34 = vmul.bf16 %v524_v33, %v10076_v41  ;;  %8179 = vmatprep.subr.bf16.mxu1 %v497_v28  ;;  %v458_v52 = vmul.bf16 %v444_v29, %v10061_v25  ;;  %v9078_v29 = vld [vmem:[#allocation5 + $0x8] ss:$20 sps:$4 sm:$0xff]   ;;  %v9081_v33 = vld [vmem:[#allocation5 + $0x50] ss:$20 sps:$4 sm:$0xff]  }
 0x23d   :  { %8213 = vmatprep.subr.bf16.mxu0 %v538_v34 }
 0x23e   :  { %v526_v49 = vpop.permute.xlu0 %525  ;;  %8180 = vmatpush3.bf16.msra.mxu1 %v457_v47  ;;  %8214 = vmatpush3.bf16.msra.mxu0 %v10124_v20  ;;  %v486_v50 = vpop.permute.xlu1 %485  ;;  %v9082_v47 = vld [vmem:[#allocation5 + $0x7c] ss:$20 sps:$4 sm:$0xff]  }
 0x23f   :  { %v539_v51 = vmul.bf16 %v526_v49, %v10076_v41  ;;  %8181 = vmatprep.subr.bf16.mxu1 %v498_v48  ;;  %v499_v53 = vmul.bf16 %v486_v50, %v10069_v31  ;;  %v9084_v50 = vld [vmem:[#allocation5 + $0x34] ss:$20 sps:$4 sm:$0xff]  }
 0x241   :  { %8215 = vmatprep.subr.bf16.mxu0 %v539_v51 }
 0x242   :  { %v488_v54 = vpop.permute.xlu0 %487  ;;  %8182 = vmatpush3.bf16.msra.mxu1 %v458_v52  ;;  %8216 = vmatpush3.bf16.msra.mxu0 %v10172_v45  ;;  %v446_v55 = vpop.permute.xlu1 %445 }
 0x243   :  { %v459_v56 = vmul.bf16 %v446_v55, %v10061_v25  ;;  %8183 = vmatprep.subr.bf16.mxu1 %v499_v53  ;;  %v500_v57 = vmul.bf16 %v488_v54, %v10069_v31  ;;  %v9086_v53 = vld [vmem:[#allocation5 + $0x78] ss:$20 sps:$4 sm:$0xff]   ;;  %v9087_v54 = vld [vmem:[#allocation5 + $0x30] ss:$20 sps:$4 sm:$0xff]  }
 0x246   :  { %v448_v20 = vpop.permute.xlu0 %447  ;;  %8184 = vmatpush3.bf16.msra.mxu1 %v459_v56  ;;  %v528_v59 = vpop.permute.xlu1 %527  ;;  %v9088_v56 = vld [vmem:[#allocation5 + $0x5c] ss:$20 sps:$4 sm:$0xff]  }
 0x247   :  { %v460_v60 = vmul.bf16 %v448_v20, %v10061_v25  ;;  %v540_v61 = vmul.bf16 %v528_v59, %v10076_v41  ;;  %8185 = vmatprep.subr.bf16.mxu1 %v500_v57  ;;  %v9090_v57 = vld [vmem:[#allocation5 + $0x10] ss:$20 sps:$4 sm:$0xff]  }
 0x249   :  { %8217 = vmatprep.subr.bf16.mxu0 %v540_v61  ;;  %v9092_v61 = vld [vmem:[#allocation5 + $0x38] ss:$20 sps:$4 sm:$0xff]  }
 0x24a   :  { %v502_v63 = vpop.permute.xlu0 %501  ;;  %8186 = vmatpush3.bf16.msra.mxu1 %v460_v60  ;;  %8218 = vmatpush3.bf16.msra.mxu0 %v10160_v42  ;;  %v542_v45 = vpop.permute.xlu1 %541  ;;  %v9091_v60 = vld [vmem:[#allocation5 + $0x58] ss:$20 sps:$4 sm:$0xff]  }
 0x24b   :  { %v517_v1 = vmul.bf16 %v502_v63, %v10073_v38  ;;  %v557_v2 = vmul.bf16 %v542_v45, %v10080_v46  ;;  %v9095_v63 = vld [vmem:[#allocation5 + $0x60] ss:$20 sps:$4 sm:$0xff]  }
 0x24c   :  { %v9096_v45 = vld [vmem:[#allocation5 + $0x80] ss:$20 sps:$4 sm:$0xff]  }
 0x24d   :  { %767 = vmatmul.mubr.bf16.vlgmr.msra.gmra.mrb[0].mxu1 %v9070_v62  ;;  %8219 = vmatprep.subr.bf16.mxu0 %v557_v2  ;;  %v9093_v62 = vld [vmem:[#allocation5 + $0x84] ss:$20 sps:$4 sm:$0xff]  }
 0x24e   :  { %v504_v3 = vpop.permute.xlu0 %503  ;;  %8220 = vmatpush3.bf16.msra.mxu0 %v517_v1  ;;  %v544_v4 = vpop.permute.xlu1 %543  ;;  %774 = vmatprep.mubr.bf16.mxu1 %v9073_v0  ;;  %v9097_v0 = vld [vmem:[#allocation5 + $0x88] ss:$20 sps:$4 sm:$0xff]  }
 0x24f   :  { %v518_v5 = vmul.bf16 %v504_v3, %v10073_v38  ;;  %v558_v6 = vmul.bf16 %v544_v4, %v10080_v46 }
 0x251   :  { %8221 = vmatprep.subr.bf16.mxu0 %v558_v6 }
 0x252   :  { %v506_v9 = vpop.permute.xlu0 %505  ;;  %8222 = vmatpush3.bf16.msra.mxu0 %v518_v5  ;;  %v546_v42 = vpop.permute.xlu1 %545 }
 0x253   :  { %v519_v12 = vmul.bf16 %v506_v9, %v10073_v38  ;;  %v559_v19 = vmul.bf16 %v546_v42, %v10080_v46 }
 0x255   :  { %775 = vmatmul.mubr.bf16.gmra.mrb[4].mxu1 %v9075_v8  ;;  %8223 = vmatprep.subr.bf16.mxu0 %v559_v19 }
 0x256   :  { %v508_v22 = vpop.permute.xlu0 %507  ;;  %8224 = vmatpush3.bf16.msra.mxu0 %v519_v12  ;;  %v548_v26 = vpop.permute.xlu1 %547  ;;  %782 = vmatprep.mubr.bf16.mxu1 %v9076_v11 }
 0x257   :  { %v520_v27 = vmul.bf16 %v508_v22, %v10073_v38  ;;  %v560_v28 = vmul.bf16 %v548_v26, %v10080_v46 }
 0x259   :  { %8225 = vmatprep.subr.bf16.mxu0 %v560_v28 }
 0x25a   :  { %8226 = vmatpush3.bf16.msra.mxu0 %v520_v27  ;;  %v562_v34 = vpop.permute.xlu1 %561  ;;  %v564_v48 = vpop.permute.xlu0 %563 }
 0x25b   :  { %v577_v49 = vmul.bf16 %v562_v34, %v10092_v58  ;;  %v578_v51 = vmul.bf16 %v564_v48, %v10092_v58 }
 0x25d   :  { %783 = vmatmul.mubr.bf16.gmra.mrb[8].mxu1 %v9081_v33  ;;  %832 = vmatmul.mubr.bf16.vlgmr.msra.gmra.mrb[8].mxu0 %v9078_v29 }
 0x25e   :  { %8905 = vmatprep.subr.bf16.mxu1 %v577_v49  ;;  %790 = vmatprep.mubr.bf16.mxu1 %v9082_v47  ;;  %v566_v52 = vpop.permute.xlu1 %565  ;;  %v568_v20 = vpop.permute.xlu0 %567 }
 0x25f   :  { %8906 = vmatpush3.bf16.msra.mxu1 %v577_v49  ;;  %839 = vmatprep.mubr.bf16.mxu0 %v9084_v50  ;;  %v579_v55 = vmul.bf16 %v566_v52, %v10092_v58  ;;  %v580_v59 = vmul.bf16 %v568_v20, %v10092_v58 }
 0x260   :  { %8907 = vmatprep.subr.bf16.mxu1 %v578_v51 }
 0x263   :  { %8908 = vmatpush3.bf16.msra.mxu1 %v578_v51 }
 0x264   :  { %8909 = vmatprep.subr.bf16.mxu1 %v579_v55 }
 0x265   :  { %791 = vmatmul.mubr.bf16.gmra.mrb[12].mxu1 %v9086_v53  ;;  %840 = vmatmul.mubr.bf16.gmra.mrb[12].mxu0 %v9087_v54 }
 0x266   :  { %847 = vmatprep.mubr.bf16.mxu0 %v9088_v56  ;;  %8913 = vmatprep.mubr.msk.bf16.mxu1 %vm721_vm4, %v9090_v57 }
 0x267   :  { %8910 = vmatpush3.bf16.msra.mxu1 %v579_v55 }
 0x268   :  { %8911 = vmatprep.subr.bf16.mxu1 %v580_v59 }
 0x26b   :  { %8912 = vmatpush3.bf16.msra.mxu1 %v580_v59 }
 0x26d   :  { %848 = vmatmul.mubr.bf16.gmra.mrb[16].mxu0 %v9091_v60 }
 0x26e   :  { %8914 = vmatmul.mubr.msk.bf16.vlgmr.msra.gmra.mrb[16].mxu1 %vm721_vm4, %v9092_v61  ;;  %855 = vmatprep.mubr.bf16.mxu0 %v9093_v62 }
 0x26f   :  { %8917 = vmatprep.mubr.msk.bf16.mxu1 %vm721_vm4, %v9095_v63  ;;  %v589_v22 = vpop.permute.xlu0 %588  ;;  %v584_v26 = vpop.permute.xlu1 %583 }
 0x273   :  { %v599_v20 = vpop.permute.xlu0 %598  ;;  %v594_v59 = vpop.permute.xlu1 %593 }
 0x275   :  { %856 = vmatmul.mubr.bf16.gmra.mrb[20].mxu0 %v9096_v45 }
 0x276   :  { %8918 = vmatmul.mubr.msk.bf16.gmra.mrb[20].mxu1 %vm721_vm4, %v9097_v0 }
 0x320   :  { %v8187_v1 = vpop.f32.mrb[0].mxu1 }
 0x321   :  { %v8188_v2 = vpop.f32.mrb[1].mxu1 }
 0x322   :  { %v8189_v3 = vadd.f32 %v8188_v2, %v8187_v1  ;;  %v8190_v4 = vpop.f32.mrb[2].mxu1 }
 0x323   :  { %v8191_v5 = vpop.f32.mrb[3].mxu1 }
 0x324   :  { %v8192_v6 = vadd.f32 %v8191_v5, %v8190_v4  ;;  %v769_v34 = vadd.f32 %v8189_v3, %v584_v26  ;;  %v604_v26 = vpop.permute.xlu1 %603 }
 0x326   :  { %v772_v53 = vadd.f32 %v8192_v6, %v589_v22  ;;  %v609_v22 = vpop.permute.xlu0 %608 }
 0x328   :  { %v8193_v8 = vpop.f32.mrb[4].mxu1 }
 0x329   :  { %v8194_v9 = vpop.f32.mrb[5].mxu1 }
 0x32a   :  { %v8195_v42 = vadd.f32 %v8194_v9, %v8193_v8  ;;  %v8196_v11 = vpop.f32.mrb[6].mxu1 }
 0x32b   :  { %v8197_v12 = vpop.f32.mrb[7].mxu1 }
 0x32c   :  { %v8198_v19 = vadd.f32 %v8197_v12, %v8196_v11  ;;  %v777_v45 = vadd.f32 %v8195_v42, %v594_v59 }
 0x32e   :  { %v780_v8 = vadd.f32 %v8198_v19, %v599_v20 }
 0x330   :  { %v8199_v27 = vpop.f32.mrb[8].mxu1  ;;  %v8227_v28 = vpop.f32.mrb[8].mxu0 }
 0x331   :  { %v8200_v29 = vpop.f32.mrb[9].mxu1  ;;  %v8228_v33 = vpop.f32.mrb[9].mxu0 }
 0x332   :  { %v8201_v47 = vadd.f32 %v8200_v29, %v8199_v27  ;;  %v8229_v48 = vadd.f32 %v8228_v33, %v8227_v28  ;;  %v8202_v49 = vpop.f32.mrb[10].mxu1  ;;  %v8230_v50 = vpop.f32.mrb[10].mxu0 }
 0x333   :  { %v8203_v51 = vpop.f32.mrb[11].mxu1  ;;  %v8231_v52 = vpop.f32.mrb[11].mxu0 }
 0x334   :  { %v8204_v54 = vadd.f32 %v8203_v51, %v8202_v49  ;;  %v8232_v55 = vadd.f32 %v8231_v52, %v8230_v50  ;;  %v834_v56 = vadd.f32 %v8229_v48, %v769_v34  ;;  %v785_v33 = vadd.f32 %v8201_v47, %v604_v26  ;;  %v614_v47 = vpop.permute.xlu1 %613 }
 0x336   :  { %v837_v57 = vadd.f32 %v8232_v55, %v772_v53  ;;  %v788_v53 = vadd.f32 %v8204_v54, %v609_v22 }
 0x338   :  { %v8205_v60 = vpop.f32.mrb[12].mxu1  ;;  %v8233_v61 = vpop.f32.mrb[12].mxu0 }
 0x339   :  { %v8206_v62 = vpop.f32.mrb[13].mxu1  ;;  %v8234_v63 = vpop.f32.mrb[13].mxu0 }
 0x33a   :  { %v8207_v0 = vadd.f32 %v8206_v62, %v8205_v60  ;;  %v8235_v1 = vadd.f32 %v8234_v63, %v8233_v61  ;;  %v8208_v2 = vpop.f32.mrb[14].mxu1  ;;  %v8236_v3 = vpop.f32.mrb[14].mxu0 }
 0x33b   :  { %v8209_v4 = vpop.f32.mrb[15].mxu1  ;;  %v8237_v5 = vpop.f32.mrb[15].mxu0 }
 0x33c   :  { %v8210_v9 = vadd.f32 %v8209_v4, %v8208_v2  ;;  %v8238_v6 = vadd.f32 %v8237_v5, %v8236_v3  ;;  %v842_v11 = vadd.f32 %v8235_v1, %v777_v45  ;;  %v619_v45 = vpop.permute.xlu0 %618  ;;  %v793_v54 = vadd.f32 %v8207_v0, %v614_v47 }
 0x33e   :  { %v845_v12 = vadd.f32 %v8238_v6, %v780_v8 }
 0x340   :  { %v8239_v27 = vpop.f32.mrb[16].mxu0 }
 0x341   :  { %v8915_v28 = vpop.f32.mrb[16].mxu1  ;;  %v8240_v29 = vpop.f32.mrb[17].mxu0 }
 0x342   :  { %v907_v34 = vadd.f32 %v8915_v28, %v842_v11  ;;  %v8241_v48 = vadd.f32 %v8240_v29, %v8239_v27  ;;  %v898_v42 = vpop.f32.mrb[17].mxu1  ;;  %v8242_v49 = vpop.f32.mrb[18].mxu0  ;;  %v796_v27 = vadd.f32 %v8210_v9, %v619_v45  ;;  %v7613_v45 = vld [vmem:[%s11347_s5 + $0x78] sm:$0xff] }
 0x343   :  { %v899_v50 = vadd.f32 %v898_v42, %v834_v56  ;;  %v8916_v51 = vpop.f32.mrb[18].mxu1  ;;  %v8243_v52 = vpop.f32.mrb[19].mxu0 }
 0x344   :  { %v910_v55 = vadd.f32 %v8916_v51, %v845_v12  ;;  %v8244_v19 = vadd.f32 %v8243_v52, %v8242_v49  ;;  %v901_v20 = vpop.f32.mrb[19].mxu1  ;;  %v850_v59 = vadd.f32 %v8241_v48, %v785_v33  ;;  %v931_v61 = vmax.f32 %v907_v34, 0.0 }
 0x345   :  { %v902_v60 = vadd.f32 %v901_v20, %v837_v57  ;;  %v929_v1 = vmax.f32 %v899_v50, 0.0  ;;  %v7607_v20 = vld [vmem:[%s11347_s5 + $0x48] sm:$0xff] }
 0x346   :  { %v932_v62 = vmax.f32 %v910_v55, 0.0  ;;  %v853_v63 = vadd.f32 %v8244_v19, %v788_v53  ;;  %v9100_v55 = vld [vmem:[#allocation5 + $0xa4] ss:$20 sps:$4 sm:$0xff]   ;;  %v9108_v19 = vld [vmem:[#allocation5 + $0xac] ss:$20 sps:$4 sm:$0xff]  }
 0x347   :  { %v930_v2 = vmax.f32 %v902_v60, 0.0  ;;  %1323 = vmatprep.mubr.bf16.mxu0 %v9100_v55  ;;  %1388 = vmatprep.mubr.bf16.mxu1 %v9108_v19  ;;  %v7609_v60 = vld [vmem:[%s11347_s5 + $0x58] sm:$0xff] }
 0x348   :  { %v10286_v3 = vpack.c.bf16 %v932_v62, %v931_v61  ;;  %v8245_v4 = vpop.f32.mrb[20].mxu0  ;;  %v7608_v61 = vld [vmem:[%s11347_s5 + $0x50] sm:$0xff]  ;;  %v7611_v62 = vld [vmem:[%s11347_s5 + $0x68] sm:$0xff] }
 0x349   :  { %v10288_v5 = vpack.c.bf16 %v930_v2, %v929_v1  ;;  %v8919_v56 = vpop.f32.mrb[20].mxu1  ;;  %v8246_v8 = vpop.f32.mrb[21].mxu0  ;;  %v7612_v1 = vld [vmem:[%s11347_s5 + $0x70] sm:$0xff] }
 0x34a   :  { %v8247_v6 = vadd.f32 %v8246_v8, %v8245_v4  ;;  %v914_v11 = vpop.f32.mrb[21].mxu1  ;;  %981 = vrot.lane.b32.xlu0 %v10286_v3, %s9868_s10  ;;  %1021 = vrot.lane.b32.xlu1 %v10286_v3, %s9867_s18  ;;  %v8248_v57 = vpop.f32.mrb[22].mxu0 }
 0x34b   :  { %v915_v12 = vadd.f32 %v914_v11, %v850_v59  ;;  %v8920_v22 = vpop.f32.mrb[22].mxu1  ;;  %v8249_v26 = vpop.f32.mrb[23].mxu0  ;;  %v7606_v59 = vld [vmem:[%s11347_s5 + $0x40] sm:$0xff] }
 0x34c   :  { %v858_v28 = vadd.f32 %v8247_v6, %v793_v54  ;;  %v8250_v29 = vadd.f32 %v8249_v26, %v8248_v57  ;;  %v917_v33 = vpop.f32.mrb[23].mxu1 }
 0x34d   :  { %v918_v34 = vadd.f32 %v917_v33, %v853_v63  ;;  %v933_v0 = vmax.f32 %v915_v12, 0.0  ;;  %v7610_v63 = vld [vmem:[%s11347_s5 + $0x60] sm:$0xff] }
 0x34e   :  { %v923_v48 = vadd.f32 %v8919_v56, %v858_v28  ;;  %v861_v42 = vadd.f32 %v8250_v29, %v796_v27  ;;  %979 = vrot.lane.b32.xlu0 %v10288_v5, %s9868_s10  ;;  %1019 = vrot.lane.b32.xlu1 %v10288_v5, %s9867_s18 }
 0x34f   :  { %v934_v49 = vmax.f32 %v918_v34, 0.0 }
 0x350   :  { %v926_v50 = vadd.f32 %v8920_v22, %v861_v42  ;;  %v935_v52 = vmax.f32 %v923_v48, 0.0 }
 0x351   :  { %v10298_v51 = vpack.c.bf16 %v934_v49, %v933_v0 }
 0x352   :  { %v936_v53 = vmax.f32 %v926_v50, 0.0  ;;  %1079 = vrot.lane.b32.xlu0 %v10288_v5, %s9870_s20  ;;  %1039 = vrot.lane.b32.xlu1 %v10288_v5, %s9869_s17 }
 0x354   :  { %v10304_v9 = vpack.c.bf16 %v936_v53, %v935_v52 }
 0x356   :  { %985 = vrot.lane.b32.xlu0 %v10304_v9, %s9868_s10  ;;  %1025 = vrot.lane.b32.xlu1 %v10304_v9, %s9867_s18 }
 0x35a   :  { %983 = vrot.lane.b32.xlu0 %v10298_v51, %s9868_s10  ;;  %1023 = vrot.lane.b32.xlu1 %v10298_v51, %s9867_s18 }
 0x35e   :  { %1041 = vrot.lane.b32.xlu0 %v10286_v3, %s9869_s17  ;;  %999 = vrot.lane.b32.xlu1 %v10288_v5, %s9866_s19 }
 0x362   :  { %1001 = vrot.lane.b32.xlu0 %v10286_v3, %s9866_s19  ;;  %1081 = vrot.lane.b32.xlu1 %v10286_v3, %s9870_s20 }
 0x366   :  { %1083 = vrot.lane.b32.xlu0 %v10298_v51, %s9870_s20  ;;  %1043 = vrot.lane.b32.xlu1 %v10298_v51, %s9869_s17 }
 0x36a   :  { %1045 = vrot.lane.b32.xlu0 %v10304_v9, %s9869_s17  ;;  %1003 = vrot.lane.b32.xlu1 %v10298_v51, %s9866_s19 }
 0x36e   :  { %1005 = vrot.lane.b32.xlu0 %v10304_v9, %s9866_s19  ;;  %1085 = vrot.lane.b32.xlu1 %v10304_v9, %s9870_s20 }
 0x372   :  { %1059 = vrot.lane.b32.xlu0 %v10288_v5, %s9871_s0  ;;  %1099 = vrot.lane.b32.xlu1 %v10288_v5, %s9872_s22 }
 0x376   :  { %1061 = vrot.lane.b32.xlu0 %v10286_v3, %s9871_s0  ;;  %1101 = vrot.lane.b32.xlu1 %v10286_v3, %s9872_s22 }
 0x37a   :  { %1063 = vrot.lane.b32.xlu0 %v10298_v51, %s9871_s0  ;;  %1103 = vrot.lane.b32.xlu1 %v10298_v51, %s9872_s22 }
 0x37e   :  { %1065 = vrot.lane.b32.xlu0 %v10304_v9, %s9871_s0  ;;  %1105 = vrot.lane.b32.xlu1 %v10304_v9, %s9872_s22 }
 0x382   :  { %1121 = vrot.lane.b32.xlu0 %v10286_v3, %s9873_s23  ;;  %1119 = vrot.lane.b32.xlu1 %v10288_v5, %s9873_s23 }
 0x386   :  { %1125 = vrot.lane.b32.xlu0 %v10304_v9, %s9873_s23  ;;  %1123 = vrot.lane.b32.xlu1 %v10298_v51, %s9873_s23 }
 0x38a   :  { %1146 = vperm.xlu0 %9064, %v7607_v20   ;;  %1141 = vperm.xlu1 %9065, %v7606_v59  }
 0x38e   :  { %1156 = vperm.xlu0 %9064, %v7609_v60   ;;  %1151 = vperm.xlu1 %9065, %v7608_v61  }
 0x392   :  { %1166 = vperm.xlu0 %9064, %v7611_v62   ;;  %1161 = vperm.xlu1 %9065, %v7610_v63  }
 0x396   :  { %1176 = vperm.xlu0 %9064, %v7613_v45   ;;  %1171 = vperm.xlu1 %9065, %v7612_v1  }
 0x3bc   :  { %v982_v2 = vpop.permute.xlu0 %981  ;;  %v1022_v47 = vpop.permute.xlu1 %1021 }
 0x3bd   :  { %v1036_v6 = vmul.bf16 %v1022_v47, %v10058_v24  ;;  %v996_v22 = vmul.bf16 %v982_v2, %v10066_v30 }
 0x3c0   :  { %v980_v4 = vpop.permute.xlu0 %979  ;;  %v1020_v56 = vpop.permute.xlu1 %1019 }
 0x3c1   :  { %v995_v8 = vmul.bf16 %v980_v4, %v10066_v30  ;;  %v1035_v54 = vmul.bf16 %v1020_v56, %v10058_v24 }
 0x3c3   :  { %8259 = vmatprep.subr.bf16.mxu0 %v1035_v54 }
 0x3c4   :  { %v1080_v11 = vpop.permute.xlu0 %1079  ;;  %8260 = vmatpush3.bf16.msra.mxu0 %v995_v8  ;;  %v1040_v57 = vpop.permute.xlu1 %1039  ;;  %v9098_v8 = vld [vmem:[#allocation5 + $0xa0] ss:$20 sps:$4 sm:$0xff]  }
 0x3c5   :  { %v1095_v12 = vmul.bf16 %v1080_v11, %v10076_v41  ;;  %8261 = vmatprep.subr.bf16.mxu0 %v1036_v6  ;;  %v1055_v50 = vmul.bf16 %v1040_v57, %v10069_v31  ;;  %v9101_v6 = vld [vmem:[#allocation5 + $0xcc] ss:$20 sps:$4 sm:$0xff]  }
 0x3c7   :  { %8299 = vmatprep.subr.bf16.mxu1 %v1095_v12 }
 0x3c8   :  { %8262 = vmatpush3.bf16.msra.mxu0 %v996_v22  ;;  %8300 = vmatpush3.bf16.msra.mxu1 %v10288_v5  ;;  %v986_v26 = vpop.permute.xlu0 %985  ;;  %v1026_v27 = vpop.permute.xlu1 %1025 }
 0x3c9   :  { %v1038_v48 = vmul.bf16 %v1026_v27, %v10058_v24  ;;  %v998_v49 = vmul.bf16 %v986_v26, %v10066_v30 }
 0x3cc   :  { %v984_v28 = vpop.permute.xlu0 %983  ;;  %v1024_v29 = vpop.permute.xlu1 %1023 }
 0x3cd   :  { %v997_v33 = vmul.bf16 %v984_v28, %v10066_v30  ;;  %v1037_v34 = vmul.bf16 %v1024_v29, %v10058_v24  ;;  %v9103_v28 = vld [vmem:[#allocation5 + $0xc8] ss:$20 sps:$4 sm:$0xff]  }
 0x3cf   :  { %8263 = vmatprep.subr.bf16.mxu0 %v1037_v34 }
 0x3d0   :  { %v1042_v42 = vpop.permute.xlu0 %1041  ;;  %8264 = vmatpush3.bf16.msra.mxu0 %v997_v33  ;;  %v1000_v0 = vpop.permute.xlu1 %999  ;;  %v9104_v33 = vld [vmem:[#allocation5 + $0xf4] ss:$20 sps:$4 sm:$0xff]  }
 0x3d1   :  { %8265 = vmatprep.subr.bf16.mxu0 %v1038_v48  ;;  %v1015_v55 = vmul.bf16 %v1000_v0, %v10061_v25  ;;  %v1056_v19 = vmul.bf16 %v1042_v42, %v10069_v31 }
 0x3d4   :  { %v1002_v5 = vpop.permute.xlu0 %1001  ;;  %8266 = vmatpush3.bf16.msra.mxu0 %v998_v49  ;;  %v1082_v52 = vpop.permute.xlu1 %1081 }
 0x3d5   :  { %v1096_v53 = vmul.bf16 %v1082_v52, %v10076_v41  ;;  %8267 = vmatprep.subr.bf16.mxu0 %v1055_v50  ;;  %v1016_v61 = vmul.bf16 %v1002_v5, %v10061_v25  ;;  %v9106_v5 = vld [vmem:[#allocation5 + $0xa8] ss:$20 sps:$4 sm:$0xff]   ;;  %v9109_v52 = vld [vmem:[#allocation5 + $0xf0] ss:$20 sps:$4 sm:$0xff]  }
 0x3d7   :  { %8301 = vmatprep.subr.bf16.mxu1 %v1096_v53 }
 0x3d8   :  { %v1084_v20 = vpop.permute.xlu0 %1083  ;;  %8268 = vmatpush3.bf16.msra.mxu0 %v1015_v55  ;;  %8302 = vmatpush3.bf16.msra.mxu1 %v10286_v3  ;;  %v1044_v59 = vpop.permute.xlu1 %1043  ;;  %v9110_v55 = vld [vmem:[#allocation5 + $0x11c] ss:$20 sps:$4 sm:$0xff]  }
 0x3d9   :  { %v1097_v60 = vmul.bf16 %v1084_v20, %v10076_v41  ;;  %8269 = vmatprep.subr.bf16.mxu0 %v1056_v19  ;;  %v1057_v62 = vmul.bf16 %v1044_v59, %v10069_v31  ;;  %v9112_v59 = vld [vmem:[#allocation5 + $0xd4] ss:$20 sps:$4 sm:$0xff]  }
 0x3db   :  { %8303 = vmatprep.subr.bf16.mxu1 %v1097_v60 }
 0x3dc   :  { %v1046_v63 = vpop.permute.xlu0 %1045  ;;  %8270 = vmatpush3.bf16.msra.mxu0 %v1016_v61  ;;  %8304 = vmatpush3.bf16.msra.mxu1 %v10298_v51  ;;  %v1004_v45 = vpop.permute.xlu1 %1003 }
 0x3dd   :  { %v1017_v1 = vmul.bf16 %v1004_v45, %v10061_v25  ;;  %8271 = vmatprep.subr.bf16.mxu0 %v1057_v62  ;;  %v1058_v2 = vmul.bf16 %v1046_v63, %v10069_v31  ;;  %v9114_v62 = vld [vmem:[#allocation5 + $0x118] ss:$20 sps:$4 sm:$0xff]   ;;  %v9115_v63 = vld [vmem:[#allocation5 + $0xd0] ss:$20 sps:$4 sm:$0xff]  }
 0x3e0   :  { %v1006_v3 = vpop.permute.xlu0 %1005  ;;  %8272 = vmatpush3.bf16.msra.mxu0 %v1017_v1  ;;  %v1086_v47 = vpop.permute.xlu1 %1085  ;;  %v9116_v1 = vld [vmem:[#allocation5 + $0xfc] ss:$20 sps:$4 sm:$0xff]  }
 0x3e1   :  { %v1018_v4 = vmul.bf16 %v1006_v3, %v10061_v25  ;;  %v1098_v56 = vmul.bf16 %v1086_v47, %v10076_v41  ;;  %8273 = vmatprep.subr.bf16.mxu0 %v1058_v2  ;;  %v9118_v2 = vld [vmem:[#allocation5 + $0xb0] ss:$20 sps:$4 sm:$0xff]  }
 0x3e3   :  { %8305 = vmatprep.subr.bf16.mxu1 %v1098_v56  ;;  %v9120_v56 = vld [vmem:[#allocation5 + $0xd8] ss:$20 sps:$4 sm:$0xff]  }
 0x3e4   :  { %v1060_v54 = vpop.permute.xlu0 %1059  ;;  %8274 = vmatpush3.bf16.msra.mxu0 %v1018_v4  ;;  %8306 = vmatpush3.bf16.msra.mxu1 %v10304_v9  ;;  %v1100_v51 = vpop.permute.xlu1 %1099  ;;  %v9119_v4 = vld [vmem:[#allocation5 + $0xf8] ss:$20 sps:$4 sm:$0xff]  }
 0x3e5   :  { %v1075_v11 = vmul.bf16 %v1060_v54, %v10073_v38  ;;  %v1115_v57 = vmul.bf16 %v1100_v51, %v10080_v46  ;;  %v9123_v54 = vld [vmem:[#allocation5 + $0x100] ss:$20 sps:$4 sm:$0xff]  }
 0x3e6   :  { %v9124_v51 = vld [vmem:[#allocation5 + $0x120] ss:$20 sps:$4 sm:$0xff]  }
 0x3e7   :  { %1324 = vmatmul.mubr.bf16.vlgmr.msra.gmra.mrb[24].mxu0 %v9098_v8  ;;  %8307 = vmatprep.subr.bf16.mxu1 %v1115_v57  ;;  %v9121_v8 = vld [vmem:[#allocation5 + $0x124] ss:$20 sps:$4 sm:$0xff]  }
 0x3e8   :  { %v1062_v12 = vpop.permute.xlu0 %1061  ;;  %8308 = vmatpush3.bf16.msra.mxu1 %v1075_v11  ;;  %v1102_v22 = vpop.permute.xlu1 %1101  ;;  %1331 = vmatprep.mubr.bf16.mxu0 %v9101_v6  ;;  %v9125_v6 = vld [vmem:[#allocation5 + $0x128] ss:$20 sps:$4 sm:$0xff]  }
 0x3e9   :  { %v1076_v26 = vmul.bf16 %v1062_v12, %v10073_v38  ;;  %v1116_v27 = vmul.bf16 %v1102_v22, %v10080_v46 }
 0x3eb   :  { %8309 = vmatprep.subr.bf16.mxu1 %v1116_v27 }
 0x3ec   :  { %v1064_v29 = vpop.permute.xlu0 %1063  ;;  %8310 = vmatpush3.bf16.msra.mxu1 %v1076_v26  ;;  %v1104_v9 = vpop.permute.xlu1 %1103 }
 0x3ed   :  { %v1077_v34 = vmul.bf16 %v1064_v29, %v10073_v38  ;;  %v1117_v48 = vmul.bf16 %v1104_v9, %v10080_v46 }
 0x3ef   :  { %1332 = vmatmul.mubr.bf16.gmra.mrb[28].mxu0 %v9103_v28  ;;  %8311 = vmatprep.subr.bf16.mxu1 %v1117_v48 }
 0x3f0   :  { %v1066_v42 = vpop.permute.xlu0 %1065  ;;  %8312 = vmatpush3.bf16.msra.mxu1 %v1077_v34  ;;  %v1106_v0 = vpop.permute.xlu1 %1105  ;;  %1339 = vmatprep.mubr.bf16.mxu0 %v9104_v33 }
 0x3f1   :  { %v1078_v49 = vmul.bf16 %v1066_v42, %v10073_v38  ;;  %v1118_v50 = vmul.bf16 %v1106_v0, %v10080_v46 }
 0x3f3   :  { %8313 = vmatprep.subr.bf16.mxu1 %v1118_v50 }
 0x3f4   :  { %8314 = vmatpush3.bf16.msra.mxu1 %v1078_v49  ;;  %v1120_v53 = vpop.permute.xlu1 %1119  ;;  %v1122_v19 = vpop.permute.xlu0 %1121 }
 0x3f5   :  { %v1135_v20 = vmul.bf16 %v1120_v53, %v10092_v58  ;;  %v1136_v60 = vmul.bf16 %v1122_v19, %v10092_v58 }
 0x3f7   :  { %1340 = vmatmul.mubr.bf16.gmra.mrb[32].mxu0 %v9109_v52  ;;  %1389 = vmatmul.mubr.bf16.vlgmr.msra.gmra.mrb[24].mxu1 %v9106_v5 }
 0x3f8   :  { %8921 = vmatprep.subr.bf16.mxu0 %v1135_v20  ;;  %1347 = vmatprep.mubr.bf16.mxu0 %v9110_v55  ;;  %v1124_v61 = vpop.permute.xlu1 %1123  ;;  %v1126_v3 = vpop.permute.xlu0 %1125 }
 0x3f9   :  { %8922 = vmatpush3.bf16.msra.mxu0 %v1135_v20  ;;  %1396 = vmatprep.mubr.bf16.mxu1 %v9112_v59  ;;  %v1137_v45 = vmul.bf16 %v1124_v61, %v10092_v58  ;;  %v1138_v47 = vmul.bf16 %v1126_v3, %v10092_v58 }
 0x3fa   :  { %8923 = vmatprep.subr.bf16.mxu0 %v1136_v60 }
 0x3fd   :  { %8924 = vmatpush3.bf16.msra.mxu0 %v1136_v60 }
 0x3fe   :  { %8925 = vmatprep.subr.bf16.mxu0 %v1137_v45 }
 0x3ff   :  { %1348 = vmatmul.mubr.bf16.gmra.mrb[36].mxu0 %v9114_v62  ;;  %1397 = vmatmul.mubr.bf16.gmra.mrb[28].mxu1 %v9115_v63 }
 0x400   :  { %1404 = vmatprep.mubr.bf16.mxu1 %v9116_v1  ;;  %8929 = vmatprep.mubr.msk.bf16.mxu0 %vm721_vm4, %v9118_v2 }
 0x401   :  { %8926 = vmatpush3.bf16.msra.mxu0 %v1137_v45 }
 0x402   :  { %8927 = vmatprep.subr.bf16.mxu0 %v1138_v47 }
 0x405   :  { %8928 = vmatpush3.bf16.msra.mxu0 %v1138_v47 }
 0x407   :  { %1405 = vmatmul.mubr.bf16.gmra.mrb[32].mxu1 %v9119_v4 }
 0x408   :  { %8930 = vmatmul.mubr.msk.bf16.vlgmr.msra.gmra.mrb[40].mxu0 %vm721_vm4, %v9120_v56  ;;  %1412 = vmatprep.mubr.bf16.mxu1 %v9121_v8 }
 0x409   :  { %8933 = vmatprep.mubr.msk.bf16.mxu0 %vm721_vm4, %v9123_v54  ;;  %v1147_v42 = vpop.permute.xlu0 %1146  ;;  %v1142_v0 = vpop.permute.xlu1 %1141 }
 0x40d   :  { %v1157_v3 = vpop.permute.xlu0 %1156  ;;  %v1152_v47 = vpop.permute.xlu1 %1151 }
 0x40f   :  { %1413 = vmatmul.mubr.bf16.gmra.mrb[36].mxu1 %v9124_v51 }
 0x410   :  { %8934 = vmatmul.mubr.msk.bf16.gmra.mrb[44].mxu0 %vm721_vm4, %v9125_v6 }
 0x4ba   :  { %v8275_v11 = vpop.f32.mrb[24].mxu0 }
 0x4bb   :  { %v8276_v57 = vpop.f32.mrb[25].mxu0 }
 0x4bc   :  { %v8277_v12 = vadd.f32 %v8276_v57, %v8275_v11  ;;  %v8278_v22 = vpop.f32.mrb[26].mxu0 }
 0x4bd   :  { %v8279_v26 = vpop.f32.mrb[27].mxu0 }
 0x4be   :  { %v8280_v27 = vadd.f32 %v8279_v26, %v8278_v22  ;;  %v1326_v53 = vadd.f32 %v8277_v12, %v1142_v0  ;;  %v1162_v0 = vpop.permute.xlu1 %1161 }
 0x4c0   :  { %v1329_v62 = vadd.f32 %v8280_v27, %v1147_v42  ;;  %v1167_v42 = vpop.permute.xlu0 %1166 }
 0x4c2   :  { %v8281_v28 = vpop.f32.mrb[28].mxu0 }
 0x4c3   :  { %v8282_v29 = vpop.f32.mrb[29].mxu0 }
 0x4c4   :  { %v8283_v9 = vadd.f32 %v8282_v29, %v8281_v28  ;;  %v8284_v33 = vpop.f32.mrb[30].mxu0 }
 0x4c5   :  { %v8285_v34 = vpop.f32.mrb[31].mxu0 }
 0x4c6   :  { %v8286_v48 = vadd.f32 %v8285_v34, %v8284_v33  ;;  %v1334_v51 = vadd.f32 %v8283_v9, %v1152_v47 }
 0x4c8   :  { %v1337_v28 = vadd.f32 %v8286_v48, %v1157_v3 }
 0x4ca   :  { %v8287_v49 = vpop.f32.mrb[32].mxu0  ;;  %v8315_v50 = vpop.f32.mrb[24].mxu1 }
 0x4cb   :  { %v8288_v5 = vpop.f32.mrb[33].mxu0  ;;  %v8316_v52 = vpop.f32.mrb[25].mxu1 }
 0x4cc   :  { %v8289_v55 = vadd.f32 %v8288_v5, %v8287_v49  ;;  %v8317_v19 = vadd.f32 %v8316_v52, %v8315_v50  ;;  %v8290_v20 = vpop.f32.mrb[34].mxu0  ;;  %v8318_v59 = vpop.f32.mrb[26].mxu1 }
 0x4cd   :  { %v8291_v60 = vpop.f32.mrb[35].mxu0  ;;  %v8319_v61 = vpop.f32.mrb[27].mxu1 }
 0x4ce   :  { %v8292_v63 = vadd.f32 %v8291_v60, %v8290_v20  ;;  %v8320_v45 = vadd.f32 %v8319_v61, %v8318_v59  ;;  %v1391_v1 = vadd.f32 %v8317_v19, %v1326_v53  ;;  %v1342_v52 = vadd.f32 %v8289_v55, %v1162_v0 }
 0x4d0   :  { %v1394_v2 = vadd.f32 %v8320_v45, %v1329_v62  ;;  %v1345_v59 = vadd.f32 %v8292_v63, %v1167_v42 }
 0x4d2   :  { %v8293_v4 = vpop.f32.mrb[36].mxu0  ;;  %v8321_v56 = vpop.f32.mrb[28].mxu1 }
 0x4d3   :  { %v8294_v8 = vpop.f32.mrb[37].mxu0  ;;  %v8322_v54 = vpop.f32.mrb[29].mxu1 }
 0x4d4   :  { %v8295_v6 = vadd.f32 %v8294_v8, %v8293_v4  ;;  %v8323_v11 = vadd.f32 %v8322_v54, %v8321_v56  ;;  %v8296_v57 = vpop.f32.mrb[38].mxu0  ;;  %v8324_v12 = vpop.f32.mrb[30].mxu1 }
 0x4d5   :  { %v8297_v22 = vpop.f32.mrb[39].mxu0  ;;  %v8325_v26 = vpop.f32.mrb[31].mxu1 }
 0x4d6   :  { %v8298_v29 = vadd.f32 %v8297_v22, %v8296_v57  ;;  %v8326_v27 = vadd.f32 %v8325_v26, %v8324_v12  ;;  %v1399_v33 = vadd.f32 %v8323_v11, %v1334_v51  ;;  %v1177_v54 = vpop.permute.xlu0 %1176 }
 0x4d8   :  { %v1402_v34 = vadd.f32 %v8326_v27, %v1337_v28  ;;  %v1353_v28 = vadd.f32 %v8298_v29, %v1177_v54 }
 0x4da   :  { %v8327_v49 = vpop.f32.mrb[32].mxu1 }
 0x4db   :  { %v8931_v50 = vpop.f32.mrb[40].mxu0  ;;  %v8328_v5 = vpop.f32.mrb[33].mxu1 }
 0x4dc   :  { %v1464_v53 = vadd.f32 %v8931_v50, %v1399_v33  ;;  %v8329_v19 = vadd.f32 %v8328_v5, %v8327_v49  ;;  %v1455_v9 = vpop.f32.mrb[41].mxu0  ;;  %v8330_v20 = vpop.f32.mrb[34].mxu1 }
 0x4dd   :  { %v1456_v60 = vadd.f32 %v1455_v9, %v1391_v1  ;;  %v8932_v61 = vpop.f32.mrb[42].mxu0  ;;  %v8331_v62 = vpop.f32.mrb[35].mxu1  ;;  %v7639_v9 = vld [vmem:[%s11347_s5 + $0x88] sm:$0xff] }
 0x4de   :  { %v10424_v48 = vadd.f32 %v1464_v53, %v375_v14  ;;  %v1467_v45 = vadd.f32 %v8932_v61, %v1402_v34  ;;  %v8332_v3 = vadd.f32 %v8331_v62, %v8330_v20  ;;  %v1458_v47 = vpop.f32.mrb[43].mxu0  ;;  %v1407_v4 = vadd.f32 %v8329_v19, %v1342_v52  ;;  %v1172_v1 = vpop.permute.xlu1 %1171  ;;  %v7638_v20 = vld [vmem:[%s11347_s5 + $0x80] sm:$0xff]  ;;  %v7643_v61 = vld [vmem:[%s11347_s5 + $0xa8] sm:$0xff] }
 0x4df   :  { %v1459_v56 = vadd.f32 %v1458_v47, %v1394_v2  ;;  %v10437_v14 = vadd.f32 %v1456_v60, %v373_v23  ;;  %v7640_v60 = vld [vmem:[%s11347_s5 + $0x90] sm:$0xff]  ;;  %v7642_v62 = vld [vmem:[%s11347_s5 + $0xa0] sm:$0xff] }
 0x4e0   :  { %v10428_v55 = vadd.f32 %v1467_v45, %v376_v16  ;;  %v1410_v8 = vadd.f32 %v8332_v3, %v1345_v59  ;;  %v1496_v7 = vmax.f32 %v10424_v48, 0.0  ;;  %v1350_v16 = vadd.f32 %v8295_v6, %v1172_v1  ;;  %v7641_v59 = vld [vmem:[%s11347_s5 + $0x98] sm:$0xff]  ;;  %v7644_v3 = vld [vmem:[%s11347_s5 + $0xb0] sm:$0xff] }
 0x4e1   :  { %v10432_v63 = vadd.f32 %v1459_v56, %v374_v21  ;;  %v1494_v27 = vmax.f32 %v10437_v14, 0.0  ;;  %v7645_v45 = vld [vmem:[%s11347_s5 + $0xb8] sm:$0xff] }
 0x4e2   :  { %v1497_v51 = vmax.f32 %v10428_v55, 0.0  ;;  %v8333_v2 = vpop.f32.mrb[36].mxu1 }
 0x4e3   :  { %v8935_v11 = vpop.f32.mrb[44].mxu0  ;;  %v8334_v10 = vpop.f32.mrb[37].mxu1  ;;  %v1495_v21 = vmax.f32 %v10432_v63, 0.0 }
 0x4e4   :  { %v10444_v13 = vpack.c.bf16 %v1497_v51, %v1496_v7  ;;  %v8335_v57 = vadd.f32 %v8334_v10, %v8333_v2  ;;  %v1471_v12 = vpop.f32.mrb[45].mxu0  ;;  %v8336_v22 = vpop.f32.mrb[38].mxu1 }
 0x4e5   :  { %v1472_v15 = vadd.f32 %v1471_v12, %v1407_v4  ;;  %v8936_v23 = vpop.f32.mrb[46].mxu0  ;;  %v8337_v26 = vpop.f32.mrb[39].mxu1  ;;  %v10456_v0 = vpack.c.bf16 %v1495_v21, %v1494_v27 }
 0x4e6   :  { %v1415_v33 = vadd.f32 %v8335_v57, %v1350_v16  ;;  %v8338_v34 = vadd.f32 %v8337_v26, %v8336_v22  ;;  %v1474_v6 = vpop.f32.mrb[47].mxu0  ;;  %1546 = vrot.lane.b32.xlu0 %v10444_v13, %s9868_s10  ;;  %1586 = vrot.lane.b32.xlu1 %v10444_v13, %s9867_s18 }
 0x4e7   :  { %v1475_v42 = vadd.f32 %v1474_v6, %v1410_v8  ;;  %v10477_v35 = vadd.f32 %v1472_v15, %v377_v44  ;;  %v9136_v44 = vld [vmem:[#allocation5 + $0x14c] ss:$20 sps:$4 sm:$0xff]  }
 0x4e8   :  { %v1480_v49 = vadd.f32 %v8935_v11, %v1415_v33  ;;  %v1418_v29 = vadd.f32 %v8338_v34, %v1353_v28  ;;  %1953 = vmatprep.mubr.bf16.mxu0 %v9136_v44 }
 0x4e9   :  { %v10472_v53 = vadd.f32 %v1475_v42, %v378_v43  ;;  %v1498_v37 = vmax.f32 %v10477_v35, 0.0  ;;  %v9128_v43 = vld [vmem:[#allocation5 + $0x144] ss:$20 sps:$4 sm:$0xff]  }
 0x4ea   :  { %v10460_v50 = vadd.f32 %v1480_v49, %v379_v39  ;;  %v1483_v5 = vadd.f32 %v8936_v23, %v1418_v29  ;;  %1544 = vrot.lane.b32.xlu0 %v10456_v0, %s9868_s10  ;;  %1584 = vrot.lane.b32.xlu1 %v10456_v0, %s9867_s18 }
 0x4eb   :  { %1888 = vmatprep.mubr.bf16.mxu1 %v9128_v43 }
 0x4ec   :  { %v10468_v52 = vadd.f32 %v1483_v5, %v380_v36  ;;  %v1500_v19 = vmax.f32 %v10460_v50, 0.0  ;;  %v1499_v36 = vmax.f32 %v10472_v53, 0.0 }
 0x4ee   :  { %v1501_v39 = vmax.f32 %v10468_v52, 0.0  ;;  %1644 = vrot.lane.b32.xlu0 %v10456_v0, %s9870_s20  ;;  %1604 = vrot.lane.b32.xlu1 %v10456_v0, %s9869_s17  ;;  %v10500_v40 = vpack.c.bf16 %v1499_v36, %v1498_v37 }
 0x4f0   :  { %v10488_v32 = vpack.c.bf16 %v1501_v39, %v1500_v19 }
 0x4f2   :  { %1550 = vrot.lane.b32.xlu0 %v10488_v32, %s9868_s10  ;;  %1590 = vrot.lane.b32.xlu1 %v10488_v32, %s9867_s18 }
 0x4f6   :  { %1548 = vrot.lane.b32.xlu0 %v10500_v40, %s9868_s10  ;;  %1588 = vrot.lane.b32.xlu1 %v10500_v40, %s9867_s18 }
 0x4fa   :  { %1606 = vrot.lane.b32.xlu0 %v10444_v13, %s9869_s17  ;;  %1564 = vrot.lane.b32.xlu1 %v10456_v0, %s9866_s19 }
 0x4fe   :  { %1566 = vrot.lane.b32.xlu0 %v10444_v13, %s9866_s19  ;;  %1646 = vrot.lane.b32.xlu1 %v10444_v13, %s9870_s20 }
 0x502   :  { %1648 = vrot.lane.b32.xlu0 %v10500_v40, %s9870_s20  ;;  %1608 = vrot.lane.b32.xlu1 %v10500_v40, %s9869_s17 }
 0x506   :  { %1610 = vrot.lane.b32.xlu0 %v10488_v32, %s9869_s17  ;;  %1568 = vrot.lane.b32.xlu1 %v10500_v40, %s9866_s19 }
 0x50a   :  { %1570 = vrot.lane.b32.xlu0 %v10488_v32, %s9866_s19  ;;  %1650 = vrot.lane.b32.xlu1 %v10488_v32, %s9870_s20 }
 0x50e   :  { %1624 = vrot.lane.b32.xlu0 %v10456_v0, %s9871_s0  ;;  %1664 = vrot.lane.b32.xlu1 %v10456_v0, %s9872_s22 }
 0x512   :  { %1626 = vrot.lane.b32.xlu0 %v10444_v13, %s9871_s0  ;;  %1666 = vrot.lane.b32.xlu1 %v10444_v13, %s9872_s22 }
 0x516   :  { %1628 = vrot.lane.b32.xlu0 %v10500_v40, %s9871_s0  ;;  %1668 = vrot.lane.b32.xlu1 %v10500_v40, %s9872_s22 }
 0x51a   :  { %1630 = vrot.lane.b32.xlu0 %v10488_v32, %s9871_s0  ;;  %1670 = vrot.lane.b32.xlu1 %v10488_v32, %s9872_s22 }
 0x51e   :  { %1686 = vrot.lane.b32.xlu0 %v10444_v13, %s9873_s23  ;;  %1684 = vrot.lane.b32.xlu1 %v10456_v0, %s9873_s23 }
 0x522   :  { %1690 = vrot.lane.b32.xlu0 %v10488_v32, %s9873_s23  ;;  %1688 = vrot.lane.b32.xlu1 %v10500_v40, %s9873_s23 }
 0x526   :  { %1711 = vperm.xlu0 %9064, %v7639_v9   ;;  %1706 = vperm.xlu1 %9065, %v7638_v20  }
 0x52a   :  { %1721 = vperm.xlu0 %9064, %v7641_v59   ;;  %1716 = vperm.xlu1 %9065, %v7640_v60  }
 0x52e   :  { %1731 = vperm.xlu0 %9064, %v7643_v61   ;;  %1726 = vperm.xlu1 %9065, %v7642_v62  }
 0x532   :  { %1741 = vperm.xlu0 %9064, %v7645_v45   ;;  %1736 = vperm.xlu1 %9065, %v7644_v3  }
 0x558   :  { %v1547_v47 = vpop.permute.xlu0 %1546  ;;  %v1587_v4 = vpop.permute.xlu1 %1586 }
 0x559   :  { %v1601_v2 = vmul.bf16 %v1587_v4, %v10058_v24  ;;  %v1561_v57 = vmul.bf16 %v1547_v47, %v10066_v30 }
 0x55c   :  { %v1545_v56 = vpop.permute.xlu0 %1544  ;;  %v1585_v8 = vpop.permute.xlu1 %1584 }
 0x55d   :  { %v1560_v54 = vmul.bf16 %v1545_v56, %v10066_v30  ;;  %v1600_v1 = vmul.bf16 %v1585_v8, %v10058_v24 }
 0x55f   :  { %8347 = vmatprep.subr.bf16.mxu1 %v1600_v1 }
 0x560   :  { %v1645_v11 = vpop.permute.xlu0 %1644  ;;  %8348 = vmatpush3.bf16.msra.mxu1 %v1560_v54  ;;  %v1605_v10 = vpop.permute.xlu1 %1604  ;;  %v9126_v54 = vld [vmem:[#allocation5 + $0x140] ss:$20 sps:$4 sm:$0xff]  }
 0x561   :  { %v1660_v16 = vmul.bf16 %v1645_v11, %v10076_v41  ;;  %8349 = vmatprep.subr.bf16.mxu1 %v1601_v2  ;;  %v1620_v49 = vmul.bf16 %v1605_v10, %v10069_v31  ;;  %v9129_v2 = vld [vmem:[#allocation5 + $0x16c] ss:$20 sps:$4 sm:$0xff]  }
 0x563   :  { %8387 = vmatprep.subr.bf16.mxu0 %v1660_v16 }
 0x564   :  { %8350 = vmatpush3.bf16.msra.mxu1 %v1561_v57  ;;  %8388 = vmatpush3.bf16.msra.mxu0 %v10456_v0  ;;  %v1551_v12 = vpop.permute.xlu0 %1550  ;;  %v1591_v22 = vpop.permute.xlu1 %1590 }
 0x565   :  { %v1603_v33 = vmul.bf16 %v1591_v22, %v10058_v24  ;;  %v1563_v42 = vmul.bf16 %v1551_v12, %v10066_v30 }
 0x568   :  { %v1549_v15 = vpop.permute.xlu0 %1548  ;;  %v1589_v23 = vpop.permute.xlu1 %1588 }
 0x569   :  { %v1562_v26 = vmul.bf16 %v1549_v15, %v10066_v30  ;;  %v1602_v28 = vmul.bf16 %v1589_v23, %v10058_v24  ;;  %v9131_v15 = vld [vmem:[#allocation5 + $0x168] ss:$20 sps:$4 sm:$0xff]  }
 0x56b   :  { %8351 = vmatprep.subr.bf16.mxu1 %v1602_v28 }
 0x56c   :  { %v1607_v34 = vpop.permute.xlu0 %1606  ;;  %8352 = vmatpush3.bf16.msra.mxu1 %v1562_v26  ;;  %v1565_v6 = vpop.permute.xlu1 %1564  ;;  %v9132_v26 = vld [vmem:[#allocation5 + $0x194] ss:$20 sps:$4 sm:$0xff]  }
 0x56d   :  { %8353 = vmatprep.subr.bf16.mxu1 %v1603_v33  ;;  %v1580_v43 = vmul.bf16 %v1565_v6, %v10061_v25  ;;  %v1621_v44 = vmul.bf16 %v1607_v34, %v10069_v31 }
 0x570   :  { %v1567_v0 = vpop.permute.xlu0 %1566  ;;  %8354 = vmatpush3.bf16.msra.mxu1 %v1563_v42  ;;  %v1647_v29 = vpop.permute.xlu1 %1646 }
 0x571   :  { %v1661_v5 = vmul.bf16 %v1647_v29, %v10076_v41  ;;  %8355 = vmatprep.subr.bf16.mxu1 %v1620_v49  ;;  %v1581_v60 = vmul.bf16 %v1567_v0, %v10061_v25  ;;  %v9134_v0 = vld [vmem:[#allocation5 + $0x148] ss:$20 sps:$4 sm:$0xff]   ;;  %v9137_v29 = vld [vmem:[#allocation5 + $0x190] ss:$20 sps:$4 sm:$0xff]  }
 0x573   :  { %8389 = vmatprep.subr.bf16.mxu0 %v1661_v5 }
 0x574   :  { %v1649_v9 = vpop.permute.xlu0 %1648  ;;  %8356 = vmatpush3.bf16.msra.mxu1 %v1580_v43  ;;  %8390 = vmatpush3.bf16.msra.mxu0 %v10444_v13  ;;  %v1609_v20 = vpop.permute.xlu1 %1608  ;;  %v9138_v43 = vld [vmem:[#allocation5 + $0x1bc] ss:$20 sps:$4 sm:$0xff]  }
 0x575   :  { %v1662_v59 = vmul.bf16 %v1649_v9, %v10076_v41  ;;  %8357 = vmatprep.subr.bf16.mxu1 %v1621_v44  ;;  %v1622_v61 = vmul.bf16 %v1609_v20, %v10069_v31  ;;  %v9140_v20 = vld [vmem:[#allocation5 + $0x174] ss:$20 sps:$4 sm:$0xff]  }
 0x577   :  { %8391 = vmatprep.subr.bf16.mxu0 %v1662_v59 }
 0x578   :  { %v1611_v62 = vpop.permute.xlu0 %1610  ;;  %8358 = vmatpush3.bf16.msra.mxu1 %v1581_v60  ;;  %8392 = vmatpush3.bf16.msra.mxu0 %v10500_v40  ;;  %v1569_v45 = vpop.permute.xlu1 %1568 }
 0x579   :  { %v1582_v3 = vmul.bf16 %v1569_v45, %v10061_v25  ;;  %8359 = vmatprep.subr.bf16.mxu1 %v1622_v61  ;;  %v1623_v47 = vmul.bf16 %v1611_v62, %v10069_v31  ;;  %v9142_v61 = vld [vmem:[#allocation5 + $0x1b8] ss:$20 sps:$4 sm:$0xff]   ;;  %v9143_v62 = vld [vmem:[#allocation5 + $0x170] ss:$20 sps:$4 sm:$0xff]  }
 0x57c   :  { %v1571_v13 = vpop.permute.xlu0 %1570  ;;  %8360 = vmatpush3.bf16.msra.mxu1 %v1582_v3  ;;  %v1651_v4 = vpop.permute.xlu1 %1650  ;;  %v9144_v3 = vld [vmem:[#allocation5 + $0x19c] ss:$20 sps:$4 sm:$0xff]  }
 0x57d   :  { %v1583_v56 = vmul.bf16 %v1571_v13, %v10061_v25  ;;  %v1663_v8 = vmul.bf16 %v1651_v4, %v10076_v41  ;;  %8361 = vmatprep.subr.bf16.mxu1 %v1623_v47  ;;  %v9146_v47 = vld [vmem:[#allocation5 + $0x150] ss:$20 sps:$4 sm:$0xff]  }
 0x57f   :  { %8393 = vmatprep.subr.bf16.mxu0 %v1663_v8  ;;  %v9148_v8 = vld [vmem:[#allocation5 + $0x178] ss:$20 sps:$4 sm:$0xff]  }
 0x580   :  { %v1625_v1 = vpop.permute.xlu0 %1624  ;;  %8362 = vmatpush3.bf16.msra.mxu1 %v1583_v56  ;;  %8394 = vmatpush3.bf16.msra.mxu0 %v10488_v32  ;;  %v1665_v40 = vpop.permute.xlu1 %1664  ;;  %v9147_v56 = vld [vmem:[#allocation5 + $0x198] ss:$20 sps:$4 sm:$0xff]  }
 0x581   :  { %v1640_v11 = vmul.bf16 %v1625_v1, %v10073_v38  ;;  %v1680_v10 = vmul.bf16 %v1665_v40, %v10080_v46  ;;  %v9151_v1 = vld [vmem:[#allocation5 + $0x1a0] ss:$20 sps:$4 sm:$0xff]  }
 0x582   :  { %v9152_v40 = vld [vmem:[#allocation5 + $0x1c0] ss:$20 sps:$4 sm:$0xff]  }
 0x583   :  { %1889 = vmatmul.mubr.bf16.vlgmr.msra.gmra.mrb[40].mxu1 %v9126_v54  ;;  %8395 = vmatprep.subr.bf16.mxu0 %v1680_v10  ;;  %v9149_v54 = vld [vmem:[#allocation5 + $0x1c4] ss:$20 sps:$4 sm:$0xff]  }
 0x584   :  { %v1627_v16 = vpop.permute.xlu0 %1626  ;;  %8396 = vmatpush3.bf16.msra.mxu0 %v1640_v11  ;;  %v1667_v57 = vpop.permute.xlu1 %1666  ;;  %1896 = vmatprep.mubr.bf16.mxu1 %v9129_v2  ;;  %v9153_v2 = vld [vmem:[#allocation5 + $0x1c8] ss:$20 sps:$4 sm:$0xff]  }
 0x585   :  { %v1641_v12 = vmul.bf16 %v1627_v16, %v10073_v38  ;;  %v1681_v22 = vmul.bf16 %v1667_v57, %v10080_v46 }
 0x587   :  { %8397 = vmatprep.subr.bf16.mxu0 %v1681_v22 }
 0x588   :  { %v1629_v23 = vpop.permute.xlu0 %1628  ;;  %8398 = vmatpush3.bf16.msra.mxu0 %v1641_v12  ;;  %v1669_v32 = vpop.permute.xlu1 %1668 }
 0x589   :  { %v1642_v28 = vmul.bf16 %v1629_v23, %v10073_v38  ;;  %v1682_v33 = vmul.bf16 %v1669_v32, %v10080_v46 }
 0x58b   :  { %1897 = vmatmul.mubr.bf16.gmra.mrb[44].mxu1 %v9131_v15  ;;  %8399 = vmatprep.subr.bf16.mxu0 %v1682_v33 }
 0x58c   :  { %v1631_v34 = vpop.permute.xlu0 %1630  ;;  %8400 = vmatpush3.bf16.msra.mxu0 %v1642_v28  ;;  %v1671_v6 = vpop.permute.xlu1 %1670  ;;  %1904 = vmatprep.mubr.bf16.mxu1 %v9132_v26 }
 0x58d   :  { %v1643_v42 = vmul.bf16 %v1631_v34, %v10073_v38  ;;  %v1683_v49 = vmul.bf16 %v1671_v6, %v10080_v46 }
 0x58f   :  { %8401 = vmatprep.subr.bf16.mxu0 %v1683_v49 }
 0x590   :  { %8402 = vmatpush3.bf16.msra.mxu0 %v1643_v42  ;;  %v1685_v5 = vpop.permute.xlu1 %1684  ;;  %v1687_v44 = vpop.permute.xlu0 %1686 }
 0x591   :  { %v1700_v9 = vmul.bf16 %v1685_v5, %v10092_v58  ;;  %v1701_v59 = vmul.bf16 %v1687_v44, %v10092_v58 }
 0x593   :  { %1905 = vmatmul.mubr.bf16.gmra.mrb[48].mxu1 %v9137_v29  ;;  %1954 = vmatmul.mubr.bf16.vlgmr.msra.gmra.mrb[48].mxu0 %v9134_v0 }
 0x594   :  { %8937 = vmatprep.subr.bf16.mxu1 %v1700_v9  ;;  %1912 = vmatprep.mubr.bf16.mxu1 %v9138_v43  ;;  %v1689_v60 = vpop.permute.xlu1 %1688  ;;  %v1691_v13 = vpop.permute.xlu0 %1690 }
 0x595   :  { %8938 = vmatpush3.bf16.msra.mxu1 %v1700_v9  ;;  %1961 = vmatprep.mubr.bf16.mxu0 %v9140_v20  ;;  %v1702_v45 = vmul.bf16 %v1689_v60, %v10092_v58  ;;  %v1703_v4 = vmul.bf16 %v1691_v13, %v10092_v58 }
 0x596   :  { %8939 = vmatprep.subr.bf16.mxu1 %v1701_v59 }
 0x599   :  { %8940 = vmatpush3.bf16.msra.mxu1 %v1701_v59 }
 0x59a   :  { %8941 = vmatprep.subr.bf16.mxu1 %v1702_v45 }
 0x59b   :  { %1913 = vmatmul.mubr.bf16.gmra.mrb[52].mxu1 %v9142_v61  ;;  %1962 = vmatmul.mubr.bf16.gmra.mrb[52].mxu0 %v9143_v62 }
 0x59c   :  { %1969 = vmatprep.mubr.bf16.mxu0 %v9144_v3  ;;  %8945 = vmatprep.mubr.msk.bf16.mxu1 %vm721_vm4, %v9146_v47 }
 0x59d   :  { %8942 = vmatpush3.bf16.msra.mxu1 %v1702_v45 }
 0x59e   :  { %8943 = vmatprep.subr.bf16.mxu1 %v1703_v4 }
 0x5a1   :  { %8944 = vmatpush3.bf16.msra.mxu1 %v1703_v4 }
 0x5a3   :  { %1970 = vmatmul.mubr.bf16.gmra.mrb[56].mxu0 %v9147_v56 }
 0x5a4   :  { %8946 = vmatmul.mubr.msk.bf16.vlgmr.msra.gmra.mrb[56].mxu1 %vm721_vm4, %v9148_v8  ;;  %1977 = vmatprep.mubr.bf16.mxu0 %v9149_v54 }
 0x5a5   :  { %8949 = vmatprep.mubr.msk.bf16.mxu1 %vm721_vm4, %v9151_v1  ;;  %v1712_v34 = vpop.permute.xlu0 %1711  ;;  %v1707_v6 = vpop.permute.xlu1 %1706 }
 0x5a9   :  { %v1722_v13 = vpop.permute.xlu0 %1721  ;;  %v1717_v4 = vpop.permute.xlu1 %1716 }
 0x5ab   :  { %1978 = vmatmul.mubr.bf16.gmra.mrb[60].mxu0 %v9152_v40 }
 0x5ac   :  { %8950 = vmatmul.mubr.msk.bf16.gmra.mrb[60].mxu1 %vm721_vm4, %v9153_v2 }
 0x656   :  { %v8363_v11 = vpop.f32.mrb[40].mxu1 }
 0x657   :  { %v8364_v10 = vpop.f32.mrb[41].mxu1 }
 0x658   :  { %v8365_v16 = vadd.f32 %v8364_v10, %v8363_v11  ;;  %v8366_v57 = vpop.f32.mrb[42].mxu1 }
 0x659   :  { %v8367_v12 = vpop.f32.mrb[43].mxu1 }
 0x65a   :  { %v8368_v22 = vadd.f32 %v8367_v12, %v8366_v57  ;;  %v1891_v5 = vadd.f32 %v8365_v16, %v1707_v6  ;;  %v1727_v6 = vpop.permute.xlu1 %1726 }
 0x65c   :  { %v1894_v61 = vadd.f32 %v8368_v22, %v1712_v34  ;;  %v1732_v34 = vpop.permute.xlu0 %1731 }
 0x65e   :  { %v8369_v15 = vpop.f32.mrb[44].mxu1 }
 0x65f   :  { %v8370_v23 = vpop.f32.mrb[45].mxu1 }
 0x660   :  { %v8371_v32 = vadd.f32 %v8370_v23, %v8369_v15  ;;  %v8372_v26 = vpop.f32.mrb[46].mxu1 }
 0x661   :  { %v8373_v28 = vpop.f32.mrb[47].mxu1 }
 0x662   :  { %v8374_v33 = vadd.f32 %v8373_v28, %v8372_v26  ;;  %v1899_v40 = vadd.f32 %v8371_v32, %v1717_v4 }
 0x664   :  { %v1902_v15 = vadd.f32 %v8374_v33, %v1722_v13 }
 0x666   :  { %v8375_v42 = vpop.f32.mrb[48].mxu1  ;;  %v8403_v49 = vpop.f32.mrb[48].mxu0 }
 0x667   :  { %v8376_v0 = vpop.f32.mrb[49].mxu1  ;;  %v8404_v29 = vpop.f32.mrb[49].mxu0 }
 0x668   :  { %v8377_v43 = vadd.f32 %v8376_v0, %v8375_v42  ;;  %v8405_v44 = vadd.f32 %v8404_v29, %v8403_v49  ;;  %v8378_v9 = vpop.f32.mrb[50].mxu1  ;;  %v8406_v20 = vpop.f32.mrb[50].mxu0 }
 0x669   :  { %v8379_v59 = vpop.f32.mrb[51].mxu1  ;;  %v8407_v60 = vpop.f32.mrb[51].mxu0 }
 0x66a   :  { %v8380_v62 = vadd.f32 %v8379_v59, %v8378_v9  ;;  %v8408_v45 = vadd.f32 %v8407_v60, %v8406_v20  ;;  %v1956_v3 = vadd.f32 %v8405_v44, %v1891_v5  ;;  %v1907_v29 = vadd.f32 %v8377_v43, %v1727_v6  ;;  %v1737_v43 = vpop.permute.xlu1 %1736 }
 0x66c   :  { %v1959_v47 = vadd.f32 %v8408_v45, %v1894_v61  ;;  %v1910_v61 = vadd.f32 %v8380_v62, %v1732_v34 }
 0x66e   :  { %v8381_v56 = vpop.f32.mrb[52].mxu1  ;;  %v8409_v8 = vpop.f32.mrb[52].mxu0 }
 0x66f   :  { %v8382_v54 = vpop.f32.mrb[53].mxu1  ;;  %v8410_v1 = vpop.f32.mrb[53].mxu0 }
 0x670   :  { %v8383_v2 = vadd.f32 %v8382_v54, %v8381_v56  ;;  %v8411_v11 = vadd.f32 %v8410_v1, %v8409_v8  ;;  %v8384_v10 = vpop.f32.mrb[54].mxu1  ;;  %v8412_v16 = vpop.f32.mrb[54].mxu0 }
 0x671   :  { %v8385_v57 = vpop.f32.mrb[55].mxu1  ;;  %v8413_v12 = vpop.f32.mrb[55].mxu0 }
 0x672   :  { %v8386_v23 = vadd.f32 %v8385_v57, %v8384_v10  ;;  %v8414_v22 = vadd.f32 %v8413_v12, %v8412_v16  ;;  %v1964_v26 = vadd.f32 %v8411_v11, %v1899_v40  ;;  %v1742_v40 = vpop.permute.xlu0 %1741  ;;  %v1915_v62 = vadd.f32 %v8383_v2, %v1737_v43 }
 0x674   :  { %v1967_v28 = vadd.f32 %v8414_v22, %v1902_v15 }
 0x676   :  { %v8415_v42 = vpop.f32.mrb[56].mxu0 }
 0x677   :  { %v8947_v49 = vpop.f32.mrb[56].mxu1  ;;  %v8416_v0 = vpop.f32.mrb[57].mxu0 }
 0x678   :  { %v2029_v5 = vadd.f32 %v8947_v49, %v1964_v26  ;;  %v8417_v44 = vadd.f32 %v8416_v0, %v8415_v42  ;;  %v2020_v32 = vpop.f32.mrb[57].mxu1  ;;  %v8418_v9 = vpop.f32.mrb[58].mxu0  ;;  %v1918_v42 = vadd.f32 %v8386_v23, %v1742_v40  ;;  %v7677_v40 = vld [vmem:[%s11347_s5 + $0xf8] sm:$0xff] }
 0x679   :  { %v2021_v20 = vadd.f32 %v2020_v32, %v1956_v3  ;;  %v8948_v59 = vpop.f32.mrb[58].mxu1  ;;  %v8419_v60 = vpop.f32.mrb[59].mxu0 }
 0x67a   :  { %v2032_v45 = vadd.f32 %v8948_v59, %v1967_v28  ;;  %v8420_v33 = vadd.f32 %v8419_v60, %v8418_v9  ;;  %v2023_v13 = vpop.f32.mrb[59].mxu1  ;;  %v1972_v4 = vadd.f32 %v8417_v44, %v1907_v29  ;;  %v2053_v8 = vmax.f32 %v2029_v5, 0.0 }
 0x67b   :  { %v2024_v56 = vadd.f32 %v2023_v13, %v1959_v47  ;;  %v2051_v11 = vmax.f32 %v2021_v20, 0.0  ;;  %v7671_v13 = vld [vmem:[%s11347_s5 + $0xc8] sm:$0xff] }
 0x67c   :  { %v2054_v54 = vmax.f32 %v2032_v45, 0.0  ;;  %v1975_v1 = vadd.f32 %v8420_v33, %v1910_v61  ;;  %v9156_v45 = vld [vmem:[#allocation5 + $0x1e4] ss:$20 sps:$4 sm:$0xff]   ;;  %v9164_v33 = vld [vmem:[#allocation5 + $0x1ec] ss:$20 sps:$4 sm:$0xff]  }
 0x67d   :  { %v2052_v10 = vmax.f32 %v2024_v56, 0.0  ;;  %2445 = vmatprep.mubr.bf16.mxu0 %v9156_v45  ;;  %2510 = vmatprep.mubr.bf16.mxu1 %v9164_v33  ;;  %v7673_v56 = vld [vmem:[%s11347_s5 + $0xd8] sm:$0xff] }
 0x67e   :  { %v10614_v16 = vpack.c.bf16 %v2054_v54, %v2053_v8  ;;  %v8421_v57 = vpop.f32.mrb[60].mxu0  ;;  %v7672_v8 = vld [vmem:[%s11347_s5 + $0xd0] sm:$0xff]  ;;  %v7675_v54 = vld [vmem:[%s11347_s5 + $0xe8] sm:$0xff] }
 0x67f   :  { %v10616_v12 = vpack.c.bf16 %v2052_v10, %v2051_v11  ;;  %v8951_v3 = vpop.f32.mrb[60].mxu1  ;;  %v8422_v15 = vpop.f32.mrb[61].mxu0  ;;  %v7676_v11 = vld [vmem:[%s11347_s5 + $0xf0] sm:$0xff] }
 0x680   :  { %v8423_v22 = vadd.f32 %v8422_v15, %v8421_v57  ;;  %v2036_v26 = vpop.f32.mrb[61].mxu1  ;;  %2103 = vrot.lane.b32.xlu0 %v10614_v16, %s9868_s10  ;;  %2143 = vrot.lane.b32.xlu1 %v10614_v16, %s9867_s18  ;;  %v8424_v47 = vpop.f32.mrb[62].mxu0 }
 0x681   :  { %v2037_v28 = vadd.f32 %v2036_v26, %v1972_v4  ;;  %v8952_v34 = vpop.f32.mrb[62].mxu1  ;;  %v8425_v6 = vpop.f32.mrb[63].mxu0  ;;  %v7670_v4 = vld [vmem:[%s11347_s5 + $0xc0] sm:$0xff] }
 0x682   :  { %v1980_v49 = vadd.f32 %v8423_v22, %v1915_v62  ;;  %v8426_v0 = vadd.f32 %v8425_v6, %v8424_v47  ;;  %v2039_v29 = vpop.f32.mrb[63].mxu1 }
 0x683   :  { %v2040_v5 = vadd.f32 %v2039_v29, %v1975_v1  ;;  %v2055_v2 = vmax.f32 %v2037_v28, 0.0  ;;  %v7674_v1 = vld [vmem:[%s11347_s5 + $0xe0] sm:$0xff] }
 0x684   :  { %v2045_v44 = vadd.f32 %v8951_v3, %v1980_v49  ;;  %v1983_v32 = vadd.f32 %v8426_v0, %v1918_v42  ;;  %2101 = vrot.lane.b32.xlu0 %v10616_v12, %s9868_s10  ;;  %2141 = vrot.lane.b32.xlu1 %v10616_v12, %s9867_s18 }
 0x685   :  { %v2056_v9 = vmax.f32 %v2040_v5, 0.0 }
 0x686   :  { %v2048_v20 = vadd.f32 %v8952_v34, %v1983_v32  ;;  %v2057_v60 = vmax.f32 %v2045_v44, 0.0 }
 0x687   :  { %v10626_v59 = vpack.c.bf16 %v2056_v9, %v2055_v2 }
 0x688   :  { %v2058_v61 = vmax.f32 %v2048_v20, 0.0  ;;  %2201 = vrot.lane.b32.xlu0 %v10616_v12, %s9870_s20  ;;  %2161 = vrot.lane.b32.xlu1 %v10616_v12, %s9869_s17 }
 0x68a   :  { %v10632_v23 = vpack.c.bf16 %v2058_v61, %v2057_v60 }
 0x68c   :  { %2107 = vrot.lane.b32.xlu0 %v10632_v23, %s9868_s10  ;;  %2147 = vrot.lane.b32.xlu1 %v10632_v23, %s9867_s18 }
 0x690   :  { %2105 = vrot.lane.b32.xlu0 %v10626_v59, %s9868_s10  ;;  %2145 = vrot.lane.b32.xlu1 %v10626_v59, %s9867_s18 }
 0x694   :  { %2163 = vrot.lane.b32.xlu0 %v10614_v16, %s9869_s17  ;;  %2121 = vrot.lane.b32.xlu1 %v10616_v12, %s9866_s19 }
 0x698   :  { %2123 = vrot.lane.b32.xlu0 %v10614_v16, %s9866_s19  ;;  %2203 = vrot.lane.b32.xlu1 %v10614_v16, %s9870_s20 }
 0x69c   :  { %2205 = vrot.lane.b32.xlu0 %v10626_v59, %s9870_s20  ;;  %2165 = vrot.lane.b32.xlu1 %v10626_v59, %s9869_s17 }
 0x6a0   :  { %2167 = vrot.lane.b32.xlu0 %v10632_v23, %s9869_s17  ;;  %2125 = vrot.lane.b32.xlu1 %v10626_v59, %s9866_s19 }
 0x6a4   :  { %2127 = vrot.lane.b32.xlu0 %v10632_v23, %s9866_s19  ;;  %2207 = vrot.lane.b32.xlu1 %v10632_v23, %s9870_s20 }
 0x6a8   :  { %2181 = vrot.lane.b32.xlu0 %v10616_v12, %s9871_s0  ;;  %2221 = vrot.lane.b32.xlu1 %v10616_v12, %s9872_s22 }
 0x6ac   :  { %2183 = vrot.lane.b32.xlu0 %v10614_v16, %s9871_s0  ;;  %2223 = vrot.lane.b32.xlu1 %v10614_v16, %s9872_s22 }
 0x6b0   :  { %2185 = vrot.lane.b32.xlu0 %v10626_v59, %s9871_s0  ;;  %2225 = vrot.lane.b32.xlu1 %v10626_v59, %s9872_s22 }
 0x6b4   :  { %2187 = vrot.lane.b32.xlu0 %v10632_v23, %s9871_s0  ;;  %2227 = vrot.lane.b32.xlu1 %v10632_v23, %s9872_s22 }
 0x6b8   :  { %2243 = vrot.lane.b32.xlu0 %v10614_v16, %s9873_s23  ;;  %2241 = vrot.lane.b32.xlu1 %v10616_v12, %s9873_s23 }
 0x6bc   :  { %2247 = vrot.lane.b32.xlu0 %v10632_v23, %s9873_s23  ;;  %2245 = vrot.lane.b32.xlu1 %v10626_v59, %s9873_s23 }
 0x6c0   :  { %2268 = vperm.xlu0 %9064, %v7671_v13   ;;  %2263 = vperm.xlu1 %9065, %v7670_v4  }
 0x6c4   :  { %2278 = vperm.xlu0 %9064, %v7673_v56   ;;  %2273 = vperm.xlu1 %9065, %v7672_v8  }
 0x6c8   :  { %2288 = vperm.xlu0 %9064, %v7675_v54   ;;  %2283 = vperm.xlu1 %9065, %v7674_v1  }
 0x6cc   :  { %2298 = vperm.xlu0 %9064, %v7677_v40   ;;  %2293 = vperm.xlu1 %9065, %v7676_v11  }
 0x6f2   :  { %v2104_v10 = vpop.permute.xlu0 %2103  ;;  %v2144_v43 = vpop.permute.xlu1 %2143 }
 0x6f3   :  { %v2158_v22 = vmul.bf16 %v2144_v43, %v10058_v24  ;;  %v2118_v34 = vmul.bf16 %v2104_v10, %v10066_v30 }
 0x6f6   :  { %v2102_v57 = vpop.permute.xlu0 %2101  ;;  %v2142_v3 = vpop.permute.xlu1 %2141 }
 0x6f7   :  { %v2117_v15 = vmul.bf16 %v2102_v57, %v10066_v30  ;;  %v2157_v62 = vmul.bf16 %v2142_v3, %v10058_v24 }
 0x6f9   :  { %8435 = vmatprep.subr.bf16.mxu0 %v2157_v62 }
 0x6fa   :  { %v2202_v26 = vpop.permute.xlu0 %2201  ;;  %8436 = vmatpush3.bf16.msra.mxu0 %v2117_v15  ;;  %v2162_v47 = vpop.permute.xlu1 %2161  ;;  %v9154_v15 = vld [vmem:[#allocation5 + $0x1e0] ss:$20 sps:$4 sm:$0xff]  }
 0x6fb   :  { %v2217_v28 = vmul.bf16 %v2202_v26, %v10076_v41  ;;  %8437 = vmatprep.subr.bf16.mxu0 %v2158_v22  ;;  %v2177_v20 = vmul.bf16 %v2162_v47, %v10069_v31  ;;  %v9157_v22 = vld [vmem:[#allocation5 + $0x20c] ss:$20 sps:$4 sm:$0xff]  }
 0x6fd   :  { %8475 = vmatprep.subr.bf16.mxu1 %v2217_v28 }
 0x6fe   :  { %8438 = vmatpush3.bf16.msra.mxu0 %v2118_v34  ;;  %8476 = vmatpush3.bf16.msra.mxu1 %v10616_v12  ;;  %v2108_v6 = vpop.permute.xlu0 %2107  ;;  %v2148_v42 = vpop.permute.xlu1 %2147 }
 0x6ff   :  { %v2160_v44 = vmul.bf16 %v2148_v42, %v10058_v24  ;;  %v2120_v9 = vmul.bf16 %v2108_v6, %v10066_v30 }
 0x702   :  { %v2106_v49 = vpop.permute.xlu0 %2105  ;;  %v2146_v0 = vpop.permute.xlu1 %2145 }
 0x703   :  { %v2119_v29 = vmul.bf16 %v2106_v49, %v10066_v30  ;;  %v2159_v5 = vmul.bf16 %v2146_v0, %v10058_v24  ;;  %v9159_v49 = vld [vmem:[#allocation5 + $0x208] ss:$20 sps:$4 sm:$0xff]  }
 0x705   :  { %8439 = vmatprep.subr.bf16.mxu0 %v2159_v5 }
 0x706   :  { %v2164_v32 = vpop.permute.xlu0 %2163  ;;  %8440 = vmatpush3.bf16.msra.mxu0 %v2119_v29  ;;  %v2122_v2 = vpop.permute.xlu1 %2121  ;;  %v9160_v29 = vld [vmem:[#allocation5 + $0x234] ss:$20 sps:$4 sm:$0xff]  }
 0x707   :  { %8441 = vmatprep.subr.bf16.mxu0 %v2160_v44  ;;  %v2137_v45 = vmul.bf16 %v2122_v2, %v10061_v25  ;;  %v2178_v33 = vmul.bf16 %v2164_v32, %v10069_v31 }
 0x70a   :  { %v2124_v12 = vpop.permute.xlu0 %2123  ;;  %8442 = vmatpush3.bf16.msra.mxu0 %v2120_v9  ;;  %v2204_v60 = vpop.permute.xlu1 %2203 }
 0x70b   :  { %v2218_v61 = vmul.bf16 %v2204_v60, %v10076_v41  ;;  %8443 = vmatprep.subr.bf16.mxu0 %v2177_v20  ;;  %v2138_v8 = vmul.bf16 %v2124_v12, %v10061_v25  ;;  %v9162_v12 = vld [vmem:[#allocation5 + $0x1e8] ss:$20 sps:$4 sm:$0xff]   ;;  %v9165_v60 = vld [vmem:[#allocation5 + $0x230] ss:$20 sps:$4 sm:$0xff]  }
 0x70d   :  { %8477 = vmatprep.subr.bf16.mxu1 %v2218_v61 }
 0x70e   :  { %v2206_v13 = vpop.permute.xlu0 %2205  ;;  %8444 = vmatpush3.bf16.msra.mxu0 %v2137_v45  ;;  %8478 = vmatpush3.bf16.msra.mxu1 %v10614_v16  ;;  %v2166_v4 = vpop.permute.xlu1 %2165  ;;  %v9166_v45 = vld [vmem:[#allocation5 + $0x25c] ss:$20 sps:$4 sm:$0xff]  }
 0x70f   :  { %v2219_v56 = vmul.bf16 %v2206_v13, %v10076_v41  ;;  %8445 = vmatprep.subr.bf16.mxu0 %v2178_v33  ;;  %v2179_v54 = vmul.bf16 %v2166_v4, %v10069_v31  ;;  %v9168_v4 = vld [vmem:[#allocation5 + $0x214] ss:$20 sps:$4 sm:$0xff]  }
 0x711   :  { %8479 = vmatprep.subr.bf16.mxu1 %v2219_v56 }
 0x712   :  { %v2168_v1 = vpop.permute.xlu0 %2167  ;;  %8446 = vmatpush3.bf16.msra.mxu0 %v2138_v8  ;;  %8480 = vmatpush3.bf16.msra.mxu1 %v10626_v59  ;;  %v2126_v40 = vpop.permute.xlu1 %2125 }
 0x713   :  { %v2139_v11 = vmul.bf16 %v2126_v40, %v10061_v25  ;;  %8447 = vmatprep.subr.bf16.mxu0 %v2179_v54  ;;  %v2180_v10 = vmul.bf16 %v2168_v1, %v10069_v31  ;;  %v9170_v54 = vld [vmem:[#allocation5 + $0x258] ss:$20 sps:$4 sm:$0xff]   ;;  %v9171_v1 = vld [vmem:[#allocation5 + $0x210] ss:$20 sps:$4 sm:$0xff]  }
 0x716   :  { %v2128_v16 = vpop.permute.xlu0 %2127  ;;  %8448 = vmatpush3.bf16.msra.mxu0 %v2139_v11  ;;  %v2208_v43 = vpop.permute.xlu1 %2207  ;;  %v9172_v11 = vld [vmem:[#allocation5 + $0x23c] ss:$20 sps:$4 sm:$0xff]  }
 0x717   :  { %v2140_v57 = vmul.bf16 %v2128_v16, %v10061_v25  ;;  %v2220_v3 = vmul.bf16 %v2208_v43, %v10076_v41  ;;  %8449 = vmatprep.subr.bf16.mxu0 %v2180_v10  ;;  %v9174_v10 = vld [vmem:[#allocation5 + $0x1f0] ss:$20 sps:$4 sm:$0xff]  }
 0x719   :  { %8481 = vmatprep.subr.bf16.mxu1 %v2220_v3  ;;  %v9176_v3 = vld [vmem:[#allocation5 + $0x218] ss:$20 sps:$4 sm:$0xff]  }
 0x71a   :  { %v2182_v62 = vpop.permute.xlu0 %2181  ;;  %8450 = vmatpush3.bf16.msra.mxu0 %v2140_v57  ;;  %8482 = vmatpush3.bf16.msra.mxu1 %v10632_v23  ;;  %v2222_v59 = vpop.permute.xlu1 %2221  ;;  %v9175_v57 = vld [vmem:[#allocation5 + $0x238] ss:$20 sps:$4 sm:$0xff]  }
 0x71b   :  { %v2197_v26 = vmul.bf16 %v2182_v62, %v10073_v38  ;;  %v2237_v47 = vmul.bf16 %v2222_v59, %v10080_v46  ;;  %v9179_v62 = vld [vmem:[#allocation5 + $0x240] ss:$20 sps:$4 sm:$0xff]  }
 0x71c   :  { %v9180_v59 = vld [vmem:[#allocation5 + $0x260] ss:$20 sps:$4 sm:$0xff]  }
 0x71d   :  { %2446 = vmatmul.mubr.bf16.vlgmr.msra.gmra.mrb[64].mxu0 %v9154_v15  ;;  %8483 = vmatprep.subr.bf16.mxu1 %v2237_v47  ;;  %v9177_v15 = vld [vmem:[#allocation5 + $0x264] ss:$20 sps:$4 sm:$0xff]  }
 0x71e   :  { %v2184_v28 = vpop.permute.xlu0 %2183  ;;  %8484 = vmatpush3.bf16.msra.mxu1 %v2197_v26  ;;  %v2224_v34 = vpop.permute.xlu1 %2223  ;;  %2453 = vmatprep.mubr.bf16.mxu0 %v9157_v22  ;;  %v9181_v22 = vld [vmem:[#allocation5 + $0x268] ss:$20 sps:$4 sm:$0xff]  }
 0x71f   :  { %v2198_v6 = vmul.bf16 %v2184_v28, %v10073_v38  ;;  %v2238_v42 = vmul.bf16 %v2224_v34, %v10080_v46 }
 0x721   :  { %8485 = vmatprep.subr.bf16.mxu1 %v2238_v42 }
 0x722   :  { %v2186_v0 = vpop.permute.xlu0 %2185  ;;  %8486 = vmatpush3.bf16.msra.mxu1 %v2198_v6  ;;  %v2226_v23 = vpop.permute.xlu1 %2225 }
 0x723   :  { %v2199_v5 = vmul.bf16 %v2186_v0, %v10073_v38  ;;  %v2239_v44 = vmul.bf16 %v2226_v23, %v10080_v46 }
 0x725   :  { %2454 = vmatmul.mubr.bf16.gmra.mrb[68].mxu0 %v9159_v49  ;;  %8487 = vmatprep.subr.bf16.mxu1 %v2239_v44 }
 0x726   :  { %v2188_v32 = vpop.permute.xlu0 %2187  ;;  %8488 = vmatpush3.bf16.msra.mxu1 %v2199_v5  ;;  %v2228_v2 = vpop.permute.xlu1 %2227  ;;  %2461 = vmatprep.mubr.bf16.mxu0 %v9160_v29 }
 0x727   :  { %v2200_v9 = vmul.bf16 %v2188_v32, %v10073_v38  ;;  %v2240_v20 = vmul.bf16 %v2228_v2, %v10080_v46 }
 0x729   :  { %8489 = vmatprep.subr.bf16.mxu1 %v2240_v20 }
 0x72a   :  { %8490 = vmatpush3.bf16.msra.mxu1 %v2200_v9  ;;  %v2242_v61 = vpop.permute.xlu1 %2241  ;;  %v2244_v33 = vpop.permute.xlu0 %2243 }
 0x72b   :  { %v2257_v13 = vmul.bf16 %v2242_v61, %v10092_v58  ;;  %v2258_v56 = vmul.bf16 %v2244_v33, %v10092_v58 }
 0x72d   :  { %2462 = vmatmul.mubr.bf16.gmra.mrb[72].mxu0 %v9165_v60  ;;  %2511 = vmatmul.mubr.bf16.vlgmr.msra.gmra.mrb[64].mxu1 %v9162_v12 }
 0x72e   :  { %8953 = vmatprep.subr.bf16.mxu0 %v2257_v13  ;;  %2469 = vmatprep.mubr.bf16.mxu0 %v9166_v45  ;;  %v2246_v8 = vpop.permute.xlu1 %2245  ;;  %v2248_v16 = vpop.permute.xlu0 %2247 }
 0x72f   :  { %8954 = vmatpush3.bf16.msra.mxu0 %v2257_v13  ;;  %2518 = vmatprep.mubr.bf16.mxu1 %v9168_v4  ;;  %v2259_v40 = vmul.bf16 %v2246_v8, %v10092_v58  ;;  %v2260_v43 = vmul.bf16 %v2248_v16, %v10092_v58 }
 0x730   :  { %8955 = vmatprep.subr.bf16.mxu0 %v2258_v56 }
 0x733   :  { %8956 = vmatpush3.bf16.msra.mxu0 %v2258_v56 }
 0x734   :  { %8957 = vmatprep.subr.bf16.mxu0 %v2259_v40 }
 0x735   :  { %2470 = vmatmul.mubr.bf16.gmra.mrb[76].mxu0 %v9170_v54  ;;  %2519 = vmatmul.mubr.bf16.gmra.mrb[68].mxu1 %v9171_v1 }
 0x736   :  { %2526 = vmatprep.mubr.bf16.mxu1 %v9172_v11  ;;  %8961 = vmatprep.mubr.msk.bf16.mxu0 %vm721_vm4, %v9174_v10 }
 0x737   :  { %8958 = vmatpush3.bf16.msra.mxu0 %v2259_v40 }
 0x738   :  { %8959 = vmatprep.subr.bf16.mxu0 %v2260_v43 }
 0x73b   :  { %8960 = vmatpush3.bf16.msra.mxu0 %v2260_v43 }
 0x73d   :  { %2527 = vmatmul.mubr.bf16.gmra.mrb[72].mxu1 %v9175_v57 }
 0x73e   :  { %8962 = vmatmul.mubr.msk.bf16.vlgmr.msra.gmra.mrb[80].mxu0 %vm721_vm4, %v9176_v3  ;;  %2534 = vmatprep.mubr.bf16.mxu1 %v9177_v15 }
 0x73f   :  { %8965 = vmatprep.mubr.msk.bf16.mxu0 %vm721_vm4, %v9179_v62  ;;  %v2269_v32 = vpop.permute.xlu0 %2268  ;;  %v2264_v2 = vpop.permute.xlu1 %2263 }
 0x743   :  { %v2279_v16 = vpop.permute.xlu0 %2278  ;;  %v2274_v43 = vpop.permute.xlu1 %2273 }
 0x745   :  { %2535 = vmatmul.mubr.bf16.gmra.mrb[76].mxu1 %v9180_v59 }
 0x746   :  { %8966 = vmatmul.mubr.msk.bf16.gmra.mrb[84].mxu0 %vm721_vm4, %v9181_v22 }
 0x7f0   :  { %v8451_v26 = vpop.f32.mrb[64].mxu0 }
 0x7f1   :  { %v8452_v47 = vpop.f32.mrb[65].mxu0 }
 0x7f2   :  { %v8453_v28 = vadd.f32 %v8452_v47, %v8451_v26  ;;  %v8454_v34 = vpop.f32.mrb[66].mxu0 }
 0x7f3   :  { %v8455_v6 = vpop.f32.mrb[67].mxu0 }
 0x7f4   :  { %v8456_v42 = vadd.f32 %v8455_v6, %v8454_v34  ;;  %v2448_v61 = vadd.f32 %v8453_v28, %v2264_v2  ;;  %v2284_v2 = vpop.permute.xlu1 %2283 }
 0x7f6   :  { %v2451_v54 = vadd.f32 %v8456_v42, %v2269_v32  ;;  %v2289_v32 = vpop.permute.xlu0 %2288 }
 0x7f8   :  { %v8457_v49 = vpop.f32.mrb[68].mxu0 }
 0x7f9   :  { %v8458_v0 = vpop.f32.mrb[69].mxu0 }
 0x7fa   :  { %v8459_v23 = vadd.f32 %v8458_v0, %v8457_v49  ;;  %v8460_v29 = vpop.f32.mrb[70].mxu0 }
 0x7fb   :  { %v8461_v5 = vpop.f32.mrb[71].mxu0 }
 0x7fc   :  { %v8462_v44 = vadd.f32 %v8461_v5, %v8460_v29  ;;  %v2456_v59 = vadd.f32 %v8459_v23, %v2274_v43 }
 0x7fe   :  { %v2459_v49 = vadd.f32 %v8462_v44, %v2279_v16 }
 0x800   :  { %v8463_v9 = vpop.f32.mrb[72].mxu0  ;;  %v8491_v20 = vpop.f32.mrb[64].mxu1 }
 0x801   :  { %v8464_v12 = vpop.f32.mrb[73].mxu0  ;;  %v8492_v60 = vpop.f32.mrb[65].mxu1 }
 0x802   :  { %v8465_v45 = vadd.f32 %v8464_v12, %v8463_v9  ;;  %v8493_v33 = vadd.f32 %v8492_v60, %v8491_v20  ;;  %v8466_v13 = vpop.f32.mrb[74].mxu0  ;;  %v8494_v4 = vpop.f32.mrb[66].mxu1 }
 0x803   :  { %v8467_v56 = vpop.f32.mrb[75].mxu0  ;;  %v8495_v8 = vpop.f32.mrb[67].mxu1 }
 0x804   :  { %v8468_v1 = vadd.f32 %v8467_v56, %v8466_v13  ;;  %v8496_v40 = vadd.f32 %v8495_v8, %v8494_v4  ;;  %v2513_v11 = vadd.f32 %v8493_v33, %v2448_v61  ;;  %v2464_v60 = vadd.f32 %v8465_v45, %v2284_v2 }
 0x806   :  { %v2516_v10 = vadd.f32 %v8496_v40, %v2451_v54  ;;  %v2467_v4 = vadd.f32 %v8468_v1, %v2289_v32 }
 0x808   :  { %v8469_v57 = vpop.f32.mrb[76].mxu0  ;;  %v8497_v3 = vpop.f32.mrb[68].mxu1 }
 0x809   :  { %v8470_v15 = vpop.f32.mrb[77].mxu0  ;;  %v8498_v62 = vpop.f32.mrb[69].mxu1 }
 0x80a   :  { %v8471_v22 = vadd.f32 %v8470_v15, %v8469_v57  ;;  %v8499_v26 = vadd.f32 %v8498_v62, %v8497_v3  ;;  %v8472_v47 = vpop.f32.mrb[78].mxu0  ;;  %v8500_v28 = vpop.f32.mrb[70].mxu1 }
 0x80b   :  { %v8473_v34 = vpop.f32.mrb[79].mxu0  ;;  %v8501_v6 = vpop.f32.mrb[71].mxu1 }
 0x80c   :  { %v8474_v0 = vadd.f32 %v8473_v34, %v8472_v47  ;;  %v8502_v42 = vadd.f32 %v8501_v6, %v8500_v28  ;;  %v2521_v29 = vadd.f32 %v8499_v26, %v2456_v59  ;;  %v2299_v62 = vpop.permute.xlu0 %2298 }
 0x80e   :  { %v2524_v5 = vadd.f32 %v8502_v42, %v2459_v49  ;;  %v2475_v49 = vadd.f32 %v8474_v0, %v2299_v62 }
 0x810   :  { %v8503_v9 = vpop.f32.mrb[72].mxu1 }
 0x811   :  { %v8963_v20 = vpop.f32.mrb[80].mxu0  ;;  %v8504_v12 = vpop.f32.mrb[73].mxu1 }
 0x812   :  { %v2586_v61 = vadd.f32 %v8963_v20, %v2521_v29  ;;  %v8505_v33 = vadd.f32 %v8504_v12, %v8503_v9  ;;  %v2577_v23 = vpop.f32.mrb[81].mxu0  ;;  %v8506_v13 = vpop.f32.mrb[74].mxu1 }
 0x813   :  { %v2578_v56 = vadd.f32 %v2577_v23, %v2513_v11  ;;  %v8964_v8 = vpop.f32.mrb[82].mxu0  ;;  %v8507_v54 = vpop.f32.mrb[75].mxu1  ;;  %v7703_v23 = vld [vmem:[%s11347_s5 + $0x108] sm:$0xff] }
 0x814   :  { %v10752_v44 = vadd.f32 %v2586_v61, %v1496_v7  ;;  %v2589_v40 = vadd.f32 %v8964_v8, %v2524_v5  ;;  %v8508_v16 = vadd.f32 %v8507_v54, %v8506_v13  ;;  %v2580_v43 = vpop.f32.mrb[83].mxu0  ;;  %v2529_v57 = vadd.f32 %v8505_v33, %v2464_v60  ;;  %v2294_v11 = vpop.permute.xlu1 %2293  ;;  %v7702_v13 = vld [vmem:[%s11347_s5 + $0x100] sm:$0xff]  ;;  %v7707_v8 = vld [vmem:[%s11347_s5 + $0x128] sm:$0xff] }
 0x815   :  { %v2581_v3 = vadd.f32 %v2580_v43, %v2516_v10  ;;  %v10765_v7 = vadd.f32 %v2578_v56, %v1494_v27  ;;  %v7704_v56 = vld [vmem:[%s11347_s5 + $0x110] sm:$0xff]  ;;  %v7706_v54 = vld [vmem:[%s11347_s5 + $0x120] sm:$0xff] }
 0x816   :  { %v10756_v45 = vadd.f32 %v2589_v40, %v1497_v51  ;;  %v2532_v15 = vadd.f32 %v8508_v16, %v2467_v4  ;;  %v2618_v48 = vmax.f32 %v10752_v44, 0.0  ;;  %v2472_v51 = vadd.f32 %v8471_v22, %v2294_v11  ;;  %v7705_v4 = vld [vmem:[%s11347_s5 + $0x118] sm:$0xff]  ;;  %v7708_v16 = vld [vmem:[%s11347_s5 + $0x130] sm:$0xff] }
 0x817   :  { %v10760_v1 = vadd.f32 %v2581_v3, %v1495_v21  ;;  %v2616_v42 = vmax.f32 %v10765_v7, 0.0  ;;  %v7709_v40 = vld [vmem:[%s11347_s5 + $0x138] sm:$0xff] }
 0x818   :  { %v2619_v59 = vmax.f32 %v10756_v45, 0.0  ;;  %v8509_v10 = vpop.f32.mrb[76].mxu1 }
 0x819   :  { %v8967_v26 = vpop.f32.mrb[84].mxu0  ;;  %v8510_v55 = vpop.f32.mrb[77].mxu1  ;;  %v2617_v21 = vmax.f32 %v10760_v1, 0.0 }
 0x81a   :  { %v10772_v63 = vpack.c.bf16 %v2619_v59, %v2618_v48  ;;  %v8511_v47 = vadd.f32 %v8510_v55, %v8509_v10  ;;  %v2593_v28 = vpop.f32.mrb[85].mxu0  ;;  %v8512_v34 = vpop.f32.mrb[78].mxu1 }
 0x81b   :  { %v2594_v14 = vadd.f32 %v2593_v28, %v2529_v57  ;;  %v8968_v27 = vpop.f32.mrb[86].mxu0  ;;  %v8513_v6 = vpop.f32.mrb[79].mxu1  ;;  %v10784_v2 = vpack.c.bf16 %v2617_v21, %v2616_v42 }
 0x81c   :  { %v2537_v29 = vadd.f32 %v8511_v47, %v2472_v51  ;;  %v8514_v5 = vadd.f32 %v8513_v6, %v8512_v34  ;;  %v2596_v22 = vpop.f32.mrb[87].mxu0  ;;  %2668 = vrot.lane.b32.xlu0 %v10772_v63, %s9868_s10  ;;  %2708 = vrot.lane.b32.xlu1 %v10772_v63, %s9867_s18 }
 0x81d   :  { %v2597_v32 = vadd.f32 %v2596_v22, %v2532_v15  ;;  %v10805_v50 = vadd.f32 %v2594_v14, %v1498_v37  ;;  %v9192_v37 = vld [vmem:[#allocation5 + $0x28c] ss:$20 sps:$4 sm:$0xff]  }
 0x81e   :  { %v2602_v9 = vadd.f32 %v8967_v26, %v2537_v29  ;;  %v2540_v0 = vadd.f32 %v8514_v5, %v2475_v49  ;;  %3075 = vmatprep.mubr.bf16.mxu0 %v9192_v37 }
 0x81f   :  { %v10800_v61 = vadd.f32 %v2597_v32, %v1499_v36  ;;  %v2620_v35 = vmax.f32 %v10805_v50, 0.0  ;;  %v9184_v36 = vld [vmem:[#allocation5 + $0x284] ss:$20 sps:$4 sm:$0xff]  }
 0x820   :  { %v10788_v20 = vadd.f32 %v2602_v9, %v1500_v19  ;;  %v2605_v12 = vadd.f32 %v8968_v27, %v2540_v0  ;;  %2666 = vrot.lane.b32.xlu0 %v10784_v2, %s9868_s10  ;;  %2706 = vrot.lane.b32.xlu1 %v10784_v2, %s9867_s18 }
 0x821   :  { %v2621_v53 = vmax.f32 %v10800_v61, 0.0  ;;  %3010 = vmatprep.mubr.bf16.mxu1 %v9184_v36  ;;  %v9239_v61 = vld [vmem:[%s11348_s6 + $0x8] sm:$0xff]  }
 0x822   :  { %v10796_v60 = vadd.f32 %v2605_v12, %v1501_v39  ;;  %v2622_v33 = vmax.f32 %v10788_v20, 0.0  ;;  %v9240_v20 = vld [vmem:[%s11348_s6 + $0x10] sm:$0xff]  }
 0x823   :  { %v10828_v39 = vpack.c.bf16 %v2621_v53, %v2620_v35 }
 0x824   :  { %v2623_v19 = vmax.f32 %v10796_v60, 0.0  ;;  %2766 = vrot.lane.b32.xlu0 %v10784_v2, %s9870_s20  ;;  %2726 = vrot.lane.b32.xlu1 %v10784_v2, %s9869_s17  ;;  %v9241_v60 = vld [vmem:[%s11348_s6 + $0x18] sm:$0xff]  }
 0x826   :  { %v10816_v52 = vpack.c.bf16 %v2623_v19, %v2622_v33 }
 0x828   :  { %2672 = vrot.lane.b32.xlu0 %v10816_v52, %s9868_s10  ;;  %2712 = vrot.lane.b32.xlu1 %v10816_v52, %s9867_s18 }
 0x82c   :  { %2670 = vrot.lane.b32.xlu0 %v10828_v39, %s9868_s10  ;;  %2710 = vrot.lane.b32.xlu1 %v10828_v39, %s9867_s18 }
 0x830   :  { %2728 = vrot.lane.b32.xlu0 %v10772_v63, %s9869_s17  ;;  %2686 = vrot.lane.b32.xlu1 %v10784_v2, %s9866_s19 }
 0x834   :  { %2688 = vrot.lane.b32.xlu0 %v10772_v63, %s9866_s19  ;;  %2768 = vrot.lane.b32.xlu1 %v10772_v63, %s9870_s20 }
 0x838   :  { %2770 = vrot.lane.b32.xlu0 %v10828_v39, %s9870_s20  ;;  %2730 = vrot.lane.b32.xlu1 %v10828_v39, %s9869_s17 }
 0x83c   :  { %2732 = vrot.lane.b32.xlu0 %v10816_v52, %s9869_s17  ;;  %2690 = vrot.lane.b32.xlu1 %v10828_v39, %s9866_s19 }
 0x840   :  { %2692 = vrot.lane.b32.xlu0 %v10816_v52, %s9866_s19  ;;  %2772 = vrot.lane.b32.xlu1 %v10816_v52, %s9870_s20 }
 0x844   :  { %2746 = vrot.lane.b32.xlu0 %v10784_v2, %s9871_s0  ;;  %2786 = vrot.lane.b32.xlu1 %v10784_v2, %s9872_s22 }
 0x848   :  { %2748 = vrot.lane.b32.xlu0 %v10772_v63, %s9871_s0  ;;  %2788 = vrot.lane.b32.xlu1 %v10772_v63, %s9872_s22 }
 0x84c   :  { %2750 = vrot.lane.b32.xlu0 %v10828_v39, %s9871_s0  ;;  %2790 = vrot.lane.b32.xlu1 %v10828_v39, %s9872_s22 }
 0x850   :  { %2752 = vrot.lane.b32.xlu0 %v10816_v52, %s9871_s0  ;;  %2792 = vrot.lane.b32.xlu1 %v10816_v52, %s9872_s22 }
 0x854   :  { %2808 = vrot.lane.b32.xlu0 %v10772_v63, %s9873_s23  ;;  %2806 = vrot.lane.b32.xlu1 %v10784_v2, %s9873_s23 }
 0x858   :  { %2812 = vrot.lane.b32.xlu0 %v10816_v52, %s9873_s23  ;;  %2810 = vrot.lane.b32.xlu1 %v10828_v39, %s9873_s23 }
 0x85c   :  { %2833 = vperm.xlu0 %9064, %v7703_v23   ;;  %2828 = vperm.xlu1 %9065, %v7702_v13  }
 0x860   :  { %2843 = vperm.xlu0 %9064, %v7705_v4   ;;  %2838 = vperm.xlu1 %9065, %v7704_v56  }
 0x864   :  { %2853 = vperm.xlu0 %9064, %v7707_v8   ;;  %2848 = vperm.xlu1 %9065, %v7706_v54  }
 0x868   :  { %2863 = vperm.xlu0 %9064, %v7709_v40   ;;  %2858 = vperm.xlu1 %9065, %v7708_v16  }
 0x88e   :  { %v2669_v43 = vpop.permute.xlu0 %2668  ;;  %v2709_v57 = vpop.permute.xlu1 %2708 }
 0x88f   :  { %v2723_v10 = vmul.bf16 %v2709_v57, %v10058_v24  ;;  %v2683_v47 = vmul.bf16 %v2669_v43, %v10066_v30 }
 0x892   :  { %v2667_v3 = vpop.permute.xlu0 %2666  ;;  %v2707_v15 = vpop.permute.xlu1 %2706 }
 0x893   :  { %v2682_v62 = vmul.bf16 %v2667_v3, %v10066_v30  ;;  %v2722_v11 = vmul.bf16 %v2707_v15, %v10058_v24 }
 0x895   :  { %8523 = vmatprep.subr.bf16.mxu1 %v2722_v11 }
 0x896   :  { %v2767_v26 = vpop.permute.xlu0 %2766  ;;  %8524 = vmatpush3.bf16.msra.mxu1 %v2682_v62  ;;  %v2727_v55 = vpop.permute.xlu1 %2726  ;;  %v9182_v62 = vld [vmem:[#allocation5 + $0x280] ss:$20 sps:$4 sm:$0xff]  }
 0x897   :  { %v2782_v51 = vmul.bf16 %v2767_v26, %v10076_v41  ;;  %8525 = vmatprep.subr.bf16.mxu1 %v2723_v10  ;;  %v2742_v9 = vmul.bf16 %v2727_v55, %v10069_v31  ;;  %v9185_v10 = vld [vmem:[#allocation5 + $0x2ac] ss:$20 sps:$4 sm:$0xff]  }
 0x899   :  { %8563 = vmatprep.subr.bf16.mxu0 %v2782_v51 }
 0x89a   :  { %8526 = vmatpush3.bf16.msra.mxu1 %v2683_v47  ;;  %8564 = vmatpush3.bf16.msra.mxu0 %v10784_v2  ;;  %v2673_v28 = vpop.permute.xlu0 %2672  ;;  %v2713_v34 = vpop.permute.xlu1 %2712 }
 0x89b   :  { %v2725_v29 = vmul.bf16 %v2713_v34, %v10058_v24  ;;  %v2685_v32 = vmul.bf16 %v2673_v28, %v10066_v30 }
 0x89e   :  { %v2671_v14 = vpop.permute.xlu0 %2670  ;;  %v2711_v27 = vpop.permute.xlu1 %2710 }
 0x89f   :  { %v2684_v6 = vmul.bf16 %v2671_v14, %v10066_v30  ;;  %v2724_v49 = vmul.bf16 %v2711_v27, %v10058_v24  ;;  %v9187_v14 = vld [vmem:[#allocation5 + $0x2a8] ss:$20 sps:$4 sm:$0xff]  }
 0x8a1   :  { %8527 = vmatprep.subr.bf16.mxu1 %v2724_v49 }
 0x8a2   :  { %v2729_v5 = vpop.permute.xlu0 %2728  ;;  %8528 = vmatpush3.bf16.msra.mxu1 %v2684_v6  ;;  %v2687_v22 = vpop.permute.xlu1 %2686  ;;  %v9188_v6 = vld [vmem:[#allocation5 + $0x2d4] ss:$20 sps:$4 sm:$0xff]  }
 0x8a3   :  { %8529 = vmatprep.subr.bf16.mxu1 %v2725_v29  ;;  %v2702_v36 = vmul.bf16 %v2687_v22, %v10061_v25  ;;  %v2743_v37 = vmul.bf16 %v2729_v5, %v10069_v31 }
 0x8a6   :  { %v2689_v2 = vpop.permute.xlu0 %2688  ;;  %8530 = vmatpush3.bf16.msra.mxu1 %v2685_v32  ;;  %v2769_v0 = vpop.permute.xlu1 %2768 }
 0x8a7   :  { %v2783_v12 = vmul.bf16 %v2769_v0, %v10076_v41  ;;  %8531 = vmatprep.subr.bf16.mxu1 %v2742_v9  ;;  %v2703_v56 = vmul.bf16 %v2689_v2, %v10061_v25  ;;  %v9190_v2 = vld [vmem:[#allocation5 + $0x288] ss:$20 sps:$4 sm:$0xff]   ;;  %v9193_v0 = vld [vmem:[#allocation5 + $0x2d0] ss:$20 sps:$4 sm:$0xff]  }
 0x8a9   :  { %8565 = vmatprep.subr.bf16.mxu0 %v2783_v12 }
 0x8aa   :  { %v2771_v23 = vpop.permute.xlu0 %2770  ;;  %8532 = vmatpush3.bf16.msra.mxu1 %v2702_v36  ;;  %8566 = vmatpush3.bf16.msra.mxu0 %v10772_v63  ;;  %v2731_v13 = vpop.permute.xlu1 %2730  ;;  %v9194_v36 = vld [vmem:[#allocation5 + $0x2fc] ss:$20 sps:$4 sm:$0xff]  }
 0x8ab   :  { %v2784_v4 = vmul.bf16 %v2771_v23, %v10076_v41  ;;  %8533 = vmatprep.subr.bf16.mxu1 %v2743_v37  ;;  %v2744_v8 = vmul.bf16 %v2731_v13, %v10069_v31  ;;  %v9196_v13 = vld [vmem:[#allocation5 + $0x2b4] ss:$20 sps:$4 sm:$0xff]  }
 0x8ad   :  { %8567 = vmatprep.subr.bf16.mxu0 %v2784_v4 }
 0x8ae   :  { %v2733_v54 = vpop.permute.xlu0 %2732  ;;  %8534 = vmatpush3.bf16.msra.mxu1 %v2703_v56  ;;  %8568 = vmatpush3.bf16.msra.mxu0 %v10828_v39  ;;  %v2691_v40 = vpop.permute.xlu1 %2690 }
 0x8af   :  { %v2704_v16 = vmul.bf16 %v2691_v40, %v10061_v25  ;;  %8535 = vmatprep.subr.bf16.mxu1 %v2744_v8  ;;  %v2745_v43 = vmul.bf16 %v2733_v54, %v10069_v31  ;;  %v9198_v8 = vld [vmem:[#allocation5 + $0x2f8] ss:$20 sps:$4 sm:$0xff]   ;;  %v9199_v54 = vld [vmem:[#allocation5 + $0x2b0] ss:$20 sps:$4 sm:$0xff]  }
 0x8b2   :  { %v2693_v63 = vpop.permute.xlu0 %2692  ;;  %8536 = vmatpush3.bf16.msra.mxu1 %v2704_v16  ;;  %v2773_v57 = vpop.permute.xlu1 %2772  ;;  %v9200_v16 = vld [vmem:[#allocation5 + $0x2dc] ss:$20 sps:$4 sm:$0xff]  }
 0x8b3   :  { %v2705_v3 = vmul.bf16 %v2693_v63, %v10061_v25  ;;  %v2785_v15 = vmul.bf16 %v2773_v57, %v10076_v41  ;;  %8537 = vmatprep.subr.bf16.mxu1 %v2745_v43  ;;  %v9202_v43 = vld [vmem:[#allocation5 + $0x290] ss:$20 sps:$4 sm:$0xff]  }
 0x8b5   :  { %8569 = vmatprep.subr.bf16.mxu0 %v2785_v15  ;;  %v9204_v15 = vld [vmem:[#allocation5 + $0x2b8] ss:$20 sps:$4 sm:$0xff]  }
 0x8b6   :  { %v2747_v11 = vpop.permute.xlu0 %2746  ;;  %8538 = vmatpush3.bf16.msra.mxu1 %v2705_v3  ;;  %8570 = vmatpush3.bf16.msra.mxu0 %v10816_v52  ;;  %v2787_v39 = vpop.permute.xlu1 %2786  ;;  %v9203_v3 = vld [vmem:[#allocation5 + $0x2d8] ss:$20 sps:$4 sm:$0xff]  }
 0x8b7   :  { %v2762_v26 = vmul.bf16 %v2747_v11, %v10073_v38  ;;  %v2802_v55 = vmul.bf16 %v2787_v39, %v10080_v46  ;;  %v9207_v11 = vld [vmem:[#allocation5 + $0x2e0] ss:$20 sps:$4 sm:$0xff]  }
 0x8b8   :  { %v9208_v39 = vld [vmem:[#allocation5 + $0x300] ss:$20 sps:$4 sm:$0xff]  }
 0x8b9   :  { %3011 = vmatmul.mubr.bf16.vlgmr.msra.gmra.mrb[80].mxu1 %v9182_v62  ;;  %8571 = vmatprep.subr.bf16.mxu0 %v2802_v55  ;;  %v9205_v62 = vld [vmem:[#allocation5 + $0x304] ss:$20 sps:$4 sm:$0xff]  }
 0x8ba   :  { %v2749_v51 = vpop.permute.xlu0 %2748  ;;  %8572 = vmatpush3.bf16.msra.mxu0 %v2762_v26  ;;  %v2789_v47 = vpop.permute.xlu1 %2788  ;;  %3018 = vmatprep.mubr.bf16.mxu1 %v9185_v10  ;;  %v9209_v10 = vld [vmem:[#allocation5 + $0x308] ss:$20 sps:$4 sm:$0xff]  }
 0x8bb   :  { %v2763_v28 = vmul.bf16 %v2749_v51, %v10073_v38  ;;  %v2803_v34 = vmul.bf16 %v2789_v47, %v10080_v46 }
 0x8bd   :  { %8573 = vmatprep.subr.bf16.mxu0 %v2803_v34 }
 0x8be   :  { %v2751_v27 = vpop.permute.xlu0 %2750  ;;  %8574 = vmatpush3.bf16.msra.mxu0 %v2763_v28  ;;  %v2791_v52 = vpop.permute.xlu1 %2790 }
 0x8bf   :  { %v2764_v49 = vmul.bf16 %v2751_v27, %v10073_v38  ;;  %v2804_v29 = vmul.bf16 %v2791_v52, %v10080_v46 }
 0x8c1   :  { %3019 = vmatmul.mubr.bf16.gmra.mrb[84].mxu1 %v9187_v14  ;;  %8575 = vmatprep.subr.bf16.mxu0 %v2804_v29 }
 0x8c2   :  { %v2753_v5 = vpop.permute.xlu0 %2752  ;;  %8576 = vmatpush3.bf16.msra.mxu0 %v2764_v49  ;;  %v2793_v22 = vpop.permute.xlu1 %2792  ;;  %3026 = vmatprep.mubr.bf16.mxu1 %v9188_v6 }
 0x8c3   :  { %v2765_v32 = vmul.bf16 %v2753_v5, %v10073_v38  ;;  %v2805_v9 = vmul.bf16 %v2793_v22, %v10080_v46 }
 0x8c5   :  { %8577 = vmatprep.subr.bf16.mxu0 %v2805_v9 }
 0x8c6   :  { %8578 = vmatpush3.bf16.msra.mxu0 %v2765_v32  ;;  %v2807_v12 = vpop.permute.xlu1 %2806  ;;  %v2809_v37 = vpop.permute.xlu0 %2808 }
 0x8c7   :  { %v2822_v23 = vmul.bf16 %v2807_v12, %v10092_v58  ;;  %v2823_v4 = vmul.bf16 %v2809_v37, %v10092_v58 }
 0x8c9   :  { %3027 = vmatmul.mubr.bf16.gmra.mrb[88].mxu1 %v9193_v0  ;;  %3076 = vmatmul.mubr.bf16.vlgmr.msra.gmra.mrb[88].mxu0 %v9190_v2 }
 0x8ca   :  { %8969 = vmatprep.subr.bf16.mxu1 %v2822_v23  ;;  %3034 = vmatprep.mubr.bf16.mxu1 %v9194_v36  ;;  %v2811_v56 = vpop.permute.xlu1 %2810  ;;  %v2813_v63 = vpop.permute.xlu0 %2812 }
 0x8cb   :  { %8970 = vmatpush3.bf16.msra.mxu1 %v2822_v23  ;;  %3083 = vmatprep.mubr.bf16.mxu0 %v9196_v13  ;;  %v2824_v40 = vmul.bf16 %v2811_v56, %v10092_v58  ;;  %v2825_v57 = vmul.bf16 %v2813_v63, %v10092_v58 }
 0x8cc   :  { %8971 = vmatprep.subr.bf16.mxu1 %v2823_v4 }
 0x8cf   :  { %8972 = vmatpush3.bf16.msra.mxu1 %v2823_v4 }
 0x8d0   :  { %8973 = vmatprep.subr.bf16.mxu1 %v2824_v40 }
 0x8d1   :  { %3035 = vmatmul.mubr.bf16.gmra.mrb[92].mxu1 %v9198_v8  ;;  %3084 = vmatmul.mubr.bf16.gmra.mrb[92].mxu0 %v9199_v54 }
 0x8d2   :  { %3091 = vmatprep.mubr.bf16.mxu0 %v9200_v16  ;;  %8977 = vmatprep.mubr.msk.bf16.mxu1 %vm721_vm4, %v9202_v43 }
 0x8d3   :  { %8974 = vmatpush3.bf16.msra.mxu1 %v2824_v40 }
 0x8d4   :  { %8975 = vmatprep.subr.bf16.mxu1 %v2825_v57 }
 0x8d7   :  { %8976 = vmatpush3.bf16.msra.mxu1 %v2825_v57 }
 0x8d9   :  { %3092 = vmatmul.mubr.bf16.gmra.mrb[96].mxu0 %v9203_v3 }
 0x8da   :  { %8978 = vmatmul.mubr.msk.bf16.vlgmr.msra.gmra.mrb[96].mxu1 %vm721_vm4, %v9204_v15  ;;  %3099 = vmatprep.mubr.bf16.mxu0 %v9205_v62 }
 0x8db   :  { %8981 = vmatprep.mubr.msk.bf16.mxu1 %vm721_vm4, %v9207_v11  ;;  %v2834_v5 = vpop.permute.xlu0 %2833  ;;  %v2829_v22 = vpop.permute.xlu1 %2828 }
 0x8df   :  { %v2844_v63 = vpop.permute.xlu0 %2843  ;;  %v2839_v57 = vpop.permute.xlu1 %2838 }
 0x8e1   :  { %3100 = vmatmul.mubr.bf16.gmra.mrb[100].mxu0 %v9208_v39 }
 0x8e2   :  { %8982 = vmatmul.mubr.msk.bf16.gmra.mrb[100].mxu1 %vm721_vm4, %v9209_v10 }
 0x98c   :  { %v8539_v26 = vpop.f32.mrb[80].mxu1 }
 0x98d   :  { %v8540_v55 = vpop.f32.mrb[81].mxu1 }
 0x98e   :  { %v8541_v51 = vadd.f32 %v8540_v55, %v8539_v26  ;;  %v8542_v47 = vpop.f32.mrb[82].mxu1 }
 0x98f   :  { %v8543_v28 = vpop.f32.mrb[83].mxu1 }
 0x990   :  { %v8544_v34 = vadd.f32 %v8543_v28, %v8542_v47  ;;  %v3013_v12 = vadd.f32 %v8541_v51, %v2829_v22  ;;  %v2849_v22 = vpop.permute.xlu1 %2848 }
 0x992   :  { %v3016_v8 = vadd.f32 %v8544_v34, %v2834_v5  ;;  %v2854_v5 = vpop.permute.xlu0 %2853 }
 0x994   :  { %v8545_v14 = vpop.f32.mrb[84].mxu1 }
 0x995   :  { %v8546_v27 = vpop.f32.mrb[85].mxu1 }
 0x996   :  { %v8547_v52 = vadd.f32 %v8546_v27, %v8545_v14  ;;  %v8548_v6 = vpop.f32.mrb[86].mxu1 }
 0x997   :  { %v8549_v49 = vpop.f32.mrb[87].mxu1 }
 0x998   :  { %v8550_v29 = vadd.f32 %v8549_v49, %v8548_v6  ;;  %v3021_v39 = vadd.f32 %v8547_v52, %v2839_v57 }
 0x99a   :  { %v3024_v14 = vadd.f32 %v8550_v29, %v2844_v63 }
 0x99c   :  { %v8551_v32 = vpop.f32.mrb[88].mxu1  ;;  %v8579_v9 = vpop.f32.mrb[88].mxu0 }
 0x99d   :  { %v8552_v2 = vpop.f32.mrb[89].mxu1  ;;  %v8580_v0 = vpop.f32.mrb[89].mxu0 }
 0x99e   :  { %v8553_v36 = vadd.f32 %v8552_v2, %v8551_v32  ;;  %v8581_v37 = vadd.f32 %v8580_v0, %v8579_v9  ;;  %v8554_v23 = vpop.f32.mrb[90].mxu1  ;;  %v8582_v13 = vpop.f32.mrb[90].mxu0 }
 0x99f   :  { %v8555_v4 = vpop.f32.mrb[91].mxu1  ;;  %v8583_v56 = vpop.f32.mrb[91].mxu0 }
 0x9a0   :  { %v8556_v54 = vadd.f32 %v8555_v4, %v8554_v23  ;;  %v8584_v40 = vadd.f32 %v8583_v56, %v8582_v13  ;;  %v3078_v16 = vadd.f32 %v8581_v37, %v3013_v12  ;;  %v3029_v0 = vadd.f32 %v8553_v36, %v2849_v22  ;;  %v2859_v36 = vpop.permute.xlu1 %2858 }
 0x9a2   :  { %v3081_v43 = vadd.f32 %v8584_v40, %v3016_v8  ;;  %v3032_v8 = vadd.f32 %v8556_v54, %v2854_v5 }
 0x9a4   :  { %v8557_v3 = vpop.f32.mrb[92].mxu1  ;;  %v8585_v15 = vpop.f32.mrb[92].mxu0 }
 0x9a5   :  { %v8558_v62 = vpop.f32.mrb[93].mxu1  ;;  %v8586_v11 = vpop.f32.mrb[93].mxu0 }
 0x9a6   :  { %v8559_v10 = vadd.f32 %v8558_v62, %v8557_v3  ;;  %v8587_v26 = vadd.f32 %v8586_v11, %v8585_v15  ;;  %v8560_v55 = vpop.f32.mrb[94].mxu1  ;;  %v8588_v51 = vpop.f32.mrb[94].mxu0 }
 0x9a7   :  { %v8561_v47 = vpop.f32.mrb[95].mxu1  ;;  %v8589_v28 = vpop.f32.mrb[95].mxu0 }
 0x9a8   :  { %v8562_v27 = vadd.f32 %v8561_v47, %v8560_v55  ;;  %v8590_v34 = vadd.f32 %v8589_v28, %v8588_v51  ;;  %v3086_v6 = vadd.f32 %v8587_v26, %v3021_v39  ;;  %v2864_v39 = vpop.permute.xlu0 %2863  ;;  %v3037_v54 = vadd.f32 %v8559_v10, %v2859_v36  ;;  %v3759_v36 = vld [vmem:[%s11349_s7 + $0x8] sm:$0xff] }
 0x9aa   :  { %v3089_v49 = vadd.f32 %v8590_v34, %v3024_v14 }
 0x9ac   :  { %v8591_v32 = vpop.f32.mrb[96].mxu0 }
 0x9ad   :  { %v8979_v9 = vpop.f32.mrb[96].mxu1  ;;  %v8592_v2 = vpop.f32.mrb[97].mxu0 }
 0x9ae   :  { %v3151_v12 = vadd.f32 %v8979_v9, %v3086_v6  ;;  %v8593_v37 = vadd.f32 %v8592_v2, %v8591_v32  ;;  %v3142_v52 = vpop.f32.mrb[97].mxu1  ;;  %v8594_v23 = vpop.f32.mrb[98].mxu0  ;;  %v3040_v32 = vadd.f32 %v8562_v27, %v2864_v39  ;;  %v7741_v39 = vld [vmem:[%s11347_s5 + $0x178] sm:$0xff] }
 0x9af   :  { %v3143_v13 = vadd.f32 %v3142_v52, %v3078_v16  ;;  %v8980_v4 = vpop.f32.mrb[98].mxu1  ;;  %v8595_v56 = vpop.f32.mrb[99].mxu0 }
 0x9b0   :  { %v3154_v40 = vadd.f32 %v8980_v4, %v3089_v49  ;;  %v8596_v29 = vadd.f32 %v8595_v56, %v8594_v23  ;;  %v3145_v63 = vpop.f32.mrb[99].mxu1  ;;  %v3094_v57 = vadd.f32 %v8593_v37, %v3029_v0  ;;  %v3175_v15 = vmax.f32 %v3151_v12, 0.0 }
 0x9b1   :  { %v3146_v3 = vadd.f32 %v3145_v63, %v3081_v43  ;;  %v3173_v26 = vmax.f32 %v3143_v13, 0.0  ;;  %v7735_v63 = vld [vmem:[%s11347_s5 + $0x148] sm:$0xff] }
 0x9b2   :  { %v3176_v62 = vmax.f32 %v3154_v40, 0.0  ;;  %v3097_v11 = vadd.f32 %v8596_v29, %v3032_v8  ;;  %v9212_v40 = vld [vmem:[#allocation5 + $0x324] ss:$20 sps:$4 sm:$0xff]   ;;  %v9220_v29 = vld [vmem:[#allocation5 + $0x32c] ss:$20 sps:$4 sm:$0xff]  }
 0x9b3   :  { %v3174_v55 = vmax.f32 %v3146_v3, 0.0  ;;  %3567 = vmatprep.mubr.bf16.mxu0 %v9212_v40  ;;  %3632 = vmatprep.mubr.bf16.mxu1 %v9220_v29  ;;  %v7737_v3 = vld [vmem:[%s11347_s5 + $0x158] sm:$0xff] }
 0x9b4   :  { %v10942_v51 = vpack.c.bf16 %v3176_v62, %v3175_v15  ;;  %v8597_v47 = vpop.f32.mrb[100].mxu0  ;;  %v7736_v15 = vld [vmem:[%s11347_s5 + $0x150] sm:$0xff]  ;;  %v7739_v62 = vld [vmem:[%s11347_s5 + $0x168] sm:$0xff] }
 0x9b5   :  { %v10944_v28 = vpack.c.bf16 %v3174_v55, %v3173_v26  ;;  %v8983_v16 = vpop.f32.mrb[100].mxu1  ;;  %v8598_v14 = vpop.f32.mrb[101].mxu0  ;;  %v7740_v26 = vld [vmem:[%s11347_s5 + $0x170] sm:$0xff]  ;;  %v3758_v55 = vld [vmem:[%s11349_s7] sm:$0xff] }
 0x9b6   :  { %v8599_v34 = vadd.f32 %v8598_v14, %v8597_v47  ;;  %v3158_v6 = vpop.f32.mrb[101].mxu1  ;;  %3225 = vrot.lane.b32.xlu0 %v10942_v51, %s9868_s10  ;;  %3265 = vrot.lane.b32.xlu1 %v10942_v51, %s9867_s18  ;;  %v8600_v43 = vpop.f32.mrb[102].mxu0  ;;  %v3760_v47 = vld [vmem:[%s11349_s7 + $0x10] sm:$0xff]  ;;  %v3762_v14 = vld [vmem:[%s11349_s7 + $0x20] sm:$0xff] }
 0x9b7   :  { %v3159_v49 = vadd.f32 %v3158_v6, %v3094_v57  ;;  %v8984_v5 = vpop.f32.mrb[102].mxu1  ;;  %v8601_v22 = vpop.f32.mrb[103].mxu0  ;;  %v7734_v57 = vld [vmem:[%s11347_s5 + $0x140] sm:$0xff] }
 0x9b8   :  { %v3102_v9 = vadd.f32 %v8599_v34, %v3037_v54  ;;  %v8602_v2 = vadd.f32 %v8601_v22, %v8600_v43  ;;  %v3161_v0 = vpop.f32.mrb[103].mxu1  ;;  %v3763_v54 = vld [vmem:[%s11349_s7 + $0x28] sm:$0xff] }
 0x9b9   :  { %v3162_v12 = vadd.f32 %v3161_v0, %v3097_v11  ;;  %v3177_v10 = vmax.f32 %v3159_v49, 0.0  ;;  %v7738_v11 = vld [vmem:[%s11347_s5 + $0x160] sm:$0xff] }
 0x9ba   :  { %v3167_v37 = vadd.f32 %v8983_v16, %v3102_v9  ;;  %v3105_v52 = vadd.f32 %v8602_v2, %v3040_v32  ;;  %3223 = vrot.lane.b32.xlu0 %v10944_v28, %s9868_s10  ;;  %3263 = vrot.lane.b32.xlu1 %v10944_v28, %s9867_s18  ;;  %v3761_v16 = vld [vmem:[%s11349_s7 + $0x18] sm:$0xff] }
 0x9bb   :  { %v3178_v23 = vmax.f32 %v3162_v12, 0.0 }
 0x9bc   :  { %v3170_v13 = vadd.f32 %v8984_v5, %v3105_v52  ;;  %v3179_v56 = vmax.f32 %v3167_v37, 0.0 }
 0x9bd   :  { %v10954_v4 = vpack.c.bf16 %v3178_v23, %v3177_v10 }
 0x9be   :  { %v3180_v8 = vmax.f32 %v3170_v13, 0.0  ;;  %3323 = vrot.lane.b32.xlu0 %v10944_v28, %s9870_s20  ;;  %3283 = vrot.lane.b32.xlu1 %v10944_v28, %s9869_s17 }
 0x9c0   :  { %v10960_v27 = vpack.c.bf16 %v3180_v8, %v3179_v56 }
 0x9c2   :  { %3229 = vrot.lane.b32.xlu0 %v10960_v27, %s9868_s10  ;;  %3269 = vrot.lane.b32.xlu1 %v10960_v27, %s9867_s18 }
 0x9c6   :  { %3227 = vrot.lane.b32.xlu0 %v10954_v4, %s9868_s10  ;;  %3267 = vrot.lane.b32.xlu1 %v10954_v4, %s9867_s18 }
 0x9ca   :  { %3285 = vrot.lane.b32.xlu0 %v10942_v51, %s9869_s17  ;;  %3243 = vrot.lane.b32.xlu1 %v10944_v28, %s9866_s19 }
 0x9ce   :  { %3245 = vrot.lane.b32.xlu0 %v10942_v51, %s9866_s19  ;;  %3325 = vrot.lane.b32.xlu1 %v10942_v51, %s9870_s20 }
 0x9d2   :  { %3327 = vrot.lane.b32.xlu0 %v10954_v4, %s9870_s20  ;;  %3287 = vrot.lane.b32.xlu1 %v10954_v4, %s9869_s17 }
 0x9d6   :  { %3289 = vrot.lane.b32.xlu0 %v10960_v27, %s9869_s17  ;;  %3247 = vrot.lane.b32.xlu1 %v10954_v4, %s9866_s19 }
 0x9da   :  { %3249 = vrot.lane.b32.xlu0 %v10960_v27, %s9866_s19  ;;  %3329 = vrot.lane.b32.xlu1 %v10960_v27, %s9870_s20 }
 0x9de   :  { %3303 = vrot.lane.b32.xlu0 %v10944_v28, %s9871_s0  ;;  %3343 = vrot.lane.b32.xlu1 %v10944_v28, %s9872_s22 }
 0x9e2   :  { %3305 = vrot.lane.b32.xlu0 %v10942_v51, %s9871_s0  ;;  %3345 = vrot.lane.b32.xlu1 %v10942_v51, %s9872_s22 }
 0x9e6   :  { %3307 = vrot.lane.b32.xlu0 %v10954_v4, %s9871_s0  ;;  %3347 = vrot.lane.b32.xlu1 %v10954_v4, %s9872_s22 }
 0x9ea   :  { %3309 = vrot.lane.b32.xlu0 %v10960_v27, %s9871_s0  ;;  %3349 = vrot.lane.b32.xlu1 %v10960_v27, %s9872_s22 }
 0x9ee   :  { %3365 = vrot.lane.b32.xlu0 %v10942_v51, %s9873_s23  ;;  %3363 = vrot.lane.b32.xlu1 %v10944_v28, %s9873_s23 }
 0x9f2   :  { %3369 = vrot.lane.b32.xlu0 %v10960_v27, %s9873_s23  ;;  %3367 = vrot.lane.b32.xlu1 %v10954_v4, %s9873_s23 }
 0x9f6   :  { %3390 = vperm.xlu0 %9064, %v7735_v63   ;;  %3385 = vperm.xlu1 %9065, %v7734_v57  }
 0x9fa   :  { %3400 = vperm.xlu0 %9064, %v7737_v3   ;;  %3395 = vperm.xlu1 %9065, %v7736_v15  }
 0x9fe   :  { %3410 = vperm.xlu0 %9064, %v7739_v62   ;;  %3405 = vperm.xlu1 %9065, %v7738_v11  }
 0xa02   :  { %3420 = vperm.xlu0 %9064, %v7741_v39   ;;  %3415 = vperm.xlu1 %9065, %v7740_v26  }
 0xa06   :  { %3768 = vperm.xlu0 %9064, %v3758_v55   ;;  %3773 = vperm.xlu1 %9065, %v3759_v36  }
 0xa0a   :  { %3778 = vperm.xlu0 %9064, %v3760_v47   ;;  %3783 = vperm.xlu1 %9065, %v3761_v16  }
 0xa0e   :  { %3788 = vperm.xlu0 %9064, %v3762_v14   ;;  %3793 = vperm.xlu1 %9065, %v3763_v54  }
 0xa28   :  { %v3226_v34 = vpop.permute.xlu0 %3225  ;;  %v3266_v6 = vpop.permute.xlu1 %3265 }
 0xa29   :  { %v3280_v32 = vmul.bf16 %v3266_v6, %v10058_v24  ;;  %v3240_v12 = vmul.bf16 %v3226_v34, %v10066_v30 }
 0xa2c   :  { %v3224_v43 = vpop.permute.xlu0 %3223  ;;  %v3264_v49 = vpop.permute.xlu1 %3263 }
 0xa2d   :  { %v3239_v5 = vmul.bf16 %v3224_v43, %v10066_v30  ;;  %v3279_v22 = vmul.bf16 %v3264_v49, %v10058_v24  ;;  %v9210_v43 = vld [vmem:[#allocation5 + $0x320] ss:$20 sps:$4 sm:$0xff]  }
 0xa2f   :  { %8611 = vmatprep.subr.bf16.mxu0 %v3279_v22 }
 0xa30   :  { %v3324_v9 = vpop.permute.xlu0 %3323  ;;  %8612 = vmatpush3.bf16.msra.mxu0 %v3239_v5  ;;  %v3284_v2 = vpop.permute.xlu1 %3283  ;;  %v9213_v5 = vld [vmem:[#allocation5 + $0x34c] ss:$20 sps:$4 sm:$0xff]  }
 0xa31   :  { %v3339_v0 = vmul.bf16 %v3324_v9, %v10076_v41  ;;  %8613 = vmatprep.subr.bf16.mxu0 %v3280_v32  ;;  %v3299_v57 = vmul.bf16 %v3284_v2, %v10069_v31  ;;  %v9215_v2 = vld [vmem:[#allocation5 + $0x348] ss:$20 sps:$4 sm:$0xff]  }
 0xa33   :  { %8651 = vmatprep.subr.bf16.mxu1 %v3339_v0 }
 0xa34   :  { %8614 = vmatpush3.bf16.msra.mxu0 %v3240_v12  ;;  %8652 = vmatpush3.bf16.msra.mxu1 %v10944_v28  ;;  %v3230_v37 = vpop.permute.xlu0 %3229  ;;  %v3270_v52 = vpop.permute.xlu1 %3269  ;;  %v9216_v12 = vld [vmem:[#allocation5 + $0x374] ss:$20 sps:$4 sm:$0xff]  }
 0xa35   :  { %v3282_v8 = vmul.bf16 %v3270_v52, %v10058_v24  ;;  %v3242_v63 = vmul.bf16 %v3230_v37, %v10066_v30 }
 0xa38   :  { %v3228_v10 = vpop.permute.xlu0 %3227  ;;  %v3268_v23 = vpop.permute.xlu1 %3267 }
 0xa39   :  { %v3241_v13 = vmul.bf16 %v3228_v10, %v10066_v30  ;;  %v3281_v56 = vmul.bf16 %v3268_v23, %v10058_v24 }
 0xa3b   :  { %8615 = vmatprep.subr.bf16.mxu0 %v3281_v56 }
 0xa3c   :  { %v3286_v40 = vpop.permute.xlu0 %3285  ;;  %8616 = vmatpush3.bf16.msra.mxu0 %v3241_v13  ;;  %v3244_v29 = vpop.permute.xlu1 %3243 }
 0xa3d   :  { %8617 = vmatprep.subr.bf16.mxu0 %v3282_v8  ;;  %v3259_v62 = vmul.bf16 %v3244_v29, %v10061_v25  ;;  %v3300_v11 = vmul.bf16 %v3286_v40, %v10069_v31  ;;  %v9218_v8 = vld [vmem:[#allocation5 + $0x328] ss:$20 sps:$4 sm:$0xff]   ;;  %v9221_v40 = vld [vmem:[#allocation5 + $0x370] ss:$20 sps:$4 sm:$0xff]  }
 0xa40   :  { %v3246_v28 = vpop.permute.xlu0 %3245  ;;  %8618 = vmatpush3.bf16.msra.mxu0 %v3242_v63  ;;  %v3326_v3 = vpop.permute.xlu1 %3325  ;;  %v9222_v63 = vld [vmem:[#allocation5 + $0x39c] ss:$20 sps:$4 sm:$0xff]  }
 0xa41   :  { %v3340_v15 = vmul.bf16 %v3326_v3, %v10076_v41  ;;  %8619 = vmatprep.subr.bf16.mxu0 %v3299_v57  ;;  %v3260_v26 = vmul.bf16 %v3246_v28, %v10061_v25  ;;  %v9224_v3 = vld [vmem:[#allocation5 + $0x354] ss:$20 sps:$4 sm:$0xff]  }
 0xa43   :  { %8653 = vmatprep.subr.bf16.mxu1 %v3340_v15 }
 0xa44   :  { %v3328_v24 = vpop.permute.xlu0 %3327  ;;  %8620 = vmatpush3.bf16.msra.mxu0 %v3259_v62  ;;  %8654 = vmatpush3.bf16.msra.mxu1 %v10942_v51  ;;  %v3288_v39 = vpop.permute.xlu1 %3287  ;;  %v9227_v62 = vld [vmem:[#allocation5 + $0x350] ss:$20 sps:$4 sm:$0xff]  }
 0xa45   :  { %v3341_v30 = vmul.bf16 %v3328_v24, %v10076_v41  ;;  %8621 = vmatprep.subr.bf16.mxu0 %v3300_v11  ;;  %v3301_v55 = vmul.bf16 %v3288_v39, %v10069_v31  ;;  %v9228_v24 = vld [vmem:[#allocation5 + $0x37c] ss:$20 sps:$4 sm:$0xff]  }
 0xa46   :  { %v9230_v39 = vld [vmem:[#allocation5 + $0x330] ss:$20 sps:$4 sm:$0xff]  }
 0xa47   :  { %8655 = vmatprep.subr.bf16.mxu1 %v3341_v30 }
 0xa48   :  { %v3290_v36 = vpop.permute.xlu0 %3289  ;;  %8622 = vmatpush3.bf16.msra.mxu0 %v3260_v26  ;;  %8656 = vmatpush3.bf16.msra.mxu1 %v10954_v4  ;;  %v3248_v47 = vpop.permute.xlu1 %3247 }
 0xa49   :  { %v3261_v16 = vmul.bf16 %v3248_v47, %v10061_v25  ;;  %8623 = vmatprep.subr.bf16.mxu0 %v3301_v55  ;;  %v3302_v14 = vmul.bf16 %v3290_v36, %v10069_v31  ;;  %v9231_v55 = vld [vmem:[#allocation5 + $0x378] ss:$20 sps:$4 sm:$0xff]  }
 0xa4a   :  { %v9232_v36 = vld [vmem:[#allocation5 + $0x358] ss:$20 sps:$4 sm:$0xff]  }
 0xa4b   :  { %v9233_v47 = vld [vmem:[#allocation5 + $0x3a4] ss:$20 sps:$4 sm:$0xff]  }
 0xa4c   :  { %v3250_v51 = vpop.permute.xlu0 %3249  ;;  %8624 = vmatpush3.bf16.msra.mxu0 %v3261_v16  ;;  %v3330_v54 = vpop.permute.xlu1 %3329  ;;  %v9235_v16 = vld [vmem:[#allocation5 + $0x380] ss:$20 sps:$4 sm:$0xff]  }
 0xa4d   :  { %v3262_v34 = vmul.bf16 %v3250_v51, %v10061_v25  ;;  %v3342_v6 = vmul.bf16 %v3330_v54, %v10076_v41  ;;  %8625 = vmatprep.subr.bf16.mxu0 %v3302_v14  ;;  %v9236_v14 = vld [vmem:[#allocation5 + $0x3a0] ss:$20 sps:$4 sm:$0xff]   ;;  %v9237_v51 = vld [vmem:[#allocation5 + $0x3a8] ss:$20 sps:$4 sm:$0xff]  }
 0xa4f   :  { %8657 = vmatprep.subr.bf16.mxu1 %v3342_v6 }
 0xa50   :  { %v3304_v49 = vpop.permute.xlu0 %3303  ;;  %8626 = vmatpush3.bf16.msra.mxu0 %v3262_v34  ;;  %8658 = vmatpush3.bf16.msra.mxu1 %v10960_v27  ;;  %v3344_v4 = vpop.permute.xlu1 %3343 }
 0xa51   :  { %v3319_v22 = vmul.bf16 %v3304_v49, %v10073_v38  ;;  %v3359_v31 = vmul.bf16 %v3344_v4, %v10080_v46 }
 0xa53   :  { %3568 = vmatmul.mubr.bf16.vlgmr.msra.gmra.mrb[104].mxu0 %v9210_v43  ;;  %8659 = vmatprep.subr.bf16.mxu1 %v3359_v31 }
 0xa54   :  { %v3306_v32 = vpop.permute.xlu0 %3305  ;;  %8660 = vmatpush3.bf16.msra.mxu1 %v3319_v22  ;;  %v3346_v25 = vpop.permute.xlu1 %3345  ;;  %3575 = vmatprep.mubr.bf16.mxu0 %v9213_v5 }
 0xa55   :  { %v3320_v41 = vmul.bf16 %v3306_v32, %v10073_v38  ;;  %v3360_v9 = vmul.bf16 %v3346_v25, %v10080_v46 }
 0xa57   :  { %8661 = vmatprep.subr.bf16.mxu1 %v3360_v9 }
 0xa58   :  { %v3308_v0 = vpop.permute.xlu0 %3307  ;;  %8662 = vmatpush3.bf16.msra.mxu1 %v3320_v41  ;;  %v3348_v27 = vpop.permute.xlu1 %3347 }
 0xa59   :  { %v3321_v37 = vmul.bf16 %v3308_v0, %v10073_v38  ;;  %v3361_v52 = vmul.bf16 %v3348_v27, %v10080_v46 }
 0xa5b   :  { %3576 = vmatmul.mubr.bf16.gmra.mrb[108].mxu0 %v9215_v2  ;;  %8663 = vmatprep.subr.bf16.mxu1 %v3361_v52 }
 0xa5c   :  { %v3310_v10 = vpop.permute.xlu0 %3309  ;;  %8664 = vmatpush3.bf16.msra.mxu1 %v3321_v37  ;;  %v3350_v23 = vpop.permute.xlu1 %3349  ;;  %3583 = vmatprep.mubr.bf16.mxu0 %v9216_v12 }
 0xa5d   :  { %v3322_v13 = vmul.bf16 %v3310_v10, %v10073_v38  ;;  %v3362_v56 = vmul.bf16 %v3350_v23, %v10080_v46  ;;  %v9226_v46 = vld [vmem:[#allocation5 + $0x398] ss:$20 sps:$4 sm:$0xff]  }
 0xa5f   :  { %8665 = vmatprep.subr.bf16.mxu1 %v3362_v56 }
 0xa60   :  { %8666 = vmatpush3.bf16.msra.mxu1 %v3322_v13  ;;  %v3364_v29 = vpop.permute.xlu1 %3363  ;;  %v3366_v57 = vpop.permute.xlu0 %3365 }
 0xa61   :  { %v3379_v28 = vmul.bf16 %v3364_v29, %v10092_v58  ;;  %v3380_v15 = vmul.bf16 %v3366_v57, %v10092_v58 }
 0xa63   :  { %3584 = vmatmul.mubr.bf16.gmra.mrb[112].mxu0 %v9221_v40  ;;  %3633 = vmatmul.mubr.bf16.vlgmr.msra.gmra.mrb[104].mxu1 %v9218_v8 }
 0xa64   :  { %8985 = vmatprep.subr.bf16.mxu0 %v3379_v28  ;;  %3591 = vmatprep.mubr.bf16.mxu0 %v9222_v63  ;;  %v3368_v38 = vpop.permute.xlu1 %3367  ;;  %v3370_v30 = vpop.permute.xlu0 %3369 }
 0xa65   :  { %8986 = vmatpush3.bf16.msra.mxu0 %v3379_v28  ;;  %3640 = vmatprep.mubr.bf16.mxu1 %v9224_v3  ;;  %v3381_v11 = vmul.bf16 %v3368_v38, %v10092_v58  ;;  %v3382_v26 = vmul.bf16 %v3370_v30, %v10092_v58  ;;  %v9238_v58 = vld [vmem:[%s11348_s6] sm:$0xff]  }
 0xa66   :  { %8987 = vmatprep.subr.bf16.mxu0 %v3380_v15 }
 0xa69   :  { %8988 = vmatpush3.bf16.msra.mxu0 %v3380_v15 }
 0xa6a   :  { %8989 = vmatprep.subr.bf16.mxu0 %v3381_v11 }
 0xa6b   :  { %3592 = vmatmul.mubr.bf16.gmra.mrb[116].mxu0 %v9226_v46  ;;  %3641 = vmatmul.mubr.bf16.gmra.mrb[108].mxu1 %v9227_v62 }
 0xa6c   :  { %3648 = vmatprep.mubr.bf16.mxu1 %v9228_v24  ;;  %8993 = vmatprep.mubr.msk.bf16.mxu0 %vm721_vm4, %v9230_v39 }
 0xa6d   :  { %8990 = vmatpush3.bf16.msra.mxu0 %v3381_v11 }
 0xa6e   :  { %8991 = vmatprep.subr.bf16.mxu0 %v3382_v26 }
 0xa71   :  { %8992 = vmatpush3.bf16.msra.mxu0 %v3382_v26 }
 0xa73   :  { %3649 = vmatmul.mubr.bf16.gmra.mrb[112].mxu1 %v9231_v55 }
 0xa74   :  { %8994 = vmatmul.mubr.msk.bf16.vlgmr.msra.gmra.mrb[120].mxu0 %vm721_vm4, %v9232_v36  ;;  %3656 = vmatprep.mubr.bf16.mxu1 %v9233_v47 }
 0xa75   :  { %8997 = vmatprep.mubr.msk.bf16.mxu0 %vm721_vm4, %v9235_v16  ;;  %v3391_v9 = vpop.permute.xlu0 %3390  ;;  %v3386_v2 = vpop.permute.xlu1 %3385 }
 0xa79   :  { %v3401_v15 = vpop.permute.xlu0 %3400  ;;  %v3396_v38 = vpop.permute.xlu1 %3395 }
 0xa7b   :  { %3657 = vmatmul.mubr.bf16.gmra.mrb[116].mxu1 %v9236_v14 }
 0xa7c   :  { %8998 = vmatmul.mubr.msk.bf16.gmra.mrb[124].mxu0 %vm721_vm4, %v9237_v51  ;;  %9009 = vmatprep.mubr.msk.bf16.mxu1 %vm721_vm4, %v9238_v58 }
 0xb26   :  { %v8627_v54 = vpop.f32.mrb[104].mxu0 }
 0xb27   :  { %v8628_v34 = vpop.f32.mrb[105].mxu0 }
 0xb28   :  { %v8629_v6 = vadd.f32 %v8628_v34, %v8627_v54  ;;  %v8630_v43 = vpop.f32.mrb[106].mxu0 }
 0xb29   :  { %v8631_v49 = vpop.f32.mrb[107].mxu0 }
 0xb2a   :  { %v8632_v4 = vadd.f32 %v8631_v49, %v8630_v43  ;;  %v3570_v52 = vadd.f32 %v8629_v6, %v3386_v2  ;;  %v3411_v6 = vpop.permute.xlu0 %3410  ;;  %v3406_v43 = vpop.permute.xlu1 %3405 }
 0xb2c   :  { %v3573_v29 = vadd.f32 %v8632_v4, %v3391_v9 }
 0xb2e   :  { %v8633_v5 = vpop.f32.mrb[108].mxu0 }
 0xb2f   :  { %v8634_v22 = vpop.f32.mrb[109].mxu0 }
 0xb30   :  { %v8635_v31 = vadd.f32 %v8634_v22, %v8633_v5  ;;  %v8636_v32 = vpop.f32.mrb[110].mxu0 }
 0xb31   :  { %v8637_v25 = vpop.f32.mrb[111].mxu0 }
 0xb32   :  { %v8638_v41 = vadd.f32 %v8637_v25, %v8636_v32  ;;  %v3578_v39 = vadd.f32 %v8635_v31, %v3396_v38 }
 0xb34   :  { %v3581_v14 = vadd.f32 %v8638_v41, %v3401_v15 }
 0xb36   :  { %v8639_v0 = vpop.f32.mrb[112].mxu0  ;;  %v8667_v27 = vpop.f32.mrb[104].mxu1 }
 0xb37   :  { %v8640_v12 = vpop.f32.mrb[113].mxu0  ;;  %v8668_v37 = vpop.f32.mrb[105].mxu1 }
 0xb38   :  { %v8641_v10 = vadd.f32 %v8640_v12, %v8639_v0  ;;  %v8669_v23 = vadd.f32 %v8668_v37, %v8667_v27  ;;  %v8642_v13 = vpop.f32.mrb[114].mxu0  ;;  %v8670_v56 = vpop.f32.mrb[106].mxu1 }
 0xb39   :  { %v8643_v8 = vpop.f32.mrb[115].mxu0  ;;  %v8671_v40 = vpop.f32.mrb[107].mxu1 }
 0xb3a   :  { %v8644_v63 = vadd.f32 %v8643_v8, %v8642_v13  ;;  %v8672_v57 = vadd.f32 %v8671_v40, %v8670_v56  ;;  %v3635_v28 = vadd.f32 %v8669_v23, %v3570_v52  ;;  %v3586_v22 = vadd.f32 %v8641_v10, %v3406_v43 }
 0xb3c   :  { %v3638_v3 = vadd.f32 %v8672_v57, %v3573_v29  ;;  %v3589_v2 = vadd.f32 %v8644_v63, %v3411_v6  ;;  %v3421_v29 = vpop.permute.xlu0 %3420  ;;  %v3416_v57 = vpop.permute.xlu1 %3415 }
 0xb3e   :  { %v8645_v46 = vpop.f32.mrb[116].mxu0  ;;  %v8673_v62 = vpop.f32.mrb[108].mxu1 }
 0xb3f   :  { %v8646_v11 = vpop.f32.mrb[117].mxu0  ;;  %v8674_v24 = vpop.f32.mrb[109].mxu1 }
 0xb40   :  { %v8647_v30 = vadd.f32 %v8646_v11, %v8645_v46  ;;  %v8675_v26 = vadd.f32 %v8674_v24, %v8673_v62  ;;  %v8648_v55 = vpop.f32.mrb[118].mxu0  ;;  %v8676_v36 = vpop.f32.mrb[110].mxu1 }
 0xb41   :  { %v8649_v47 = vpop.f32.mrb[119].mxu0  ;;  %v8677_v16 = vpop.f32.mrb[111].mxu1 }
 0xb42   :  { %v8650_v51 = vadd.f32 %v8649_v47, %v8648_v55  ;;  %v8678_v58 = vadd.f32 %v8677_v16, %v8676_v36  ;;  %v3643_v54 = vadd.f32 %v8675_v26, %v3578_v39  ;;  %v3594_v11 = vadd.f32 %v8647_v30, %v3416_v57  ;;  %v9254_v57 = vld [vmem:[#allocation8 + $0x10] sm:$0xff]  }
 0xb44   :  { %v3646_v34 = vadd.f32 %v8678_v58, %v3581_v14  ;;  %v3597_v55 = vadd.f32 %v8650_v51, %v3421_v29  ;;  %v9252_v29 = vld [vmem:[#allocation8 + $0x50] sm:$0xff]  }
 0xb46   :  { %v8679_v49 = vpop.f32.mrb[112].mxu1 }
 0xb47   :  { %v8995_v4 = vpop.f32.mrb[120].mxu0  ;;  %v8680_v5 = vpop.f32.mrb[113].mxu1 }
 0xb48   :  { %v3708_v32 = vadd.f32 %v8995_v4, %v3643_v54  ;;  %v8681_v25 = vadd.f32 %v8680_v5, %v8679_v49  ;;  %v3699_v31 = vpop.f32.mrb[121].mxu0  ;;  %v8682_v9 = vpop.f32.mrb[114].mxu1  ;;  %v9245_v5 = vld [vmem:[#allocation8 + $0xc8] sm:$0xff]  }
 0xb49   :  { %v3700_v0 = vadd.f32 %v3699_v31, %v3635_v28  ;;  %v8996_v27 = vpop.f32.mrb[122].mxu0  ;;  %v8683_v12 = vpop.f32.mrb[115].mxu1  ;;  %v9250_v31 = vld [vmem:[#allocation8 + $0x8] sm:$0xff]  }
 0xb4a   :  { %v3732_v41 = vadd.f32 %v3708_v32, %v2618_v48  ;;  %v3711_v37 = vadd.f32 %v8996_v27, %v3646_v34  ;;  %v8684_v52 = vadd.f32 %v8683_v12, %v8682_v9  ;;  %v3702_v23 = vpop.f32.mrb[123].mxu0  ;;  %v3651_v13 = vadd.f32 %v8681_v25, %v3586_v22  ;;  %v9246_v22 = vld [vmem:[#allocation8] sm:$0xff]   ;;  %v9248_v32 = vld [vmem:[#allocation8 + $0x48] sm:$0xff]   ;;  %v9249_v9 = vld [vmem:[#allocation8 + $0xd0] sm:$0xff]   ;;  %v3774_v27 = vpop.permute.xlu1 %3773 }
 0xb4b   :  { %v3730_v56 = vadd.f32 %v3700_v0, %v2616_v42  ;;  %v3703_v8 = vadd.f32 %v3702_v23, %v3638_v3  ;;  %v9247_v25 = vld [vmem:[#allocation8 + $0x88] sm:$0xff]   ;;  %v3769_v0 = vpop.permute.xlu0 %3768 }
 0xb4c   :  { %v3733_v10 = vadd.f32 %v3711_v37, %v2619_v59  ;;  %v3654_v40 = vadd.f32 %v8684_v52, %v3589_v2  ;;  %v3740_v28 = vmax.f32 %v3732_v41, 0.0  ;;  %v9251_v2 = vld [vmem:[#allocation8 + $0x90] sm:$0xff]  }
 0xb4d   :  { %v3731_v63 = vadd.f32 %v3703_v8, %v2617_v21  ;;  %v3738_v15 = vmax.f32 %v3730_v56, 0.0 }
 0xb4e   :  { %v3741_v44 = vmax.f32 %v3733_v10, 0.0  ;;  %v8685_v48 = vpop.f32.mrb[116].mxu1  ;;  %v3784_v23 = vpop.permute.xlu1 %3783 }
 0xb4f   :  { %v3739_v38 = vmax.f32 %v3731_v63, 0.0  ;;  %v8999_v46 = vpop.f32.mrb[124].mxu0  ;;  %v8686_v62 = vpop.f32.mrb[117].mxu1  ;;  %v9253_v63 = vld [vmem:[#allocation8 + $0xd8] sm:$0xff]  }
 0xb50   :  { %v8687_v7 = vadd.f32 %v8686_v62, %v8685_v48  ;;  %v3715_v42 = vpop.f32.mrb[125].mxu0  ;;  %v8688_v3 = vpop.f32.mrb[118].mxu1  ;;  %v3747_v24 = vpack.c.bf16 %v3741_v44, %v3740_v28  ;;  %v9255_v48 = vld [vmem:[#allocation8 + $0x98] sm:$0xff]  }
 0xb51   :  { %v3716_v45 = vadd.f32 %v3715_v42, %v3651_v13  ;;  %v9000_v59 = vpop.f32.mrb[126].mxu0  ;;  %v8689_v39 = vpop.f32.mrb[119].mxu1  ;;  %v3746_v26 = vpack.c.bf16 %v3739_v38, %v3738_v15  ;;  %v9256_v62 = vld [vmem:[#allocation8 + $0x58] sm:$0xff]  }
 0xb52   :  { %v3659_v1 = vadd.f32 %v8687_v7, %v3594_v11  ;;  %v8690_v21 = vadd.f32 %v8689_v39, %v8688_v3  ;;  %v3718_v36 = vpop.f32.mrb[127].mxu0  ;;  %v3779_v12 = vpop.permute.xlu0 %3778  ;;  %v9257_v11 = vld [vmem:[#allocation8 + $0xe0] sm:$0xff]   ;;  %v9258_v7 = vld [vmem:[#allocation8 + $0x18] sm:$0xff]  }
 0xb53   :  { %v3734_v47 = vadd.f32 %v3716_v45, %v2620_v35  ;;  %v3719_v16 = vadd.f32 %v3718_v36, %v3654_v40  ;;  %9001 = vmatprep.subr.bf16.mxu1 %v3746_v26  ;;  %v3794_v39 = vpop.permute.xlu1 %3793 }
 0xb54   :  { %v3724_v14 = vadd.f32 %v8999_v46, %v3659_v1  ;;  %v3662_v58 = vadd.f32 %v8690_v21, %v3597_v55  ;;  %9002 = vmatpush3.bf16.msra.mxu1 %v3746_v26  ;;  %v9260_v21 = vld [vmem:[#allocation8 + $0x60] sm:$0xff]  }
 0xb55   :  { %v3735_v30 = vadd.f32 %v3719_v16, %v2621_v53  ;;  %9003 = vmatprep.subr.bf16.mxu1 %v3747_v24  ;;  %v3742_v51 = vmax.f32 %v3734_v47, 0.0  ;;  %v9244_v53 = vld [vmem:[#allocation8 + $0x40] sm:$0xff]  }
 0xb56   :  { %v3727_v54 = vadd.f32 %v9000_v59, %v3662_v58  ;;  %v3736_v34 = vadd.f32 %v3724_v14, %v2622_v33  ;;  %v9242_v33 = vld [vmem:[#allocation8 + $0xc0] sm:$0xff]   ;;  %8707 = vmatprep.subr.bf16.mxu0 %v9244_v53  ;;  %v3789_v42 = vpop.permute.xlu0 %3788  ;;  %v9265_v53 = vld [vmem:[#allocation8 + $0xf0] sm:$0xff]  }
 0xb57   :  { %v3743_v6 = vmax.f32 %v3735_v30, 0.0  ;;  %8708 = vmatpush3.bf16.msra.mxu0 %v9246_v22  ;;  %v9266_v22 = vld [vmem:[#allocation8 + $0x28] sm:$0xff]  }
 0xb58   :  { %9004 = vmatpush3.bf16.msra.mxu1 %v3747_v24  ;;  %v3737_v50 = vadd.f32 %v3727_v54, %v2623_v19  ;;  %v3744_v43 = vmax.f32 %v3736_v34, 0.0  ;;  %v9243_v19 = vld [vmem:[#allocation8 + $0x80] sm:$0xff]   ;;  %8709 = vmatprep.subr.bf16.mxu0 %v9248_v32  ;;  %v9267_v32 = vld [vmem:[#allocation8 + $0xb0] sm:$0xff]  }
 0xb59   :  { %v3748_v35 = vpack.c.bf16 %v3743_v6, %v3742_v51  ;;  %v9259_v24 = vld [vmem:[#allocation8 + $0xa0] sm:$0xff]   ;;  %v9261_v51 = vld [vmem:[#allocation8 + $0xe8] sm:$0xff]  }
 0xb5a   :  { %v3745_v49 = vmax.f32 %v3737_v50, 0.0 }
 0xb5b   :  { %9005 = vmatprep.subr.bf16.mxu1 %v3748_v35  ;;  %8710 = vmatpush3.bf16.msra.mxu0 %v9250_v31  ;;  %v3765_v31 = vld [vmem:[%s11349_s7 + $0x38] sm:$0xff] }
 0xb5c   :  { %9006 = vmatpush3.bf16.msra.mxu1 %v3748_v35  ;;  %v3749_v4 = vpack.c.bf16 %v3745_v49, %v3744_v43  ;;  %8711 = vmatprep.subr.bf16.mxu0 %v9252_v29 }
 0xb5e   :  { %9007 = vmatprep.subr.bf16.mxu1 %v3749_v4 }
 0xb5f   :  { %8712 = vmatpush3.bf16.msra.mxu0 %v9254_v57  ;;  %v9278_v57 = vld [vmem:[#allocation8 + $0x140] sm:$0xff]  }
 0xb60   :  { %9008 = vmatpush3.bf16.msra.mxu1 %v3749_v4  ;;  %8713 = vmatprep.subr.bf16.mxu0 %v9256_v62 }
 0xb61   :  { %8729 = vmatprep.subr.bf16.mxu1 %v9242_v33 }
 0xb63   :  { %9010 = vmatmul.mubr.msk.bf16.vlgmr.msra.gmra.mrb[120].mxu1 %vm721_vm4, %v9239_v61  ;;  %8714 = vmatpush3.bf16.msra.mxu0 %v9258_v7  ;;  %v9262_v61 = vld [vmem:[#allocation8 + $0x20] sm:$0xff]  }
 0xb64   :  { %9013 = vmatprep.mubr.msk.bf16.mxu1 %vm721_vm4, %v9240_v20  ;;  %8730 = vmatpush3.bf16.msra.mxu1 %v9243_v19  ;;  %v9263_v20 = vld [vmem:[#allocation8 + $0xa8] sm:$0xff]  }
 0xb65   :  { %8731 = vmatprep.subr.bf16.mxu1 %v9245_v5  ;;  %8715 = vmatprep.subr.bf16.mxu0 %v9260_v21  ;;  %v9264_v19 = vld [vmem:[#allocation8 + $0x68] sm:$0xff]  }
 0xb67   :  { %8716 = vmatpush3.bf16.msra.mxu0 %v9262_v61 }
 0xb68   :  { %8732 = vmatpush3.bf16.msra.mxu1 %v9247_v25  ;;  %v3764_v25 = vld [vmem:[%s11349_s7 + $0x30] sm:$0xff]  ;;  %8717 = vmatprep.subr.bf16.mxu0 %v9264_v19 }
 0xb69   :  { %8733 = vmatprep.subr.bf16.mxu1 %v9249_v9  ;;  %v9268_v9 = vld [vmem:[#allocation8 + $0x70] sm:$0xff]  }
 0xb6b   :  { %9014 = vmatmul.mubr.msk.bf16.gmra.mrb[124].mxu1 %vm721_vm4, %v9241_v60  ;;  %8718 = vmatpush3.bf16.msra.mxu0 %v9266_v22 }
 0xb6c   :  { %8734 = vmatpush3.bf16.msra.mxu1 %v9251_v2  ;;  %v9269_v2 = vld [vmem:[#allocation8 + $0xf8] sm:$0xff]   ;;  %8719 = vmatprep.subr.bf16.mxu0 %v9268_v9 }
 0xb6d   :  { %8735 = vmatprep.subr.bf16.mxu1 %v9253_v63 }
 0xb70   :  { %8736 = vmatpush3.bf16.msra.mxu1 %v9255_v48 }
 0xb71   :  { %8737 = vmatprep.subr.bf16.mxu1 %v9257_v11 }
 0xb74   :  { %8738 = vmatpush3.bf16.msra.mxu1 %v9259_v24 }
 0xb75   :  { %8739 = vmatprep.subr.bf16.mxu1 %v9261_v51 }
 0xb78   :  { %8740 = vmatpush3.bf16.msra.mxu1 %v9263_v20 }
 0xb79   :  { %8741 = vmatprep.subr.bf16.mxu1 %v9265_v53 }
 0xb7c   :  { %8742 = vmatpush3.bf16.msra.mxu1 %v9267_v32 }
 0xb7d   :  { %8743 = vmatprep.subr.bf16.mxu1 %v9269_v2 }
 0xc36   :  { %v9011_v41 = vpop.f32.mrb[120].mxu1 }
 0xc37   :  { %v3881_v37 = vadd.f32 %v9011_v41, %v3779_v12  ;;  %v3872_v52 = vpop.f32.mrb[121].mxu1  ;;  %v9270_v12 = vld [vmem:[#allocation8 + $0x30] sm:$0xff]   ;;  %v9271_v41 = vld [vmem:[#allocation8 + $0xb8] sm:$0xff]  }
 0xc38   :  { %v3873_v13 = vadd.f32 %v3872_v52, %v3769_v0  ;;  %v9012_v56 = vpop.f32.mrb[122].mxu1  ;;  %v9272_v52 = vld [vmem:[#allocation8 + $0x78] sm:$0xff]   ;;  %8720 = vmatpush3.bf16.msra.mxu0 %v9270_v12  ;;  %8744 = vmatpush3.bf16.msra.mxu1 %v9271_v41  ;;  %v9280_v41 = vld [vmem:[#allocation8 + $0x100] sm:$0xff]  }
 0xc39   :  { %v3905_v8 = vmax.f32 %v3881_v37, 0.0  ;;  %v3884_v10 = vadd.f32 %v9012_v56, %v3784_v23  ;;  %v3875_v40 = vpop.f32.mrb[123].mxu1  ;;  %v9274_v23 = vld [vmem:[#allocation8 + $0x1c0] sm:$0xff]   ;;  %8721 = vmatprep.subr.bf16.mxu0 %v9272_v52  ;;  %v9281_v52 = vld [vmem:[#allocation8 + $0x188] sm:$0xff]  }
 0xc3a   :  { %v3903_v28 = vmax.f32 %v3873_v13, 0.0  ;;  %v3876_v44 = vadd.f32 %v3875_v40, %v3774_v27  ;;  %v9275_v40 = vld [vmem:[#allocation8 + $0x38] sm:$0xff]   ;;  %8773 = vmatprep.subr.bf16.mxu1 %v9274_v23  ;;  %v9282_v23 = vld [vmem:[#allocation8 + $0x148] sm:$0xff]  }
 0xc3b   :  { %3913 = vst [vmem:[#allocation2 + $0x10] sm:$0xff] %v3905_v8  ;;  %v3906_v15 = vmax.f32 %v3884_v10, 0.0 }
 0xc3c   :  { %3911 = vst [vmem:[#allocation2] sm:$0xff] %v3903_v28  ;;  %v3904_v38 = vmax.f32 %v3876_v44, 0.0  ;;  %8722 = vmatpush3.bf16.msra.mxu0 %v9275_v40 }
 0xc3d   :  { %3914 = vst [vmem:[#allocation2 + $0x18] sm:$0xff] %v3906_v15  ;;  %8751 = vmatprep.subr.bf16.mxu0 %v9278_v57 }
 0xc3e   :  { %3912 = vst [vmem:[#allocation2 + $0x8] sm:$0xff] %v3904_v38  ;;  %v11128_v46 = vpop.f32.mrb[124].mxu1 }
 0xc3f   :  { %v3888_v3 = vpop.f32.mrb[125].mxu1 }
 0xc40   :  { %v3889_v45 = vadd.f32 %v3888_v3, %v3789_v42  ;;  %v11130_v59 = vpop.f32.mrb[126].mxu1 }
 0xc41   :  { %v3891_v26 = vpop.f32.mrb[127].mxu1 }
 0xc42   :  { %v3907_v55 = vmax.f32 %v3889_v45, 0.0  ;;  %v3892_v1 = vadd.f32 %v3891_v26, %v3794_v39  ;;  %v3961_v10 = vld [vmem:[#allocation2 + $0x14] sm:$0x3]  ;;  %v3953_v29 = vld [vmem:[#allocation2 + $0x10] sm:$0x3] }
 0xc43   :  { %v4063_v47 = vld [vmem:[#allocation2 + $0x4] sm:$0x3]  ;;  %v4049_v58 = vld [vmem:[#allocation2] sm:$0x3]  ;;  %v3931_v4 = vld [vmem:[#allocation2 + $0x6] sm:$0x3] }
 0xc44   :  { %3915 = vst [vmem:[#allocation2 + $0x20] sm:$0xff] %v3907_v55  ;;  %v3908_v36 = vmax.f32 %v3892_v1, 0.0  ;;  %v4065_v30 = vrot.slane %v4063_v47, 6  ;;  %v4051_v54 = vrot.slane %v4049_v58, 6  ;;  %v3929_v60 = vld [vmem:[#allocation2 + $0x4] sm:$0x3] }
 0xc45   :  { %v3947_v16 = vld [vmem:[#allocation2 + $0xe] sm:$0x3]  ;;  %v3939_v14 = vld [vmem:[#allocation2 + $0xa] sm:$0x3]  ;;  %v4087_v34 = vld [vmem:[#allocation2 + $0xc] sm:$0x3] }
 0xc46   :  { %3916 = vst [vmem:[#allocation2 + $0x28] sm:$0xff] %v3908_v36  ;;  %3949 = vrot.lane.b32.xlu0 %v3947_v16, %s9859_s29  ;;  %3941 = vrot.lane.b32.xlu1 %v3939_v14, %s9859_s29  ;;  %v4075_v6 = vld [vmem:[#allocation2 + $0x8] sm:$0x3]  ;;  %v3945_v50 = vld [vmem:[#allocation2 + $0xc] sm:$0x3]  ;;  %v4089_v43 = vrot.slane %v4087_v34, 6 }
 0xc47   :  { %v3937_v35 = vld [vmem:[#allocation2 + $0x8] sm:$0x3]  ;;  %3946 = vst.msk [vmem:[#allocation3 + $0xc] sm:$0x3] %vm3920_vm5, %v3945_v50  ;;  %v4077_v49 = vrot.slane %v4075_v6, 6 }
 0xc48   :  { %3938 = vst.msk [vmem:[#allocation3 + $0x8] sm:$0x3] %vm3920_vm5, %v3937_v35  ;;  %3930 = vst.msk [vmem:[#allocation3 + $0x4] sm:$0x3] %vm3920_vm5, %v3929_v60  ;;  %v3919_v33 = vld [vmem:[#allocation2] sm:$0x3] }
 0xc49   :  { %v3922_v5 = vld [vmem:[#allocation2 + $0x2] sm:$0x3]  ;;  %3921 = vst.msk [vmem:[#allocation3] sm:$0x3] %vm3920_vm5, %v3919_v33  ;;  %v4135_v0 = vld [vmem:[#allocation2 + $0x1c] sm:$0x3] }
 0xc4a   :  { %4066 = vrot.lane.b32.xlu0 %v4065_v30, %s9859_s29  ;;  %4052 = vrot.lane.b32.xlu1 %v4051_v54, %s9859_s29  ;;  %v4123_v27 = vld [vmem:[#allocation2 + $0x18] sm:$0x3]  ;;  %v3977_v37 = vld [vmem:[#allocation2 + $0x1c] sm:$0x3]  ;;  %v4137_v56 = vrot.slane %v4135_v0, 6 }
 0xc4b   :  { %3978 = vst.msk [vmem:[#allocation3 + $0x1c] sm:$0x3] %vm3920_vm5, %v3977_v37  ;;  %v3969_v13 = vld [vmem:[#allocation2 + $0x18] sm:$0x3]  ;;  %v4125_v8 = vrot.slane %v4123_v27, 6  ;;  %v9279_v27 = vld [vmem:[#allocation8 + $0x1c8] sm:$0xff]  }
 0xc4c   :  { %3970 = vst.msk [vmem:[#allocation3 + $0x18] sm:$0x3] %vm3920_vm5, %v3969_v13  ;;  %3962 = vst.msk [vmem:[#allocation3 + $0x14] sm:$0x3] %vm3920_vm5, %v3961_v10  ;;  %v4111_v28 = vld [vmem:[#allocation2 + $0x14] sm:$0x3] }
 0xc4d   :  { %v4009_v63 = vld [vmem:[#allocation2 + $0x2c] sm:$0x3]  ;;  %3954 = vst.msk [vmem:[#allocation3 + $0x10] sm:$0x3] %vm3920_vm5, %v3953_v29  ;;  %v4001_v44 = vld [vmem:[#allocation2 + $0x28] sm:$0x3] }
 0xc4e   :  { %4090 = vrot.lane.b32.xlu0 %v4089_v43, %s9859_s29  ;;  %4078 = vrot.lane.b32.xlu1 %v4077_v49, %s9859_s29  ;;  %4010 = vst.msk [vmem:[#allocation3 + $0x2c] sm:$0x3] %vm3920_vm5, %v4009_v63  ;;  %v3979_v48 = vld [vmem:[#allocation2 + $0x1e] sm:$0x3]  ;;  %v3971_v15 = vld [vmem:[#allocation2 + $0x1a] sm:$0x3] }
 0xc4f   :  { %v4099_v38 = vld [vmem:[#allocation2 + $0x10] sm:$0x3]  ;;  %4002 = vst.msk [vmem:[#allocation3 + $0x28] sm:$0x3] %vm3920_vm5, %v4001_v44  ;;  %v3993_v62 = vld [vmem:[#allocation2 + $0x24] sm:$0x3] }
 0xc50   :  { %v4113_v11 = vrot.slane %v4111_v28, 6  ;;  %v4101_v7 = vrot.slane %v4099_v38, 6  ;;  %3994 = vst.msk [vmem:[#allocation3 + $0x24] sm:$0x3] %vm3920_vm5, %v3993_v62  ;;  %v3985_v42 = vld [vmem:[#allocation2 + $0x20] sm:$0x3] }
 0xc51   :  { %3986 = vst.msk [vmem:[#allocation3 + $0x20] sm:$0x3] %vm3920_vm5, %v3985_v42  ;;  %v3963_v3 = vld [vmem:[#allocation2 + $0x16] sm:$0x3]  ;;  %v3955_v24 = vld [vmem:[#allocation2 + $0x12] sm:$0x3] }
 0xc52   :  { %3933 = vrot.lane.b32.xlu0 %v3931_v4, %s9859_s29  ;;  %3924 = vrot.lane.b32.xlu1 %v3922_v5, %s9859_s29  ;;  %v4159_v45 = vld [vmem:[#allocation2 + $0x24] sm:$0x3]  ;;  %v4011_v39 = vld [vmem:[#allocation2 + $0x2e] sm:$0x3]  ;;  %v4003_v26 = vld [vmem:[#allocation2 + $0x2a] sm:$0x3] }
 0xc53   :  { %v4147_v55 = vld [vmem:[#allocation2 + $0x20] sm:$0x3]  ;;  %v4161_v1 = vrot.slane %v4159_v45, 6  ;;  %v4183_v36 = vld [vmem:[#allocation2 + $0x2c] sm:$0x3]  ;;  %v9283_v13 = vld [vmem:[#allocation8 + $0x1d0] sm:$0xff]  }
 0xc54   :  { %v4149_v21 = vrot.slane %v4147_v55, 6  ;;  %v4171_v47 = vld [vmem:[#allocation2 + $0x28] sm:$0x3]  ;;  %v4185_v16 = vrot.slane %v4183_v36, 6  ;;  %v3995_v58 = vld [vmem:[#allocation2 + $0x26] sm:$0x3] }
 0xc55   :  { %v4173_v14 = vrot.slane %v4171_v47, 6  ;;  %v3987_v30 = vld [vmem:[#allocation2 + $0x22] sm:$0x3]  ;;  %v4070_v51 = vld [vmem:[#allocation2 + $0x6] sm:$0x3]  ;;  %v9286_v10 = vld [vmem:[#allocation8 + $0x150] sm:$0xff]  }
 0xc56   :  { %3798 = vperm.xlu0 %9064, %v3764_v25   ;;  %3803 = vperm.xlu1 %9065, %v3765_v31   ;;  %v4057_v6 = vld [vmem:[#allocation2 + $0x2] sm:$0x3]  ;;  %v4072_v50 = vrot.slane %v4070_v51, 6  ;;  %v4094_v4 = vld [vmem:[#allocation2 + $0xe] sm:$0x3]  ;;  %v9287_v63 = vld [vmem:[#allocation8 + $0x1d8] sm:$0xff]  }
 0xc57   :  { %v4059_v43 = vrot.slane %v4057_v6, 6  ;;  %v4082_v61 = vld [vmem:[#allocation2 + $0xa] sm:$0x3]  ;;  %v4096_v20 = vrot.slane %v4094_v4, 6  ;;  %v9276_v31 = vld [vmem:[#allocation8 + $0x180] sm:$0xff]  }
 0xc58   :  { %v4084_v33 = vrot.slane %v4082_v61, 6  ;;  %v4142_v44 = vld [vmem:[#allocation2 + $0x1e] sm:$0x3]  ;;  %v9295_v36 = vld [vmem:[#allocation8 + $0x1e8] sm:$0xff]   ;;  %v4106_v47 = vld [vmem:[#allocation2 + $0x12] sm:$0x3] }
 0xc59   :  { %v4144_v42 = vrot.slane %v4142_v44, 6  ;;  %v9300_v4 = vld [vmem:[#allocation8 + $0x128] sm:$0xff]   ;;  %v9301_v61 = vld [vmem:[#allocation8 + $0x1b0] sm:$0xff]  }
 0xc5a   :  { %4138 = vrot.lane.b32.xlu0 %v4137_v56, %s9859_s29  ;;  %4126 = vrot.lane.b32.xlu1 %v4125_v8, %s9859_s29  ;;  %v9284_v56 = vld [vmem:[#allocation8 + $0x108] sm:$0xff]   ;;  %v9285_v8 = vld [vmem:[#allocation8 + $0x190] sm:$0xff]  }
 0xc5e   :  { %3981 = vrot.lane.b32.xlu0 %v3979_v48, %s9859_s29  ;;  %3973 = vrot.lane.b32.xlu1 %v3971_v15, %s9859_s29  ;;  %v4130_v48 = vld [vmem:[#allocation2 + $0x1a] sm:$0x3]  ;;  %v9288_v15 = vld [vmem:[#allocation8 + $0x110] sm:$0xff]  }
 0xc62   :  { %4114 = vrot.lane.b32.xlu0 %v4113_v11, %s9859_s29  ;;  %4102 = vrot.lane.b32.xlu1 %v4101_v7, %s9859_s29  ;;  %v9289_v11 = vld [vmem:[#allocation8 + $0x198] sm:$0xff]  }
 0xc63   :  { %v9290_v7 = vld [vmem:[#allocation8 + $0x158] sm:$0xff]  }
 0xc66   :  { %3965 = vrot.lane.b32.xlu0 %v3963_v3, %s9859_s29  ;;  %3957 = vrot.lane.b32.xlu1 %v3955_v24, %s9859_s29  ;;  %v4132_v24 = vrot.slane %v4130_v48, 6  ;;  %v9309_v48 = vld [vmem:[#allocation8 + $0x138] sm:$0xff]  }
 0xc6a   :  { %4013 = vrot.lane.b32.xlu0 %v4011_v39, %s9859_s29  ;;  %4005 = vrot.lane.b32.xlu1 %v4003_v26, %s9859_s29  ;;  %v9291_v39 = vld [vmem:[#allocation8 + $0x1e0] sm:$0xff]  }
 0xc6b   :  { %v9294_v26 = vld [vmem:[#allocation8 + $0x160] sm:$0xff]  }
 0xc6e   :  { %4162 = vrot.lane.b32.xlu0 %v4161_v1, %s9859_s29  ;;  %4150 = vrot.lane.b32.xlu1 %v4149_v21, %s9859_s29  ;;  %v4118_v21 = vld [vmem:[#allocation2 + $0x16] sm:$0x3] }
 0xc72   :  { %4186 = vrot.lane.b32.xlu0 %v4185_v16, %s9859_s29  ;;  %4174 = vrot.lane.b32.xlu1 %v4173_v14, %s9859_s29  ;;  %v9296_v16 = vld [vmem:[#allocation8 + $0x120] sm:$0xff]   ;;  %v4120_v14 = vrot.slane %v4118_v21, 6 }
 0xc73   :  { %v9314_v21 = vld [vmem:[#allocation8 + $0x200] sm:$0xff]  }
 0xc76   :  { %3997 = vrot.lane.b32.xlu0 %v3995_v58, %s9859_s29  ;;  %3989 = vrot.lane.b32.xlu1 %v3987_v30, %s9859_s29  ;;  %v9297_v58 = vld [vmem:[#allocation8 + $0x1a8] sm:$0xff]  }
 0xcb8   :  { %v3950_v54 = vpop.permute.xlu0 %3949  ;;  %v3942_v34 = vpop.permute.xlu1 %3941 }
 0xcb9   :  { %3952 = vst.msk [vmem:[#allocation3 + $0xc] sm:$0x3] %vm3927_vm6, %v3950_v54  ;;  %3944 = vst.msk [vmem:[#allocation3 + $0x8] sm:$0x3] %vm3927_vm6, %v3942_v34  ;;  %v4108_v54 = vrot.slane %v4106_v47, 6 }
 0xcbc   :  { %v4067_v35 = vpop.permute.xlu0 %4066  ;;  %v4053_v49 = vpop.permute.xlu1 %4052 }
 0xcbd   :  { %4069 = vst.msk [vmem:[#allocation3 + $0x4] sm:$0xc] %vm4055_vm7, %v4067_v35  ;;  %4056 = vst.msk [vmem:[#allocation3] sm:$0xc] %vm4055_vm7, %v4053_v49  ;;  %v9299_v49 = vld [vmem:[#allocation8 + $0x1f0] sm:$0xff]  }
 0xcbe   :  { %4074 = vst.msk [vmem:[#allocation3 + $0x4] sm:$0xc] %vm4061_vm8, %v4072_v50  ;;  %4062 = vst.msk [vmem:[#allocation3] sm:$0xc] %vm4061_vm8, %v4059_v43  ;;  %v9298_v50 = vld [vmem:[#allocation8 + $0x168] sm:$0xff]  }
 0xcc0   :  { %v4091_v60 = vpop.permute.xlu0 %4090  ;;  %v4079_v19 = vpop.permute.xlu1 %4078 }
 0xcc1   :  { %4093 = vst.msk [vmem:[#allocation3 + $0xc] sm:$0xc] %vm4055_vm7, %v4091_v60  ;;  %4081 = vst.msk [vmem:[#allocation3 + $0x8] sm:$0xc] %vm4055_vm7, %v4079_v19  ;;  %v9303_v19 = vld [vmem:[#allocation8 + $0x1f8] sm:$0xff]  }
 0xcc2   :  { %4098 = vst.msk [vmem:[#allocation3 + $0xc] sm:$0xc] %vm4061_vm8, %v4096_v20  ;;  %4086 = vst.msk [vmem:[#allocation3 + $0x8] sm:$0xc] %vm4061_vm8, %v4084_v33  ;;  %v9302_v20 = vld [vmem:[#allocation8 + $0x170] sm:$0xff]  }
 0xcc4   :  { %v3934_v53 = vpop.permute.xlu0 %3933  ;;  %v3925_v5 = vpop.permute.xlu1 %3924 }
 0xcc5   :  { %3936 = vst.msk [vmem:[#allocation3 + $0x4] sm:$0x3] %vm3927_vm6, %v3934_v53  ;;  %3928 = vst.msk [vmem:[#allocation3] sm:$0x3] %vm3927_vm6, %v3925_v5 }
 0xcc9   :  { %v4244_v22 = vld [vmem:[#allocation3 + $0x8] sm:$0xff] }
 0xcca   :  { %v4260_v32 = vcombine.high %v4244_v22, %v4244_v22  ;;  %v11188_v2 = vpack.c.bf16 %v4244_v22, %v4244_v22 }
 0xccc   :  { %v11186_v25 = vpack.c.bf16 %v4260_v32, %v4260_v32  ;;  %v4243_v9 = vld [vmem:[#allocation3] sm:$0xff]  ;;  %v9305_v32 = vld [vmem:[#allocation8 + $0x130] sm:$0xff]  }
 0xccd   :  { %v4259_v0 = vcombine.high %v4243_v9, %v4243_v9  ;;  %v11194_v37 = vpack.c.bf16 %v4243_v9, %v4243_v9 }
 0xcce   :  { %5394 = vmatprep.mubr.bf16.mxu1 %v11186_v25 }
 0xccf   :  { %5395 = vmatmul.mubr.bf16.vlgmr.msra.gmra.mrb[128].mxu1 %v11188_v2  ;;  %v11192_v12 = vpack.c.bf16 %v4259_v0, %v4259_v0 }
 0xcd0   :  { %8774 = vmatpush3.bf16.msra.mxu1 %v9276_v31  ;;  %v9306_v31 = vld [vmem:[#allocation8 + $0x1b8] sm:$0xff]  }
 0xcd1   :  { %5354 = vmatprep.mubr.bf16.mxu0 %v11192_v12  ;;  %8775 = vmatprep.subr.bf16.mxu1 %v9279_v27 }
 0xcd2   :  { %5355 = vmatmul.mubr.bf16.vlgmr.msra.gmra.mrb[128].mxu0 %v11194_v37 }
 0xcd3   :  { %8752 = vmatpush3.bf16.msra.mxu0 %v9280_v41 }
 0xcd4   :  { %8776 = vmatpush3.bf16.msra.mxu1 %v9281_v52  ;;  %8753 = vmatprep.subr.bf16.mxu0 %v9282_v23 }
 0xcd5   :  { %v3799_v40 = vpop.permute.xlu0 %3798  ;;  %v3804_v29 = vpop.permute.xlu1 %3803  ;;  %8777 = vmatprep.subr.bf16.mxu1 %v9283_v13 }
 0xcd6   :  { %v3897_v57 = vadd.f32 %v11128_v46, %v3799_v40  ;;  %v3900_v28 = vadd.f32 %v11130_v59, %v3804_v29  ;;  %v9292_v46 = vld [vmem:[#allocation8 + $0x118] sm:$0xff]   ;;  %v9293_v59 = vld [vmem:[#allocation8 + $0x1a0] sm:$0xff]  }
 0xcd7   :  { %8754 = vmatpush3.bf16.msra.mxu0 %v9284_v56  ;;  %v9307_v40 = vld [vmem:[#allocation8 + $0x178] sm:$0xff]  }
 0xcd8   :  { %v3909_v38 = vmax.f32 %v3897_v57, 0.0  ;;  %v3910_v62 = vmax.f32 %v3900_v28, 0.0  ;;  %8778 = vmatpush3.bf16.msra.mxu1 %v9285_v8  ;;  %8755 = vmatprep.subr.bf16.mxu0 %v9286_v10  ;;  %v4154_v57 = vld [vmem:[#allocation2 + $0x22] sm:$0x3] }
 0xcd9   :  { %v4139_v3 = vpop.permute.xlu0 %4138  ;;  %v4127_v45 = vpop.permute.xlu1 %4126  ;;  %8779 = vmatprep.subr.bf16.mxu1 %v9287_v63  ;;  %v4166_v63 = vld [vmem:[#allocation2 + $0x26] sm:$0x3] }
 0xcda   :  { %3917 = vst [vmem:[#allocation2 + $0x30] sm:$0xff] %v3909_v38  ;;  %3918 = vst [vmem:[#allocation2 + $0x38] sm:$0xff] %v3910_v62  ;;  %v9308_v28 = vld [vmem:[#allocation8 + $0x2c0] sm:$0xff]   ;;  %v4168_v62 = vrot.slane %v4166_v63, 6  ;;  %v9340_v63 = vld [vmem:[#allocation8 + $0x230] sm:$0xff]  }
 0xcdb   :  { %4141 = vst.msk [vmem:[#allocation3 + $0x1c] sm:$0xc] %vm4055_vm7, %v4139_v3  ;;  %4129 = vst.msk [vmem:[#allocation3 + $0x18] sm:$0xc] %vm4055_vm7, %v4127_v45  ;;  %8756 = vmatpush3.bf16.msra.mxu0 %v9288_v15  ;;  %v9310_v15 = vld [vmem:[#allocation8 + $0x280] sm:$0xff]  }
 0xcdc   :  { %4146 = vst.msk [vmem:[#allocation3 + $0x1c] sm:$0xc] %vm4061_vm8, %v4144_v42  ;;  %4134 = vst.msk [vmem:[#allocation3 + $0x18] sm:$0xc] %vm4061_vm8, %v4132_v24  ;;  %8780 = vmatpush3.bf16.msra.mxu1 %v9289_v11  ;;  %8757 = vmatprep.subr.bf16.mxu0 %v9290_v7  ;;  %v4156_v7 = vrot.slane %v4154_v57, 6  ;;  %v9312_v24 = vld [vmem:[#allocation8 + $0x240] sm:$0xff]  }
 0xcdd   :  { %v3982_v55 = vpop.permute.xlu0 %3981  ;;  %v3974_v1 = vpop.permute.xlu1 %3973  ;;  %8781 = vmatprep.subr.bf16.mxu1 %v9291_v39  ;;  %v4190_v45 = vld [vmem:[#allocation2 + $0x2e] sm:$0x3]  ;;  %v4178_v39 = vld [vmem:[#allocation2 + $0x2a] sm:$0x3]  ;;  %v9341_v57 = vld [vmem:[#allocation8 + $0x2b8] sm:$0xff]  }
 0xcde   :  { %3984 = vst.msk [vmem:[#allocation3 + $0x1c] sm:$0x3] %vm3927_vm6, %v3982_v55  ;;  %3976 = vst.msk [vmem:[#allocation3 + $0x18] sm:$0x3] %vm3927_vm6, %v3974_v1  ;;  %v4192_v47 = vrot.slane %v4190_v45, 6  ;;  %v9349_v45 = vld [vmem:[#allocation8 + $0x3d0] sm:$0xff]  }
 0xcdf   :  { %8758 = vmatpush3.bf16.msra.mxu0 %v9292_v46 }
 0xce0   :  { %8782 = vmatpush3.bf16.msra.mxu1 %v9293_v59  ;;  %8759 = vmatprep.subr.bf16.mxu0 %v9294_v26  ;;  %v9313_v59 = vld [vmem:[#allocation8 + $0x2c8] sm:$0xff]  }
 0xce1   :  { %v4115_v30 = vpop.permute.xlu0 %4114  ;;  %v4103_v34 = vpop.permute.xlu1 %4102  ;;  %8783 = vmatprep.subr.bf16.mxu1 %v9295_v36  ;;  %v4231_v51 = vld [vmem:[#allocation2 + $0x3c] sm:$0x3]  ;;  %v4219_v6 = vld [vmem:[#allocation2 + $0x38] sm:$0x3]  ;;  %v4043_v0 = vld [vmem:[#allocation2 + $0x3e] sm:$0x3] }
 0xce2   :  { %4117 = vst.msk [vmem:[#allocation3 + $0x14] sm:$0xc] %vm4055_vm7, %v4115_v30  ;;  %4105 = vst.msk [vmem:[#allocation3 + $0x10] sm:$0xc] %vm4055_vm7, %v4103_v34  ;;  %v4233_v35 = vrot.slane %v4231_v51, 6  ;;  %v4221_v43 = vrot.slane %v4219_v6, 6 }
 0xce3   :  { %4122 = vst.msk [vmem:[#allocation3 + $0x14] sm:$0xc] %vm4061_vm8, %v4120_v14  ;;  %4110 = vst.msk [vmem:[#allocation3 + $0x10] sm:$0xc] %vm4061_vm8, %v4108_v54  ;;  %8760 = vmatpush3.bf16.msra.mxu0 %v9296_v16  ;;  %v4041_v5 = vld [vmem:[#allocation2 + $0x3c] sm:$0x3] }
 0xce4   :  { %8784 = vmatpush3.bf16.msra.mxu1 %v9297_v58  ;;  %4234 = vrot.lane.b32.xlu0 %v4233_v35, %s9859_s29  ;;  %4042 = vst.msk [vmem:[#allocation3 + $0x3c] sm:$0x3] %vm3920_vm5, %v4041_v5  ;;  %v4033_v9 = vld [vmem:[#allocation2 + $0x38] sm:$0x3]  ;;  %v4207_v27 = vld [vmem:[#allocation2 + $0x34] sm:$0x3] }
 0xce5   :  { %4222 = vrot.lane.b32.xlu1 %v4221_v43, %s9859_s29  ;;  %v3966_v60 = vpop.permute.xlu0 %3965  ;;  %v3958_v33 = vpop.permute.xlu1 %3957  ;;  %8761 = vmatprep.subr.bf16.mxu0 %v9298_v50  ;;  %v4246_v53 = vld [vmem:[#allocation3 + $0x18] sm:$0xff]  ;;  %4034 = vst.msk [vmem:[#allocation3 + $0x38] sm:$0x3] %vm3920_vm5, %v4033_v9  ;;  %v4025_v41 = vld [vmem:[#allocation2 + $0x34] sm:$0x3]  ;;  %v4209_v29 = vrot.slane %v4207_v27, 6 }
 0xce6   :  { %3968 = vst.msk [vmem:[#allocation3 + $0x14] sm:$0x3] %vm3927_vm6, %v3966_v60  ;;  %3960 = vst.msk [vmem:[#allocation3 + $0x10] sm:$0x3] %vm3927_vm6, %v3958_v33  ;;  %8785 = vmatprep.subr.bf16.mxu1 %v9299_v49  ;;  %v4262_v22 = vcombine.high %v4246_v53, %v4246_v53  ;;  %v4035_v52 = vld [vmem:[#allocation2 + $0x3a] sm:$0x3]  ;;  %v11226_v38 = vpack.c.bf16 %v4246_v53, %v4246_v53 }
 0xce7   :  { %8762 = vmatpush3.bf16.msra.mxu0 %v9300_v4  ;;  %v4195_v13 = vld [vmem:[#allocation2 + $0x30] sm:$0x3]  ;;  %4026 = vst.msk [vmem:[#allocation3 + $0x34] sm:$0x3] %vm3920_vm5, %v4025_v41  ;;  %v4027_v26 = vld [vmem:[#allocation2 + $0x36] sm:$0x3] }
 0xce8   :  { %8786 = vmatpush3.bf16.msra.mxu1 %v9301_v61  ;;  %4045 = vrot.lane.b32.xlu0 %v4043_v0, %s9859_s29  ;;  %v11217_v23 = vpack.c.bf16 %v4262_v22, %v4262_v22  ;;  %v4017_v56 = vld [vmem:[#allocation2 + $0x30] sm:$0x3]  ;;  %v4197_v44 = vrot.slane %v4195_v13, 6  ;;  %v4019_v55 = vld [vmem:[#allocation2 + $0x32] sm:$0x3]  ;;  %v4180_v14 = vrot.slane %v4178_v39, 6 }
 0xce9   :  { %4037 = vrot.lane.b32.xlu1 %v4035_v52, %s9859_s29  ;;  %v4014_v8 = vpop.permute.xlu0 %4013  ;;  %v4006_v10 = vpop.permute.xlu1 %4005  ;;  %8763 = vmatprep.subr.bf16.mxu0 %v9302_v20  ;;  %4018 = vst.msk [vmem:[#allocation3 + $0x30] sm:$0x3] %vm3920_vm5, %v4017_v56  ;;  %v9315_v36 = vld [vmem:[#allocation8 + $0x288] sm:$0xff]   ;;  %v9317_v34 = vld [vmem:[#allocation8 + $0x2d0] sm:$0xff]   ;;  %v9321_v49 = vld [vmem:[#allocation8 + $0x2d8] sm:$0xff]  }
 0xcea   :  { %4016 = vst.msk [vmem:[#allocation3 + $0x2c] sm:$0x3] %vm3927_vm6, %v4014_v8  ;;  %4008 = vst.msk [vmem:[#allocation3 + $0x28] sm:$0x3] %vm3927_vm6, %v4006_v10  ;;  %8787 = vmatprep.subr.bf16.mxu1 %v9303_v19  ;;  %5474 = vmatprep.mubr.bf16.mxu1 %v11217_v23  ;;  %v9316_v54 = vld [vmem:[#allocation8 + $0x248] sm:$0xff]   ;;  %v9319_v6 = vld [vmem:[#allocation8 + $0x290] sm:$0xff]  }
 0xceb   :  { %8764 = vmatpush3.bf16.msra.mxu0 %v9305_v32  ;;  %v9318_v51 = vld [vmem:[#allocation8 + $0x208] sm:$0xff]   ;;  %v9320_v43 = vld [vmem:[#allocation8 + $0x250] sm:$0xff]   ;;  %v9323_v61 = vld [vmem:[#allocation8 + $0x298] sm:$0xff]  }
 0xcec   :  { %8788 = vmatpush3.bf16.msra.mxu1 %v9306_v31  ;;  %4210 = vrot.lane.b32.xlu0 %v4209_v29, %s9859_s29  ;;  %v9322_v4 = vld [vmem:[#allocation8 + $0x210] sm:$0xff]   ;;  %v9324_v20 = vld [vmem:[#allocation8 + $0x258] sm:$0xff]   ;;  %v9325_v60 = vld [vmem:[#allocation8 + $0x2e0] sm:$0xff]  }
 0xced   :  { %4198 = vrot.lane.b32.xlu1 %v4197_v44, %s9859_s29  ;;  %v4163_v11 = vpop.permute.xlu0 %4162  ;;  %v4151_v42 = vpop.permute.xlu1 %4150  ;;  %8765 = vmatprep.subr.bf16.mxu0 %v9307_v40  ;;  %v4245_v3 = vld [vmem:[#allocation3 + $0x10] sm:$0xff]  ;;  %v9326_v53 = vld [vmem:[#allocation8 + $0x218] sm:$0xff]   ;;  %v9327_v5 = vld [vmem:[#allocation8 + $0x2a0] sm:$0xff]  }
 0xcee   :  { %4165 = vst.msk [vmem:[#allocation3 + $0x24] sm:$0xc] %vm4055_vm7, %v4163_v11  ;;  %4153 = vst.msk [vmem:[#allocation3 + $0x20] sm:$0xc] %vm4055_vm7, %v4151_v42  ;;  %8817 = vmatprep.subr.bf16.mxu1 %v9308_v28  ;;  %v4261_v46 = vcombine.high %v4245_v3, %v4245_v3  ;;  %v11238_v30 = vpack.c.bf16 %v4245_v3, %v4245_v3  ;;  %v9329_v32 = vld [vmem:[#allocation8 + $0x260] sm:$0xff]   ;;  %v9331_v9 = vld [vmem:[#allocation8 + $0x2e8] sm:$0xff]  }
 0xcef   :  { %4170 = vst.msk [vmem:[#allocation3 + $0x24] sm:$0xc] %vm4061_vm8, %v4168_v62  ;;  %4158 = vst.msk [vmem:[#allocation3 + $0x20] sm:$0xc] %vm4061_vm8, %v4156_v7  ;;  %5475 = vmatmul.mubr.bf16.vlgmr.msra.gmra.mrb[132].mxu1 %v11226_v38  ;;  %8766 = vmatpush3.bf16.msra.mxu0 %v9309_v48  ;;  %v9332_v41 = vld [vmem:[#allocation8 + $0x220] sm:$0xff]   ;;  %v9333_v52 = vld [vmem:[#allocation8 + $0x2a8] sm:$0xff]  }
 0xcf0   :  { %8818 = vmatpush3.bf16.msra.mxu1 %v9310_v15  ;;  %4029 = vrot.lane.b32.xlu0 %v4027_v26, %s9859_s29  ;;  %v11235_v1 = vpack.c.bf16 %v4261_v46, %v4261_v46  ;;  %v9334_v13 = vld [vmem:[#allocation8 + $0x268] sm:$0xff]   ;;  %v9335_v56 = vld [vmem:[#allocation8 + $0x2f0] sm:$0xff]   ;;  %v9339_v29 = vld [vmem:[#allocation8 + $0x2f8] sm:$0xff]  }
 0xcf1   :  { %4021 = vrot.lane.b32.xlu1 %v4019_v55, %s9859_s29  ;;  %v4187_v16 = vpop.permute.xlu0 %4186  ;;  %v4175_v58 = vpop.permute.xlu1 %4174  ;;  %8795 = vmatprep.subr.bf16.mxu0 %v9312_v24  ;;  %v9336_v8 = vld [vmem:[#allocation8 + $0x228] sm:$0xff]   ;;  %v9337_v10 = vld [vmem:[#allocation8 + $0x2b0] sm:$0xff]   ;;  %v9342_v28 = vld [vmem:[#allocation8 + $0x278] sm:$0xff]  }
 0xcf2   :  { %4189 = vst.msk [vmem:[#allocation3 + $0x2c] sm:$0xc] %vm4055_vm7, %v4187_v16  ;;  %4177 = vst.msk [vmem:[#allocation3 + $0x28] sm:$0xc] %vm4055_vm7, %v4175_v58  ;;  %5434 = vmatprep.mubr.bf16.mxu0 %v11235_v1  ;;  %8819 = vmatprep.subr.bf16.mxu1 %v9313_v59  ;;  %v9338_v40 = vld [vmem:[#allocation8 + $0x270] sm:$0xff]   ;;  %v9344_v44 = vld [vmem:[#allocation8 + $0x3c0] sm:$0xff]  }
 0xcf3   :  { %4194 = vst.msk [vmem:[#allocation3 + $0x2c] sm:$0xc] %vm4061_vm8, %v4192_v47  ;;  %4182 = vst.msk [vmem:[#allocation3 + $0x28] sm:$0xc] %vm4061_vm8, %v4180_v14  ;;  %5435 = vmatmul.mubr.bf16.vlgmr.msra.gmra.mrb[132].mxu0 %v11238_v30  ;;  %v9343_v48 = vld [vmem:[#allocation8 + $0x238] sm:$0xff]   ;;  %v9345_v15 = vld [vmem:[#allocation8 + $0x380] sm:$0xff]  }
 0xcf4   :  { %8796 = vmatpush3.bf16.msra.mxu0 %v9314_v21  ;;  %8820 = vmatpush3.bf16.msra.mxu1 %v9315_v36  ;;  %v9346_v11 = vld [vmem:[#allocation8 + $0x3c8] sm:$0xff]   ;;  %v9348_v7 = vld [vmem:[#allocation8 + $0x340] sm:$0xff]   ;;  %v9351_v46 = vld [vmem:[#allocation8 + $0x390] sm:$0xff]  }
 0xcf5   :  { %v3998_v50 = vpop.permute.xlu0 %3997  ;;  %v3990_v35 = vpop.permute.xlu1 %3989  ;;  %8797 = vmatprep.subr.bf16.mxu0 %v9316_v54  ;;  %8821 = vmatprep.subr.bf16.mxu1 %v9317_v34  ;;  %v9347_v42 = vld [vmem:[#allocation8 + $0x388] sm:$0xff]   ;;  %v9350_v3 = vld [vmem:[#allocation8 + $0x300] sm:$0xff]   ;;  %v9353_v26 = vld [vmem:[#allocation8 + $0x3d8] sm:$0xff]  }
 0xcf6   :  { %4000 = vst.msk [vmem:[#allocation3 + $0x24] sm:$0x3] %vm3927_vm6, %v3998_v50  ;;  %3992 = vst.msk [vmem:[#allocation3 + $0x20] sm:$0x3] %vm3927_vm6, %v3990_v35  ;;  %v9352_v39 = vld [vmem:[#allocation8 + $0x348] sm:$0xff]   ;;  %v9356_v55 = vld [vmem:[#allocation8 + $0x350] sm:$0xff]  }
 0xcf7   :  { %v9354_v59 = vld [vmem:[#allocation8 + $0x308] sm:$0xff]   ;;  %v9355_v21 = vld [vmem:[#allocation8 + $0x398] sm:$0xff]   ;;  %v9358_v36 = vld [vmem:[#allocation8 + $0x310] sm:$0xff]  }
 0xcf8   :  { %8798 = vmatpush3.bf16.msra.mxu0 %v9318_v51  ;;  %8822 = vmatpush3.bf16.msra.mxu1 %v9319_v6  ;;  %v9357_v47 = vld [vmem:[#allocation8 + $0x3e0] sm:$0xff]   ;;  %v9360_v16 = vld [vmem:[#allocation8 + $0x358] sm:$0xff]   ;;  %v9361_v54 = vld [vmem:[#allocation8 + $0x3e8] sm:$0xff]  }
 0xcf9   :  { %8799 = vmatprep.subr.bf16.mxu0 %v9320_v43  ;;  %8823 = vmatprep.subr.bf16.mxu1 %v9321_v49  ;;  %v9359_v14 = vld [vmem:[#allocation8 + $0x3a0] sm:$0xff]   ;;  %v9362_v58 = vld [vmem:[#allocation8 + $0x318] sm:$0xff]   ;;  %v9363_v51 = vld [vmem:[#allocation8 + $0x3a8] sm:$0xff]  }
 0xcfa   :  { %v4248_v33 = vld [vmem:[#allocation3 + $0x28] sm:$0xff]  ;;  %v9365_v50 = vld [vmem:[#allocation8 + $0x3f0] sm:$0xff]  }
 0xcfb   :  { %v4264_v19 = vcombine.high %v4248_v33, %v4248_v33  ;;  %v11254_v62 = vpack.c.bf16 %v4248_v33, %v4248_v33  ;;  %v9364_v34 = vld [vmem:[#allocation8 + $0x360] sm:$0xff]   ;;  %v9368_v35 = vld [vmem:[#allocation8 + $0x368] sm:$0xff]   ;;  %v9367_v43 = vld [vmem:[#allocation8 + $0x3b0] sm:$0xff]  }
 0xcfc   :  { %8800 = vmatpush3.bf16.msra.mxu0 %v9322_v4  ;;  %8824 = vmatpush3.bf16.msra.mxu1 %v9323_v61  ;;  %v9366_v6 = vld [vmem:[#allocation8 + $0x320] sm:$0xff]   ;;  %v9370_v49 = vld [vmem:[#allocation8 + $0x328] sm:$0xff]   ;;  %v9369_v4 = vld [vmem:[#allocation8 + $0x3f8] sm:$0xff]  }
 0xcfd   :  { %8801 = vmatprep.subr.bf16.mxu0 %v9324_v20  ;;  %8825 = vmatprep.subr.bf16.mxu1 %v9325_v60  ;;  %v11248_v22 = vpack.c.bf16 %v4264_v19, %v4264_v19  ;;  %v4247_v31 = vld [vmem:[#allocation3 + $0x20] sm:$0xff]  ;;  %v9372_v61 = vld [vmem:[#allocation8 + $0x370] sm:$0xff]  }
 0xcfe   :  { %v4263_v0 = vcombine.high %v4247_v31, %v4247_v31  ;;  %v11257_v24 = vpack.c.bf16 %v4247_v31, %v4247_v31  ;;  %v9371_v20 = vld [vmem:[#allocation8 + $0x3b8] sm:$0xff]   ;;  %v9377_v60 = vld [vmem:[#allocation8 + $0x330] sm:$0xff]   ;;  %v9376_v33 = vld [vmem:[#allocation10 + $0x4] ss:$8 sps:$4 sm:$0xff]  }
 0xcff   :  { %5554 = vmatprep.mubr.bf16.mxu1 %v11248_v22  ;;  %v9378_v19 = vld [vmem:[#allocation8 + $0x378] sm:$0xff]  }
 0xd00   :  { %8802 = vmatpush3.bf16.msra.mxu0 %v9326_v53  ;;  %8826 = vmatpush3.bf16.msra.mxu1 %v9327_v5  ;;  %v11251_v27 = vpack.c.bf16 %v4263_v0, %v4263_v0  ;;  %v9382_v53 = vld [vmem:[#allocation8 + $0x338] sm:$0xff]   ;;  %v9389_v5 = vld [vmem:[#allocation10 + $0x404] ss:$8 sps:$4 sm:$0xff]  }
 0xd01   :  { %8803 = vmatprep.subr.bf16.mxu0 %v9329_v32  ;;  %8827 = vmatprep.subr.bf16.mxu1 %v9331_v9  ;;  %v4238_v32 = vld [vmem:[#allocation2 + $0x3e] sm:$0x3]  ;;  %v4226_v31 = vld [vmem:[#allocation2 + $0x3a] sm:$0x3] }
 0xd02   :  { %5514 = vmatprep.mubr.bf16.mxu0 %v11251_v27  ;;  %v4240_v9 = vrot.slane %v4238_v32, 6  ;;  %v9420_v32 = vld [vmem:[#allocation10 + $0x80] ss:$8 sps:$4 sm:$0xff]  }
 0xd04   :  { %8804 = vmatpush3.bf16.msra.mxu0 %v9332_v41  ;;  %8828 = vmatpush3.bf16.msra.mxu1 %v9333_v52  ;;  %v4228_v41 = vrot.slane %v4226_v31, 6  ;;  %v9423_v31 = vld [vmem:[#allocation10 + $0x460] ss:$8 sps:$4 sm:$0xff]  }
 0xd05   :  { %8805 = vmatprep.subr.bf16.mxu0 %v9334_v13  ;;  %8829 = vmatprep.subr.bf16.mxu1 %v9335_v56 }
 0xd08   :  { %8806 = vmatpush3.bf16.msra.mxu0 %v9336_v8  ;;  %8830 = vmatpush3.bf16.msra.mxu1 %v9337_v10  ;;  %v4214_v8 = vld [vmem:[#allocation2 + $0x36] sm:$0x3]  ;;  %v4202_v10 = vld [vmem:[#allocation2 + $0x32] sm:$0x3] }
 0xd09   :  { %8807 = vmatprep.subr.bf16.mxu0 %v9338_v40  ;;  %8831 = vmatprep.subr.bf16.mxu1 %v9339_v29  ;;  %v4216_v40 = vrot.slane %v4214_v8, 6  ;;  %v9432_v8 = vld [vmem:[#allocation10 + $0xa0] ss:$8 sps:$4 sm:$0xff]  }
 0xd0c   :  { %8808 = vmatpush3.bf16.msra.mxu0 %v9340_v63  ;;  %8832 = vmatpush3.bf16.msra.mxu1 %v9341_v57  ;;  %v4204_v63 = vrot.slane %v4202_v10, 6  ;;  %v9435_v10 = vld [vmem:[#allocation10 + $0x480] ss:$8 sps:$4 sm:$0xff]  }
 0xd0d   :  { %8809 = vmatprep.subr.bf16.mxu0 %v9342_v28  ;;  %8861 = vmatprep.subr.bf16.mxu1 %v9344_v44 }
 0xd0f   :  { %5555 = vmatmul.mubr.bf16.vlgmr.msra.gmra.mrb[136].mxu1 %v11254_v62 }
 0xd10   :  { %8810 = vmatpush3.bf16.msra.mxu0 %v9343_v48  ;;  %8862 = vmatpush3.bf16.msra.mxu1 %v9345_v15 }
 0xd11   :  { %8863 = vmatprep.subr.bf16.mxu1 %v9346_v11  ;;  %8839 = vmatprep.subr.bf16.mxu0 %v9348_v7  ;;  %v9374_v7 = vld [vmem:[#allocation10] ss:$8 sps:$4 sm:$0xff]  }
 0xd13   :  { %5515 = vmatmul.mubr.bf16.vlgmr.msra.gmra.mrb[136].mxu0 %v11257_v24 }
 0xd14   :  { %8864 = vmatpush3.bf16.msra.mxu1 %v9347_v42  ;;  %8840 = vmatpush3.bf16.msra.mxu0 %v9350_v3  ;;  %v9381_v3 = vld [vmem:[#allocation10 + $0x14] ss:$8 sps:$4 sm:$0xff]  }
 0xd15   :  { %8865 = vmatprep.subr.bf16.mxu1 %v9349_v45  ;;  %8841 = vmatprep.subr.bf16.mxu0 %v9352_v39  ;;  %v9379_v45 = vld [vmem:[#allocation10 + $0x10] ss:$8 sps:$4 sm:$0xff]  }
 0xd18   :  { %8866 = vmatpush3.bf16.msra.mxu1 %v9351_v46  ;;  %8842 = vmatpush3.bf16.msra.mxu0 %v9354_v59  ;;  %v9386_v46 = vld [vmem:[#allocation10 + $0x24] ss:$8 sps:$4 sm:$0xff]  }
 0xd19   :  { %8867 = vmatprep.subr.bf16.mxu1 %v9353_v26  ;;  %8843 = vmatprep.subr.bf16.mxu0 %v9356_v55  ;;  %v9384_v55 = vld [vmem:[#allocation10 + $0x20] ss:$8 sps:$4 sm:$0xff]  }
 0xd1c   :  { %8868 = vmatpush3.bf16.msra.mxu1 %v9355_v21  ;;  %8844 = vmatpush3.bf16.msra.mxu0 %v9358_v36  ;;  %v9387_v21 = vld [vmem:[#allocation10 + $0x400] ss:$8 sps:$4 sm:$0xff]  }
 0xd1d   :  { %8869 = vmatprep.subr.bf16.mxu1 %v9357_v47  ;;  %8845 = vmatprep.subr.bf16.mxu0 %v9360_v16  ;;  %v9392_v47 = vld [vmem:[#allocation10 + $0x34] ss:$8 sps:$4 sm:$0xff]  }
 0xd1e   :  { %v9395_v16 = vld [vmem:[#allocation10 + $0x414] ss:$8 sps:$4 sm:$0xff]  }
 0xd20   :  { %8870 = vmatpush3.bf16.msra.mxu1 %v9359_v14  ;;  %8846 = vmatpush3.bf16.msra.mxu0 %v9362_v58  ;;  %v9393_v14 = vld [vmem:[#allocation10 + $0x410] ss:$8 sps:$4 sm:$0xff]   ;;  %v9398_v58 = vld [vmem:[#allocation10 + $0x44] ss:$8 sps:$4 sm:$0xff]  }
 0xd21   :  { %8871 = vmatprep.subr.bf16.mxu1 %v9361_v54  ;;  %8847 = vmatprep.subr.bf16.mxu0 %v9364_v34  ;;  %v9401_v54 = vld [vmem:[#allocation10 + $0x424] ss:$8 sps:$4 sm:$0xff]   ;;  %v9396_v34 = vld [vmem:[#allocation10 + $0x40] ss:$8 sps:$4 sm:$0xff]  }
 0xd24   :  { %8872 = vmatpush3.bf16.msra.mxu1 %v9363_v51  ;;  %8848 = vmatpush3.bf16.msra.mxu0 %v9366_v6  ;;  %v9399_v51 = vld [vmem:[#allocation10 + $0x420] ss:$8 sps:$4 sm:$0xff]   ;;  %v9404_v6 = vld [vmem:[#allocation10 + $0x54] ss:$8 sps:$4 sm:$0xff]  }
 0xd25   :  { %8873 = vmatprep.subr.bf16.mxu1 %v9365_v50  ;;  %8849 = vmatprep.subr.bf16.mxu0 %v9368_v35  ;;  %v9407_v50 = vld [vmem:[#allocation10 + $0x434] ss:$8 sps:$4 sm:$0xff]   ;;  %v9402_v35 = vld [vmem:[#allocation10 + $0x50] ss:$8 sps:$4 sm:$0xff]  }
 0xd28   :  { %8874 = vmatpush3.bf16.msra.mxu1 %v9367_v43  ;;  %8850 = vmatpush3.bf16.msra.mxu0 %v9370_v49  ;;  %v9405_v43 = vld [vmem:[#allocation10 + $0x430] ss:$8 sps:$4 sm:$0xff]   ;;  %v9410_v49 = vld [vmem:[#allocation10 + $0x64] ss:$8 sps:$4 sm:$0xff]  }
 0xd29   :  { %8875 = vmatprep.subr.bf16.mxu1 %v9369_v4  ;;  %8851 = vmatprep.subr.bf16.mxu0 %v9372_v61  ;;  %v9408_v4 = vld [vmem:[#allocation10 + $0x60] ss:$8 sps:$4 sm:$0xff]  }
 0xd2a   :  { %v9411_v61 = vld [vmem:[#allocation10 + $0x440] ss:$8 sps:$4 sm:$0xff]  }
 0xd2c   :  { %8876 = vmatpush3.bf16.msra.mxu1 %v9371_v20  ;;  %8852 = vmatpush3.bf16.msra.mxu0 %v9377_v60  ;;  %v9416_v20 = vld [vmem:[#allocation10 + $0x74] ss:$8 sps:$4 sm:$0xff]  }
 0xd2d   :  { %7190 = vmatprep.subr.bf16.mxu1 %v9376_v33  ;;  %8853 = vmatprep.subr.bf16.mxu0 %v9378_v19  ;;  %v9419_v60 = vld [vmem:[#allocation10 + $0x454] ss:$8 sps:$4 sm:$0xff]   ;;  %v9414_v33 = vld [vmem:[#allocation10 + $0x70] ss:$8 sps:$4 sm:$0xff]  }
 0xd2e   :  { %v9417_v19 = vld [vmem:[#allocation10 + $0x450] ss:$8 sps:$4 sm:$0xff]  }
 0xd30   :  { %8854 = vmatpush3.bf16.msra.mxu0 %v9382_v53  ;;  %v9422_v53 = vld [vmem:[#allocation10 + $0x84] ss:$8 sps:$4 sm:$0xff]  }
 0xd31   :  { %7354 = vmatprep.subr.bf16.mxu0 %v9389_v5  ;;  %v9425_v5 = vld [vmem:[#allocation10 + $0x464] ss:$8 sps:$4 sm:$0xff]  }
 0xd56   :  { %v4235_v0 = vpop.permute.xlu0 %4234 }
 0xd57   :  { %4237 = vst.msk [vmem:[#allocation3 + $0x3c] sm:$0xc] %vm4055_vm7, %v4235_v0  ;;  %v4223_v52 = vpop.permute.xlu1 %4222  ;;  %v9431_v0 = vld [vmem:[#allocation10 + $0x474] ss:$8 sps:$4 sm:$0xff]  }
 0xd58   :  { %4242 = vst.msk [vmem:[#allocation3 + $0x3c] sm:$0xc] %vm4061_vm8, %v4240_v9  ;;  %v9428_v9 = vld [vmem:[#allocation10 + $0x94] ss:$8 sps:$4 sm:$0xff]  }
 0xd59   :  { %4225 = vst.msk [vmem:[#allocation3 + $0x38] sm:$0xc] %vm4055_vm7, %v4223_v52  ;;  %v9429_v52 = vld [vmem:[#allocation10 + $0x470] ss:$8 sps:$4 sm:$0xff]  }
 0xd5a   :  { %4230 = vst.msk [vmem:[#allocation3 + $0x38] sm:$0xc] %vm4061_vm8, %v4228_v41  ;;  %v4046_v13 = vpop.permute.xlu0 %4045  ;;  %v9426_v41 = vld [vmem:[#allocation10 + $0x90] ss:$8 sps:$4 sm:$0xff]  }
 0xd5b   :  { %4048 = vst.msk [vmem:[#allocation3 + $0x3c] sm:$0x3] %vm3927_vm6, %v4046_v13  ;;  %v4038_v56 = vpop.permute.xlu1 %4037  ;;  %v9434_v13 = vld [vmem:[#allocation10 + $0xa4] ss:$8 sps:$4 sm:$0xff]  }
 0xd5c   :  { %4040 = vst.msk [vmem:[#allocation3 + $0x38] sm:$0x3] %vm3927_vm6, %v4038_v56  ;;  %v9437_v56 = vld [vmem:[#allocation10 + $0x484] ss:$8 sps:$4 sm:$0xff]  }
 0xd5e   :  { %v4211_v29 = vpop.permute.xlu0 %4210 }
 0xd5f   :  { %4213 = vst.msk [vmem:[#allocation3 + $0x34] sm:$0xc] %vm4055_vm7, %v4211_v29  ;;  %v4199_v57 = vpop.permute.xlu1 %4198  ;;  %v9443_v29 = vld [vmem:[#allocation10 + $0x494] ss:$8 sps:$4 sm:$0xff]  }
 0xd60   :  { %4218 = vst.msk [vmem:[#allocation3 + $0x34] sm:$0xc] %vm4061_vm8, %v4216_v40  ;;  %v9440_v40 = vld [vmem:[#allocation10 + $0xb4] ss:$8 sps:$4 sm:$0xff]  }
 0xd61   :  { %4201 = vst.msk [vmem:[#allocation3 + $0x30] sm:$0xc] %vm4055_vm7, %v4199_v57  ;;  %v9441_v57 = vld [vmem:[#allocation10 + $0x490] ss:$8 sps:$4 sm:$0xff]  }
 0xd62   :  { %4206 = vst.msk [vmem:[#allocation3 + $0x30] sm:$0xc] %vm4061_vm8, %v4204_v63  ;;  %v4030_v28 = vpop.permute.xlu0 %4029  ;;  %v9438_v63 = vld [vmem:[#allocation10 + $0xb0] ss:$8 sps:$4 sm:$0xff]  }
 0xd63   :  { %4032 = vst.msk [vmem:[#allocation3 + $0x34] sm:$0x3] %vm3927_vm6, %v4030_v28  ;;  %v4022_v44 = vpop.permute.xlu1 %4021  ;;  %v4250_v48 = vld [vmem:[#allocation3 + $0x38] sm:$0xff]  ;;  %v9446_v28 = vld [vmem:[#allocation10 + $0xc4] ss:$8 sps:$4 sm:$0xff]  }
 0xd64   :  { %4024 = vst.msk [vmem:[#allocation3 + $0x30] sm:$0x3] %vm3927_vm6, %v4022_v44  ;;  %v4266_v15 = vcombine.high %v4250_v48, %v4250_v48  ;;  %v11274_v42 = vpack.c.bf16 %v4250_v48, %v4250_v48  ;;  %v9449_v44 = vld [vmem:[#allocation10 + $0x4a4] ss:$8 sps:$4 sm:$0xff]   ;;  %v9444_v48 = vld [vmem:[#allocation10 + $0xc0] ss:$8 sps:$4 sm:$0xff]  }
 0xd66   :  { %v11272_v11 = vpack.c.bf16 %v4266_v15, %v4266_v15  ;;  %v9447_v15 = vld [vmem:[#allocation10 + $0x4a0] ss:$8 sps:$4 sm:$0xff]  }
 0xd68   :  { %5634 = vmatprep.mubr.bf16.mxu1 %v11272_v11 }
 0xd69   :  { %5635 = vmatmul.mubr.bf16.vlgmr.msra.gmra.mrb[140].mxu1 %v11274_v42 }
 0xd6a   :  { %7191 = vmatpush1.bf16.msra.mxu1 %v9374_v7  ;;  %7222 = vmatprep.mubr.bf16.mxu1 %v11192_v12  ;;  %v9390_v12 = vld [vmem:[#allocation10 + $0x30] ss:$8 sps:$4 sm:$0xff]   ;;  %v9452_v7 = vld [vmem:[#allocation10 + $0xd4] ss:$8 sps:$4 sm:$0xff]  }
 0xd6b   :  { %7192 = vmatprep.subr.bf16.mxu1 %v9381_v3  ;;  %v4249_v39 = vld [vmem:[#allocation3 + $0x30] sm:$0xff] }
 0xd6c   :  { %v4265_v59 = vcombine.high %v4249_v39, %v4249_v39  ;;  %v11281_v36 = vpack.c.bf16 %v4249_v39, %v4249_v39  ;;  %v9455_v3 = vld [vmem:[#allocation10 + $0x4b4] ss:$8 sps:$4 sm:$0xff]   ;;  %v9453_v39 = vld [vmem:[#allocation10 + $0x4b0] ss:$8 sps:$4 sm:$0xff]  }
 0xd6e   :  { %7193 = vmatpush1.bf16.msra.mxu1 %v9379_v45  ;;  %v11279_v26 = vpack.c.bf16 %v4265_v59, %v4265_v59  ;;  %v9450_v45 = vld [vmem:[#allocation10 + $0xd0] ss:$8 sps:$4 sm:$0xff]   ;;  %v9461_v59 = vld [vmem:[#allocation10 + $0x4c4] ss:$8 sps:$4 sm:$0xff]  }
 0xd6f   :  { %7194 = vmatprep.subr.bf16.mxu1 %v9386_v46  ;;  %v9458_v46 = vld [vmem:[#allocation10 + $0xe4] ss:$8 sps:$4 sm:$0xff]  }
 0xd70   :  { %5594 = vmatprep.mubr.bf16.mxu0 %v11279_v26 }
 0xd71   :  { %5595 = vmatmul.mubr.bf16.vlgmr.msra.gmra.mrb[140].mxu0 %v11281_v36 }
 0xd72   :  { %7195 = vmatpush1.bf16.msra.mxu1 %v9384_v55  ;;  %7355 = vmatpush1.bf16.msra.mxu0 %v9387_v21  ;;  %v9456_v55 = vld [vmem:[#allocation10 + $0xe0] ss:$8 sps:$4 sm:$0xff]  }
 0xd73   :  { %7386 = vmatprep.mubr.bf16.mxu0 %v11251_v27  ;;  %7196 = vmatprep.subr.bf16.mxu1 %v9392_v47  ;;  %v9413_v27 = vld [vmem:[#allocation10 + $0x444] ss:$8 sps:$4 sm:$0xff]   ;;  %v9459_v21 = vld [vmem:[#allocation10 + $0x4c0] ss:$8 sps:$4 sm:$0xff]   ;;  %v9464_v47 = vld [vmem:[#allocation10 + $0xf4] ss:$8 sps:$4 sm:$0xff]  }
 0xd74   :  { %7356 = vmatprep.subr.bf16.mxu0 %v9395_v16  ;;  %v9467_v16 = vld [vmem:[#allocation10 + $0x4d4] ss:$8 sps:$4 sm:$0xff]  }
 0xd76   :  { %7197 = vmatpush1.bf16.msra.mxu1 %v9390_v12  ;;  %7357 = vmatpush1.bf16.msra.mxu0 %v9393_v14  ;;  %v9462_v14 = vld [vmem:[#allocation10 + $0xf0] ss:$8 sps:$4 sm:$0xff]  }
 0xd77   :  { %7198 = vmatprep.subr.bf16.mxu1 %v9398_v58  ;;  %7358 = vmatprep.subr.bf16.mxu0 %v9401_v54  ;;  %v9465_v58 = vld [vmem:[#allocation10 + $0x4d0] ss:$8 sps:$4 sm:$0xff]  }
 0xd7a   :  { %7199 = vmatpush1.bf16.msra.mxu1 %v9396_v34  ;;  %7359 = vmatpush1.bf16.msra.mxu0 %v9399_v51  ;;  %v9470_v34 = vld [vmem:[#allocation10 + $0x104] ss:$8 sps:$4 sm:$0xff]  }
 0xd7b   :  { %7200 = vmatprep.subr.bf16.mxu1 %v9404_v6  ;;  %7360 = vmatprep.subr.bf16.mxu0 %v9407_v50  ;;  %v9473_v51 = vld [vmem:[#allocation10 + $0x4e4] ss:$8 sps:$4 sm:$0xff]  }
 0xd7e   :  { %7201 = vmatpush1.bf16.msra.mxu1 %v9402_v35  ;;  %7361 = vmatpush1.bf16.msra.mxu0 %v9405_v43 }
 0xd7f   :  { %7202 = vmatprep.subr.bf16.mxu1 %v9410_v49  ;;  %7362 = vmatprep.subr.bf16.mxu0 %v9413_v27  ;;  %v7774_v49 = vld [vmem:[%s11351_s9] ss:$0 sm:$0xff] }
 0xd82   :  { %7203 = vmatpush1.bf16.msra.mxu1 %v9408_v4  ;;  %7363 = vmatpush1.bf16.msra.mxu0 %v9411_v61  ;;  %v9468_v4 = vld [vmem:[#allocation10 + $0x100] ss:$8 sps:$4 sm:$0xff]  }
 0xd83   :  { %7204 = vmatprep.subr.bf16.mxu1 %v9416_v20  ;;  %7364 = vmatprep.subr.bf16.mxu0 %v9419_v60  ;;  %v9471_v60 = vld [vmem:[#allocation10 + $0x4e0] ss:$8 sps:$4 sm:$0xff]  }
 0xd86   :  { %7205 = vmatpush1.bf16.msra.mxu1 %v9414_v33  ;;  %7365 = vmatpush1.bf16.msra.mxu0 %v9417_v19  ;;  %v9476_v33 = vld [vmem:[#allocation10 + $0x114] ss:$8 sps:$4 sm:$0xff]  }
 0xd87   :  { %7206 = vmatprep.subr.bf16.mxu1 %v9422_v53  ;;  %7366 = vmatprep.subr.bf16.mxu0 %v9425_v5  ;;  %v9479_v53 = vld [vmem:[#allocation10 + $0x4f4] ss:$8 sps:$4 sm:$0xff]  }
 0xd8a   :  { %7207 = vmatpush1.bf16.msra.mxu1 %v9420_v32  ;;  %7367 = vmatpush1.bf16.msra.mxu0 %v9423_v31  ;;  %v9474_v32 = vld [vmem:[#allocation10 + $0x110] ss:$8 sps:$4 sm:$0xff]  }
 0xd8b   :  { %7208 = vmatprep.subr.bf16.mxu1 %v9428_v9  ;;  %7368 = vmatprep.subr.bf16.mxu0 %v9431_v0  ;;  %v9477_v31 = vld [vmem:[#allocation10 + $0x4f0] ss:$8 sps:$4 sm:$0xff]   ;;  %v9482_v9 = vld [vmem:[#allocation10 + $0x124] ss:$8 sps:$4 sm:$0xff]  }
 0xd8e   :  { %7209 = vmatpush1.bf16.msra.mxu1 %v9426_v41  ;;  %7369 = vmatpush1.bf16.msra.mxu0 %v9429_v52  ;;  %v9485_v41 = vld [vmem:[#allocation10 + $0x504] ss:$8 sps:$4 sm:$0xff]   ;;  %v9480_v52 = vld [vmem:[#allocation10 + $0x120] ss:$8 sps:$4 sm:$0xff]  }
 0xd8f   :  { %7210 = vmatprep.subr.bf16.mxu1 %v9434_v13  ;;  %7370 = vmatprep.subr.bf16.mxu0 %v9437_v56  ;;  %v9483_v13 = vld [vmem:[#allocation10 + $0x500] ss:$8 sps:$4 sm:$0xff]   ;;  %v9488_v56 = vld [vmem:[#allocation10 + $0x134] ss:$8 sps:$4 sm:$0xff]  }
 0xd92   :  { %7211 = vmatpush1.bf16.msra.mxu1 %v9432_v8  ;;  %7371 = vmatpush1.bf16.msra.mxu0 %v9435_v10  ;;  %v9489_v8 = vld [vmem:[#allocation10 + $0x510] ss:$8 sps:$4 sm:$0xff]   ;;  %v9494_v10 = vld [vmem:[#allocation10 + $0x144] ss:$8 sps:$4 sm:$0xff]  }
 0xd93   :  { %7212 = vmatprep.subr.bf16.mxu1 %v9440_v40  ;;  %7372 = vmatprep.subr.bf16.mxu0 %v9443_v29  ;;  %v9497_v40 = vld [vmem:[#allocation10 + $0x524] ss:$8 sps:$4 sm:$0xff]   ;;  %v9492_v29 = vld [vmem:[#allocation10 + $0x140] ss:$8 sps:$4 sm:$0xff]  }
 0xd96   :  { %7213 = vmatpush1.bf16.msra.mxu1 %v9438_v63  ;;  %7373 = vmatpush1.bf16.msra.mxu0 %v9441_v57  ;;  %v9495_v63 = vld [vmem:[#allocation10 + $0x520] ss:$8 sps:$4 sm:$0xff]   ;;  %v9500_v57 = vld [vmem:[#allocation10 + $0x154] ss:$8 sps:$4 sm:$0xff]  }
 0xd97   :  { %7214 = vmatprep.subr.bf16.mxu1 %v9446_v28  ;;  %7374 = vmatprep.subr.bf16.mxu0 %v9449_v44  ;;  %v9503_v28 = vld [vmem:[#allocation10 + $0x534] ss:$8 sps:$4 sm:$0xff]   ;;  %v9501_v44 = vld [vmem:[#allocation10 + $0x530] ss:$8 sps:$4 sm:$0xff]  }
 0xd9a   :  { %7215 = vmatpush1.bf16.msra.mxu1 %v9444_v48  ;;  %7375 = vmatpush1.bf16.msra.mxu0 %v9447_v15  ;;  %v9506_v48 = vld [vmem:[#allocation10 + $0x164] ss:$8 sps:$4 sm:$0xff]   ;;  %v9504_v15 = vld [vmem:[#allocation10 + $0x160] ss:$8 sps:$4 sm:$0xff]  }
 0xd9b   :  { %7216 = vmatprep.subr.bf16.mxu1 %v9452_v7  ;;  %7376 = vmatprep.subr.bf16.mxu0 %v9455_v3  ;;  %v9507_v7 = vld [vmem:[#allocation10 + $0x540] ss:$8 sps:$4 sm:$0xff]   ;;  %v9512_v3 = vld [vmem:[#allocation10 + $0x174] ss:$8 sps:$4 sm:$0xff]  }
 0xd9e   :  { %7217 = vmatpush1.bf16.msra.mxu1 %v9450_v45  ;;  %7377 = vmatpush1.bf16.msra.mxu0 %v9453_v39  ;;  %v9515_v45 = vld [vmem:[#allocation10 + $0x554] ss:$8 sps:$4 sm:$0xff]  }
 0xd9f   :  { %7218 = vmatprep.subr.bf16.mxu1 %v9458_v46  ;;  %7378 = vmatprep.subr.bf16.mxu0 %v9461_v59  ;;  %v9510_v46 = vld [vmem:[#allocation10 + $0x170] ss:$8 sps:$4 sm:$0xff]  }
 0xda2   :  { %7219 = vmatpush1.bf16.msra.mxu1 %v9456_v55  ;;  %7379 = vmatpush1.bf16.msra.mxu0 %v9459_v21  ;;  %v8745_v12 = vpop.f32.mrb[128].mxu1  ;;  %v9513_v55 = vld [vmem:[#allocation10 + $0x550] ss:$8 sps:$4 sm:$0xff]   ;;  %v9518_v21 = vld [vmem:[#allocation10 + $0x184] ss:$8 sps:$4 sm:$0xff]  }
 0xda3   :  { %v8746_v54 = vpop.f32.mrb[129].mxu1  ;;  %7220 = vmatprep.subr.bf16.mxu1 %v9464_v47  ;;  %7380 = vmatprep.subr.bf16.mxu0 %v9467_v16 }
 0xda4   :  { %v8747_v6 = vadd.f32 %v8746_v54, %v8745_v12  ;;  %v8748_v50 = vpop.f32.mrb[130].mxu1  ;;  %v9521_v12 = vld [vmem:[#allocation10 + $0x564] ss:$8 sps:$4 sm:$0xff]   ;;  %v9516_v54 = vld [vmem:[#allocation10 + $0x180] ss:$8 sps:$4 sm:$0xff]  }
 0xda5   :  { %v8723_v35 = vpop.f32.mrb[128].mxu0  ;;  %v8749_v43 = vpop.f32.mrb[131].mxu1 }
 0xda6   :  { %7221 = vmatpush1.bf16.msra.mxu1 %v9462_v14  ;;  %7381 = vmatpush1.bf16.msra.mxu0 %v9465_v58  ;;  %v8724_v27 = vpop.f32.mrb[129].mxu0  ;;  %v9527_v43 = vld [vmem:[#allocation10 + $0x574] ss:$8 sps:$4 sm:$0xff]  }
 0xda7   :  { %v8725_v61 = vadd.f32 %v8724_v27, %v8723_v35  ;;  %v8726_v20 = vpop.f32.mrb[130].mxu0  ;;  %7231 = vmatprep.subr.bf16.mxu1 %v9470_v34  ;;  %7382 = vmatprep.subr.bf16.mxu0 %v9473_v51  ;;  %v9519_v51 = vld [vmem:[#allocation10 + $0x560] ss:$8 sps:$4 sm:$0xff]  }
 0xda8   :  { %v8727_v19 = vpop.f32.mrb[131].mxu0  ;;  %v9530_v20 = vld [vmem:[#allocation10 + $0x1a4] ss:$8 sps:$4 sm:$0xff]  }
 0xda9   :  { %v5357_v5 = vadd.f32 %v8725_v61, %v7774_v49  ;;  %7223 = vmatmul.mubr.bf16.vlgmr.msra.gmra.mrb[144].mxu1 %v11194_v37  ;;  %v9491_v37 = vld [vmem:[#allocation10 + $0x514] ss:$8 sps:$4 sm:$0xff]   ;;  %v9525_v61 = vld [vmem:[#allocation10 + $0x570] ss:$8 sps:$4 sm:$0xff]   ;;  %v9528_v19 = vld [vmem:[#allocation10 + $0x1a0] ss:$8 sps:$4 sm:$0xff]  }
 0xdaa   :  { %7232 = vmatpush1.bf16.msra.mxu1 %v9468_v4  ;;  %7263 = vmatprep.mubr.bf16.mxu1 %v11186_v25  ;;  %v9486_v25 = vld [vmem:[#allocation10 + $0x130] ss:$8 sps:$4 sm:$0xff]  }
 0xdab   :  { %7383 = vmatpush1.bf16.msra.mxu0 %v9471_v60  ;;  %7233 = vmatprep.subr.bf16.mxu1 %v9476_v33  ;;  %v11291_v0 = vadd.f32 %v8747_v6, %v5357_v5  ;;  %v9524_v6 = vld [vmem:[#allocation10 + $0x194] ss:$8 sps:$4 sm:$0xff]   ;;  %v9522_v4 = vld [vmem:[#allocation10 + $0x190] ss:$8 sps:$4 sm:$0xff]   ;;  %v9533_v60 = vld [vmem:[#allocation10 + $0x584] ss:$8 sps:$4 sm:$0xff]  }
 0xdac   :  { %7384 = vmatprep.subr.bf16.mxu0 %v9479_v53  ;;  %v9531_v53 = vld [vmem:[#allocation10 + $0x580] ss:$8 sps:$4 sm:$0xff]   ;;  %v9536_v5 = vld [vmem:[#allocation10 + $0x1b4] ss:$8 sps:$4 sm:$0xff]  }
 0xdae   :  { %7234 = vmatpush1.bf16.msra.mxu1 %v9474_v32  ;;  %v9539_v32 = vld [vmem:[#allocation10 + $0x594] ss:$8 sps:$4 sm:$0xff]  }
 0xdaf   :  { %7385 = vmatpush1.bf16.msra.mxu0 %v9477_v31  ;;  %7235 = vmatprep.subr.bf16.mxu1 %v9482_v9  ;;  %v9534_v31 = vld [vmem:[#allocation10 + $0x1b0] ss:$8 sps:$4 sm:$0xff]  }
 0xdb0   :  { %7395 = vmatprep.subr.bf16.mxu0 %v9485_v41  ;;  %v9537_v9 = vld [vmem:[#allocation10 + $0x590] ss:$8 sps:$4 sm:$0xff]   ;;  %v9545_v41 = vld [vmem:[#allocation10 + $0x5a4] ss:$8 sps:$4 sm:$0xff]  }
 0xdb2   :  { %7387 = vmatmul.mubr.bf16.vlgmr.msra.gmra.mrb[144].mxu0 %v11257_v24  ;;  %7236 = vmatpush1.bf16.msra.mxu1 %v9480_v52  ;;  %v9498_v24 = vld [vmem:[#allocation10 + $0x150] ss:$8 sps:$4 sm:$0xff]   ;;  %v9540_v52 = vld [vmem:[#allocation10 + $0x1c0] ss:$8 sps:$4 sm:$0xff]  }
 0xdb3   :  { %7396 = vmatpush1.bf16.msra.mxu0 %v9483_v13  ;;  %7427 = vmatprep.mubr.bf16.mxu0 %v11248_v22  ;;  %v9509_v22 = vld [vmem:[#allocation10 + $0x544] ss:$8 sps:$4 sm:$0xff]   ;;  %v9543_v13 = vld [vmem:[#allocation10 + $0x5a0] ss:$8 sps:$4 sm:$0xff]  }
 0xdb4   :  { %7237 = vmatprep.subr.bf16.mxu1 %v9488_v56  ;;  %7397 = vmatprep.subr.bf16.mxu0 %v9491_v37  ;;  %v9548_v56 = vld [vmem:[#allocation10 + $0x1d4] ss:$8 sps:$4 sm:$0xff]  }
 0xdb5   :  { %v9551_v37 = vld [vmem:[#allocation10 + $0x5b4] ss:$8 sps:$4 sm:$0xff]  }
 0xdb6   :  { %7238 = vmatpush1.bf16.msra.mxu1 %v9486_v25  ;;  %v9546_v25 = vld [vmem:[#allocation10 + $0x1d0] ss:$8 sps:$4 sm:$0xff]  }
 0xdb7   :  { %7398 = vmatpush1.bf16.msra.mxu0 %v9489_v8  ;;  %7239 = vmatprep.subr.bf16.mxu1 %v9494_v10  ;;  %v9549_v8 = vld [vmem:[#allocation10 + $0x5b0] ss:$8 sps:$4 sm:$0xff]   ;;  %v9554_v10 = vld [vmem:[#allocation10 + $0x1e4] ss:$8 sps:$4 sm:$0xff]  }
 0xdb8   :  { %7399 = vmatprep.subr.bf16.mxu0 %v9497_v40  ;;  %v9557_v40 = vld [vmem:[#allocation10 + $0x5c4] ss:$8 sps:$4 sm:$0xff]  }
 0xdba   :  { %7240 = vmatpush1.bf16.msra.mxu1 %v9492_v29  ;;  %v9552_v29 = vld [vmem:[#allocation10 + $0x1e0] ss:$8 sps:$4 sm:$0xff]  }
 0xdbb   :  { %7400 = vmatpush1.bf16.msra.mxu0 %v9495_v63  ;;  %7241 = vmatprep.subr.bf16.mxu1 %v9500_v57  ;;  %v9555_v63 = vld [vmem:[#allocation10 + $0x5c0] ss:$8 sps:$4 sm:$0xff]   ;;  %v9560_v57 = vld [vmem:[#allocation10 + $0x1f4] ss:$8 sps:$4 sm:$0xff]  }
 0xdbc   :  { %7401 = vmatprep.subr.bf16.mxu0 %v9503_v28  ;;  %v9563_v28 = vld [vmem:[#allocation10 + $0x5d4] ss:$8 sps:$4 sm:$0xff]  }
 0xdbe   :  { %7242 = vmatpush1.bf16.msra.mxu1 %v9498_v24 }
 0xdbf   :  { %7402 = vmatpush1.bf16.msra.mxu0 %v9501_v44  ;;  %7243 = vmatprep.subr.bf16.mxu1 %v9506_v48  ;;  %v9558_v44 = vld [vmem:[#allocation10 + $0x1f0] ss:$8 sps:$4 sm:$0xff]  }
 0xdc0   :  { %7403 = vmatprep.subr.bf16.mxu0 %v9509_v22  ;;  %v9561_v22 = vld [vmem:[#allocation10 + $0x5d0] ss:$8 sps:$4 sm:$0xff]  }
 0xdc2   :  { %7244 = vmatpush1.bf16.msra.mxu1 %v9504_v15  ;;  %v8789_v39 = vpop.f32.mrb[132].mxu1  ;;  %v9566_v15 = vld [vmem:[#allocation10 + $0x204] ss:$8 sps:$4 sm:$0xff]  }
 0xdc3   :  { %7404 = vmatpush1.bf16.msra.mxu0 %v9507_v7  ;;  %v8790_v59 = vpop.f32.mrb[133].mxu1  ;;  %7245 = vmatprep.subr.bf16.mxu1 %v9512_v3 }
 0xdc4   :  { %v8791_v47 = vadd.f32 %v8790_v59, %v8789_v39  ;;  %v8792_v16 = vpop.f32.mrb[134].mxu1  ;;  %7405 = vmatprep.subr.bf16.mxu0 %v9515_v45  ;;  %v9569_v45 = vld [vmem:[#allocation10 + $0x5e4] ss:$8 sps:$4 sm:$0xff]   ;;  %v9564_v59 = vld [vmem:[#allocation10 + $0x200] ss:$8 sps:$4 sm:$0xff]  }
 0xdc5   :  { %v8793_v14 = vpop.f32.mrb[135].mxu1 }
 0xdc6   :  { %7246 = vmatpush1.bf16.msra.mxu1 %v9510_v46  ;;  %v8767_v58 = vpop.f32.mrb[132].mxu0  ;;  %v9575_v14 = vld [vmem:[#allocation10 + $0x5f4] ss:$8 sps:$4 sm:$0xff]  }
 0xdc7   :  { %7406 = vmatpush1.bf16.msra.mxu0 %v9513_v55  ;;  %v8768_v34 = vpop.f32.mrb[133].mxu0  ;;  %7247 = vmatprep.subr.bf16.mxu1 %v9518_v21  ;;  %v9567_v21 = vld [vmem:[#allocation10 + $0x5e0] ss:$8 sps:$4 sm:$0xff]  }
 0xdc8   :  { %v8769_v50 = vadd.f32 %v8768_v34, %v8767_v58  ;;  %7407 = vmatprep.subr.bf16.mxu0 %v9521_v12  ;;  %v8770_v35 = vpop.f32.mrb[134].mxu0  ;;  %v9570_v34 = vld [vmem:[#allocation10 + $0x210] ss:$8 sps:$4 sm:$0xff]  }
 0xdc9   :  { %v8771_v49 = vpop.f32.mrb[135].mxu0 }
 0xdca   :  { %v5437_v27 = vadd.f32 %v8769_v50, %v11291_v0  ;;  %7248 = vmatpush1.bf16.msra.mxu1 %v9516_v54  ;;  %v9542_v0 = vld [vmem:[#allocation10 + $0x1c4] ss:$8 sps:$4 sm:$0xff]   ;;  %v9584_v49 = vld [vmem:[#allocation10 + $0x234] ss:$8 sps:$4 sm:$0xff]  }
 0xdcb   :  { %7408 = vmatpush1.bf16.msra.mxu0 %v9519_v51  ;;  %7249 = vmatprep.subr.bf16.mxu1 %v9524_v6  ;;  %v9573_v51 = vld [vmem:[#allocation10 + $0x5f0] ss:$8 sps:$4 sm:$0xff]   ;;  %v9578_v6 = vld [vmem:[#allocation10 + $0x224] ss:$8 sps:$4 sm:$0xff]  }
 0xdcc   :  { %7409 = vmatprep.subr.bf16.mxu0 %v9527_v43  ;;  %v11296_v33 = vadd.f32 %v8791_v47, %v5437_v27  ;;  %v9572_v47 = vld [vmem:[#allocation10 + $0x214] ss:$8 sps:$4 sm:$0xff]   ;;  %v9581_v50 = vld [vmem:[#allocation10 + $0x604] ss:$8 sps:$4 sm:$0xff]   ;;  %v9576_v43 = vld [vmem:[#allocation10 + $0x220] ss:$8 sps:$4 sm:$0xff]  }
 0xdcd   :  { %v9587_v27 = vld [vmem:[#allocation10 + $0x614] ss:$8 sps:$4 sm:$0xff]  }
 0xdce   :  { %7250 = vmatpush1.bf16.msra.mxu1 %v9522_v4  ;;  %v9585_v4 = vld [vmem:[#allocation10 + $0x610] ss:$8 sps:$4 sm:$0xff]  }
 0xdcf   :  { %7410 = vmatpush1.bf16.msra.mxu0 %v9525_v61  ;;  %7251 = vmatprep.subr.bf16.mxu1 %v9530_v20  ;;  %v9590_v61 = vld [vmem:[#allocation10 + $0x244] ss:$8 sps:$4 sm:$0xff]  }
 0xdd0   :  { %7411 = vmatprep.subr.bf16.mxu0 %v9533_v60  ;;  %v9593_v20 = vld [vmem:[#allocation10 + $0x624] ss:$8 sps:$4 sm:$0xff]   ;;  %v9588_v60 = vld [vmem:[#allocation10 + $0x240] ss:$8 sps:$4 sm:$0xff]  }
 0xdd2   :  { %7252 = vmatpush1.bf16.msra.mxu1 %v9528_v19  ;;  %v9596_v19 = vld [vmem:[#allocation10 + $0x254] ss:$8 sps:$4 sm:$0xff]  }
 0xdd3   :  { %7412 = vmatpush1.bf16.msra.mxu0 %v9531_v53  ;;  %7253 = vmatprep.subr.bf16.mxu1 %v9536_v5  ;;  %v9599_v53 = vld [vmem:[#allocation10 + $0x634] ss:$8 sps:$4 sm:$0xff]   ;;  %v9597_v5 = vld [vmem:[#allocation10 + $0x630] ss:$8 sps:$4 sm:$0xff]  }
 0xdd4   :  { %7413 = vmatprep.subr.bf16.mxu0 %v9539_v32  ;;  %v9602_v32 = vld [vmem:[#allocation10 + $0x264] ss:$8 sps:$4 sm:$0xff]  }
 0xdd6   :  { %7254 = vmatpush1.bf16.msra.mxu1 %v9534_v31  ;;  %v9600_v31 = vld [vmem:[#allocation10 + $0x260] ss:$8 sps:$4 sm:$0xff]  }
 0xdd7   :  { %7414 = vmatpush1.bf16.msra.mxu0 %v9537_v9  ;;  %7255 = vmatprep.subr.bf16.mxu1 %v9542_v0  ;;  %v9603_v9 = vld [vmem:[#allocation10 + $0x640] ss:$8 sps:$4 sm:$0xff]   ;;  %v9608_v0 = vld [vmem:[#allocation10 + $0x274] ss:$8 sps:$4 sm:$0xff]  }
 0xdd8   :  { %7415 = vmatprep.subr.bf16.mxu0 %v9545_v41  ;;  %v9611_v41 = vld [vmem:[#allocation10 + $0x654] ss:$8 sps:$4 sm:$0xff]  }
 0xdda   :  { %7256 = vmatpush1.bf16.msra.mxu1 %v9540_v52  ;;  %v9606_v52 = vld [vmem:[#allocation10 + $0x270] ss:$8 sps:$4 sm:$0xff]  }
 0xddb   :  { %7416 = vmatpush1.bf16.msra.mxu0 %v9543_v13  ;;  %7257 = vmatprep.subr.bf16.mxu1 %v9548_v56  ;;  %v9609_v13 = vld [vmem:[#allocation10 + $0x650] ss:$8 sps:$4 sm:$0xff]   ;;  %v9614_v56 = vld [vmem:[#allocation10 + $0x284] ss:$8 sps:$4 sm:$0xff]  }
 0xddc   :  { %7417 = vmatprep.subr.bf16.mxu0 %v9551_v37  ;;  %v9617_v37 = vld [vmem:[#allocation10 + $0x664] ss:$8 sps:$4 sm:$0xff]  }
 0xdde   :  { %7258 = vmatpush1.bf16.msra.mxu1 %v9546_v25  ;;  %v9612_v25 = vld [vmem:[#allocation10 + $0x280] ss:$8 sps:$4 sm:$0xff]  }
 0xddf   :  { %7418 = vmatpush1.bf16.msra.mxu0 %v9549_v8  ;;  %7259 = vmatprep.subr.bf16.mxu1 %v9554_v10  ;;  %v9615_v8 = vld [vmem:[#allocation10 + $0x660] ss:$8 sps:$4 sm:$0xff]   ;;  %v9620_v10 = vld [vmem:[#allocation10 + $0x294] ss:$8 sps:$4 sm:$0xff]  }
 0xde0   :  { %7419 = vmatprep.subr.bf16.mxu0 %v9557_v40  ;;  %v9623_v40 = vld [vmem:[#allocation10 + $0x674] ss:$8 sps:$4 sm:$0xff]  }
 0xde2   :  { %7260 = vmatpush1.bf16.msra.mxu1 %v9552_v29  ;;  %v8833_v24 = vpop.f32.mrb[136].mxu1  ;;  %v9618_v29 = vld [vmem:[#allocation10 + $0x290] ss:$8 sps:$4 sm:$0xff]  }
 0xde3   :  { %7420 = vmatpush1.bf16.msra.mxu0 %v9555_v63  ;;  %v8834_v48 = vpop.f32.mrb[137].mxu1  ;;  %7261 = vmatprep.subr.bf16.mxu1 %v9560_v57  ;;  %v9621_v63 = vld [vmem:[#allocation10 + $0x670] ss:$8 sps:$4 sm:$0xff]   ;;  %v9626_v57 = vld [vmem:[#allocation10 + $0x2a4] ss:$8 sps:$4 sm:$0xff]  }
 0xde4   :  { %v8835_v7 = vadd.f32 %v8834_v48, %v8833_v24  ;;  %v8836_v3 = vpop.f32.mrb[138].mxu1  ;;  %7421 = vmatprep.subr.bf16.mxu0 %v9563_v28  ;;  %v9629_v28 = vld [vmem:[#allocation10 + $0x684] ss:$8 sps:$4 sm:$0xff]   ;;  %v9624_v24 = vld [vmem:[#allocation10 + $0x2a0] ss:$8 sps:$4 sm:$0xff]  }
 0xde5   :  { %v8837_v39 = vpop.f32.mrb[139].mxu1  ;;  %v9632_v48 = vld [vmem:[#allocation10 + $0x2b4] ss:$8 sps:$4 sm:$0xff]   ;;  %v9638_v3 = vld [vmem:[#allocation10 + $0x2c4] ss:$8 sps:$4 sm:$0xff]  }
 0xde6   :  { %7262 = vmatpush1.bf16.msra.mxu1 %v9558_v44  ;;  %v8811_v46 = vpop.f32.mrb[136].mxu0  ;;  %v9627_v44 = vld [vmem:[#allocation10 + $0x680] ss:$8 sps:$4 sm:$0xff]  }
 0xde7   :  { %7422 = vmatpush1.bf16.msra.mxu0 %v9561_v22  ;;  %v8812_v55 = vpop.f32.mrb[137].mxu0  ;;  %7272 = vmatprep.subr.bf16.mxu1 %v9566_v15  ;;  %v9635_v22 = vld [vmem:[#allocation10 + $0x694] ss:$8 sps:$4 sm:$0xff]   ;;  %v9630_v15 = vld [vmem:[#allocation10 + $0x2b0] ss:$8 sps:$4 sm:$0xff]  }
 0xde8   :  { %v8813_v16 = vadd.f32 %v8812_v55, %v8811_v46  ;;  %v8814_v12 = vpop.f32.mrb[138].mxu0  ;;  %7423 = vmatprep.subr.bf16.mxu0 %v9569_v45  ;;  %v9641_v45 = vld [vmem:[#allocation10 + $0x6a4] ss:$8 sps:$4 sm:$0xff]   ;;  %v9636_v39 = vld [vmem:[#allocation10 + $0x2c0] ss:$8 sps:$4 sm:$0xff]  }
 0xde9   :  { %7264 = vmatmul.mubr.bf16.vlgmr.msra.gmra.mrb[144].mxu1 %v11188_v2  ;;  %v8815_v58 = vpop.f32.mrb[139].mxu0  ;;  %v9579_v2 = vld [vmem:[#allocation10 + $0x600] ss:$8 sps:$4 sm:$0xff]   ;;  %v9647_v55 = vld [vmem:[#allocation10 + $0x6b4] ss:$8 sps:$4 sm:$0xff]  }
 0xdea   :  { %v5517_v54 = vadd.f32 %v8813_v16, %v11296_v33  ;;  %7273 = vmatpush1.bf16.msra.mxu1 %v9564_v59  ;;  %7304 = vmatprep.mubr.bf16.mxu1 %v11235_v1  ;;  %v9582_v1 = vld [vmem:[#allocation10 + $0x230] ss:$8 sps:$4 sm:$0xff]   ;;  %v9591_v33 = vld [vmem:[#allocation10 + $0x620] ss:$8 sps:$4 sm:$0xff]   ;;  %v9644_v59 = vld [vmem:[#allocation10 + $0x2d4] ss:$8 sps:$4 sm:$0xff]  }
 0xdeb   :  { %7424 = vmatpush1.bf16.msra.mxu0 %v9567_v21  ;;  %7274 = vmatprep.subr.bf16.mxu1 %v9572_v47  ;;  %v9639_v46 = vld [vmem:[#allocation10 + $0x6a0] ss:$8 sps:$4 sm:$0xff]   ;;  %v9642_v21 = vld [vmem:[#allocation10 + $0x2d0] ss:$8 sps:$4 sm:$0xff]   ;;  %v9650_v16 = vld [vmem:[#allocation10 + $0x2e4] ss:$8 sps:$4 sm:$0xff]  }
 0xdec   :  { %7425 = vmatprep.subr.bf16.mxu0 %v9575_v14  ;;  %v11301_v35 = vadd.f32 %v8835_v7, %v5517_v54  ;;  %v9633_v7 = vld [vmem:[#allocation10 + $0x690] ss:$8 sps:$4 sm:$0xff]   ;;  %v9653_v12 = vld [vmem:[#allocation10 + $0x6c4] ss:$8 sps:$4 sm:$0xff]   ;;  %v9648_v14 = vld [vmem:[#allocation10 + $0x2e0] ss:$8 sps:$4 sm:$0xff]  }
 0xded   :  { %v9645_v47 = vld [vmem:[#allocation10 + $0x6b0] ss:$8 sps:$4 sm:$0xff]   ;;  %v9651_v58 = vld [vmem:[#allocation10 + $0x6c0] ss:$8 sps:$4 sm:$0xff]   ;;  %v9656_v54 = vld [vmem:[#allocation10 + $0x2f4] ss:$8 sps:$4 sm:$0xff]  }
 0xdee   :  { %7275 = vmatpush1.bf16.msra.mxu1 %v9570_v34  ;;  %v9659_v34 = vld [vmem:[#allocation10 + $0x6d4] ss:$8 sps:$4 sm:$0xff]  }
 0xdef   :  { %7426 = vmatpush1.bf16.msra.mxu0 %v9573_v51  ;;  %7276 = vmatprep.subr.bf16.mxu1 %v9578_v6  ;;  %v9654_v51 = vld [vmem:[#allocation10 + $0x2f0] ss:$8 sps:$4 sm:$0xff]  }
 0xdf0   :  { %7436 = vmatprep.subr.bf16.mxu0 %v9581_v50  ;;  %v9657_v6 = vld [vmem:[#allocation10 + $0x6d0] ss:$8 sps:$4 sm:$0xff]   ;;  %v9662_v50 = vld [vmem:[#allocation10 + $0x304] ss:$8 sps:$4 sm:$0xff]  }
 0xdf2   :  { %7428 = vmatmul.mubr.bf16.vlgmr.msra.gmra.mrb[144].mxu0 %v11254_v62  ;;  %7277 = vmatpush1.bf16.msra.mxu1 %v9576_v43  ;;  %v9594_v62 = vld [vmem:[#allocation10 + $0x250] ss:$8 sps:$4 sm:$0xff]   ;;  %v9665_v43 = vld [vmem:[#allocation10 + $0x6e4] ss:$8 sps:$4 sm:$0xff]  }
 0xdf3   :  { %7437 = vmatpush1.bf16.msra.mxu0 %v9579_v2  ;;  %7468 = vmatprep.mubr.bf16.mxu0 %v11279_v26  ;;  %v9605_v26 = vld [vmem:[#allocation10 + $0x644] ss:$8 sps:$4 sm:$0xff]   ;;  %v9660_v2 = vld [vmem:[#allocation10 + $0x300] ss:$8 sps:$4 sm:$0xff]  }
 0xdf4   :  { %7278 = vmatprep.subr.bf16.mxu1 %v9584_v49  ;;  %7438 = vmatprep.subr.bf16.mxu0 %v9587_v27  ;;  %v9663_v49 = vld [vmem:[#allocation10 + $0x6e0] ss:$8 sps:$4 sm:$0xff]   ;;  %v9668_v27 = vld [vmem:[#allocation10 + $0x314] ss:$8 sps:$4 sm:$0xff]  }
 0xdf6   :  { %7279 = vmatpush1.bf16.msra.mxu1 %v9582_v1  ;;  %v9671_v1 = vld [vmem:[#allocation10 + $0x6f4] ss:$8 sps:$4 sm:$0xff]  }
 0xdf7   :  { %7439 = vmatpush1.bf16.msra.mxu0 %v9585_v4  ;;  %7280 = vmatprep.subr.bf16.mxu1 %v9590_v61  ;;  %v9666_v4 = vld [vmem:[#allocation10 + $0x310] ss:$8 sps:$4 sm:$0xff]  }
 0xdf8   :  { %7440 = vmatprep.subr.bf16.mxu0 %v9593_v20  ;;  %v9669_v61 = vld [vmem:[#allocation10 + $0x6f0] ss:$8 sps:$4 sm:$0xff]   ;;  %v9674_v20 = vld [vmem:[#allocation10 + $0x324] ss:$8 sps:$4 sm:$0xff]  }
 0xdfa   :  { %7281 = vmatpush1.bf16.msra.mxu1 %v9588_v60  ;;  %v9677_v60 = vld [vmem:[#allocation10 + $0x704] ss:$8 sps:$4 sm:$0xff]  }
 0xdfb   :  { %7441 = vmatpush1.bf16.msra.mxu0 %v9591_v33  ;;  %7282 = vmatprep.subr.bf16.mxu1 %v9596_v19  ;;  %v9672_v33 = vld [vmem:[#allocation10 + $0x320] ss:$8 sps:$4 sm:$0xff]  }
 0xdfc   :  { %7442 = vmatprep.subr.bf16.mxu0 %v9599_v53  ;;  %v9675_v19 = vld [vmem:[#allocation10 + $0x700] ss:$8 sps:$4 sm:$0xff]   ;;  %v9680_v53 = vld [vmem:[#allocation10 + $0x334] ss:$8 sps:$4 sm:$0xff]  }
 0xdfe   :  { %7283 = vmatpush1.bf16.msra.mxu1 %v9594_v62  ;;  %v9683_v62 = vld [vmem:[#allocation10 + $0x714] ss:$8 sps:$4 sm:$0xff]  }
 0xdff   :  { %7443 = vmatpush1.bf16.msra.mxu0 %v9597_v5  ;;  %7284 = vmatprep.subr.bf16.mxu1 %v9602_v32  ;;  %v9686_v5 = vld [vmem:[#allocation10 + $0x344] ss:$8 sps:$4 sm:$0xff]  }
 0xe00   :  { %7444 = vmatprep.subr.bf16.mxu0 %v9605_v26  ;;  %v9689_v32 = vld [vmem:[#allocation10 + $0x724] ss:$8 sps:$4 sm:$0xff]   ;;  %v9684_v26 = vld [vmem:[#allocation10 + $0x340] ss:$8 sps:$4 sm:$0xff]  }
 0xe02   :  { %7285 = vmatpush1.bf16.msra.mxu1 %v9600_v31  ;;  %v9687_v31 = vld [vmem:[#allocation10 + $0x720] ss:$8 sps:$4 sm:$0xff]  }
 0xe03   :  { %7445 = vmatpush1.bf16.msra.mxu0 %v9603_v9  ;;  %7286 = vmatprep.subr.bf16.mxu1 %v9608_v0  ;;  %v9692_v9 = vld [vmem:[#allocation10 + $0x354] ss:$8 sps:$4 sm:$0xff]  }
 0xe04   :  { %7446 = vmatprep.subr.bf16.mxu0 %v9611_v41  ;;  %v9695_v0 = vld [vmem:[#allocation10 + $0x734] ss:$8 sps:$4 sm:$0xff]   ;;  %v9693_v41 = vld [vmem:[#allocation10 + $0x730] ss:$8 sps:$4 sm:$0xff]  }
 0xe06   :  { %7287 = vmatpush1.bf16.msra.mxu1 %v9606_v52  ;;  %v9698_v52 = vld [vmem:[#allocation10 + $0x364] ss:$8 sps:$4 sm:$0xff]  }
 0xe07   :  { %7447 = vmatpush1.bf16.msra.mxu0 %v9609_v13  ;;  %7288 = vmatprep.subr.bf16.mxu1 %v9614_v56  ;;  %v9701_v13 = vld [vmem:[#allocation10 + $0x744] ss:$8 sps:$4 sm:$0xff]  }
 0xe08   :  { %7448 = vmatprep.subr.bf16.mxu0 %v9617_v37 }
 0xe0a   :  { %7289 = vmatpush1.bf16.msra.mxu1 %v9612_v25 }
 0xe0b   :  { %7449 = vmatpush1.bf16.msra.mxu0 %v9615_v8  ;;  %7290 = vmatprep.subr.bf16.mxu1 %v9620_v10  ;;  %v9696_v8 = vld [vmem:[#allocation10 + $0x360] ss:$8 sps:$4 sm:$0xff]  }
 0xe0c   :  { %7450 = vmatprep.subr.bf16.mxu0 %v9623_v40  ;;  %v9699_v40 = vld [vmem:[#allocation10 + $0x740] ss:$8 sps:$4 sm:$0xff]  }
 0xe0e   :  { %7291 = vmatpush1.bf16.msra.mxu1 %v9618_v29  ;;  %v9704_v29 = vld [vmem:[#allocation10 + $0x374] ss:$8 sps:$4 sm:$0xff]  }
 0xe0f   :  { %7451 = vmatpush1.bf16.msra.mxu0 %v9621_v63  ;;  %7292 = vmatprep.subr.bf16.mxu1 %v9626_v57  ;;  %v9707_v63 = vld [vmem:[#allocation10 + $0x754] ss:$8 sps:$4 sm:$0xff]   ;;  %v9702_v57 = vld [vmem:[#allocation10 + $0x370] ss:$8 sps:$4 sm:$0xff]  }
 0xe10   :  { %7452 = vmatprep.subr.bf16.mxu0 %v9629_v28  ;;  %v9705_v28 = vld [vmem:[#allocation10 + $0x750] ss:$8 sps:$4 sm:$0xff]  }
 0xe12   :  { %7293 = vmatpush1.bf16.msra.mxu1 %v9624_v24  ;;  %v9710_v24 = vld [vmem:[#allocation10 + $0x384] ss:$8 sps:$4 sm:$0xff]  }
 0xe13   :  { %7453 = vmatpush1.bf16.msra.mxu0 %v9627_v44  ;;  %7294 = vmatprep.subr.bf16.mxu1 %v9632_v48  ;;  %v9713_v48 = vld [vmem:[#allocation10 + $0x764] ss:$8 sps:$4 sm:$0xff]  }
 0xe14   :  { %7454 = vmatprep.subr.bf16.mxu0 %v9635_v22 }
 0xe16   :  { %7295 = vmatpush1.bf16.msra.mxu1 %v9630_v15 }
 0xe17   :  { %7455 = vmatpush1.bf16.msra.mxu0 %v9633_v7  ;;  %7296 = vmatprep.subr.bf16.mxu1 %v9638_v3  ;;  %v9708_v3 = vld [vmem:[#allocation10 + $0x380] ss:$8 sps:$4 sm:$0xff]  }
 0xe18   :  { %7456 = vmatprep.subr.bf16.mxu0 %v9641_v45 }
 0xe1a   :  { %7297 = vmatpush1.bf16.msra.mxu1 %v9636_v39  ;;  %v9711_v39 = vld [vmem:[#allocation10 + $0x760] ss:$8 sps:$4 sm:$0xff]  }
 0xe1b   :  { %7457 = vmatpush1.bf16.msra.mxu0 %v9639_v46  ;;  %7298 = vmatprep.subr.bf16.mxu1 %v9644_v59  ;;  %v9716_v46 = vld [vmem:[#allocation10 + $0x394] ss:$8 sps:$4 sm:$0xff]  }
 0xe1c   :  { %7458 = vmatprep.subr.bf16.mxu0 %v9647_v55  ;;  %v9719_v55 = vld [vmem:[#allocation10 + $0x774] ss:$8 sps:$4 sm:$0xff]  }
 0xe1e   :  { %7299 = vmatpush1.bf16.msra.mxu1 %v9642_v21 }
 0xe1f   :  { %7459 = vmatpush1.bf16.msra.mxu0 %v9645_v47  ;;  %7300 = vmatprep.subr.bf16.mxu1 %v9650_v16  ;;  %v9714_v47 = vld [vmem:[#allocation10 + $0x390] ss:$8 sps:$4 sm:$0xff]  }
 0xe20   :  { %7460 = vmatprep.subr.bf16.mxu0 %v9653_v12  ;;  %v9717_v16 = vld [vmem:[#allocation10 + $0x770] ss:$8 sps:$4 sm:$0xff]   ;;  %v9722_v12 = vld [vmem:[#allocation10 + $0x3a4] ss:$8 sps:$4 sm:$0xff]  }
 0xe22   :  { %7301 = vmatpush1.bf16.msra.mxu1 %v9648_v14  ;;  %v9725_v14 = vld [vmem:[#allocation10 + $0x784] ss:$8 sps:$4 sm:$0xff]  }
 0xe23   :  { %7461 = vmatpush1.bf16.msra.mxu0 %v9651_v58  ;;  %7302 = vmatprep.subr.bf16.mxu1 %v9656_v54  ;;  %v9720_v58 = vld [vmem:[#allocation10 + $0x3a0] ss:$8 sps:$4 sm:$0xff]  }
 0xe24   :  { %7462 = vmatprep.subr.bf16.mxu0 %v9659_v34  ;;  %v9723_v54 = vld [vmem:[#allocation10 + $0x780] ss:$8 sps:$4 sm:$0xff]   ;;  %v9728_v34 = vld [vmem:[#allocation10 + $0x3b4] ss:$8 sps:$4 sm:$0xff]  }
 0xe26   :  { %7303 = vmatpush1.bf16.msra.mxu1 %v9654_v51  ;;  %v9726_v51 = vld [vmem:[#allocation10 + $0x3b0] ss:$8 sps:$4 sm:$0xff]  }
 0xe27   :  { %7463 = vmatpush1.bf16.msra.mxu0 %v9657_v6  ;;  %7313 = vmatprep.subr.bf16.mxu1 %v9662_v50  ;;  %v9729_v6 = vld [vmem:[#allocation10 + $0x790] ss:$8 sps:$4 sm:$0xff]   ;;  %v9734_v50 = vld [vmem:[#allocation10 + $0x3c4] ss:$8 sps:$4 sm:$0xff]  }
 0xe28   :  { %7464 = vmatprep.subr.bf16.mxu0 %v9665_v43  ;;  %v9737_v43 = vld [vmem:[#allocation10 + $0x7a4] ss:$8 sps:$4 sm:$0xff]  }
 0xe29   :  { %7305 = vmatmul.mubr.bf16.vlgmr.msra.gmra.mrb[144].mxu1 %v11238_v30  ;;  %v9678_v30 = vld [vmem:[#allocation10 + $0x330] ss:$8 sps:$4 sm:$0xff]  }
 0xe2a   :  { %7314 = vmatpush1.bf16.msra.mxu1 %v9660_v2  ;;  %7345 = vmatprep.mubr.bf16.mxu1 %v11217_v23  ;;  %v9681_v23 = vld [vmem:[#allocation10 + $0x710] ss:$8 sps:$4 sm:$0xff]   ;;  %v9732_v2 = vld [vmem:[#allocation10 + $0x3c0] ss:$8 sps:$4 sm:$0xff]  }
 0xe2b   :  { %7465 = vmatpush1.bf16.msra.mxu0 %v9663_v49  ;;  %7315 = vmatprep.subr.bf16.mxu1 %v9668_v27  ;;  %v9735_v49 = vld [vmem:[#allocation10 + $0x7a0] ss:$8 sps:$4 sm:$0xff]   ;;  %v9740_v27 = vld [vmem:[#allocation10 + $0x3d4] ss:$8 sps:$4 sm:$0xff]  }
 0xe2c   :  { %7466 = vmatprep.subr.bf16.mxu0 %v9671_v1  ;;  %v9743_v1 = vld [vmem:[#allocation10 + $0x7b4] ss:$8 sps:$4 sm:$0xff]  }
 0xe2e   :  { %7316 = vmatpush1.bf16.msra.mxu1 %v9666_v4  ;;  %v9738_v4 = vld [vmem:[#allocation10 + $0x3d0] ss:$8 sps:$4 sm:$0xff]  }
 0xe2f   :  { %7467 = vmatpush1.bf16.msra.mxu0 %v9669_v61  ;;  %7317 = vmatprep.subr.bf16.mxu1 %v9674_v20  ;;  %v9741_v61 = vld [vmem:[#allocation10 + $0x7b0] ss:$8 sps:$4 sm:$0xff]   ;;  %v9746_v20 = vld [vmem:[#allocation10 + $0x3e4] ss:$8 sps:$4 sm:$0xff]  }
 0xe30   :  { %7477 = vmatprep.subr.bf16.mxu0 %v9677_v60  ;;  %v9749_v60 = vld [vmem:[#allocation10 + $0x7c4] ss:$8 sps:$4 sm:$0xff]  }
 0xe32   :  { %7469 = vmatmul.mubr.bf16.vlgmr.msra.gmra.mrb[144].mxu0 %v11281_v36  ;;  %7318 = vmatpush1.bf16.msra.mxu1 %v9672_v33  ;;  %v9690_v36 = vld [vmem:[#allocation10 + $0x350] ss:$8 sps:$4 sm:$0xff]   ;;  %v9744_v33 = vld [vmem:[#allocation10 + $0x3e0] ss:$8 sps:$4 sm:$0xff]  }
 0xe33   :  { %7478 = vmatpush1.bf16.msra.mxu0 %v9675_v19  ;;  %7509 = vmatprep.mubr.bf16.mxu0 %v11272_v11  ;;  %v9747_v19 = vld [vmem:[#allocation10 + $0x7c0] ss:$8 sps:$4 sm:$0xff]  }
 0xe34   :  { %7319 = vmatprep.subr.bf16.mxu1 %v9680_v53  ;;  %7479 = vmatprep.subr.bf16.mxu0 %v9683_v62  ;;  %v9752_v53 = vld [vmem:[#allocation10 + $0x3f4] ss:$8 sps:$4 sm:$0xff]  }
 0xe35   :  { %v9755_v62 = vld [vmem:[#allocation10 + $0x7d4] ss:$8 sps:$4 sm:$0xff]  }
 0xe36   :  { %7320 = vmatpush1.bf16.msra.mxu1 %v9678_v30  ;;  %v9750_v30 = vld [vmem:[#allocation10 + $0x3f0] ss:$8 sps:$4 sm:$0xff]  }
 0xe37   :  { %7480 = vmatpush1.bf16.msra.mxu0 %v9681_v23  ;;  %7321 = vmatprep.subr.bf16.mxu1 %v9686_v5  ;;  %v9753_v23 = vld [vmem:[#allocation10 + $0x7d0] ss:$8 sps:$4 sm:$0xff]   ;;  %v9758_v5 = vld [vmem:[#allocation10 + $0x7e4] ss:$8 sps:$4 sm:$0xff]  }
 0xe38   :  { %7481 = vmatprep.subr.bf16.mxu0 %v9689_v32  ;;  %v9756_v32 = vld [vmem:[#allocation10 + $0x7e0] ss:$8 sps:$4 sm:$0xff]  }
 0xe3a   :  { %7322 = vmatpush1.bf16.msra.mxu1 %v9684_v26  ;;  %v9761_v26 = vld [vmem:[#allocation10 + $0x7f4] ss:$8 sps:$4 sm:$0xff]  }
 0xe3b   :  { %7482 = vmatpush1.bf16.msra.mxu0 %v9687_v31  ;;  %7323 = vmatprep.subr.bf16.mxu1 %v9692_v9  ;;  %v9759_v31 = vld [vmem:[#allocation10 + $0x7f0] ss:$8 sps:$4 sm:$0xff]  }
 0xe3c   :  { %v8877_v11 = vpop.f32.mrb[140].mxu1  ;;  %7483 = vmatprep.subr.bf16.mxu0 %v9695_v0  ;;  %v5898_v0 = vld [vmem:[%s11353_s11] sm:$0x3]  ;;  %s9875_s11 = smov [#allocation11]  }
 0xe3d   :  { %v8878_v56 = vpop.f32.mrb[141].mxu1 }
 0xe3e   :  { %v8879_v37 = vadd.f32 %v8878_v56, %v8877_v11  ;;  %7324 = vmatpush1.bf16.msra.mxu1 %v9690_v36  ;;  %v8880_v25 = vpop.f32.mrb[142].mxu1  ;;  %v5903_v11 = vrot.slane %v5898_v0, %v10055_v18 }
 0xe3f   :  { %7484 = vmatpush1.bf16.msra.mxu0 %v9693_v41  ;;  %v8881_v10 = vpop.f32.mrb[143].mxu1  ;;  %7325 = vmatprep.subr.bf16.mxu1 %v9698_v52 }
 0xe40   :  { %7485 = vmatprep.subr.bf16.mxu0 %v9701_v13  ;;  %v5907_v13 = vrot.slane %v5898_v0, %v10053_v17 }
 0xe42   :  { %7326 = vmatpush1.bf16.msra.mxu1 %v9696_v8 }
 0xe43   :  { %7486 = vmatpush1.bf16.msra.mxu0 %v9699_v40  ;;  %7327 = vmatprep.subr.bf16.mxu1 %v9704_v29 }
 0xe44   :  { %v8855_v44 = vpop.f32.mrb[140].mxu0  ;;  %7487 = vmatprep.subr.bf16.mxu0 %v9707_v63 }
 0xe45   :  { %v8856_v22 = vpop.f32.mrb[141].mxu0 }
 0xe46   :  { %v8857_v15 = vadd.f32 %v8856_v22, %v8855_v44  ;;  %7328 = vmatpush1.bf16.msra.mxu1 %v9702_v57  ;;  %v8858_v7 = vpop.f32.mrb[142].mxu0 }
 0xe47   :  { %7488 = vmatpush1.bf16.msra.mxu0 %v9705_v28  ;;  %v8859_v45 = vpop.f32.mrb[143].mxu0  ;;  %7329 = vmatprep.subr.bf16.mxu1 %v9710_v24 }
 0xe48   :  { %v5597_v59 = vadd.f32 %v8857_v15, %v11301_v35  ;;  %7489 = vmatprep.subr.bf16.mxu0 %v9713_v48  ;;  %v9731_v35 = vld [vmem:[#allocation10 + $0x794] ss:$8 sps:$4 sm:$0xff]  }
 0xe4a   :  { %v5637_v21 = vadd.f32 %v8879_v37, %v5597_v59  ;;  %7330 = vmatpush1.bf16.msra.mxu1 %v9708_v3 }
 0xe4b   :  { %7490 = vmatpush1.bf16.msra.mxu0 %v9711_v39  ;;  %7331 = vmatprep.subr.bf16.mxu1 %v9716_v46 }
 0xe4c   :  { %7548 = vst [vmem:[#allocation11] sm:$0x1] %v5637_v21  ;;  %7551 = vst [vmem:[#allocation11 - $0x1] sm:$0x4] %v5637_v21  ;;  %7491 = vmatprep.subr.bf16.mxu0 %v9719_v55 }
 0xe4e   :  { %7332 = vmatpush1.bf16.msra.mxu1 %v9714_v47 }
 0xe4f   :  { %7492 = vmatpush1.bf16.msra.mxu0 %v9717_v16  ;;  %7333 = vmatprep.subr.bf16.mxu1 %v9722_v12 }
 0xe50   :  { %7493 = vmatprep.subr.bf16.mxu0 %v9725_v14 }
 0xe52   :  { %7334 = vmatpush1.bf16.msra.mxu1 %v9720_v58 }
 0xe53   :  { %7494 = vmatpush1.bf16.msra.mxu0 %v9723_v54  ;;  %7335 = vmatprep.subr.bf16.mxu1 %v9728_v34 }
 0xe54   :  { %7495 = vmatprep.subr.bf16.mxu0 %v9731_v35 }
 0xe56   :  { %7336 = vmatpush1.bf16.msra.mxu1 %v9726_v51 }
 0xe57   :  { %7496 = vmatpush1.bf16.msra.mxu0 %v9729_v6  ;;  %7337 = vmatprep.subr.bf16.mxu1 %v9734_v50 }
 0xe58   :  { %7497 = vmatprep.subr.bf16.mxu0 %v9737_v43 }
 0xe5a   :  { %7338 = vmatpush1.bf16.msra.mxu1 %v9732_v2 }
 0xe5b   :  { %7498 = vmatpush1.bf16.msra.mxu0 %v9735_v49  ;;  %7339 = vmatprep.subr.bf16.mxu1 %v9740_v27 }
 0xe5c   :  { %7499 = vmatprep.subr.bf16.mxu0 %v9743_v1 }
 0xe5e   :  { %7340 = vmatpush1.bf16.msra.mxu1 %v9738_v4 }
 0xe5f   :  { %7500 = vmatpush1.bf16.msra.mxu0 %v9741_v61  ;;  %7341 = vmatprep.subr.bf16.mxu1 %v9746_v20 }
 0xe60   :  { %7501 = vmatprep.subr.bf16.mxu0 %v9749_v60 }
 0xe62   :  { %7342 = vmatpush1.bf16.msra.mxu1 %v9744_v33 }
 0xe63   :  { %7502 = vmatpush1.bf16.msra.mxu0 %v9747_v19  ;;  %7343 = vmatprep.subr.bf16.mxu1 %v9752_v53 }
 0xe64   :  { %7503 = vmatprep.subr.bf16.mxu0 %v9755_v62 }
 0xe66   :  { %7344 = vmatpush1.bf16.msra.mxu1 %v9750_v30 }
 0xe67   :  { %7504 = vmatpush1.bf16.msra.mxu0 %v9753_v23 }
 0xe68   :  { %7505 = vmatprep.subr.bf16.mxu0 %v9758_v5 }
 0xe69   :  { %7346 = vmatmul.mubr.bf16.vlgmr.msra.gmra.mrb[144].mxu1 %v11226_v38  ;;  %v7520_v38 = vld [vmem:[%s11354_s12] sm:$0x3]  ;;  %s7560_s12 = sshll.u32 %s9875_s11, 4  ;;  %s7561_s12 = int_to_ptr.vmem [resolvable:$true] %s7560_s12 }
 0xe6a   :  { %v7525_v8 = vrot.slane %v7520_v38, %v10055_v18  ;;  %v7529_v29 = vrot.slane %v7520_v38, %v10053_v17  ;;  %s9830_s30 = scalar_lea.vmem %s7561_s12, 32  ;;  %p9835_p11 = scmp.lt.s32.totalorder %s7561_s12, %s7561_s12 }
 0xe6b   :  { %7506 = vmatpush1.bf16.msra.mxu0 %v9756_v32  ;;  %p9831_p10 = scmp.ne.s32.totalorder %s7561_s12, %s9830_s30  ;;  %p9836_p12 = scmp.lt.s32.totalorder %s9830_s30, %s9830_s30 }
 0xe6c   :  { %7507 = vmatprep.subr.bf16.mxu0 %v9761_v26 }
 0xe6d   :  { %p9837_p13 = por %p9836_p12, %p9835_p11 }
 0xe6f   :  { %7508 = vmatpush1.bf16.msra.mxu0 %v9759_v31  ;;  %p9838_p0 = pnand %p9837_p13, %p9831_p10 }
 0xe72   :  { %7510 = vmatmul.mubr.bf16.vlgmr.msra.gmra.mrb[144].mxu0 %v11274_v42 }
 0xf3c   :  { %v7347_v9 = vpop.f32.mrb[144].mxu1 }
 0xf3d   :  { %v7349_v36 = vpop.f32.mrb[145].mxu1  ;;  %v9017_v56 = vadd.f32 %v7347_v9, %v5903_v11 }
 0xf3e   :  { %v7351_v41 = vpop.f32.mrb[146].mxu1  ;;  %v9019_v37 = vadd.f32 %v7349_v36, %v5907_v13 }
 0xf3f   :  { %v7352_v52 = vpop.f32.mrb[147].mxu1 }
 0xf45   :  { %v7511_v25 = vpop.f32.mrb[144].mxu0 }
 0xf46   :  { %v9018_v42 = vadd.f32 %v9017_v56, %v7511_v25  ;;  %v7513_v10 = vpop.f32.mrb[145].mxu0 }
 0xf47   :  { %v9020_v40 = vadd.f32 %v9019_v37, %v7513_v10  ;;  %v7515_v63 = vpop.f32.mrb[146].mxu0 }
 0xf48   :  { %v7518_v57 = vmax.f32 %v9018_v42, 0.0  ;;  %v7516_v28 = vpop.f32.mrb[147].mxu0 }
 0xf49   :  { %v7519_v24 = vmax.f32 %v9020_v40, 0.0 }
 0xf4a   :  { %v7532_v44 = vmul.f32 %v7525_v8, %v7518_v57 }
 0xf4b   :  { %v7533_v48 = vmul.f32 %v7529_v29, %v7519_v24 }
 0xf4c   :  { %v7534_v22 = vsel %vm214_vm2, %v7532_v44, 0.0 }
 0xf4d   :  { %v7535_v15 = vsel %vm214_vm2, %v7533_v48, 0.0 }
 0xf4e   :  { %v7536_v7 = vadd.f32 %v7535_v15, %v7534_v22 }
 0xf50   :  { %7537 = vadd.xlane.f32.xlu1 %v7536_v7 }
 0xf51   :  { %9841 = shalt.err (!%p9838_p0)
}
 0xf52   :  { %s9842_s19 = scalar_lea.hbm %s11356_s14, 32 }
 0xf53   :  { %p9843_p1 = scmp.ne.s32.totalorder %s11356_s14, %s9842_s19  ;;  %p9846_p2 = scmp.lt.u32.totalorder %s9842_s19, %s11356_s14 }
 0xf55   :  { %p9848_p3 = pnand %p9846_p2, %p9843_p1 }
 0xf57   :  { %9851 = shalt.err (!%p9848_p3)
}
 0xf58   :  { %7563 = dma.vmem_to_hbm [thread:$0]  %s7561_s12, 32, %s11356_s14, [#allocation7]   ;;  %v8159_v17 = vld [vmem:[#allocation4] ss:$0 sm:$0xff]  ;;  %vm7549_vm9 = vcmask 1025   ;;  %vm7552_vm10 = vcmask 3075  }
 0xfdd   :  { %v7538_v18 = vpop.xlane.xlu1 %7537 }
 0xfde   :  { %v7546_v3 = vadd.f32 %v8159_v17, %v7538_v18 }
 0xfe0   :  { %9762 = vtanh.f32 %v7546_v3 }
 0xfea   :  { %v9763_v45 = vpop.eup %9762 }
 0xfeb   :  { %7550 = vst.msk [vmem:[%s11357_s15 - $0x1] sm:$0x2] %vm7549_vm9, %v9763_v45 }
 0xfec   :  { %7553 = vst.msk [vmem:[%s11357_s15 - $0x2] sm:$0x8] %vm7552_vm10, %v9763_v45 }
 0xfed   :  { %9856 = dma.done.wait [#allocation7], 32  }
 0xfee   :  { %9857 = vsyncadd [#allocation7], 4294967264 }
 0xfef   :  { %7571 = vsyncpa [#allocation6], 1 }
 0xff0   :  { %7572 = vsyncpa [#allocation9], 1 }
 0xff1   :  { %7573 = vsyncpa [#allocation7], 1 }

</bundles_post_ra>
